<compile_context>
chip_gen: v7x
topology: tpu7x:2x2x1
jax: 0.10.0
libtpu: 0.0.40
codegen_flags: <defaults>
</compile_context>

<pallas_src>
import functools

import jax
import jax.numpy as jnp
from jax.experimental import pallas as pl
from jax.experimental.pallas import tpu as pltpu


# ----------------------------------------------------------------------------
# Fused matmul + bias + optional LeakyReLU kernel.
# One full-K block per grid step; grid only tiles N (when N is a >128 multiple
# of 128), marked "parallel" for megacore sharding on v7x.
# ----------------------------------------------------------------------------
def _matmul_bias_act_kernel(a_ref, b_ref, bias_ref, o_ref, *, negative_slope):
    y = jnp.dot(a_ref[...], b_ref[...], preferred_element_type=jnp.float32)
    y = y + bias_ref[...]
    if negative_slope is not None:
        y = jnp.where(y >= 0, y, jnp.float32(negative_slope) * y)
    o_ref[...] = y.astype(o_ref.dtype)


def matmul_bias_act(a, b, bias, *, negative_slope=None, out_dtype=None):
    """out = act(a @ b + bias).  a: [M, K], b: [K, N], bias: [1, N] (f32)."""
    M, K = a.shape
    Kb, N = b.shape
    assert K == Kb, (K, Kb)
    out_dtype = out_dtype if out_dtype is not None else a.dtype
    if bias.ndim == 1:
        bias = bias.reshape(1, N)

    # Tile N only when it is a multiple of 128 larger than 128 (conv3: 256).
    tn = 128 if (N > 128 and N % 128 == 0) else N
    grid = (N // tn,)

    kernel = functools.partial(_matmul_bias_act_kernel,
                               negative_slope=negative_slope)
    return pl.pallas_call(
        kernel,
        out_shape=jax.ShapeDtypeStruct((M, N), out_dtype),
        grid_spec=pltpu.PrefetchScalarGridSpec(
            num_scalar_prefetch=0,
            grid=grid,
            in_specs=[
                pl.BlockSpec((M, K), lambda j: (0, 0)),   # full-K, resident A
                pl.BlockSpec((K, tn), lambda j: (0, j)),  # unpadded weights
                pl.BlockSpec((1, tn), lambda j: (0, j)),  # f32 bias row
            ],
            out_specs=pl.BlockSpec((M, tn), lambda j: (0, j)),
        ),
        compiler_params=pltpu.CompilerParams(
            dimension_semantics=("parallel",)),
    )(a, b, bias)


# ----------------------------------------------------------------------------
# Conv2d via im2col (thin XLA glue) + the fused Pallas matmul kernel.
# ----------------------------------------------------------------------------
def _im2col(x, ksize, stride, padding):
    # x: [B, H, W, C]  ->  patches: [B*Ho*Wo, ksize*ksize*C]
    B, H, W, C = x.shape
    xp = jnp.pad(x, ((0, 0), (padding, padding), (padding, padding), (0, 0)))
    Ho = (H + 2 * padding - ksize) // stride + 1
    Wo = (W + 2 * padding - ksize) // stride + 1
    cols = []
    for di in range(ksize):
        for dj in range(ksize):
            cols.append(
                xp[:, di:di + stride * Ho:stride, dj:dj + stride * Wo:stride, :])
    p = jnp.stack(cols, axis=3)                  # [B, Ho, Wo, k*k, C]
    return p.reshape(B * Ho * Wo, ksize * ksize * C), Ho, Wo


def conv2d_leaky(x, wmat, bias, *, stride, padding, ksize=3,
                 negative_slope=0.2):
    # x: [B, H, W, Cin] bf16; wmat: [k*k*Cin, Cout] bf16; bias: [1, Cout] f32
    B = x.shape[0]
    patches, Ho, Wo = _im2col(x, ksize, stride, padding)
    out = matmul_bias_act(patches, wmat, bias, negative_slope=negative_slope,
                          out_dtype=jnp.bfloat16)
    return out.reshape(B, Ho, Wo, wmat.shape[1])


# ----------------------------------------------------------------------------
# Parameters: PyTorch-layout init + one-time conversion to kernel layout.
# ----------------------------------------------------------------------------
def init_params(key, in_channels=1, num_classes=10):
    """Random params in PyTorch layouts (Conv2d: [Cout,Cin,kH,kW], Linear: [out,in])."""
    ks = jax.random.split(key, 5)
    s = 0.05
    return {
        "conv1_w": s * jax.random.normal(ks[0], (64, in_channels, 3, 3), jnp.float32),
        "conv1_b": jnp.zeros((64,), jnp.float32),
        "conv2_w": s * jax.random.normal(ks[1], (128, 64, 3, 3), jnp.float32),
        "conv2_b": jnp.zeros((128,), jnp.float32),
        "conv3_w": s * jax.random.normal(ks[2], (256, 128, 3, 3), jnp.float32),
        "conv3_b": jnp.zeros((256,), jnp.float32),
        "disc_w": s * jax.random.normal(ks[3], (1, 7 * 7 * 256), jnp.float32),
        "disc_b": jnp.zeros((1,), jnp.float32),
        "aux_w": s * jax.random.normal(ks[4], (num_classes, 7 * 7 * 256), jnp.float32),
        "aux_b": jnp.zeros((num_classes,), jnp.float32),
    }


def prepare_params(p):
    """One-time conversion: reshape conv weights to im2col matrices, permute the
    head weights to NHWC flatten order, fuse the two heads, cast to bf16."""

    def conv_w(w):
        # [Cout, Cin, kH, kW] -> [kH*kW*Cin, Cout] (matches im2col feature order).
        cout = w.shape[0]
        return jnp.transpose(w, (2, 3, 1, 0)).reshape(-1, cout).astype(jnp.bfloat16)

    def head_w(w, C=256, H=7, W=7):
        # PyTorch Linear weight [out, C*H*W] expects NCHW-flattened input;
        # permute rows to NHWC flatten order and transpose -> [H*W*C, out].
        nout = w.shape[0]
        w = w.reshape(nout, C, H, W)
        w = jnp.transpose(w, (2, 3, 1, 0))            # [H, W, C, out]
        return w.reshape(H * W * C, nout).astype(jnp.bfloat16)

    w_head = jnp.concatenate([head_w(p["disc_w"]), head_w(p["aux_w"])], axis=1)
    b_head = jnp.concatenate([p["disc_b"], p["aux_b"]], axis=0)
    return {
        "wm1": conv_w(p["conv1_w"]), "b1": p["conv1_b"].reshape(1, -1),
        "wm2": conv_w(p["conv2_w"]), "b2": p["conv2_b"].reshape(1, -1),
        "wm3": conv_w(p["conv3_w"]), "b3": p["conv3_b"].reshape(1, -1),
        "w_head": w_head, "b_head": b_head.reshape(1, -1),
    }


# ----------------------------------------------------------------------------
# Discriminator forward (ACGAN).
# ----------------------------------------------------------------------------
@jax.jit
def discriminator_forward(params, img_nchw):
    # Input is NCHW [B, C, 28, 28] (PyTorch convention) -> NHWC bf16 internally.
    x = jnp.transpose(img_nchw, (0, 2, 3, 1)).astype(jnp.bfloat16)
    x = conv2d_leaky(x, params["wm1"], params["b1"], stride=2, padding=1)
    # TODO(synk): nn.Dropout2d(0.4) treated as identity (inference/eval mode).
    x = conv2d_leaky(x, params["wm2"], params["b2"], stride=2, padding=1)
    x = conv2d_leaky(x, params["wm3"], params["b3"], stride=1, padding=1)
    B = x.shape[0]
    # Flatten in NHWC order; head weight rows were pre-permuted to match, so no
    # transpose back to NCHW is needed here.
    x = x.reshape(B, -1)                                       # [B, 12544] bf16
    logits = matmul_bias_act(x, params["w_head"], params["b_head"],
                             negative_slope=None, out_dtype=jnp.float32)
    validity = logits[:, :1]                                   # nn.Linear(12544, 1)
    label_pred = logits[:, 1:]                                 # nn.Linear(12544, nc)
    return validity, label_pred


# ----------------------------------------------------------------------------
# Pure-JAX reference (independent path: lax.conv + NCHW flatten + Linear heads,
# using the ORIGINAL PyTorch-layout weights) for correctness checking.
# ----------------------------------------------------------------------------
@jax.jit
def reference_forward(raw, img_nchw):
    def conv(x_nhwc, w_oihw, b, stride):
        w = jnp.transpose(w_oihw, (2, 3, 1, 0)).astype(jnp.bfloat16)   # HWIO
        y = jax.lax.conv_general_dilated(
            x_nhwc.astype(jnp.bfloat16), w,
            window_strides=(stride, stride), padding=((1, 1), (1, 1)),
            dimension_numbers=("NHWC", "HWIO", "NHWC"),
            preferred_element_type=jnp.float32)
        y = y + b.reshape(1, 1, 1, -1)
        y = jnp.where(y >= 0, y, jnp.float32(0.2) * y)
        return y.astype(jnp.bfloat16)

    x = jnp.transpose(img_nchw, (0, 2, 3, 1)).astype(jnp.bfloat16)
    x = conv(x, raw["conv1_w"], raw["conv1_b"], 2)
    x = conv(x, raw["conv2_w"], raw["conv2_b"], 2)
    x = conv(x, raw["conv3_w"], raw["conv3_b"], 1)
    # PyTorch flattens NCHW order: x.view(B, -1)
    xf = jnp.transpose(x, (0, 3, 1, 2)).reshape(x.shape[0], -1)
    validity = jnp.dot(xf, raw["disc_w"].T.astype(jnp.bfloat16),
                       preferred_element_type=jnp.float32) + raw["disc_b"]
    label_pred = jnp.dot(xf, raw["aux_w"].T.astype(jnp.bfloat16),
                         preferred_element_type=jnp.float32) + raw["aux_b"]
    return validity, label_pred


if __name__ == "__main__":
    key = jax.random.PRNGKey(0)
    k_param, k_img = jax.random.split(key)

    batch, in_channels, num_classes = 2, 1, 10
    raw_params = init_params(k_param, in_channels=in_channels,
                             num_classes=num_classes)
    params = prepare_params(raw_params)
    # 28x28 input is required by the 7*7*256 Linear in the module.
    img = jax.random.normal(k_img, (batch, in_channels, 28, 28), jnp.float32)

    validity, label_pred = discriminator_forward(params, img)
    jax.block_until_ready((validity, label_pred))

    assert validity.shape == (batch, 1), validity.shape
    assert label_pred.shape == (batch, num_classes), label_pred.shape
    assert validity.dtype == jnp.float32 and label_pred.dtype == jnp.float32
    assert bool(jnp.all(jnp.isfinite(validity)))
    assert bool(jnp.all(jnp.isfinite(label_pred)))

    # Correctness vs. an independent pure-JAX reference (same bf16 operand
    # precision, f32 accumulation) — only accumulation-order differences remain.
    ref_v, ref_l = reference_forward(raw_params, img)
    jax.block_until_ready((ref_v, ref_l))
    err_v = float(jnp.max(jnp.abs(validity - ref_v)))
    err_l = float(jnp.max(jnp.abs(label_pred - ref_l)))
    assert err_v < 0.2 and err_l < 0.2, (err_v, err_l)

    print("KERNEL_OK")
</pallas_src>

<mosaic_0001>
module attributes {stable_mosaic.version = 11 : i64} {
  func.func @_matmul_bias_act_kernel(%arg0: i32, %arg1: memref<392x9xbf16, #tpu.memory_space<vmem>>, %arg2: memref<9x64xbf16, #tpu.memory_space<vmem>>, %arg3: memref<1x64xf32, #tpu.memory_space<vmem>>, %arg4: memref<392x64xbf16, #tpu.memory_space<vmem>>) attributes {dimension_semantics = [#tpu.dimension_semantics<parallel>], iteration_bounds = array<i64: 1>, scalar_prefetch = 0 : i64, scratch_operands = 0 : i64, tpu.core_type = #tpu.core_type<tc>, window_params = [{pipeline_mode = #tpu.pipeline_mode<synchronous>, transform_indices = @transform_0, window_bounds = array<i64: 392, 9>}, {transform_indices = @transform_1, window_bounds = array<i64: 9, 64>}, {transform_indices = @transform_2, window_bounds = array<i64: 1, 64>}, {transform_indices = @transform_3, window_bounds = array<i64: 392, 64>}]} {
    %c0 = arith.constant 0 : index
    %c0_0 = arith.constant 0 : index
    %0 = vector.load %arg1[%c0, %c0_0] : memref<392x9xbf16, #tpu.memory_space<vmem>>, vector<392x9xbf16>
    %c0_1 = arith.constant 0 : index
    %c0_2 = arith.constant 0 : index
    %1 = vector.load %arg2[%c0_1, %c0_2] : memref<9x64xbf16, #tpu.memory_space<vmem>>, vector<9x64xbf16>
    %cst = arith.constant dense<0.000000e+00> : vector<392x64xf32>
    %2 = tpu.matmul %0, %1, %cst {dimension_numbers = #tpu.dot_dimension_numbers<[1], [0], [0], [1], [0, 0, 1, 1], [], []>} : vector<392x9xbf16>, vector<9x64xbf16>, vector<392x64xf32> -> vector<392x64xf32>
    %c0_3 = arith.constant 0 : index
    %c0_4 = arith.constant 0 : index
    %3 = vector.load %arg3[%c0_3, %c0_4] : memref<1x64xf32, #tpu.memory_space<vmem>>, vector<1x64xf32>
    %4 = vector.broadcast %3 : vector<1x64xf32> to vector<392x64xf32>
    %5 = arith.addf %2, %4 : vector<392x64xf32>
    %cst_5 = arith.constant 0.000000e+00 : f32
    %6 = vector.broadcast %cst_5 : f32 to vector<392x64xf32>
    %7 = arith.cmpf oge, %5, %6 : vector<392x64xf32>
    %cst_6 = arith.constant 2.000000e-01 : f32
    %8 = vector.broadcast %cst_6 : f32 to vector<392x64xf32>
    %9 = arith.mulf %8, %5 : vector<392x64xf32>
    %10 = arith.select %7, %5, %9 : vector<392x64xi1>, vector<392x64xf32>
    %11 = arith.truncf %10 : vector<392x64xf32> to vector<392x64xbf16>
    %c0_7 = arith.constant 0 : index
    %c0_8 = arith.constant 0 : index
    %12 = vector.load %arg4[%c0_7, %c0_8] : memref<392x64xbf16, #tpu.memory_space<vmem>>, vector<392x64xbf16>
    tpu.vector_store %arg4[%c0_7, %c0_8], %11 {strides = array<i32>} : memref<392x64xbf16, #tpu.memory_space<vmem>>, vector<392x64xbf16>,
    return
  }
  func.func @transform_0(%arg0: i32) -> (i32, i32) {
    %c0_i32 = arith.constant 0 : i32
    %c0_i32_0 = arith.constant 0 : i32
    %c0_i32_1 = arith.constant 0 : i32
    return %c0_i32, %c0_i32_0 : i32, i32
  }
  func.func @transform_1(%arg0: i32) -> (i32, i32) {
    %c0_i32 = arith.constant 0 : i32
    %c0_i32_0 = arith.constant 0 : i32
    return %c0_i32, %arg0 : i32, i32
  }
  func.func @transform_2(%arg0: i32) -> (i32, i32) {
    %c0_i32 = arith.constant 0 : i32
    %c0_i32_0 = arith.constant 0 : i32
    return %c0_i32, %arg0 : i32, i32
  }
  func.func @transform_3(%arg0: i32) -> (i32, i32) {
    %c0_i32 = arith.constant 0 : i32
    %c0_i32_0 = arith.constant 0 : i32
    return %c0_i32, %arg0 : i32, i32
  }
}

module attributes {stable_mosaic.version = 11 : i64} {
  func.func @_matmul_bias_act_kernel(%arg0: i32, %arg1: memref<98x576xbf16, #tpu.memory_space<vmem>>, %arg2: memref<576x128xbf16, #tpu.memory_space<vmem>>, %arg3: memref<1x128xf32, #tpu.memory_space<vmem>>, %arg4: memref<98x128xbf16, #tpu.memory_space<vmem>>) attributes {dimension_semantics = [#tpu.dimension_semantics<parallel>], iteration_bounds = array<i64: 1>, scalar_prefetch = 0 : i64, scratch_operands = 0 : i64, tpu.core_type = #tpu.core_type<tc>, window_params = [{pipeline_mode = #tpu.pipeline_mode<synchronous>, transform_indices = @transform_0, window_bounds = array<i64: 98, 576>}, {transform_indices = @transform_1, window_bounds = array<i64: 576, 128>}, {transform_indices = @transform_2, window_bounds = array<i64: 1, 128>}, {transform_indices = @transform_3, window_bounds = array<i64: 98, 128>}]} {
    %c0 = arith.constant 0 : index
    %c0_0 = arith.constant 0 : index
    %0 = vector.load %arg1[%c0, %c0_0] : memref<98x576xbf16, #tpu.memory_space<vmem>>, vector<98x576xbf16>
    %c0_1 = arith.constant 0 : index
    %c0_2 = arith.constant 0 : index
    %1 = vector.load %arg2[%c0_1, %c0_2] : memref<576x128xbf16, #tpu.memory_space<vmem>>, vector<576x128xbf16>
    %cst = arith.constant dense<0.000000e+00> : vector<98x128xf32>
    %2 = tpu.matmul %0, %1, %cst {dimension_numbers = #tpu.dot_dimension_numbers<[1], [0], [0], [1], [0, 0, 1, 1], [], []>} : vector<98x576xbf16>, vector<576x128xbf16>, vector<98x128xf32> -> vector<98x128xf32>
    %c0_3 = arith.constant 0 : index
    %c0_4 = arith.constant 0 : index
    %3 = vector.load %arg3[%c0_3, %c0_4] : memref<1x128xf32, #tpu.memory_space<vmem>>, vector<1x128xf32>
    %4 = vector.broadcast %3 : vector<1x128xf32> to vector<98x128xf32>
    %5 = arith.addf %2, %4 : vector<98x128xf32>
    %cst_5 = arith.constant 0.000000e+00 : f32
    %6 = vector.broadcast %cst_5 : f32 to vector<98x128xf32>
    %7 = arith.cmpf oge, %5, %6 : vector<98x128xf32>
    %cst_6 = arith.constant 2.000000e-01 : f32
    %8 = vector.broadcast %cst_6 : f32 to vector<98x128xf32>
    %9 = arith.mulf %8, %5 : vector<98x128xf32>
    %10 = arith.select %7, %5, %9 : vector<98x128xi1>, vector<98x128xf32>
    %11 = arith.truncf %10 : vector<98x128xf32> to vector<98x128xbf16>
    %c0_7 = arith.constant 0 : index
    %c0_8 = arith.constant 0 : index
    %12 = vector.load %arg4[%c0_7, %c0_8] : memref<98x128xbf16, #tpu.memory_space<vmem>>, vector<98x128xbf16>
    tpu.vector_store %arg4[%c0_7, %c0_8], %11 {strides = array<i32>} : memref<98x128xbf16, #tpu.memory_space<vmem>>, vector<98x128xbf16>,
    return
  }
  func.func @transform_0(%arg0: i32) -> (i32, i32) {
    %c0_i32 = arith.constant 0 : i32
    %c0_i32_0 = arith.constant 0 : i32
    %c0_i32_1 = arith.constant 0 : i32
    return %c0_i32, %c0_i32_0 : i32, i32
  }
  func.func @transform_1(%arg0: i32) -> (i32, i32) {
    %c0_i32 = arith.constant 0 : i32
    %c0_i32_0 = arith.constant 0 : i32
    return %c0_i32, %arg0 : i32, i32
  }
  func.func @transform_2(%arg0: i32) -> (i32, i32) {
    %c0_i32 = arith.constant 0 : i32
    %c0_i32_0 = arith.constant 0 : i32
    return %c0_i32, %arg0 : i32, i32
  }
  func.func @transform_3(%arg0: i32) -> (i32, i32) {
    %c0_i32 = arith.constant 0 : i32
    %c0_i32_0 = arith.constant 0 : i32
    return %c0_i32, %arg0 : i32, i32
  }
}

module attributes {stable_mosaic.version = 11 : i64} {
  func.func @_matmul_bias_act_kernel(%arg0: i32, %arg1: memref<98x1152xbf16, #tpu.memory_space<vmem>>, %arg2: memref<1152x128xbf16, #tpu.memory_space<vmem>>, %arg3: memref<1x128xf32, #tpu.memory_space<vmem>>, %arg4: memref<98x128xbf16, #tpu.memory_space<vmem>>) attributes {dimension_semantics = [#tpu.dimension_semantics<parallel>], iteration_bounds = array<i64: 2>, scalar_prefetch = 0 : i64, scratch_operands = 0 : i64, tpu.core_type = #tpu.core_type<tc>, window_params = [{pipeline_mode = #tpu.pipeline_mode<synchronous>, transform_indices = @transform_0, window_bounds = array<i64: 98, 1152>}, {transform_indices = @transform_1, window_bounds = array<i64: 1152, 128>}, {transform_indices = @transform_2, window_bounds = array<i64: 1, 128>}, {transform_indices = @transform_3, window_bounds = array<i64: 98, 128>}]} {
    %c0 = arith.constant 0 : index
    %c0_0 = arith.constant 0 : index
    %0 = vector.load %arg1[%c0, %c0_0] : memref<98x1152xbf16, #tpu.memory_space<vmem>>, vector<98x1152xbf16>
    %c0_1 = arith.constant 0 : index
    %c0_2 = arith.constant 0 : index
    %1 = vector.load %arg2[%c0_1, %c0_2] : memref<1152x128xbf16, #tpu.memory_space<vmem>>, vector<1152x128xbf16>
    %cst = arith.constant dense<0.000000e+00> : vector<98x128xf32>
    %2 = tpu.matmul %0, %1, %cst {dimension_numbers = #tpu.dot_dimension_numbers<[1], [0], [0], [1], [0, 0, 1, 1], [], []>} : vector<98x1152xbf16>, vector<1152x128xbf16>, vector<98x128xf32> -> vector<98x128xf32>
    %c0_3 = arith.constant 0 : index
    %c0_4 = arith.constant 0 : index
    %3 = vector.load %arg3[%c0_3, %c0_4] : memref<1x128xf32, #tpu.memory_space<vmem>>, vector<1x128xf32>
    %4 = vector.broadcast %3 : vector<1x128xf32> to vector<98x128xf32>
    %5 = arith.addf %2, %4 : vector<98x128xf32>
    %cst_5 = arith.constant 0.000000e+00 : f32
    %6 = vector.broadcast %cst_5 : f32 to vector<98x128xf32>
    %7 = arith.cmpf oge, %5, %6 : vector<98x128xf32>
    %cst_6 = arith.constant 2.000000e-01 : f32
    %8 = vector.broadcast %cst_6 : f32 to vector<98x128xf32>
    %9 = arith.mulf %8, %5 : vector<98x128xf32>
    %10 = arith.select %7, %5, %9 : vector<98x128xi1>, vector<98x128xf32>
    %11 = arith.truncf %10 : vector<98x128xf32> to vector<98x128xbf16>
    %c0_7 = arith.constant 0 : index
    %c0_8 = arith.constant 0 : index
    %12 = vector.load %arg4[%c0_7, %c0_8] : memref<98x128xbf16, #tpu.memory_space<vmem>>, vector<98x128xbf16>
    tpu.vector_store %arg4[%c0_7, %c0_8], %11 {strides = array<i32>} : memref<98x128xbf16, #tpu.memory_space<vmem>>, vector<98x128xbf16>,
    return
  }
  func.func @transform_0(%arg0: i32) -> (i32, i32) {
    %c0_i32 = arith.constant 0 : i32
    %c0_i32_0 = arith.constant 0 : i32
    %c0_i32_1 = arith.constant 0 : i32
    return %c0_i32, %c0_i32_0 : i32, i32
  }
  func.func @transform_1(%arg0: i32) -> (i32, i32) {
    %c0_i32 = arith.constant 0 : i32
    %c0_i32_0 = arith.constant 0 : i32
    return %c0_i32, %arg0 : i32, i32
  }
  func.func @transform_2(%arg0: i32) -> (i32, i32) {
    %c0_i32 = arith.constant 0 : i32
    %c0_i32_0 = arith.constant 0 : i32
    return %c0_i32, %arg0 : i32, i32
  }
  func.func @transform_3(%arg0: i32) -> (i32, i32) {
    %c0_i32 = arith.constant 0 : i32
    %c0_i32_0 = arith.constant 0 : i32
    return %c0_i32, %arg0 : i32, i32
  }
}

module attributes {stable_mosaic.version = 11 : i64} {
  func.func @_matmul_bias_act_kernel(%arg0: i32, %arg1: memref<2x12544xbf16, #tpu.memory_space<vmem>>, %arg2: memref<12544x11xbf16, #tpu.memory_space<vmem>>, %arg3: memref<1x11xf32, #tpu.memory_space<vmem>>, %arg4: memref<2x11xf32, #tpu.memory_space<vmem>>) attributes {dimension_semantics = [#tpu.dimension_semantics<parallel>], iteration_bounds = array<i64: 1>, scalar_prefetch = 0 : i64, scratch_operands = 0 : i64, tpu.core_type = #tpu.core_type<tc>, window_params = [{pipeline_mode = #tpu.pipeline_mode<synchronous>, transform_indices = @transform_0, window_bounds = array<i64: 2, 12544>}, {transform_indices = @transform_1, window_bounds = array<i64: 12544, 11>}, {transform_indices = @transform_2, window_bounds = array<i64: 1, 11>}, {transform_indices = @transform_3, window_bounds = array<i64: 2, 11>}]} {
    %c0 = arith.constant 0 : index
    %c0_0 = arith.constant 0 : index
    %0 = vector.load %arg1[%c0, %c0_0] : memref<2x12544xbf16, #tpu.memory_space<vmem>>, vector<2x12544xbf16>
    %c0_1 = arith.constant 0 : index
    %c0_2 = arith.constant 0 : index
    %1 = vector.load %arg2[%c0_1, %c0_2] : memref<12544x11xbf16, #tpu.memory_space<vmem>>, vector<12544x11xbf16>
    %cst = arith.constant dense<0.000000e+00> : vector<2x11xf32>
    %2 = tpu.matmul %0, %1, %cst {dimension_numbers = #tpu.dot_dimension_numbers<[1], [0], [0], [1], [0, 0, 1, 1], [], []>} : vector<2x12544xbf16>, vector<12544x11xbf16>, vector<2x11xf32> -> vector<2x11xf32>
    %c0_3 = arith.constant 0 : index
    %c0_4 = arith.constant 0 : index
    %3 = vector.load %arg3[%c0_3, %c0_4] : memref<1x11xf32, #tpu.memory_space<vmem>>, vector<1x11xf32>
    %4 = vector.broadcast %3 : vector<1x11xf32> to vector<2x11xf32>
    %5 = arith.addf %2, %4 : vector<2x11xf32>
    %c0_5 = arith.constant 0 : index
    %c0_6 = arith.constant 0 : index
    %6 = vector.load %arg4[%c0_5, %c0_6] : memref<2x11xf32, #tpu.memory_space<vmem>>, vector<2x11xf32>
    tpu.vector_store %arg4[%c0_5, %c0_6], %5 {strides = array<i32>} : memref<2x11xf32, #tpu.memory_space<vmem>>, vector<2x11xf32>,
    return
  }
  func.func @transform_0(%arg0: i32) -> (i32, i32) {
    %c0_i32 = arith.constant 0 : i32
    %c0_i32_0 = arith.constant 0 : i32
    %c0_i32_1 = arith.constant 0 : i32
    return %c0_i32, %c0_i32_0 : i32, i32
  }
  func.func @transform_1(%arg0: i32) -> (i32, i32) {
    %c0_i32 = arith.constant 0 : i32
    %c0_i32_0 = arith.constant 0 : i32
    return %c0_i32, %arg0 : i32, i32
  }
  func.func @transform_2(%arg0: i32) -> (i32, i32) {
    %c0_i32 = arith.constant 0 : i32
    %c0_i32_0 = arith.constant 0 : i32
    return %c0_i32, %arg0 : i32, i32
  }
  func.func @transform_3(%arg0: i32) -> (i32, i32) {
    %c0_i32 = arith.constant 0 : i32
    %c0_i32_0 = arith.constant 0 : i32
    return %c0_i32, %arg0 : i32, i32
  }
}

</mosaic_0001>

<bundles_post_ra>
// kernel: discriminator_forward.4
= control target key start
LH: loop header
LB: loop body
LE: loop exit
PB: predicated region body
PF: predicated region fallthrough
CT: control target
= control target key end

     0   :  { %8 = vsyncpa [#allocation3], 0  ;;  %s1753_s0 = inlined_call_operand.vmem [shape: bf16[392,9], index: 0, kind: input, shape index: {}]   ;;  %s1754_s1 = inlined_call_operand.hbm [shape: bf16[9,64], index: 1, kind: input, shape index: {}]   ;;  %s1755_s2 = inlined_call_operand.hbm [shape: f32[1,64], index: 2, kind: input, shape index: {}]   ;;  %s1756_s3 = inlined_call_operand.vmem [shape: bf16[392,64], index: 3, kind: output, shape index: {}]  }
   0x1   :  { %9 = vsyncpa [#allocation5], 0  ;;  %s1303_s12 = smov [#allocation2]   ;;  %s1255_s16 = scalar_lea.hbm %s1754_s1, 128 }
   0x2   :  { %s17_s13 = sshll.u32 %s1303_s12, 4  ;;  %p1256_p0 = scmp.ne.s32.totalorder %s1754_s1, %s1255_s16  ;;  %s18_s13 = int_to_ptr.vmem [resolvable:$true] %s17_s13 }
   0x3   :  { %p1259_p1 = scmp.lt.u32.totalorder %s1255_s16, %s1754_s1 }
   0x5   :  { %p1261_p2 = pnand %p1259_p1, %p1256_p0 }
   0x7   :  { %1264 = shalt.err (!%p1261_p2)
}
   0x8   :  { %s1265_s21 = scalar_lea.vmem %s18_s13, 128  ;;  %p1270_p4 = scmp.lt.s32.totalorder %s18_s13, %s18_s13 }
   0x9   :  { %p1266_p3 = scmp.ne.s32.totalorder %s18_s13, %s1265_s21  ;;  %p1271_p5 = scmp.lt.s32.totalorder %s1265_s21, %s1265_s21 }
   0xb   :  { %p1272_p6 = por %p1271_p5, %p1270_p4 }
   0xd   :  { %p1273_p7 = pnand %p1272_p6, %p1266_p3 }
   0xf   :  { %1276 = shalt.err (!%p1273_p7)
}
  0x10   :  { %s1304_s22 = smov 64   ;;  %s1305_s23 = smov 4  }
  0x11   :  { %23 = dma.hbm_to_vmem [thread:$0]  %s1754_s1, 128, %s18_s13, [#allocation3], %s1304_s22, %s1304_s22, %s1305_s23  }
  0x12   :  { %s1306_s26 = smov [#allocation4]   ;;  %s1277_s30 = scalar_lea.hbm %s1755_s2, 16 }
  0x13   :  { %s30_s27 = sshll.u32 %s1306_s26, 4  ;;  %p1278_p8 = scmp.ne.s32.totalorder %s1755_s2, %s1277_s30  ;;  %s31_s27 = int_to_ptr.vmem [resolvable:$true] %s30_s27 }
  0x14   :  { %p1281_p9 = scmp.lt.u32.totalorder %s1277_s30, %s1755_s2 }
  0x16   :  { %p1283_p10 = pnand %p1281_p9, %p1278_p8 }
  0x18   :  { %1286 = shalt.err (!%p1283_p10)
}
  0x19   :  { %s1287_s8 = scalar_lea.vmem %s31_s27, 16  ;;  %s1291_s1 = scalar_lea.vmem %s31_s27, 32 }
  0x1a   :  { %p1288_p11 = scmp.ne.s32.totalorder %s31_s27, %s1287_s8  ;;  %p1292_p12 = scmp.lt.s32.totalorder %s31_s27, %s31_s27 }
  0x1b   :  { %p1293_p13 = scmp.lt.s32.totalorder %s1291_s1, %s1287_s8 }
  0x1d   :  { %p1294_p0 = por %p1293_p13, %p1292_p12 }
  0x1f   :  { %p1295_p1 = pnand %p1294_p0, %p1288_p11 }
  0x21   :  { %1298 = shalt.err (!%p1295_p1)
}
  0x22   :  { %33 = dma.hbm_to_vmem [thread:$0]  %s1755_s2, 16, %s31_s27, [#allocation5]  }
  0x23   :  { %1299 = dma.done.wait [#allocation3], 128  }
  0x24   :  { %1300 = vsyncadd [#allocation3], 4294967168 }
  0x25   :  { %1301 = dma.done.wait [#allocation5], 16  }
  0x26   :  { %1302 = vsyncadd [#allocation5], 4294967280  ;;  %vm303_vm0 = vcmask 1043456   ;;  %v1307_v0 = vmov 0.0   ;;  %vm1308_vm1 = vmmov 0   ;;  %vm304_vm2 = vcmask 1044480  }
  0x27   :  { %1118 = vmatprep.subr.bf16.mxu0 %v1307_v0  ;;  %1220 = vmatprep.subr.bf16.mxu1 %v1307_v0  ;;  %v1309_v1 = vmov 65535   ;;  %v1229_v4 = vld [vmem:[#allocation2] sm:$0x1f]   ;;  %v1231_v7 = vld [vmem:[%s1753_s0 + $0x68] sm:$0xff]   ;;  %vm227_vm3 = vcmask 72704   ;;  %v1233_v9 = vld [vmem:[%s1753_s0 + $0x70] sm:$0xff]  }
  0x28   :  { %1120 = vmatprep.mubr.msk.bf16.mxu0 %vm1308_vm1, %v1307_v0  ;;  %1172 = vmatprep.mubr.msk.bf16.mxu1 %vm1308_vm1, %v1307_v0  ;;  %v305_v2 = vsel %vm303_vm0, 4294967295, %v1309_v1  ;;  %v1230_v6 = vld [vmem:[%s1753_s0] sm:$0xff]   ;;  %v1232_v8 = vld [vmem:[%s1753_s0 + $0x8] sm:$0xff]   ;;  %v1234_v10 = vld [vmem:[%s1753_s0 + $0x10] sm:$0xff]   ;;  %vm886_vm6 = vcmask 519168  }
  0x29   :  { %v306_v3 = vsel %vm304_vm2, %v305_v2, 0  ;;  %v1235_v11 = vld [vmem:[%s1753_s0 + $0x78] sm:$0xff]   ;;  %v1237_v13 = vld [vmem:[%s1753_s0 + $0x80] sm:$0xff]   ;;  %v1239_v15 = vld [vmem:[%s1753_s0 + $0x88] sm:$0xff]  }
  0x2a   :  { %v308_v5 = vand.u32 %v1229_v4, %v306_v3  ;;  %v1236_v12 = vld [vmem:[%s1753_s0 + $0x18] sm:$0xff]   ;;  %v1238_v14 = vld [vmem:[%s1753_s0 + $0x20] sm:$0xff]   ;;  %v1240_v16 = vld [vmem:[%s1753_s0 + $0x28] sm:$0xff]  }
  0x2b   :  { %v1241_v17 = vld [vmem:[%s1753_s0 + $0x90] sm:$0xff]   ;;  %v1243_v19 = vld [vmem:[%s1753_s0 + $0x98] sm:$0xff]   ;;  %v1245_v21 = vld [vmem:[%s1753_s0 + $0xa0] sm:$0xff]  }
  0x2c   :  { %1119 = vmatpush3.bf16.msra.mxu0 %v308_v5  ;;  %1221 = vmatpush3.bf16.msra.mxu1 %v308_v5  ;;  %v1242_v18 = vld [vmem:[%s1753_s0 + $0x30] sm:$0xff]   ;;  %v1244_v20 = vld [vmem:[%s1753_s0 + $0x38] sm:$0xff]   ;;  %v1246_v22 = vld [vmem:[%s1753_s0 + $0x40] sm:$0xff]  }
  0x2d   :  { %v1247_v23 = vld [vmem:[%s1753_s0 + $0xa8] sm:$0xff]   ;;  %v1249_v25 = vld [vmem:[%s1753_s0 + $0xb0] sm:$0xff]   ;;  %v1251_v27 = vld [vmem:[%s1753_s0 + $0xb8] sm:$0xff]  }
  0x2e   :  { %v1248_v24 = vld [vmem:[%s1753_s0 + $0x48] sm:$0xff]   ;;  %v1250_v26 = vld [vmem:[%s1753_s0 + $0x50] sm:$0xff]   ;;  %v1252_v28 = vld [vmem:[%s1753_s0 + $0x58] sm:$0xff]  }
  0x2f   :  { %1121 = vmatmul.mubr.msk.bf16.vlgmr.msra.gmra.mrb[0].mxu0 %vm227_vm3, %v1230_v6  ;;  %1173 = vmatmul.mubr.msk.bf16.vlgmr.msra.gmra.mrb[0].mxu1 %vm227_vm3, %v1231_v7  ;;  %v1253_v29 = vld [vmem:[%s1753_s0 + $0xc0] ss:$0 sps:$4 sm:$0xff]   ;;  %v1506_v31 = vld [vmem:[#allocation4] ss:$0 sm:$0xff] }
  0x30   :  { %1124 = vmatprep.mubr.msk.bf16.mxu0 %vm1308_vm1, %v1307_v0  ;;  %1176 = vmatprep.mubr.msk.bf16.mxu1 %vm1308_vm1, %v1307_v0  ;;  %v1254_v30 = vld [vmem:[%s1753_s0 + $0x60] sm:$0xff]  }
  0x37   :  { %1125 = vmatmul.mubr.msk.bf16.gmra.mrb[4].mxu0 %vm227_vm3, %v1232_v8  ;;  %1177 = vmatmul.mubr.msk.bf16.gmra.mrb[4].mxu1 %vm227_vm3, %v1233_v9 }
  0x38   :  { %1128 = vmatprep.mubr.msk.bf16.mxu0 %vm1308_vm1, %v1307_v0  ;;  %1180 = vmatprep.mubr.msk.bf16.mxu1 %vm1308_vm1, %v1307_v0 }
  0x3f   :  { %1129 = vmatmul.mubr.msk.bf16.gmra.mrb[8].mxu0 %vm227_vm3, %v1234_v10  ;;  %1181 = vmatmul.mubr.msk.bf16.gmra.mrb[8].mxu1 %vm227_vm3, %v1235_v11 }
  0x40   :  { %1132 = vmatprep.mubr.msk.bf16.mxu0 %vm1308_vm1, %v1307_v0  ;;  %1184 = vmatprep.mubr.msk.bf16.mxu1 %vm1308_vm1, %v1307_v0 }
  0x47   :  { %1133 = vmatmul.mubr.msk.bf16.gmra.mrb[12].mxu0 %vm227_vm3, %v1236_v12  ;;  %1185 = vmatmul.mubr.msk.bf16.gmra.mrb[12].mxu1 %vm227_vm3, %v1237_v13 }
  0x48   :  { %1136 = vmatprep.mubr.msk.bf16.mxu0 %vm1308_vm1, %v1307_v0  ;;  %1188 = vmatprep.mubr.msk.bf16.mxu1 %vm1308_vm1, %v1307_v0 }
  0x4f   :  { %1137 = vmatmul.mubr.msk.bf16.gmra.mrb[16].mxu0 %vm227_vm3, %v1238_v14  ;;  %1189 = vmatmul.mubr.msk.bf16.gmra.mrb[16].mxu1 %vm227_vm3, %v1239_v15 }
  0x50   :  { %1140 = vmatprep.mubr.msk.bf16.mxu0 %vm1308_vm1, %v1307_v0  ;;  %1192 = vmatprep.mubr.msk.bf16.mxu1 %vm1308_vm1, %v1307_v0 }
  0x57   :  { %1141 = vmatmul.mubr.msk.bf16.gmra.mrb[20].mxu0 %vm227_vm3, %v1240_v16  ;;  %1193 = vmatmul.mubr.msk.bf16.gmra.mrb[20].mxu1 %vm227_vm3, %v1241_v17 }
  0x58   :  { %1144 = vmatprep.mubr.msk.bf16.mxu0 %vm1308_vm1, %v1307_v0  ;;  %1196 = vmatprep.mubr.msk.bf16.mxu1 %vm1308_vm1, %v1307_v0 }
  0x5f   :  { %1145 = vmatmul.mubr.msk.bf16.gmra.mrb[24].mxu0 %vm227_vm3, %v1242_v18  ;;  %1197 = vmatmul.mubr.msk.bf16.gmra.mrb[24].mxu1 %vm227_vm3, %v1243_v19 }
  0x60   :  { %1148 = vmatprep.mubr.msk.bf16.mxu0 %vm1308_vm1, %v1307_v0  ;;  %1200 = vmatprep.mubr.msk.bf16.mxu1 %vm1308_vm1, %v1307_v0 }
  0x67   :  { %1149 = vmatmul.mubr.msk.bf16.gmra.mrb[28].mxu0 %vm227_vm3, %v1244_v20  ;;  %1201 = vmatmul.mubr.msk.bf16.gmra.mrb[28].mxu1 %vm227_vm3, %v1245_v21 }
  0x68   :  { %1152 = vmatprep.mubr.msk.bf16.mxu0 %vm1308_vm1, %v1307_v0  ;;  %1204 = vmatprep.mubr.msk.bf16.mxu1 %vm1308_vm1, %v1307_v0 }
  0x6f   :  { %1153 = vmatmul.mubr.msk.bf16.gmra.mrb[32].mxu0 %vm227_vm3, %v1246_v22  ;;  %1205 = vmatmul.mubr.msk.bf16.gmra.mrb[32].mxu1 %vm227_vm3, %v1247_v23 }
  0x70   :  { %1156 = vmatprep.mubr.msk.bf16.mxu0 %vm1308_vm1, %v1307_v0  ;;  %1208 = vmatprep.mubr.msk.bf16.mxu1 %vm1308_vm1, %v1307_v0 }
  0x77   :  { %1157 = vmatmul.mubr.msk.bf16.gmra.mrb[36].mxu0 %vm227_vm3, %v1248_v24  ;;  %1209 = vmatmul.mubr.msk.bf16.gmra.mrb[36].mxu1 %vm227_vm3, %v1249_v25 }
  0x78   :  { %1160 = vmatprep.mubr.msk.bf16.mxu0 %vm1308_vm1, %v1307_v0  ;;  %1212 = vmatprep.mubr.msk.bf16.mxu1 %vm1308_vm1, %v1307_v0 }
  0x7f   :  { %1161 = vmatmul.mubr.msk.bf16.gmra.mrb[40].mxu0 %vm227_vm3, %v1250_v26  ;;  %1213 = vmatmul.mubr.msk.bf16.gmra.mrb[40].mxu1 %vm227_vm3, %v1251_v27 }
  0x80   :  { %1164 = vmatprep.mubr.msk.bf16.mxu0 %vm1308_vm1, %v1307_v0  ;;  %1216 = vmatprep.mubr.msk.bf16.mxu1 %vm1308_vm1, %v1307_v0 }
  0x87   :  { %1165 = vmatmul.mubr.msk.bf16.gmra.mrb[44].mxu0 %vm227_vm3, %v1252_v28  ;;  %1217 = vmatmul.mubr.msk.bf16.gmra.mrb[44].mxu1 %vm227_vm3, %v1253_v29 }
  0x88   :  { %1168 = vmatprep.mubr.msk.bf16.mxu0 %vm1308_vm1, %v1307_v0 }
  0x8f   :  { %1169 = vmatmul.mubr.msk.bf16.gmra.mrb[48].mxu0 %vm227_vm3, %v1254_v30 }
 0x102   :  { %v344_v32 = vpop.f32.mrb[0].mxu0  ;;  %v448_v33 = vpop.f32.mrb[0].mxu1 }
 0x103   :  { %v345_v34 = vadd.f32 %v1506_v31, %v344_v32  ;;  %v1122_v35 = vpop.f32.mrb[1].mxu0  ;;  %v449_v36 = vadd.f32 %v1506_v31, %v448_v33  ;;  %v1174_v37 = vpop.f32.mrb[1].mxu1 }
 0x104   :  { %v347_v38 = vpop.f32.mrb[2].mxu0  ;;  %v451_v39 = vpop.f32.mrb[2].mxu1 }
 0x105   :  { %vm542_vm4 = vcmp.ge.f32.partialorder %v345_v34, 0.0  ;;  %v591_v40 = vmul.f32 0.2, %v345_v34  ;;  %v348_v41 = vadd.f32 %v1506_v31, %v347_v38  ;;  %v1123_v42 = vpop.f32.mrb[3].mxu0  ;;  %vm568_vm5 = vcmp.ge.f32.partialorder %v449_v36, 0.0  ;;  %v1175_v43 = vpop.f32.mrb[3].mxu1 }
 0x106   :  { %v617_v44 = vmul.f32 0.2, %v449_v36  ;;  %v452_v45 = vadd.f32 %v1506_v31, %v451_v39 }
 0x107   :  { %v640_v46 = vsel %vm542_vm4, %v345_v34, %v591_v40  ;;  %vm543_vm7 = vcmp.ge.f32.partialorder %v348_v41, 0.0  ;;  %v592_v47 = vmul.f32 0.2, %v348_v41 }
 0x108   :  { %v1043_v48 = vpack.c.bf16 %v640_v46, %v640_v46  ;;  %v666_v49 = vsel %vm568_vm5, %v449_v36, %v617_v44  ;;  %vm569_vm8 = vcmp.ge.f32.partialorder %v452_v45, 0.0  ;;  %v618_v50 = vmul.f32 0.2, %v452_v45 }
 0x109   :  { %v641_v51 = vsel %vm543_vm7, %v348_v41, %v592_v47  ;;  %v1069_v52 = vpack.c.bf16 %v666_v49, %v666_v49 }
 0x10a   :  { %887 = vst.msk [vmem:[%s1756_s3] sm:$0xf] %vm886_vm6, %v1043_v48  ;;  %v1044_v53 = vpack.c.bf16 %v641_v51, %v641_v51  ;;  %v352_v54 = vpop.f32.mrb[4].mxu0  ;;  %v667_v55 = vsel %vm569_vm8, %v452_v45, %v618_v50  ;;  %v456_v56 = vpop.f32.mrb[4].mxu1 }
 0x10b   :  { %913 = vst.msk [vmem:[%s1756_s3 + $0x68] sm:$0xf] %vm886_vm6, %v1069_v52  ;;  %v353_v57 = vadd.f32 %v1506_v31, %v352_v54  ;;  %v1070_v58 = vpack.c.bf16 %v667_v55, %v667_v55  ;;  %v1126_v59 = vpop.f32.mrb[5].mxu0  ;;  %v457_v60 = vadd.f32 %v1506_v31, %v456_v56  ;;  %v1178_v61 = vpop.f32.mrb[5].mxu1 }
 0x10c   :  { %888 = vst.msk [vmem:[%s1756_s3 + $0x4] sm:$0xf] %vm886_vm6, %v1044_v53  ;;  %v355_v62 = vpop.f32.mrb[6].mxu0  ;;  %v459_v63 = vpop.f32.mrb[6].mxu1 }
 0x10d   :  { %vm544_vm9 = vcmp.ge.f32.partialorder %v353_v57, 0.0  ;;  %v593_v0 = vmul.f32 0.2, %v353_v57  ;;  %914 = vst.msk [vmem:[%s1756_s3 + $0x6c] sm:$0xf] %vm886_vm6, %v1070_v58  ;;  %v356_v1 = vadd.f32 %v1506_v31, %v355_v62  ;;  %v1127_v2 = vpop.f32.mrb[7].mxu0  ;;  %v460_v5 = vadd.f32 %v1506_v31, %v459_v63 }
 0x10e   :  { %vm570_vm10 = vcmp.ge.f32.partialorder %v457_v60, 0.0  ;;  %v1179_v3 = vpop.f32.mrb[7].mxu1  ;;  %v619_v4 = vmul.f32 0.2, %v457_v60 }
 0x10f   :  { %v642_v6 = vsel %vm544_vm9, %v353_v57, %v593_v0  ;;  %vm545_vm11 = vcmp.ge.f32.partialorder %v356_v1, 0.0  ;;  %v594_v7 = vmul.f32 0.2, %v356_v1  ;;  %vm571_vm12 = vcmp.ge.f32.partialorder %v460_v5, 0.0 }
 0x110   :  { %v1045_v8 = vpack.c.bf16 %v642_v6, %v642_v6  ;;  %v668_v9 = vsel %vm570_vm10, %v457_v60, %v619_v4  ;;  %v620_v10 = vmul.f32 0.2, %v460_v5 }
 0x111   :  { %v643_v11 = vsel %vm545_vm11, %v356_v1, %v594_v7  ;;  %v1071_v12 = vpack.c.bf16 %v668_v9, %v668_v9 }
 0x112   :  { %889 = vst.msk [vmem:[%s1756_s3 + $0x8] sm:$0xf] %vm886_vm6, %v1045_v8  ;;  %v1046_v13 = vpack.c.bf16 %v643_v11, %v643_v11  ;;  %v360_v14 = vpop.f32.mrb[8].mxu0  ;;  %v669_v15 = vsel %vm571_vm12, %v460_v5, %v620_v10  ;;  %v464_v16 = vpop.f32.mrb[8].mxu1 }
 0x113   :  { %915 = vst.msk [vmem:[%s1756_s3 + $0x70] sm:$0xf] %vm886_vm6, %v1071_v12  ;;  %v361_v17 = vadd.f32 %v1506_v31, %v360_v14  ;;  %v1072_v18 = vpack.c.bf16 %v669_v15, %v669_v15  ;;  %v1130_v19 = vpop.f32.mrb[9].mxu0  ;;  %v465_v20 = vadd.f32 %v1506_v31, %v464_v16  ;;  %v1182_v21 = vpop.f32.mrb[9].mxu1 }
 0x114   :  { %890 = vst.msk [vmem:[%s1756_s3 + $0xc] sm:$0xf] %vm886_vm6, %v1046_v13  ;;  %v363_v22 = vpop.f32.mrb[10].mxu0  ;;  %v467_v23 = vpop.f32.mrb[10].mxu1 }
 0x115   :  { %vm546_vm13 = vcmp.ge.f32.partialorder %v361_v17, 0.0  ;;  %v595_v24 = vmul.f32 0.2, %v361_v17  ;;  %916 = vst.msk [vmem:[%s1756_s3 + $0x74] sm:$0xf] %vm886_vm6, %v1072_v18  ;;  %v364_v25 = vadd.f32 %v1506_v31, %v363_v22  ;;  %v1131_v26 = vpop.f32.mrb[11].mxu0  ;;  %v468_v29 = vadd.f32 %v1506_v31, %v467_v23 }
 0x116   :  { %vm572_vm14 = vcmp.ge.f32.partialorder %v465_v20, 0.0  ;;  %v1183_v27 = vpop.f32.mrb[11].mxu1  ;;  %v621_v28 = vmul.f32 0.2, %v465_v20 }
 0x117   :  { %v644_v30 = vsel %vm546_vm13, %v361_v17, %v595_v24  ;;  %vm547_vm15 = vcmp.ge.f32.partialorder %v364_v25, 0.0  ;;  %v596_v32 = vmul.f32 0.2, %v364_v25  ;;  %vm573_vm0 = vcmp.ge.f32.partialorder %v468_v29, 0.0 }
 0x118   :  { %v1047_v33 = vpack.c.bf16 %v644_v30, %v644_v30  ;;  %v670_v34 = vsel %vm572_vm14, %v465_v20, %v621_v28  ;;  %v622_v35 = vmul.f32 0.2, %v468_v29 }
 0x119   :  { %v645_v36 = vsel %vm547_vm15, %v364_v25, %v596_v32  ;;  %v1073_v37 = vpack.c.bf16 %v670_v34, %v670_v34 }
 0x11a   :  { %891 = vst.msk [vmem:[%s1756_s3 + $0x10] sm:$0xf] %vm886_vm6, %v1047_v33  ;;  %v1048_v38 = vpack.c.bf16 %v645_v36, %v645_v36  ;;  %v368_v39 = vpop.f32.mrb[12].mxu0  ;;  %v671_v40 = vsel %vm573_vm0, %v468_v29, %v622_v35  ;;  %v472_v41 = vpop.f32.mrb[12].mxu1 }
 0x11b   :  { %917 = vst.msk [vmem:[%s1756_s3 + $0x78] sm:$0xf] %vm886_vm6, %v1073_v37  ;;  %v369_v42 = vadd.f32 %v1506_v31, %v368_v39  ;;  %v1074_v43 = vpack.c.bf16 %v671_v40, %v671_v40  ;;  %v1134_v44 = vpop.f32.mrb[13].mxu0  ;;  %v473_v45 = vadd.f32 %v1506_v31, %v472_v41  ;;  %v1186_v46 = vpop.f32.mrb[13].mxu1 }
 0x11c   :  { %892 = vst.msk [vmem:[%s1756_s3 + $0x14] sm:$0xf] %vm886_vm6, %v1048_v38  ;;  %v371_v47 = vpop.f32.mrb[14].mxu0  ;;  %v475_v48 = vpop.f32.mrb[14].mxu1 }
 0x11d   :  { %vm548_vm1 = vcmp.ge.f32.partialorder %v369_v42, 0.0  ;;  %v597_v49 = vmul.f32 0.2, %v369_v42  ;;  %918 = vst.msk [vmem:[%s1756_s3 + $0x7c] sm:$0xf] %vm886_vm6, %v1074_v43  ;;  %v372_v50 = vadd.f32 %v1506_v31, %v371_v47  ;;  %v1135_v51 = vpop.f32.mrb[15].mxu0  ;;  %v476_v54 = vadd.f32 %v1506_v31, %v475_v48 }
 0x11e   :  { %vm574_vm2 = vcmp.ge.f32.partialorder %v473_v45, 0.0  ;;  %v1187_v52 = vpop.f32.mrb[15].mxu1  ;;  %v623_v53 = vmul.f32 0.2, %v473_v45 }
 0x11f   :  { %v646_v55 = vsel %vm548_vm1, %v369_v42, %v597_v49  ;;  %vm549_vm3 = vcmp.ge.f32.partialorder %v372_v50, 0.0  ;;  %v598_v56 = vmul.f32 0.2, %v372_v50  ;;  %vm575_vm4 = vcmp.ge.f32.partialorder %v476_v54, 0.0 }
 0x120   :  { %v1049_v57 = vpack.c.bf16 %v646_v55, %v646_v55  ;;  %v672_v58 = vsel %vm574_vm2, %v473_v45, %v623_v53  ;;  %v624_v59 = vmul.f32 0.2, %v476_v54 }
 0x121   :  { %v647_v60 = vsel %vm549_vm3, %v372_v50, %v598_v56  ;;  %v1075_v61 = vpack.c.bf16 %v672_v58, %v672_v58 }
 0x122   :  { %893 = vst.msk [vmem:[%s1756_s3 + $0x18] sm:$0xf] %vm886_vm6, %v1049_v57  ;;  %v1050_v62 = vpack.c.bf16 %v647_v60, %v647_v60  ;;  %v376_v63 = vpop.f32.mrb[16].mxu0  ;;  %v673_v0 = vsel %vm575_vm4, %v476_v54, %v624_v59  ;;  %v480_v1 = vpop.f32.mrb[16].mxu1 }
 0x123   :  { %919 = vst.msk [vmem:[%s1756_s3 + $0x80] sm:$0xf] %vm886_vm6, %v1075_v61  ;;  %v377_v2 = vadd.f32 %v1506_v31, %v376_v63  ;;  %v1076_v3 = vpack.c.bf16 %v673_v0, %v673_v0  ;;  %v1138_v4 = vpop.f32.mrb[17].mxu0  ;;  %v481_v5 = vadd.f32 %v1506_v31, %v480_v1  ;;  %v1190_v6 = vpop.f32.mrb[17].mxu1 }
 0x124   :  { %894 = vst.msk [vmem:[%s1756_s3 + $0x1c] sm:$0xf] %vm886_vm6, %v1050_v62  ;;  %v379_v7 = vpop.f32.mrb[18].mxu0  ;;  %v483_v8 = vpop.f32.mrb[18].mxu1 }
 0x125   :  { %vm550_vm5 = vcmp.ge.f32.partialorder %v377_v2, 0.0  ;;  %v599_v9 = vmul.f32 0.2, %v377_v2  ;;  %920 = vst.msk [vmem:[%s1756_s3 + $0x84] sm:$0xf] %vm886_vm6, %v1076_v3  ;;  %v380_v10 = vadd.f32 %v1506_v31, %v379_v7  ;;  %v1139_v11 = vpop.f32.mrb[19].mxu0  ;;  %v484_v14 = vadd.f32 %v1506_v31, %v483_v8 }
 0x126   :  { %vm576_vm7 = vcmp.ge.f32.partialorder %v481_v5, 0.0  ;;  %v1191_v12 = vpop.f32.mrb[19].mxu1  ;;  %v625_v13 = vmul.f32 0.2, %v481_v5 }
 0x127   :  { %v648_v15 = vsel %vm550_vm5, %v377_v2, %v599_v9  ;;  %vm551_vm8 = vcmp.ge.f32.partialorder %v380_v10, 0.0  ;;  %v600_v16 = vmul.f32 0.2, %v380_v10  ;;  %vm577_vm9 = vcmp.ge.f32.partialorder %v484_v14, 0.0 }
 0x128   :  { %v1051_v17 = vpack.c.bf16 %v648_v15, %v648_v15  ;;  %v674_v18 = vsel %vm576_vm7, %v481_v5, %v625_v13  ;;  %v626_v19 = vmul.f32 0.2, %v484_v14 }
 0x129   :  { %v649_v20 = vsel %vm551_vm8, %v380_v10, %v600_v16  ;;  %v1077_v21 = vpack.c.bf16 %v674_v18, %v674_v18 }
 0x12a   :  { %895 = vst.msk [vmem:[%s1756_s3 + $0x20] sm:$0xf] %vm886_vm6, %v1051_v17  ;;  %v1052_v22 = vpack.c.bf16 %v649_v20, %v649_v20  ;;  %v384_v23 = vpop.f32.mrb[20].mxu0  ;;  %v675_v24 = vsel %vm577_vm9, %v484_v14, %v626_v19  ;;  %v488_v25 = vpop.f32.mrb[20].mxu1 }
 0x12b   :  { %921 = vst.msk [vmem:[%s1756_s3 + $0x88] sm:$0xf] %vm886_vm6, %v1077_v21  ;;  %v385_v26 = vadd.f32 %v1506_v31, %v384_v23  ;;  %v1078_v27 = vpack.c.bf16 %v675_v24, %v675_v24  ;;  %v1142_v28 = vpop.f32.mrb[21].mxu0  ;;  %v489_v29 = vadd.f32 %v1506_v31, %v488_v25  ;;  %v1194_v30 = vpop.f32.mrb[21].mxu1 }
 0x12c   :  { %896 = vst.msk [vmem:[%s1756_s3 + $0x24] sm:$0xf] %vm886_vm6, %v1052_v22  ;;  %v387_v32 = vpop.f32.mrb[22].mxu0  ;;  %v491_v33 = vpop.f32.mrb[22].mxu1 }
 0x12d   :  { %vm552_vm10 = vcmp.ge.f32.partialorder %v385_v26, 0.0  ;;  %v601_v34 = vmul.f32 0.2, %v385_v26  ;;  %922 = vst.msk [vmem:[%s1756_s3 + $0x8c] sm:$0xf] %vm886_vm6, %v1078_v27  ;;  %v388_v35 = vadd.f32 %v1506_v31, %v387_v32  ;;  %v1143_v36 = vpop.f32.mrb[23].mxu0  ;;  %v492_v39 = vadd.f32 %v1506_v31, %v491_v33 }
 0x12e   :  { %vm578_vm11 = vcmp.ge.f32.partialorder %v489_v29, 0.0  ;;  %v1195_v37 = vpop.f32.mrb[23].mxu1  ;;  %v627_v38 = vmul.f32 0.2, %v489_v29 }
 0x12f   :  { %v650_v40 = vsel %vm552_vm10, %v385_v26, %v601_v34  ;;  %vm553_vm12 = vcmp.ge.f32.partialorder %v388_v35, 0.0  ;;  %v602_v41 = vmul.f32 0.2, %v388_v35  ;;  %vm579_vm13 = vcmp.ge.f32.partialorder %v492_v39, 0.0 }
 0x130   :  { %v1053_v42 = vpack.c.bf16 %v650_v40, %v650_v40  ;;  %v676_v43 = vsel %vm578_vm11, %v489_v29, %v627_v38  ;;  %v628_v44 = vmul.f32 0.2, %v492_v39 }
 0x131   :  { %v651_v45 = vsel %vm553_vm12, %v388_v35, %v602_v41  ;;  %v1079_v46 = vpack.c.bf16 %v676_v43, %v676_v43 }
 0x132   :  { %897 = vst.msk [vmem:[%s1756_s3 + $0x28] sm:$0xf] %vm886_vm6, %v1053_v42  ;;  %v1054_v47 = vpack.c.bf16 %v651_v45, %v651_v45  ;;  %v392_v48 = vpop.f32.mrb[24].mxu0  ;;  %v677_v49 = vsel %vm579_vm13, %v492_v39, %v628_v44  ;;  %v496_v50 = vpop.f32.mrb[24].mxu1 }
 0x133   :  { %923 = vst.msk [vmem:[%s1756_s3 + $0x90] sm:$0xf] %vm886_vm6, %v1079_v46  ;;  %v393_v51 = vadd.f32 %v1506_v31, %v392_v48  ;;  %v1080_v52 = vpack.c.bf16 %v677_v49, %v677_v49  ;;  %v1146_v53 = vpop.f32.mrb[25].mxu0  ;;  %v497_v54 = vadd.f32 %v1506_v31, %v496_v50  ;;  %v1198_v55 = vpop.f32.mrb[25].mxu1 }
 0x134   :  { %898 = vst.msk [vmem:[%s1756_s3 + $0x2c] sm:$0xf] %vm886_vm6, %v1054_v47  ;;  %v395_v56 = vpop.f32.mrb[26].mxu0  ;;  %v499_v57 = vpop.f32.mrb[26].mxu1 }
 0x135   :  { %vm554_vm14 = vcmp.ge.f32.partialorder %v393_v51, 0.0  ;;  %v603_v58 = vmul.f32 0.2, %v393_v51  ;;  %924 = vst.msk [vmem:[%s1756_s3 + $0x94] sm:$0xf] %vm886_vm6, %v1080_v52  ;;  %v396_v59 = vadd.f32 %v1506_v31, %v395_v56  ;;  %v1147_v60 = vpop.f32.mrb[27].mxu0  ;;  %v500_v63 = vadd.f32 %v1506_v31, %v499_v57 }
 0x136   :  { %vm580_vm15 = vcmp.ge.f32.partialorder %v497_v54, 0.0  ;;  %v1199_v61 = vpop.f32.mrb[27].mxu1  ;;  %v629_v62 = vmul.f32 0.2, %v497_v54 }
 0x137   :  { %v652_v0 = vsel %vm554_vm14, %v393_v51, %v603_v58  ;;  %vm555_vm0 = vcmp.ge.f32.partialorder %v396_v59, 0.0  ;;  %v604_v1 = vmul.f32 0.2, %v396_v59  ;;  %vm581_vm1 = vcmp.ge.f32.partialorder %v500_v63, 0.0 }
 0x138   :  { %v1055_v2 = vpack.c.bf16 %v652_v0, %v652_v0  ;;  %v678_v3 = vsel %vm580_vm15, %v497_v54, %v629_v62  ;;  %v630_v4 = vmul.f32 0.2, %v500_v63 }
 0x139   :  { %v653_v5 = vsel %vm555_vm0, %v396_v59, %v604_v1  ;;  %v1081_v6 = vpack.c.bf16 %v678_v3, %v678_v3 }
 0x13a   :  { %899 = vst.msk [vmem:[%s1756_s3 + $0x30] sm:$0xf] %vm886_vm6, %v1055_v2  ;;  %v1056_v7 = vpack.c.bf16 %v653_v5, %v653_v5  ;;  %v400_v8 = vpop.f32.mrb[28].mxu0  ;;  %v679_v9 = vsel %vm581_vm1, %v500_v63, %v630_v4  ;;  %v504_v10 = vpop.f32.mrb[28].mxu1 }
 0x13b   :  { %925 = vst.msk [vmem:[%s1756_s3 + $0x98] sm:$0xf] %vm886_vm6, %v1081_v6  ;;  %v401_v11 = vadd.f32 %v1506_v31, %v400_v8  ;;  %v1082_v12 = vpack.c.bf16 %v679_v9, %v679_v9  ;;  %v1150_v13 = vpop.f32.mrb[29].mxu0  ;;  %v505_v14 = vadd.f32 %v1506_v31, %v504_v10  ;;  %v1202_v15 = vpop.f32.mrb[29].mxu1 }
 0x13c   :  { %900 = vst.msk [vmem:[%s1756_s3 + $0x34] sm:$0xf] %vm886_vm6, %v1056_v7  ;;  %v403_v16 = vpop.f32.mrb[30].mxu0  ;;  %v507_v17 = vpop.f32.mrb[30].mxu1 }
 0x13d   :  { %vm556_vm2 = vcmp.ge.f32.partialorder %v401_v11, 0.0  ;;  %v605_v18 = vmul.f32 0.2, %v401_v11  ;;  %926 = vst.msk [vmem:[%s1756_s3 + $0x9c] sm:$0xf] %vm886_vm6, %v1082_v12  ;;  %v404_v19 = vadd.f32 %v1506_v31, %v403_v16  ;;  %v1151_v20 = vpop.f32.mrb[31].mxu0  ;;  %v508_v23 = vadd.f32 %v1506_v31, %v507_v17 }
 0x13e   :  { %vm582_vm3 = vcmp.ge.f32.partialorder %v505_v14, 0.0  ;;  %v1203_v21 = vpop.f32.mrb[31].mxu1  ;;  %v631_v22 = vmul.f32 0.2, %v505_v14 }
 0x13f   :  { %v654_v24 = vsel %vm556_vm2, %v401_v11, %v605_v18  ;;  %vm557_vm4 = vcmp.ge.f32.partialorder %v404_v19, 0.0  ;;  %v606_v25 = vmul.f32 0.2, %v404_v19  ;;  %vm583_vm5 = vcmp.ge.f32.partialorder %v508_v23, 0.0 }
 0x140   :  { %v1057_v26 = vpack.c.bf16 %v654_v24, %v654_v24  ;;  %v680_v27 = vsel %vm582_vm3, %v505_v14, %v631_v22  ;;  %v632_v28 = vmul.f32 0.2, %v508_v23 }
 0x141   :  { %v655_v29 = vsel %vm557_vm4, %v404_v19, %v606_v25  ;;  %v1083_v30 = vpack.c.bf16 %v680_v27, %v680_v27 }
 0x142   :  { %901 = vst.msk [vmem:[%s1756_s3 + $0x38] sm:$0xf] %vm886_vm6, %v1057_v26  ;;  %v1058_v32 = vpack.c.bf16 %v655_v29, %v655_v29  ;;  %v408_v33 = vpop.f32.mrb[32].mxu0  ;;  %v681_v34 = vsel %vm583_vm5, %v508_v23, %v632_v28  ;;  %v512_v35 = vpop.f32.mrb[32].mxu1 }
 0x143   :  { %927 = vst.msk [vmem:[%s1756_s3 + $0xa0] sm:$0xf] %vm886_vm6, %v1083_v30  ;;  %v409_v36 = vadd.f32 %v1506_v31, %v408_v33  ;;  %v1084_v37 = vpack.c.bf16 %v681_v34, %v681_v34  ;;  %v1154_v38 = vpop.f32.mrb[33].mxu0  ;;  %v513_v39 = vadd.f32 %v1506_v31, %v512_v35  ;;  %v1206_v40 = vpop.f32.mrb[33].mxu1 }
 0x144   :  { %902 = vst.msk [vmem:[%s1756_s3 + $0x3c] sm:$0xf] %vm886_vm6, %v1058_v32  ;;  %v411_v41 = vpop.f32.mrb[34].mxu0  ;;  %v515_v42 = vpop.f32.mrb[34].mxu1 }
 0x145   :  { %vm558_vm7 = vcmp.ge.f32.partialorder %v409_v36, 0.0  ;;  %v607_v43 = vmul.f32 0.2, %v409_v36  ;;  %928 = vst.msk [vmem:[%s1756_s3 + $0xa4] sm:$0xf] %vm886_vm6, %v1084_v37  ;;  %v412_v44 = vadd.f32 %v1506_v31, %v411_v41  ;;  %v1155_v45 = vpop.f32.mrb[35].mxu0  ;;  %v516_v48 = vadd.f32 %v1506_v31, %v515_v42 }
 0x146   :  { %vm584_vm8 = vcmp.ge.f32.partialorder %v513_v39, 0.0  ;;  %v1207_v46 = vpop.f32.mrb[35].mxu1  ;;  %v633_v47 = vmul.f32 0.2, %v513_v39 }
 0x147   :  { %v656_v49 = vsel %vm558_vm7, %v409_v36, %v607_v43  ;;  %vm559_vm9 = vcmp.ge.f32.partialorder %v412_v44, 0.0  ;;  %v608_v50 = vmul.f32 0.2, %v412_v44  ;;  %vm585_vm10 = vcmp.ge.f32.partialorder %v516_v48, 0.0 }
 0x148   :  { %v1059_v51 = vpack.c.bf16 %v656_v49, %v656_v49  ;;  %v682_v52 = vsel %vm584_vm8, %v513_v39, %v633_v47  ;;  %v634_v53 = vmul.f32 0.2, %v516_v48 }
 0x149   :  { %v657_v54 = vsel %vm559_vm9, %v412_v44, %v608_v50  ;;  %v1085_v55 = vpack.c.bf16 %v682_v52, %v682_v52 }
 0x14a   :  { %903 = vst.msk [vmem:[%s1756_s3 + $0x40] sm:$0xf] %vm886_vm6, %v1059_v51  ;;  %v1060_v56 = vpack.c.bf16 %v657_v54, %v657_v54  ;;  %v416_v57 = vpop.f32.mrb[36].mxu0  ;;  %v683_v58 = vsel %vm585_vm10, %v516_v48, %v634_v53  ;;  %v520_v59 = vpop.f32.mrb[36].mxu1 }
 0x14b   :  { %929 = vst.msk [vmem:[%s1756_s3 + $0xa8] sm:$0xf] %vm886_vm6, %v1085_v55  ;;  %v417_v60 = vadd.f32 %v1506_v31, %v416_v57  ;;  %v1086_v61 = vpack.c.bf16 %v683_v58, %v683_v58  ;;  %v1158_v62 = vpop.f32.mrb[37].mxu0  ;;  %v521_v63 = vadd.f32 %v1506_v31, %v520_v59  ;;  %v1210_v0 = vpop.f32.mrb[37].mxu1 }
 0x14c   :  { %904 = vst.msk [vmem:[%s1756_s3 + $0x44] sm:$0xf] %vm886_vm6, %v1060_v56  ;;  %v419_v1 = vpop.f32.mrb[38].mxu0  ;;  %v523_v2 = vpop.f32.mrb[38].mxu1 }
 0x14d   :  { %vm560_vm11 = vcmp.ge.f32.partialorder %v417_v60, 0.0  ;;  %v609_v3 = vmul.f32 0.2, %v417_v60  ;;  %930 = vst.msk [vmem:[%s1756_s3 + $0xac] sm:$0xf] %vm886_vm6, %v1086_v61  ;;  %v420_v4 = vadd.f32 %v1506_v31, %v419_v1  ;;  %v1159_v5 = vpop.f32.mrb[39].mxu0  ;;  %v524_v8 = vadd.f32 %v1506_v31, %v523_v2 }
 0x14e   :  { %vm586_vm12 = vcmp.ge.f32.partialorder %v521_v63, 0.0  ;;  %v1211_v6 = vpop.f32.mrb[39].mxu1  ;;  %v635_v7 = vmul.f32 0.2, %v521_v63 }
 0x14f   :  { %v658_v9 = vsel %vm560_vm11, %v417_v60, %v609_v3  ;;  %vm561_vm13 = vcmp.ge.f32.partialorder %v420_v4, 0.0  ;;  %v610_v10 = vmul.f32 0.2, %v420_v4  ;;  %vm587_vm14 = vcmp.ge.f32.partialorder %v524_v8, 0.0 }
 0x150   :  { %v1061_v11 = vpack.c.bf16 %v658_v9, %v658_v9  ;;  %v684_v12 = vsel %vm586_vm12, %v521_v63, %v635_v7  ;;  %v636_v13 = vmul.f32 0.2, %v524_v8 }
 0x151   :  { %v659_v14 = vsel %vm561_vm13, %v420_v4, %v610_v10  ;;  %v1087_v15 = vpack.c.bf16 %v684_v12, %v684_v12 }
 0x152   :  { %905 = vst.msk [vmem:[%s1756_s3 + $0x48] sm:$0xf] %vm886_vm6, %v1061_v11  ;;  %v1062_v16 = vpack.c.bf16 %v659_v14, %v659_v14  ;;  %v424_v17 = vpop.f32.mrb[40].mxu0  ;;  %v685_v18 = vsel %vm587_vm14, %v524_v8, %v636_v13  ;;  %v528_v19 = vpop.f32.mrb[40].mxu1 }
 0x153   :  { %931 = vst.msk [vmem:[%s1756_s3 + $0xb0] sm:$0xf] %vm886_vm6, %v1087_v15  ;;  %v425_v20 = vadd.f32 %v1506_v31, %v424_v17  ;;  %v1088_v21 = vpack.c.bf16 %v685_v18, %v685_v18  ;;  %v1162_v22 = vpop.f32.mrb[41].mxu0  ;;  %v529_v23 = vadd.f32 %v1506_v31, %v528_v19  ;;  %v1214_v24 = vpop.f32.mrb[41].mxu1 }
 0x154   :  { %906 = vst.msk [vmem:[%s1756_s3 + $0x4c] sm:$0xf] %vm886_vm6, %v1062_v16  ;;  %v427_v25 = vpop.f32.mrb[42].mxu0  ;;  %v531_v26 = vpop.f32.mrb[42].mxu1 }
 0x155   :  { %vm562_vm15 = vcmp.ge.f32.partialorder %v425_v20, 0.0  ;;  %v611_v27 = vmul.f32 0.2, %v425_v20  ;;  %932 = vst.msk [vmem:[%s1756_s3 + $0xb4] sm:$0xf] %vm886_vm6, %v1088_v21  ;;  %v428_v28 = vadd.f32 %v1506_v31, %v427_v25  ;;  %v1163_v29 = vpop.f32.mrb[43].mxu0  ;;  %v532_v33 = vadd.f32 %v1506_v31, %v531_v26 }
 0x156   :  { %vm588_vm0 = vcmp.ge.f32.partialorder %v529_v23, 0.0  ;;  %v1215_v30 = vpop.f32.mrb[43].mxu1  ;;  %v637_v32 = vmul.f32 0.2, %v529_v23 }
 0x157   :  { %v660_v34 = vsel %vm562_vm15, %v425_v20, %v611_v27  ;;  %vm563_vm1 = vcmp.ge.f32.partialorder %v428_v28, 0.0  ;;  %v612_v35 = vmul.f32 0.2, %v428_v28  ;;  %vm589_vm2 = vcmp.ge.f32.partialorder %v532_v33, 0.0 }
 0x158   :  { %v1063_v36 = vpack.c.bf16 %v660_v34, %v660_v34  ;;  %v686_v37 = vsel %vm588_vm0, %v529_v23, %v637_v32  ;;  %v638_v38 = vmul.f32 0.2, %v532_v33 }
 0x159   :  { %v661_v39 = vsel %vm563_vm1, %v428_v28, %v612_v35  ;;  %v1089_v40 = vpack.c.bf16 %v686_v37, %v686_v37 }
 0x15a   :  { %907 = vst.msk [vmem:[%s1756_s3 + $0x50] sm:$0xf] %vm886_vm6, %v1063_v36  ;;  %v1064_v41 = vpack.c.bf16 %v661_v39, %v661_v39  ;;  %v432_v42 = vpop.f32.mrb[44].mxu0  ;;  %v687_v43 = vsel %vm589_vm2, %v532_v33, %v638_v38  ;;  %v536_v44 = vpop.f32.mrb[44].mxu1 }
 0x15b   :  { %933 = vst.msk [vmem:[%s1756_s3 + $0xb8] sm:$0xf] %vm886_vm6, %v1089_v40  ;;  %v433_v45 = vadd.f32 %v1506_v31, %v432_v42  ;;  %v1090_v46 = vpack.c.bf16 %v687_v43, %v687_v43  ;;  %v1166_v47 = vpop.f32.mrb[45].mxu0  ;;  %v537_v48 = vadd.f32 %v1506_v31, %v536_v44  ;;  %v1218_v49 = vpop.f32.mrb[45].mxu1 }
 0x15c   :  { %908 = vst.msk [vmem:[%s1756_s3 + $0x54] sm:$0xf] %vm886_vm6, %v1064_v41  ;;  %v435_v50 = vpop.f32.mrb[46].mxu0  ;;  %v539_v51 = vpop.f32.mrb[46].mxu1 }
 0x15d   :  { %vm564_vm3 = vcmp.ge.f32.partialorder %v433_v45, 0.0  ;;  %v613_v52 = vmul.f32 0.2, %v433_v45  ;;  %934 = vst.msk [vmem:[%s1756_s3 + $0xbc] sm:$0xf] %vm886_vm6, %v1090_v46  ;;  %v436_v53 = vadd.f32 %v1506_v31, %v435_v50  ;;  %v1167_v54 = vpop.f32.mrb[47].mxu0 }
 0x15e   :  { %vm590_vm4 = vcmp.ge.f32.partialorder %v537_v48, 0.0  ;;  %v1219_v55 = vpop.f32.mrb[47].mxu1  ;;  %v639_v56 = vmul.f32 0.2, %v537_v48 }
 0x15f   :  { %v662_v57 = vsel %vm564_vm3, %v433_v45, %v613_v52  ;;  %vm565_vm5 = vcmp.ge.f32.partialorder %v436_v53, 0.0  ;;  %v614_v58 = vmul.f32 0.2, %v436_v53 }
 0x160   :  { %v1065_v59 = vpack.c.bf16 %v662_v57, %v662_v57  ;;  %v688_v60 = vsel %vm590_vm4, %v537_v48, %v639_v56 }
 0x161   :  { %v663_v61 = vsel %vm565_vm5, %v436_v53, %v614_v58  ;;  %v1091_v62 = vpack.c.bf16 %v688_v60, %v688_v60 }
 0x162   :  { %909 = vst.msk [vmem:[%s1756_s3 + $0x58] sm:$0xf] %vm886_vm6, %v1065_v59  ;;  %v1066_v63 = vpack.c.bf16 %v663_v61, %v663_v61  ;;  %v440_v0 = vpop.f32.mrb[48].mxu0 }
 0x163   :  { %935 = vst.msk [vmem:[%s1756_s3 + $0xc0] sm:$0xf] %vm886_vm6, %v1091_v62  ;;  %v441_v1 = vadd.f32 %v1506_v31, %v440_v0  ;;  %v1170_v2 = vpop.f32.mrb[49].mxu0 }
 0x164   :  { %910 = vst.msk [vmem:[%s1756_s3 + $0x5c] sm:$0xf] %vm886_vm6, %v1066_v63  ;;  %v443_v3 = vpop.f32.mrb[50].mxu0 }
 0x165   :  { %vm566_vm7 = vcmp.ge.f32.partialorder %v441_v1, 0.0  ;;  %v615_v4 = vmul.f32 0.2, %v441_v1  ;;  %v444_v5 = vadd.f32 %v1506_v31, %v443_v3  ;;  %v1171_v6 = vpop.f32.mrb[51].mxu0 }
 0x167   :  { %v664_v7 = vsel %vm566_vm7, %v441_v1, %v615_v4  ;;  %vm567_vm8 = vcmp.ge.f32.partialorder %v444_v5, 0.0  ;;  %v616_v8 = vmul.f32 0.2, %v444_v5 }
 0x168   :  { %v1067_v9 = vpack.c.bf16 %v664_v7, %v664_v7 }
 0x169   :  { %v665_v10 = vsel %vm567_vm8, %v444_v5, %v616_v8 }
 0x16a   :  { %911 = vst.msk [vmem:[%s1756_s3 + $0x60] sm:$0xf] %vm886_vm6, %v1067_v9  ;;  %v1068_v11 = vpack.c.bf16 %v665_v10, %v665_v10 }
 0x16c   :  { %912 = vst.msk [vmem:[%s1756_s3 + $0x64] sm:$0xf] %vm886_vm6, %v1068_v11 }
 0x16d   :  { %940 = vsyncpa [#allocation3], 1 }
 0x16e   :  { %941 = vsyncpa [#allocation5], 1 }

// kernel: discriminator_forward.5
= control target key start
LH: loop header
LB: loop body
LE: loop exit
PB: predicated region body
PF: predicated region fallthrough
CT: control target
= control target key end

     0   :  { %v1307_v34 = vmov 0.0   ;;  %vm1308_vm0 = vmmov 0   ;;  %vm516_vm1 = vcmask 523264   ;;  %s1628_s1 = inlined_call_operand.vmem [shape: bf16[576,128], index: 1, kind: input, shape index: {}]   ;;  %s1629_s0 = inlined_call_operand.vmem [shape: bf16[98,576], index: 0, kind: input, shape index: {}]   ;;  %s1630_s2 = inlined_call_operand.vmem [shape: f32[1,128], index: 2, kind: input, shape index: {}]   ;;  %s1631_s3 = inlined_call_operand.vmem [shape: bf16[98,128], index: 3, kind: output, shape index: {}]  }
   0x1   :  { %v1224_v0 = vld [vmem:[%s1628_s1 + $0x40] sm:$0xff]   ;;  %v1228_v4 = vld [vmem:[%s1628_s1 + $0x48] sm:$0xff]   ;;  %v1232_v8 = vld [vmem:[%s1628_s1 + $0x50] sm:$0xff]  }
   0x2   :  { %v1225_v1 = vld [vmem:[%s1628_s1 + $0xc0] sm:$0xff]   ;;  %1051 = vmatprep.subr.bf16.mxu0 %v1224_v0  ;;  %v1229_v5 = vld [vmem:[%s1628_s1 + $0xc8] sm:$0xff]   ;;  %v1233_v9 = vld [vmem:[%s1628_s1 + $0xd0] sm:$0xff]  }
   0x3   :  { %v1226_v2 = vld [vmem:[%s1628_s1] sm:$0xff]   ;;  %1109 = vmatprep.subr.bf16.mxu1 %v1225_v1  ;;  %v1230_v6 = vld [vmem:[%s1628_s1 + $0x8] sm:$0xff]   ;;  %v1234_v10 = vld [vmem:[%s1628_s1 + $0x10] sm:$0xff]  }
   0x4   :  { %v1227_v3 = vld [vmem:[%s1628_s1 + $0x80] sm:$0xff]   ;;  %1052 = vmatpush3.bf16.msra.mxu0 %v1226_v2  ;;  %v1231_v7 = vld [vmem:[%s1628_s1 + $0x88] sm:$0xff]   ;;  %v1235_v11 = vld [vmem:[%s1628_s1 + $0x90] sm:$0xff]  }
   0x5   :  { %1110 = vmatpush3.bf16.msra.mxu1 %v1227_v3  ;;  %1053 = vmatprep.subr.bf16.mxu0 %v1228_v4  ;;  %v1236_v12 = vld [vmem:[%s1628_s1 + $0x58] sm:$0xff]   ;;  %v1240_v16 = vld [vmem:[%s1628_s1 + $0x60] sm:$0xff]   ;;  %v1244_v20 = vld [vmem:[%s1628_s1 + $0x68] sm:$0xff]  }
   0x6   :  { %1111 = vmatprep.subr.bf16.mxu1 %v1229_v5  ;;  %v1237_v13 = vld [vmem:[%s1628_s1 + $0xd8] sm:$0xff]   ;;  %v1241_v17 = vld [vmem:[%s1628_s1 + $0xe0] sm:$0xff]   ;;  %v1245_v21 = vld [vmem:[%s1628_s1 + $0xe8] sm:$0xff]  }
   0x7   :  { %v1238_v14 = vld [vmem:[%s1628_s1 + $0x18] sm:$0xff]   ;;  %v1242_v18 = vld [vmem:[%s1628_s1 + $0x20] sm:$0xff]   ;;  %v1246_v22 = vld [vmem:[%s1628_s1 + $0x28] sm:$0xff]  }
   0x8   :  { %1054 = vmatpush3.bf16.msra.mxu0 %v1230_v6  ;;  %v1239_v15 = vld [vmem:[%s1628_s1 + $0x98] sm:$0xff]   ;;  %v1243_v19 = vld [vmem:[%s1628_s1 + $0xa0] sm:$0xff]   ;;  %v1247_v23 = vld [vmem:[%s1628_s1 + $0xa8] sm:$0xff]  }
   0x9   :  { %1112 = vmatpush3.bf16.msra.mxu1 %v1231_v7  ;;  %1055 = vmatprep.subr.bf16.mxu0 %v1232_v8  ;;  %v1248_v24 = vld [vmem:[%s1628_s1 + $0x70] sm:$0xff]   ;;  %v1252_v28 = vld [vmem:[%s1628_s1 + $0x78] sm:$0xff]   ;;  %v1261_v36 = vld [vmem:[%s1629_s0 + $0xc] ss:$20 sps:$4 sm:$0xff]  }
   0xa   :  { %1113 = vmatprep.subr.bf16.mxu1 %v1233_v9  ;;  %v1249_v25 = vld [vmem:[%s1628_s1 + $0xf0] sm:$0xff]   ;;  %v1253_v29 = vld [vmem:[%s1628_s1 + $0xf8] sm:$0xff]   ;;  %v1262_v37 = vld [vmem:[%s1628_s1 + $0x100] sm:$0xff]   ;;  %658 = vmatprep.mubr.bf16.mxu1 %v1261_v36 }
   0xb   :  { %v1250_v26 = vld [vmem:[%s1628_s1 + $0x30] sm:$0xff]   ;;  %v1254_v30 = vld [vmem:[%s1628_s1 + $0x38] sm:$0xff]   ;;  %v1263_v38 = vld [vmem:[%s1629_s0 + $0x2c] ss:$20 sps:$4 sm:$0xff]  }
   0xc   :  { %1056 = vmatpush3.bf16.msra.mxu0 %v1234_v10  ;;  %v1251_v27 = vld [vmem:[%s1628_s1 + $0xb0] sm:$0xff]   ;;  %v1255_v31 = vld [vmem:[%s1628_s1 + $0xb8] sm:$0xff]   ;;  %v1273_v43 = vld [vmem:[%s1628_s1 + $0x108] sm:$0xff]  }
   0xd   :  { %1114 = vmatpush3.bf16.msra.mxu1 %v1235_v11  ;;  %1057 = vmatprep.subr.bf16.mxu0 %v1236_v12  ;;  %v1256_v32 = vld [vmem:[%s1629_s0] ss:$20 sps:$4 sm:$0xff]   ;;  %v1258_v33 = vld [vmem:[%s1629_s0 + $0x4] ss:$20 sps:$4 sm:$0xff]   ;;  %v1259_v35 = vld [vmem:[%s1629_s0 + $0x8] ss:$20 sps:$4 sm:$0xff]  }
   0xe   :  { %1115 = vmatprep.subr.bf16.mxu1 %v1237_v13  ;;  %570 = vmatprep.mubr.bf16.mxu0 %v1258_v33  ;;  %v1265_v39 = vld [vmem:[%s1629_s0 + $0x34] ss:$20 sps:$4 sm:$0xff]   ;;  %v1268_v41 = vld [vmem:[%s1629_s0 + $0x30] ss:$20 sps:$4 sm:$0xff]   ;;  %v1275_v47 = vld [vmem:[%s1629_s0 + $0x58] ss:$20 sps:$4 sm:$0xff]  }
   0xf   :  { %v1267_v40 = vld [vmem:[%s1629_s0 + $0x28] ss:$20 sps:$4 sm:$0xff]   ;;  %v1282_v45 = vld [vmem:[%s1628_s1 + $0x110] sm:$0xff]   ;;  %v1278_v49 = vld [vmem:[%s1629_s0 + $0x84] ss:$20 sps:$4 sm:$0xff]  }
  0x10   :  { %1058 = vmatpush3.bf16.msra.mxu0 %v1238_v14  ;;  %v1269_v42 = vld [vmem:[%s1629_s0 + $0x54] ss:$20 sps:$4 sm:$0xff]   ;;  %v1271_v44 = vld [vmem:[%s1629_s0 + $0x5c] ss:$20 sps:$4 sm:$0xff]   ;;  %v1280_v51 = vld [vmem:[%s1629_s0 + $0x78] ss:$20 sps:$4 sm:$0xff]  }
  0x11   :  { %1116 = vmatpush3.bf16.msra.mxu1 %v1239_v15  ;;  %1059 = vmatprep.subr.bf16.mxu0 %v1240_v16  ;;  %v1274_v46 = vld [vmem:[%s1629_s0 + $0x50] ss:$20 sps:$4 sm:$0xff]   ;;  %v1295_v50 = vld [vmem:[%s1628_s1 + $0x118] sm:$0xff]   ;;  %v1281_v52 = vld [vmem:[%s1629_s0 + $0x80] ss:$20 sps:$4 sm:$0xff]  }
  0x12   :  { %1117 = vmatprep.subr.bf16.mxu1 %v1241_v17  ;;  %v1276_v48 = vld [vmem:[%s1629_s0 + $0x7c] ss:$20 sps:$4 sm:$0xff]   ;;  %v1283_v53 = vld [vmem:[%s1629_s0 + $0xa4] ss:$20 sps:$4 sm:$0xff]   ;;  %v1285_v54 = vld [vmem:[%s1629_s0 + $0xac] ss:$20 sps:$4 sm:$0xff]  }
  0x13   :  { %v1287_v55 = vld [vmem:[%s1629_s0 + $0xa0] ss:$20 sps:$4 sm:$0xff]   ;;  %v1288_v56 = vld [vmem:[%s1629_s0 + $0xa8] ss:$20 sps:$4 sm:$0xff]   ;;  %v1294_v62 = vld [vmem:[%s1629_s0 + $0xd0] ss:$20 sps:$4 sm:$0xff]  }
  0x14   :  { %1060 = vmatpush3.bf16.msra.mxu0 %v1242_v18  ;;  %v1289_v57 = vld [vmem:[%s1629_s0 + $0xcc] ss:$20 sps:$4 sm:$0xff]   ;;  %v1291_v58 = vld [vmem:[%s1629_s0 + $0xd4] ss:$20 sps:$4 sm:$0xff]   ;;  %v52_v60 = vld [vmem:[%s1629_s0 + $0xf8] sm:$0x11] }
  0x15   :  { %1118 = vmatpush3.bf16.msra.mxu1 %v1243_v19  ;;  %1061 = vmatprep.subr.bf16.mxu0 %v1244_v20  ;;  %v51_v59 = vld [vmem:[%s1629_s0 + $0xf0] sm:$0x11]  ;;  %v1293_v61 = vld [vmem:[%s1629_s0 + $0xc8] ss:$20 sps:$4 sm:$0xff]   ;;  %v945_v0 = vcombine.high %v52_v60, %v52_v60  ;;  %v944_v2 = vcombine.low %v52_v60, %v52_v60  ;;  %v1302_v5 = vld [vmem:[%s1629_s0 + $0x38] ss:$20 sps:$4 sm:$0xff]  }
  0x16   :  { %1119 = vmatprep.subr.bf16.mxu1 %v1245_v21  ;;  %v943_v63 = vcombine.high %v51_v59, %v51_v59  ;;  %v942_v1 = vcombine.low %v51_v59, %v51_v59  ;;  %v1300_v3 = vld [vmem:[%s1629_s0 + $0x10] ss:$20 sps:$4 sm:$0xff]   ;;  %v1303_v6 = vld [vmem:[%s1629_s0 + $0xd8] ss:$20 sps:$4 sm:$0xff]   ;;  %v1304_v7 = vld [vmem:[%s1629_s0 + $0x60] ss:$20 sps:$4 sm:$0xff]  }
  0x17   :  { %v1301_v4 = vld [vmem:[%s1629_s0 + $0xb0] ss:$20 sps:$4 sm:$0xff]   ;;  %v1305_v8 = vld [vmem:[%s1629_s0 + $0x100] ss:$0 sps:$4 sm:$0x11]  }
  0x18   :  { %1062 = vmatpush3.bf16.msra.mxu0 %v1246_v22  ;;  %v1306_v9 = vld [vmem:[%s1629_s0 + $0x88] ss:$20 sps:$4 sm:$0xff]   ;;  %v1568_v11 = vld [vmem:[%s1630_s2] ss:$0 sm:$0xff] }
  0x19   :  { %1120 = vmatpush3.bf16.msra.mxu1 %v1247_v23  ;;  %1063 = vmatprep.subr.bf16.mxu0 %v1248_v24 }
  0x1a   :  { %1121 = vmatprep.subr.bf16.mxu1 %v1249_v25 }
  0x1c   :  { %1064 = vmatpush3.bf16.msra.mxu0 %v1250_v26 }
  0x1d   :  { %1122 = vmatpush3.bf16.msra.mxu1 %v1251_v27  ;;  %1065 = vmatprep.subr.bf16.mxu0 %v1252_v28 }
  0x1e   :  { %1123 = vmatprep.subr.bf16.mxu1 %v1253_v29 }
  0x20   :  { %1066 = vmatpush3.bf16.msra.mxu0 %v1254_v30 }
  0x21   :  { %1124 = vmatpush3.bf16.msra.mxu1 %v1255_v31  ;;  %1178 = vmatprep.subr.bf16.mxu0 %v1307_v34 }
  0x22   :  { %1214 = vmatprep.subr.bf16.mxu1 %v1307_v34 }
  0x23   :  { %571 = vmatmul.mubr.bf16.vlgmr.msra.gmra.mrb[0].mxu0 %v1256_v32 }
  0x24   :  { %659 = vmatmul.mubr.bf16.vlgmr.msra.gmra.mrb[0].mxu1 %v1259_v35  ;;  %1179 = vmatpush3.bf16.msra.mxu0 %v1262_v37 }
  0x25   :  { %578 = vmatprep.mubr.bf16.mxu0 %v1263_v38  ;;  %1218 = vmatpush3.bf16.msra.mxu1 %v1262_v37 }
  0x26   :  { %666 = vmatprep.mubr.bf16.mxu1 %v1265_v39  ;;  %1180 = vmatprep.subr.bf16.mxu0 %v1307_v34 }
  0x27   :  { %1215 = vmatprep.subr.bf16.mxu1 %v1307_v34 }
  0x28   :  { %1181 = vmatpush3.bf16.msra.mxu0 %v1273_v43 }
  0x29   :  { %1219 = vmatpush3.bf16.msra.mxu1 %v1273_v43  ;;  %1182 = vmatprep.subr.bf16.mxu0 %v1307_v34 }
  0x2a   :  { %1216 = vmatprep.subr.bf16.mxu1 %v1307_v34 }
  0x2b   :  { %579 = vmatmul.mubr.bf16.gmra.mrb[4].mxu0 %v1267_v40 }
  0x2c   :  { %667 = vmatmul.mubr.bf16.gmra.mrb[4].mxu1 %v1268_v41  ;;  %586 = vmatprep.mubr.bf16.mxu0 %v1269_v42 }
  0x2d   :  { %674 = vmatprep.mubr.bf16.mxu1 %v1271_v44  ;;  %1183 = vmatpush3.bf16.msra.mxu0 %v1282_v45 }
  0x2e   :  { %1220 = vmatpush3.bf16.msra.mxu1 %v1282_v45  ;;  %1184 = vmatprep.subr.bf16.mxu0 %v1307_v34 }
  0x2f   :  { %1217 = vmatprep.subr.bf16.mxu1 %v1307_v34 }
  0x31   :  { %1185 = vmatpush3.bf16.msra.mxu0 %v1295_v50 }
  0x32   :  { %1221 = vmatpush3.bf16.msra.mxu1 %v1295_v50 }
  0x33   :  { %587 = vmatmul.mubr.bf16.gmra.mrb[8].mxu0 %v1274_v46 }
  0x34   :  { %675 = vmatmul.mubr.bf16.gmra.mrb[8].mxu1 %v1275_v47  ;;  %594 = vmatprep.mubr.bf16.mxu0 %v1276_v48 }
  0x35   :  { %682 = vmatprep.mubr.bf16.mxu1 %v1278_v49 }
  0x3b   :  { %595 = vmatmul.mubr.bf16.gmra.mrb[12].mxu0 %v1280_v51 }
  0x3c   :  { %683 = vmatmul.mubr.bf16.gmra.mrb[12].mxu1 %v1281_v52  ;;  %602 = vmatprep.mubr.bf16.mxu0 %v1283_v53 }
  0x3d   :  { %690 = vmatprep.mubr.bf16.mxu1 %v1285_v54 }
  0x43   :  { %603 = vmatmul.mubr.bf16.gmra.mrb[16].mxu0 %v1287_v55 }
  0x44   :  { %691 = vmatmul.mubr.bf16.gmra.mrb[16].mxu1 %v1288_v56  ;;  %610 = vmatprep.mubr.bf16.mxu0 %v1289_v57 }
  0x45   :  { %698 = vmatprep.mubr.bf16.mxu1 %v1291_v58 }
  0x4b   :  { %611 = vmatmul.mubr.bf16.gmra.mrb[20].mxu0 %v1293_v61 }
  0x4c   :  { %699 = vmatmul.mubr.bf16.gmra.mrb[20].mxu1 %v1294_v62  ;;  %618 = vmatprep.mubr.bf16.mxu0 %v943_v63 }
  0x4d   :  { %706 = vmatprep.mubr.bf16.mxu1 %v945_v0 }
  0x53   :  { %619 = vmatmul.mubr.bf16.gmra.mrb[24].mxu0 %v942_v1 }
  0x54   :  { %707 = vmatmul.mubr.bf16.gmra.mrb[24].mxu1 %v944_v2  ;;  %1186 = vmatprep.mubr.msk.bf16.mxu0 %vm1308_vm0, %v1307_v34 }
  0x55   :  { %1202 = vmatprep.mubr.msk.bf16.mxu1 %vm1308_vm0, %v1307_v34 }
  0x5b   :  { %1187 = vmatmul.mubr.msk.bf16.vlgmr.msra.gmra.mrb[28].mxu0 %vm516_vm1, %v1300_v3 }
  0x5c   :  { %1203 = vmatmul.mubr.msk.bf16.vlgmr.msra.gmra.mrb[28].mxu1 %vm516_vm1, %v1301_v4  ;;  %1190 = vmatprep.mubr.msk.bf16.mxu0 %vm1308_vm0, %v1307_v34 }
  0x5d   :  { %1206 = vmatprep.mubr.msk.bf16.mxu1 %vm1308_vm0, %v1307_v34 }
  0x63   :  { %1191 = vmatmul.mubr.msk.bf16.gmra.mrb[32].mxu0 %vm516_vm1, %v1302_v5 }
  0x64   :  { %1207 = vmatmul.mubr.msk.bf16.gmra.mrb[32].mxu1 %vm516_vm1, %v1303_v6  ;;  %1194 = vmatprep.mubr.msk.bf16.mxu0 %vm1308_vm0, %v1307_v34 }
  0x65   :  { %1210 = vmatprep.mubr.msk.bf16.mxu1 %vm1308_vm0, %v1307_v34 }
  0x6b   :  { %1195 = vmatmul.mubr.msk.bf16.gmra.mrb[36].mxu0 %vm516_vm1, %v1304_v7 }
  0x6c   :  { %1211 = vmatmul.mubr.msk.bf16.gmra.mrb[36].mxu1 %vm516_vm1, %v1305_v8  ;;  %1198 = vmatprep.mubr.msk.bf16.mxu0 %vm1308_vm0, %v1307_v34 }
  0x73   :  { %1199 = vmatmul.mubr.msk.bf16.gmra.mrb[40].mxu0 %vm516_vm1, %v1306_v9 }
  0xf6   :  { %v1067_v10 = vpop.f32.mrb[0].mxu0 }
  0xf7   :  { %v1068_v12 = vpop.f32.mrb[1].mxu0  ;;  %v1125_v13 = vpop.f32.mrb[0].mxu1 }
  0xf8   :  { %v1069_v14 = vadd.f32 %v1068_v12, %v1067_v10  ;;  %v1070_v15 = vpop.f32.mrb[2].mxu0  ;;  %v1126_v16 = vpop.f32.mrb[1].mxu1 }
  0xf9   :  { %v1071_v17 = vpop.f32.mrb[3].mxu0  ;;  %v1127_v18 = vadd.f32 %v1126_v16, %v1125_v13  ;;  %v1128_v19 = vpop.f32.mrb[2].mxu1 }
  0xfa   :  { %v573_v20 = vadd.f32 %v1069_v14, %v1568_v11  ;;  %v1072_v21 = vadd.f32 %v1071_v17, %v1070_v15  ;;  %v1129_v22 = vpop.f32.mrb[3].mxu1 }
  0xfb   :  { %v1130_v23 = vadd.f32 %v1129_v22, %v1128_v19 }
  0xfc   :  { %v576_v24 = vadd.f32 %v1072_v21, %v1568_v11  ;;  %v1572_v25 = vadd.f32 %v1127_v18, %v573_v20 }
  0xfe   :  { %v1073_v26 = vpop.f32.mrb[4].mxu0  ;;  %v1574_v27 = vadd.f32 %v1130_v23, %v576_v24 }
  0xff   :  { %v1074_v28 = vpop.f32.mrb[5].mxu0  ;;  %v1131_v29 = vpop.f32.mrb[4].mxu1 }
 0x100   :  { %v1075_v30 = vadd.f32 %v1074_v28, %v1073_v26  ;;  %v1076_v31 = vpop.f32.mrb[6].mxu0  ;;  %v1132_v32 = vpop.f32.mrb[5].mxu1 }
 0x101   :  { %v1077_v33 = vpop.f32.mrb[7].mxu0  ;;  %v1133_v34 = vadd.f32 %v1132_v32, %v1131_v29  ;;  %v1134_v35 = vpop.f32.mrb[6].mxu1 }
 0x102   :  { %v581_v36 = vadd.f32 %v1075_v30, %v1568_v11  ;;  %v1078_v37 = vadd.f32 %v1077_v33, %v1076_v31  ;;  %v1135_v38 = vpop.f32.mrb[7].mxu1 }
 0x103   :  { %v1136_v39 = vadd.f32 %v1135_v38, %v1134_v35 }
 0x104   :  { %v584_v40 = vadd.f32 %v1078_v37, %v1568_v11  ;;  %v1578_v41 = vadd.f32 %v1133_v34, %v581_v36 }
 0x106   :  { %v1079_v42 = vpop.f32.mrb[8].mxu0  ;;  %v1580_v43 = vadd.f32 %v1136_v39, %v584_v40 }
 0x107   :  { %v1080_v44 = vpop.f32.mrb[9].mxu0  ;;  %v1137_v45 = vpop.f32.mrb[8].mxu1 }
 0x108   :  { %v1081_v46 = vadd.f32 %v1080_v44, %v1079_v42  ;;  %v1082_v47 = vpop.f32.mrb[10].mxu0  ;;  %v1138_v48 = vpop.f32.mrb[9].mxu1 }
 0x109   :  { %v1083_v49 = vpop.f32.mrb[11].mxu0  ;;  %v1139_v50 = vadd.f32 %v1138_v48, %v1137_v45  ;;  %v1140_v51 = vpop.f32.mrb[10].mxu1 }
 0x10a   :  { %v589_v52 = vadd.f32 %v1081_v46, %v1568_v11  ;;  %v1084_v53 = vadd.f32 %v1083_v49, %v1082_v47  ;;  %v1141_v54 = vpop.f32.mrb[11].mxu1 }
 0x10b   :  { %v1142_v55 = vadd.f32 %v1141_v54, %v1140_v51 }
 0x10c   :  { %v592_v56 = vadd.f32 %v1084_v53, %v1568_v11  ;;  %v1584_v57 = vadd.f32 %v1139_v50, %v589_v52 }
 0x10e   :  { %v1085_v58 = vpop.f32.mrb[12].mxu0  ;;  %v1586_v59 = vadd.f32 %v1142_v55, %v592_v56 }
 0x10f   :  { %v1086_v60 = vpop.f32.mrb[13].mxu0  ;;  %v1143_v61 = vpop.f32.mrb[12].mxu1 }
 0x110   :  { %v1087_v62 = vadd.f32 %v1086_v60, %v1085_v58  ;;  %v1088_v63 = vpop.f32.mrb[14].mxu0  ;;  %v1144_v0 = vpop.f32.mrb[13].mxu1 }
 0x111   :  { %v1089_v1 = vpop.f32.mrb[15].mxu0  ;;  %v1145_v2 = vadd.f32 %v1144_v0, %v1143_v61  ;;  %v1146_v3 = vpop.f32.mrb[14].mxu1 }
 0x112   :  { %v597_v4 = vadd.f32 %v1087_v62, %v1568_v11  ;;  %v1090_v5 = vadd.f32 %v1089_v1, %v1088_v63  ;;  %v1147_v6 = vpop.f32.mrb[15].mxu1 }
 0x113   :  { %v1148_v7 = vadd.f32 %v1147_v6, %v1146_v3 }
 0x114   :  { %v600_v8 = vadd.f32 %v1090_v5, %v1568_v11  ;;  %v1590_v9 = vadd.f32 %v1145_v2, %v597_v4 }
 0x116   :  { %v1091_v10 = vpop.f32.mrb[16].mxu0  ;;  %v1592_v12 = vadd.f32 %v1148_v7, %v600_v8 }
 0x117   :  { %v1092_v13 = vpop.f32.mrb[17].mxu0  ;;  %v1149_v14 = vpop.f32.mrb[16].mxu1 }
 0x118   :  { %v1093_v15 = vadd.f32 %v1092_v13, %v1091_v10  ;;  %v1094_v16 = vpop.f32.mrb[18].mxu0  ;;  %v1150_v17 = vpop.f32.mrb[17].mxu1 }
 0x119   :  { %v1095_v18 = vpop.f32.mrb[19].mxu0  ;;  %v1151_v19 = vadd.f32 %v1150_v17, %v1149_v14  ;;  %v1152_v20 = vpop.f32.mrb[18].mxu1 }
 0x11a   :  { %v605_v21 = vadd.f32 %v1093_v15, %v1568_v11  ;;  %v1096_v22 = vadd.f32 %v1095_v18, %v1094_v16  ;;  %v1153_v23 = vpop.f32.mrb[19].mxu1 }
 0x11b   :  { %v1154_v24 = vadd.f32 %v1153_v23, %v1152_v20 }
 0x11c   :  { %v608_v26 = vadd.f32 %v1096_v22, %v1568_v11  ;;  %v693_v28 = vadd.f32 %v1151_v19, %v605_v21 }
 0x11e   :  { %v1097_v29 = vpop.f32.mrb[20].mxu0  ;;  %v696_v30 = vadd.f32 %v1154_v24, %v608_v26 }
 0x11f   :  { %v1098_v31 = vpop.f32.mrb[21].mxu0  ;;  %v1155_v32 = vpop.f32.mrb[20].mxu1 }
 0x120   :  { %v1099_v33 = vadd.f32 %v1098_v31, %v1097_v29  ;;  %v1100_v34 = vpop.f32.mrb[22].mxu0  ;;  %v1156_v35 = vpop.f32.mrb[21].mxu1 }
 0x121   :  { %v1101_v36 = vpop.f32.mrb[23].mxu0  ;;  %v1157_v37 = vadd.f32 %v1156_v35, %v1155_v32  ;;  %v1158_v38 = vpop.f32.mrb[22].mxu1 }
 0x122   :  { %v613_v39 = vadd.f32 %v1099_v33, %v1568_v11  ;;  %v1102_v40 = vadd.f32 %v1101_v36, %v1100_v34  ;;  %v1159_v42 = vpop.f32.mrb[23].mxu1 }
 0x123   :  { %v1160_v44 = vadd.f32 %v1159_v42, %v1158_v38 }
 0x124   :  { %v616_v45 = vadd.f32 %v1102_v40, %v1568_v11  ;;  %v701_v46 = vadd.f32 %v1157_v37, %v613_v39 }
 0x126   :  { %v1103_v47 = vpop.f32.mrb[24].mxu0  ;;  %v704_v48 = vadd.f32 %v1160_v44, %v616_v45 }
 0x127   :  { %v1104_v49 = vpop.f32.mrb[25].mxu0  ;;  %v1161_v50 = vpop.f32.mrb[24].mxu1 }
 0x128   :  { %v1105_v51 = vadd.f32 %v1104_v49, %v1103_v47  ;;  %v1106_v52 = vpop.f32.mrb[26].mxu0  ;;  %v1162_v53 = vpop.f32.mrb[25].mxu1 }
 0x129   :  { %v1107_v54 = vpop.f32.mrb[27].mxu0  ;;  %v1163_v55 = vadd.f32 %v1162_v53, %v1161_v50  ;;  %v1164_v56 = vpop.f32.mrb[26].mxu1 }
 0x12a   :  { %v621_v58 = vadd.f32 %v1105_v51, %v1568_v11  ;;  %v1165_v60 = vpop.f32.mrb[27].mxu1 }
 0x12c   :  { %v709_v61 = vadd.f32 %v1163_v55, %v621_v58 }
 0x12e   :  { %v748_v62 = vpop.f32.mrb[28].mxu0 }
 0x12f   :  { %v749_v63 = vadd.f32 %v748_v62, %v1572_v25  ;;  %v780_v0 = vpop.f32.mrb[28].mxu1  ;;  %v1188_v1 = vpop.f32.mrb[29].mxu0 }
 0x130   :  { %v781_v2 = vadd.f32 %v780_v0, %v693_v28  ;;  %v1204_v3 = vpop.f32.mrb[29].mxu1  ;;  %v751_v4 = vpop.f32.mrb[30].mxu0 }
 0x131   :  { %v815_v5 = vmul.f32 0.2, %v749_v63  ;;  %v752_v6 = vadd.f32 %v751_v4, %v1574_v27  ;;  %v783_v7 = vpop.f32.mrb[30].mxu1  ;;  %v1189_v8 = vpop.f32.mrb[31].mxu0  ;;  %vm802_vm2 = vcmp.ge.f32.partialorder %v749_v63, 0.0 }
 0x132   :  { %v823_v10 = vmul.f32 0.2, %v781_v2  ;;  %v784_v13 = vadd.f32 %v783_v7, %v696_v30  ;;  %v1205_v14 = vpop.f32.mrb[31].mxu1  ;;  %vm810_vm3 = vcmp.ge.f32.partialorder %v781_v2, 0.0 }
 0x133   :  { %vm803_vm4 = vcmp.ge.f32.partialorder %v752_v6, 0.0  ;;  %v816_v11 = vmul.f32 0.2, %v752_v6  ;;  %v828_v25 = vsel %vm802_vm2, %v749_v63, %v815_v5 }
 0x134   :  { %vm811_vm5 = vcmp.ge.f32.partialorder %v784_v13, 0.0  ;;  %v824_v15 = vmul.f32 0.2, %v784_v13  ;;  %v836_v17 = vsel %vm810_vm3, %v781_v2, %v823_v10 }
 0x135   :  { %v829_v16 = vsel %vm803_vm4, %v752_v6, %v816_v11 }
 0x136   :  { %v1019_v18 = vpack.c.bf16 %v829_v16, %v828_v25  ;;  %v837_v19 = vsel %vm811_vm5, %v784_v13, %v824_v15  ;;  %v756_v20 = vpop.f32.mrb[32].mxu0 }
 0x137   :  { %v1039_v21 = vpack.c.bf16 %v837_v19, %v836_v17  ;;  %v757_v27 = vadd.f32 %v756_v20, %v1578_v41  ;;  %v788_v22 = vpop.f32.mrb[32].mxu1  ;;  %v1192_v23 = vpop.f32.mrb[33].mxu0 }
 0x138   :  { %1020 = vst [vmem:[%s1631_s3] sm:$0xff] %v1019_v18   ;;  %v789_v24 = vadd.f32 %v788_v22, %v701_v46  ;;  %v1208_v26 = vpop.f32.mrb[33].mxu1  ;;  %v759_v28 = vpop.f32.mrb[34].mxu0 }
 0x139   :  { %1049 = vst [vmem:[%s1631_s3 + $0x20] sm:$0xff] %v1039_v21   ;;  %v817_v29 = vmul.f32 0.2, %v757_v27  ;;  %v760_v30 = vadd.f32 %v759_v28, %v1580_v43  ;;  %v791_v31 = vpop.f32.mrb[34].mxu1  ;;  %v1193_v32 = vpop.f32.mrb[35].mxu0  ;;  %vm804_vm6 = vcmp.ge.f32.partialorder %v757_v27, 0.0 }
 0x13a   :  { %v825_v41 = vmul.f32 0.2, %v789_v24  ;;  %v792_v33 = vadd.f32 %v791_v31, %v704_v48  ;;  %v1209_v34 = vpop.f32.mrb[35].mxu1  ;;  %vm812_vm7 = vcmp.ge.f32.partialorder %v789_v24, 0.0 }
 0x13b   :  { %vm805_vm8 = vcmp.ge.f32.partialorder %v760_v30, 0.0  ;;  %v818_v35 = vmul.f32 0.2, %v760_v30  ;;  %v830_v37 = vsel %vm804_vm6, %v757_v27, %v817_v29 }
 0x13c   :  { %vm813_vm9 = vcmp.ge.f32.partialorder %v792_v33, 0.0  ;;  %v826_v36 = vmul.f32 0.2, %v792_v33  ;;  %v838_v39 = vsel %vm812_vm7, %v789_v24, %v825_v41 }
 0x13d   :  { %v831_v38 = vsel %vm805_vm8, %v760_v30, %v818_v35 }
 0x13e   :  { %v1024_v40 = vpack.c.bf16 %v831_v38, %v830_v37  ;;  %v839_v42 = vsel %vm813_vm9, %v792_v33, %v826_v36  ;;  %v764_v44 = vpop.f32.mrb[36].mxu0 }
 0x13f   :  { %v1044_v45 = vpack.c.bf16 %v839_v42, %v838_v39  ;;  %v765_v43 = vadd.f32 %v764_v44, %v1584_v57  ;;  %v796_v46 = vpop.f32.mrb[36].mxu1  ;;  %v1196_v47 = vpop.f32.mrb[37].mxu0 }
 0x140   :  { %1046 = vst [vmem:[%s1631_s3 + $0x8] sm:$0xff] %v1024_v40   ;;  %v797_v48 = vadd.f32 %v796_v46, %v709_v61  ;;  %v767_v49 = vpop.f32.mrb[38].mxu0  ;;  %v1212_v50 = vpop.f32.mrb[37].mxu1 }
 0x141   :  { %1050 = vst [vmem:[%s1631_s3 + $0x28] sm:$0xff] %v1044_v45   ;;  %v819_v51 = vmul.f32 0.2, %v765_v43  ;;  %v768_v52 = vadd.f32 %v767_v49, %v1586_v59  ;;  %v1197_v53 = vpop.f32.mrb[39].mxu0  ;;  %v799_v54 = vpop.f32.mrb[38].mxu1  ;;  %vm806_vm10 = vcmp.ge.f32.partialorder %v765_v43, 0.0 }
 0x142   :  { %vm814_vm11 = vcmp.ge.f32.partialorder %v797_v48, 0.0  ;;  %v827_v57 = vmul.f32 0.2, %v797_v48  ;;  %v1213_v55 = vpop.f32.mrb[39].mxu1 }
 0x143   :  { %vm807_vm12 = vcmp.ge.f32.partialorder %v768_v52, 0.0  ;;  %v820_v56 = vmul.f32 0.2, %v768_v52  ;;  %v832_v60 = vsel %vm806_vm10, %v765_v43, %v819_v51 }
 0x144   :  { %v840_v58 = vsel %vm814_vm11, %v797_v48, %v827_v57 }
 0x145   :  { %v1015_v61 = vpack.c.bf16 %v840_v58, %v840_v58  ;;  %v833_v62 = vsel %vm807_vm12, %v768_v52, %v820_v56 }
 0x146   :  { %v1029_v63 = vpack.c.bf16 %v833_v62, %v832_v60  ;;  %v772_v0 = vpop.f32.mrb[40].mxu0 }
 0x147   :  { %906 = vst [vmem:[%s1631_s3 + $0x30] sm:$0x1] %v1015_v61  ;;  %v773_v59 = vadd.f32 %v772_v0, %v1590_v9  ;;  %v1200_v1 = vpop.f32.mrb[41].mxu0 }
 0x148   :  { %1047 = vst [vmem:[%s1631_s3 + $0x10] sm:$0xff] %v1029_v63   ;;  %v775_v2 = vpop.f32.mrb[42].mxu0 }
 0x149   :  { %v821_v3 = vmul.f32 0.2, %v773_v59  ;;  %v776_v4 = vadd.f32 %v775_v2, %v1592_v12  ;;  %v1201_v5 = vpop.f32.mrb[43].mxu0  ;;  %vm808_vm13 = vcmp.ge.f32.partialorder %v773_v59, 0.0 }
 0x14b   :  { %vm809_vm14 = vcmp.ge.f32.partialorder %v776_v4, 0.0  ;;  %v822_v6 = vmul.f32 0.2, %v776_v4  ;;  %v834_v7 = vsel %vm808_vm13, %v773_v59, %v821_v3 }
 0x14d   :  { %v835_v8 = vsel %vm809_vm14, %v776_v4, %v822_v6 }
 0x14e   :  { %v1034_v10 = vpack.c.bf16 %v835_v8, %v834_v7 }
 0x150   :  { %1048 = vst [vmem:[%s1631_s3 + $0x18] sm:$0xff] %v1034_v10  }

// kernel: discriminator_forward.6
= control target key start
LH: loop header
LB: loop body
LE: loop exit
PB: predicated region body
PF: predicated region fallthrough
CT: control target
= control target key end

     0   :  { %s3202_s12 = smov 0   ;;  %s3204_s13 = smov 0   ;;  %s3933_s0 = inlined_call_operand.vmem [shape: bf16[98,1152], index: 0, kind: input, shape index: {}]   ;;  %s3934_s1 = inlined_call_operand.vmem [shape: bf16[1152,256], index: 1, kind: input, shape index: {}]   ;;  %s3935_s2 = inlined_call_operand.vmem [shape: f32[1,256], index: 2, kind: input, shape index: {}]   ;;  %s3936_s3 = inlined_call_operand.vmem [shape: bf16[98,256], index: 3, kind: output, shape index: {}]  }
   0x1   :  { %s3206_s14 = smov 0  }
   0x2 LB: > { %s3218_s15 = sadd.s32 4294967295, %s3178_s14   ;;  %s3221_s16 = sadd.s32 1, %s3178_s14   ;;  %s3178_s14 = sphi %s3206_s14, %s3940_s14   ;;  %s3174_s13 = sphi %s3204_s13, %s3939_s13   ;;  %s3170_s12 = sphi %s3202_s12, %s3938_s12  }
   0x3   : > { %s38_s17 = ssub.s32 %s3178_s14, %s3221_s16  ;;  %s41_s18 = sadd.s32 1, %s3174_s13 }
   0x4   : > { %p39_p0 = scmp.eq.s32.totalorder %s38_s17, 0  ;;  %p48_p1 = scmp.ne.s32.totalorder %s3174_s13, %s3170_s12 }
   0x5   : > { %p49_p2 = scmp.eq.s32.totalorder %s3178_s14, 0  ;;  %p104_p3 = scmp.eq.s32.totalorder %s3218_s15, 1 }
   0x6   : > { %s3231_s19 = scalar_select %p39_p0, %s3174_s13, %s41_s18  }
   0x7   : > { %p50_p4 = por %p49_p2, %p48_p1  ;;  %p3233_p5 = por %p104_p3, %p48_p1 }
   0x8   : > { %p2458_p6 = scmp.ge.s32.totalorder %s3178_s14, 2 }
   0xa   : > { %129 = sbr.rel (%p2458_p6) target bundleno = 117 (0x75), region = 20 }
  0x11   : > { %132 = sbr.rel (!%p50_p4) target bundleno = 117 (0x75), region = 24  ;;  %s134_s21 = sand.u32 (%p50_p4), 1, %s3174_s13  }
  0x12   : > { %s2459_s22 = sshll.u32 (%p50_p4), %s3178_s14, 2  ;;  %s2968_s23 = smul.u32 (%p50_p4), 576, %s134_s21 }
  0x13   : > { %s3243_s26 = scalar_lea.vmem (%p50_p4), %s3934_s1, %s2459_s22 }
  0x14   : > { %v154_v0 = vld [vmem:[%s3243_s26] sm:$0xf] (%p50_p4)  ;;  %v156_v1 = vld [vmem:[%s3243_s26 + $0x8] sm:$0xf] (%p50_p4)  ;;  %v158_v2 = vld [vmem:[%s3243_s26 + $0x10] sm:$0xf] (%p50_p4) }
  0x15   : > { %v160_v3 = vld [vmem:[%s3243_s26 + $0x18] sm:$0xf] (%p50_p4)  ;;  %v162_v4 = vld [vmem:[%s3243_s26 + $0x20] sm:$0xf] (%p50_p4)  ;;  %s3250_s27 = scalar_lea.vmem (%p50_p4), [#allocation2], %s2968_s23 }
  0x16   : > { %155 = vst [vmem:[%s3250_s27] sm:$0xf] (%p50_p4), %v154_v0  ;;  %157 = vst [vmem:[%s3250_s27 + $0x4] sm:$0xf] (%p50_p4), %v156_v1  ;;  %v164_v5 = vld [vmem:[%s3243_s26 + $0x28] sm:$0xf] (%p50_p4) }
  0x17   : > { %159 = vst [vmem:[%s3250_s27 + $0x8] sm:$0xf] (%p50_p4), %v158_v2  ;;  %161 = vst [vmem:[%s3250_s27 + $0xc] sm:$0xf] (%p50_p4), %v160_v3  ;;  %v166_v6 = vld [vmem:[%s3243_s26 + $0x30] sm:$0xf] (%p50_p4) }
  0x18   : > { %163 = vst [vmem:[%s3250_s27 + $0x10] sm:$0xf] %v162_v4  ;;  %v168_v7 = vld [vmem:[%s3243_s26 + $0x38] sm:$0xf]  ;;  %165 = vst [vmem:[%s3250_s27 + $0x14] sm:$0xf] %v164_v5 }
  0x19   : > { %167 = vst [vmem:[%s3250_s27 + $0x18] sm:$0xf] %v166_v6  ;;  %169 = vst [vmem:[%s3250_s27 + $0x1c] sm:$0xf] %v168_v7  ;;  %v170_v8 = vld [vmem:[%s3243_s26 + $0x40] sm:$0xf] }
  0x1a   : > { %v172_v9 = vld [vmem:[%s3243_s26 + $0x48] sm:$0xf]  ;;  %v174_v10 = vld [vmem:[%s3243_s26 + $0x50] sm:$0xf]  ;;  %171 = vst [vmem:[%s3250_s27 + $0x20] sm:$0xf] %v170_v8 }
  0x1b   : > { %173 = vst [vmem:[%s3250_s27 + $0x24] sm:$0xf] %v172_v9  ;;  %175 = vst [vmem:[%s3250_s27 + $0x28] sm:$0xf] %v174_v10  ;;  %v176_v11 = vld [vmem:[%s3243_s26 + $0x58] sm:$0xf] }
  0x1c   : > { %v178_v12 = vld [vmem:[%s3243_s26 + $0x60] sm:$0xf]  ;;  %v180_v13 = vld [vmem:[%s3243_s26 + $0x68] sm:$0xf]  ;;  %177 = vst [vmem:[%s3250_s27 + $0x2c] sm:$0xf] %v176_v11 }
  0x1d   : > { %179 = vst [vmem:[%s3250_s27 + $0x30] sm:$0xf] %v178_v12  ;;  %181 = vst [vmem:[%s3250_s27 + $0x34] sm:$0xf] %v180_v13  ;;  %v182_v14 = vld [vmem:[%s3243_s26 + $0x70] sm:$0xf] }
  0x1e   : > { %v184_v15 = vld [vmem:[%s3243_s26 + $0x78] sm:$0xf]  ;;  %v186_v16 = vld [vmem:[%s3243_s26 + $0x80] sm:$0xf]  ;;  %183 = vst [vmem:[%s3250_s27 + $0x38] sm:$0xf] %v182_v14 }
  0x1f   : > { %185 = vst [vmem:[%s3250_s27 + $0x3c] sm:$0xf] %v184_v15  ;;  %187 = vst [vmem:[%s3250_s27 + $0x40] sm:$0xf] %v186_v16  ;;  %v188_v17 = vld [vmem:[%s3243_s26 + $0x88] sm:$0xf] }
  0x20   : > { %v190_v18 = vld [vmem:[%s3243_s26 + $0x90] sm:$0xf]  ;;  %v192_v19 = vld [vmem:[%s3243_s26 + $0x98] sm:$0xf]  ;;  %189 = vst [vmem:[%s3250_s27 + $0x44] sm:$0xf] %v188_v17 }
  0x21   : > { %191 = vst [vmem:[%s3250_s27 + $0x48] sm:$0xf] %v190_v18  ;;  %193 = vst [vmem:[%s3250_s27 + $0x4c] sm:$0xf] %v192_v19  ;;  %v194_v20 = vld [vmem:[%s3243_s26 + $0xa0] sm:$0xf] }
  0x22   : > { %v196_v21 = vld [vmem:[%s3243_s26 + $0xa8] sm:$0xf]  ;;  %v198_v22 = vld [vmem:[%s3243_s26 + $0xb0] sm:$0xf]  ;;  %195 = vst [vmem:[%s3250_s27 + $0x50] sm:$0xf] %v194_v20 }
  0x23   : > { %197 = vst [vmem:[%s3250_s27 + $0x54] sm:$0xf] %v196_v21  ;;  %199 = vst [vmem:[%s3250_s27 + $0x58] sm:$0xf] %v198_v22  ;;  %v200_v23 = vld [vmem:[%s3243_s26 + $0xb8] sm:$0xf] }
  0x24   : > { %v202_v24 = vld [vmem:[%s3243_s26 + $0xc0] sm:$0xf]  ;;  %v204_v25 = vld [vmem:[%s3243_s26 + $0xc8] sm:$0xf]  ;;  %201 = vst [vmem:[%s3250_s27 + $0x5c] sm:$0xf] %v200_v23 }
  0x25   : > { %203 = vst [vmem:[%s3250_s27 + $0x60] sm:$0xf] %v202_v24  ;;  %205 = vst [vmem:[%s3250_s27 + $0x64] sm:$0xf] %v204_v25  ;;  %v206_v26 = vld [vmem:[%s3243_s26 + $0xd0] sm:$0xf] }
  0x26   : > { %v208_v27 = vld [vmem:[%s3243_s26 + $0xd8] sm:$0xf]  ;;  %v210_v28 = vld [vmem:[%s3243_s26 + $0xe0] sm:$0xf]  ;;  %207 = vst [vmem:[%s3250_s27 + $0x68] sm:$0xf] %v206_v26 }
  0x27   : > { %209 = vst [vmem:[%s3250_s27 + $0x6c] sm:$0xf] %v208_v27  ;;  %211 = vst [vmem:[%s3250_s27 + $0x70] sm:$0xf] %v210_v28  ;;  %v212_v29 = vld [vmem:[%s3243_s26 + $0xe8] sm:$0xf] }
  0x28   : > { %v214_v30 = vld [vmem:[%s3243_s26 + $0xf0] sm:$0xf]  ;;  %v216_v31 = vld [vmem:[%s3243_s26 + $0xf8] sm:$0xf]  ;;  %213 = vst [vmem:[%s3250_s27 + $0x74] sm:$0xf] %v212_v29 }
  0x29   : > { %215 = vst [vmem:[%s3250_s27 + $0x78] sm:$0xf] %v214_v30  ;;  %217 = vst [vmem:[%s3250_s27 + $0x7c] sm:$0xf] %v216_v31  ;;  %v218_v32 = vld [vmem:[%s3243_s26 + $0x100] sm:$0xf] }
  0x2a   : > { %v220_v33 = vld [vmem:[%s3243_s26 + $0x108] sm:$0xf]  ;;  %v222_v34 = vld [vmem:[%s3243_s26 + $0x110] sm:$0xf]  ;;  %219 = vst [vmem:[%s3250_s27 + $0x80] sm:$0xf] %v218_v32 }
  0x2b   : > { %221 = vst [vmem:[%s3250_s27 + $0x84] sm:$0xf] %v220_v33  ;;  %223 = vst [vmem:[%s3250_s27 + $0x88] sm:$0xf] %v222_v34  ;;  %v224_v35 = vld [vmem:[%s3243_s26 + $0x118] sm:$0xf] }
  0x2c   : > { %v226_v36 = vld [vmem:[%s3243_s26 + $0x120] sm:$0xf]  ;;  %v228_v37 = vld [vmem:[%s3243_s26 + $0x128] sm:$0xf]  ;;  %225 = vst [vmem:[%s3250_s27 + $0x8c] sm:$0xf] %v224_v35 }
  0x2d   : > { %227 = vst [vmem:[%s3250_s27 + $0x90] sm:$0xf] %v226_v36  ;;  %229 = vst [vmem:[%s3250_s27 + $0x94] sm:$0xf] %v228_v37  ;;  %v230_v38 = vld [vmem:[%s3243_s26 + $0x130] sm:$0xf] }
  0x2e   : > { %v232_v39 = vld [vmem:[%s3243_s26 + $0x138] sm:$0xf]  ;;  %v234_v40 = vld [vmem:[%s3243_s26 + $0x140] sm:$0xf]  ;;  %231 = vst [vmem:[%s3250_s27 + $0x98] sm:$0xf] %v230_v38 }
  0x2f   : > { %233 = vst [vmem:[%s3250_s27 + $0x9c] sm:$0xf] %v232_v39  ;;  %235 = vst [vmem:[%s3250_s27 + $0xa0] sm:$0xf] %v234_v40  ;;  %v236_v41 = vld [vmem:[%s3243_s26 + $0x148] sm:$0xf] }
  0x30   : > { %v238_v42 = vld [vmem:[%s3243_s26 + $0x150] sm:$0xf]  ;;  %v240_v43 = vld [vmem:[%s3243_s26 + $0x158] sm:$0xf]  ;;  %237 = vst [vmem:[%s3250_s27 + $0xa4] sm:$0xf] %v236_v41 }
  0x31   : > { %239 = vst [vmem:[%s3250_s27 + $0xa8] sm:$0xf] %v238_v42  ;;  %241 = vst [vmem:[%s3250_s27 + $0xac] sm:$0xf] %v240_v43  ;;  %v242_v44 = vld [vmem:[%s3243_s26 + $0x160] sm:$0xf] }
  0x32   : > { %v244_v45 = vld [vmem:[%s3243_s26 + $0x168] sm:$0xf]  ;;  %v246_v46 = vld [vmem:[%s3243_s26 + $0x170] sm:$0xf]  ;;  %243 = vst [vmem:[%s3250_s27 + $0xb0] sm:$0xf] %v242_v44 }
  0x33   : > { %245 = vst [vmem:[%s3250_s27 + $0xb4] sm:$0xf] %v244_v45  ;;  %247 = vst [vmem:[%s3250_s27 + $0xb8] sm:$0xf] %v246_v46  ;;  %v248_v47 = vld [vmem:[%s3243_s26 + $0x178] sm:$0xf] }
  0x34   : > { %v250_v48 = vld [vmem:[%s3243_s26 + $0x180] sm:$0xf]  ;;  %v252_v49 = vld [vmem:[%s3243_s26 + $0x188] sm:$0xf]  ;;  %249 = vst [vmem:[%s3250_s27 + $0xbc] sm:$0xf] %v248_v47 }
  0x35   : > { %251 = vst [vmem:[%s3250_s27 + $0xc0] sm:$0xf] %v250_v48  ;;  %253 = vst [vmem:[%s3250_s27 + $0xc4] sm:$0xf] %v252_v49  ;;  %v254_v50 = vld [vmem:[%s3243_s26 + $0x190] sm:$0xf] }
  0x36   : > { %v256_v51 = vld [vmem:[%s3243_s26 + $0x198] sm:$0xf]  ;;  %v258_v52 = vld [vmem:[%s3243_s26 + $0x1a0] sm:$0xf]  ;;  %255 = vst [vmem:[%s3250_s27 + $0xc8] sm:$0xf] %v254_v50 }
  0x37   : > { %257 = vst [vmem:[%s3250_s27 + $0xcc] sm:$0xf] %v256_v51  ;;  %259 = vst [vmem:[%s3250_s27 + $0xd0] sm:$0xf] %v258_v52  ;;  %v260_v53 = vld [vmem:[%s3243_s26 + $0x1a8] sm:$0xf] }
  0x38   : > { %v262_v54 = vld [vmem:[%s3243_s26 + $0x1b0] sm:$0xf]  ;;  %v264_v55 = vld [vmem:[%s3243_s26 + $0x1b8] sm:$0xf]  ;;  %261 = vst [vmem:[%s3250_s27 + $0xd4] sm:$0xf] %v260_v53 }
  0x39   : > { %263 = vst [vmem:[%s3250_s27 + $0xd8] sm:$0xf] %v262_v54  ;;  %265 = vst [vmem:[%s3250_s27 + $0xdc] sm:$0xf] %v264_v55  ;;  %v266_v56 = vld [vmem:[%s3243_s26 + $0x1c0] sm:$0xf] }
  0x3a   : > { %v268_v57 = vld [vmem:[%s3243_s26 + $0x1c8] sm:$0xf]  ;;  %v270_v58 = vld [vmem:[%s3243_s26 + $0x1d0] sm:$0xf]  ;;  %267 = vst [vmem:[%s3250_s27 + $0xe0] sm:$0xf] %v266_v56 }
  0x3b   : > { %269 = vst [vmem:[%s3250_s27 + $0xe4] sm:$0xf] %v268_v57  ;;  %271 = vst [vmem:[%s3250_s27 + $0xe8] sm:$0xf] %v270_v58  ;;  %v272_v59 = vld [vmem:[%s3243_s26 + $0x1d8] sm:$0xf] }
  0x3c   : > { %v274_v60 = vld [vmem:[%s3243_s26 + $0x1e0] sm:$0xf]  ;;  %v276_v61 = vld [vmem:[%s3243_s26 + $0x1e8] sm:$0xf]  ;;  %273 = vst [vmem:[%s3250_s27 + $0xec] sm:$0xf] %v272_v59 }
  0x3d   : > { %275 = vst [vmem:[%s3250_s27 + $0xf0] sm:$0xf] %v274_v60  ;;  %277 = vst [vmem:[%s3250_s27 + $0xf4] sm:$0xf] %v276_v61  ;;  %v278_v62 = vld [vmem:[%s3243_s26 + $0x1f0] sm:$0xf] }
  0x3e   : > { %v280_v63 = vld [vmem:[%s3243_s26 + $0x1f8] sm:$0xf]  ;;  %v282_v0 = vld [vmem:[%s3243_s26 + $0x200] sm:$0xf]  ;;  %279 = vst [vmem:[%s3250_s27 + $0xf8] sm:$0xf] %v278_v62 }
  0x3f   : > { %281 = vst [vmem:[%s3250_s27 + $0xfc] sm:$0xf] %v280_v63  ;;  %283 = vst [vmem:[%s3250_s27 + $0x100] sm:$0xf] %v282_v0  ;;  %v284_v1 = vld [vmem:[%s3243_s26 + $0x208] sm:$0xf] }
  0x40   : > { %v286_v2 = vld [vmem:[%s3243_s26 + $0x210] sm:$0xf]  ;;  %v288_v3 = vld [vmem:[%s3243_s26 + $0x218] sm:$0xf]  ;;  %285 = vst [vmem:[%s3250_s27 + $0x104] sm:$0xf] %v284_v1 }
  0x41   : > { %287 = vst [vmem:[%s3250_s27 + $0x108] sm:$0xf] %v286_v2  ;;  %289 = vst [vmem:[%s3250_s27 + $0x10c] sm:$0xf] %v288_v3  ;;  %v290_v4 = vld [vmem:[%s3243_s26 + $0x220] sm:$0xf] }
  0x42   : > { %v292_v5 = vld [vmem:[%s3243_s26 + $0x228] sm:$0xf]  ;;  %v294_v6 = vld [vmem:[%s3243_s26 + $0x230] sm:$0xf]  ;;  %291 = vst [vmem:[%s3250_s27 + $0x110] sm:$0xf] %v290_v4 }
  0x43   : > { %293 = vst [vmem:[%s3250_s27 + $0x114] sm:$0xf] %v292_v5  ;;  %295 = vst [vmem:[%s3250_s27 + $0x118] sm:$0xf] %v294_v6  ;;  %v296_v7 = vld [vmem:[%s3243_s26 + $0x238] sm:$0xf] }
  0x44   : > { %v298_v8 = vld [vmem:[%s3243_s26 + $0x240] sm:$0xf]  ;;  %v300_v9 = vld [vmem:[%s3243_s26 + $0x248] sm:$0xf]  ;;  %297 = vst [vmem:[%s3250_s27 + $0x11c] sm:$0xf] %v296_v7 }
  0x45   : > { %299 = vst [vmem:[%s3250_s27 + $0x120] sm:$0xf] %v298_v8  ;;  %301 = vst [vmem:[%s3250_s27 + $0x124] sm:$0xf] %v300_v9  ;;  %v302_v10 = vld [vmem:[%s3243_s26 + $0x250] sm:$0xf] }
  0x46   : > { %v304_v11 = vld [vmem:[%s3243_s26 + $0x258] sm:$0xf]  ;;  %v306_v12 = vld [vmem:[%s3243_s26 + $0x260] sm:$0xf]  ;;  %303 = vst [vmem:[%s3250_s27 + $0x128] sm:$0xf] %v302_v10 }
  0x47   : > { %305 = vst [vmem:[%s3250_s27 + $0x12c] sm:$0xf] %v304_v11  ;;  %307 = vst [vmem:[%s3250_s27 + $0x130] sm:$0xf] %v306_v12  ;;  %v308_v13 = vld [vmem:[%s3243_s26 + $0x268] sm:$0xf] }
  0x48   : > { %v310_v14 = vld [vmem:[%s3243_s26 + $0x270] sm:$0xf]  ;;  %v312_v15 = vld [vmem:[%s3243_s26 + $0x278] sm:$0xf]  ;;  %309 = vst [vmem:[%s3250_s27 + $0x134] sm:$0xf] %v308_v13 }
  0x49   : > { %311 = vst [vmem:[%s3250_s27 + $0x138] sm:$0xf] %v310_v14  ;;  %313 = vst [vmem:[%s3250_s27 + $0x13c] sm:$0xf] %v312_v15  ;;  %v314_v16 = vld [vmem:[%s3243_s26 + $0x280] sm:$0xf] }
  0x4a   : > { %v316_v17 = vld [vmem:[%s3243_s26 + $0x288] sm:$0xf]  ;;  %v318_v18 = vld [vmem:[%s3243_s26 + $0x290] sm:$0xf]  ;;  %315 = vst [vmem:[%s3250_s27 + $0x140] sm:$0xf] %v314_v16 }
  0x4b   : > { %317 = vst [vmem:[%s3250_s27 + $0x144] sm:$0xf] %v316_v17  ;;  %319 = vst [vmem:[%s3250_s27 + $0x148] sm:$0xf] %v318_v18  ;;  %v320_v19 = vld [vmem:[%s3243_s26 + $0x298] sm:$0xf] }
  0x4c   : > { %v322_v20 = vld [vmem:[%s3243_s26 + $0x2a0] sm:$0xf]  ;;  %v324_v21 = vld [vmem:[%s3243_s26 + $0x2a8] sm:$0xf]  ;;  %321 = vst [vmem:[%s3250_s27 + $0x14c] sm:$0xf] %v320_v19 }
  0x4d   : > { %323 = vst [vmem:[%s3250_s27 + $0x150] sm:$0xf] %v322_v20  ;;  %325 = vst [vmem:[%s3250_s27 + $0x154] sm:$0xf] %v324_v21  ;;  %v326_v22 = vld [vmem:[%s3243_s26 + $0x2b0] sm:$0xf] }
  0x4e   : > { %v328_v23 = vld [vmem:[%s3243_s26 + $0x2b8] sm:$0xf]  ;;  %v330_v24 = vld [vmem:[%s3243_s26 + $0x2c0] sm:$0xf]  ;;  %327 = vst [vmem:[%s3250_s27 + $0x158] sm:$0xf] %v326_v22 }
  0x4f   : > { %329 = vst [vmem:[%s3250_s27 + $0x15c] sm:$0xf] %v328_v23  ;;  %331 = vst [vmem:[%s3250_s27 + $0x160] sm:$0xf] %v330_v24  ;;  %v332_v25 = vld [vmem:[%s3243_s26 + $0x2c8] sm:$0xf] }
  0x50   : > { %v334_v26 = vld [vmem:[%s3243_s26 + $0x2d0] sm:$0xf]  ;;  %v336_v27 = vld [vmem:[%s3243_s26 + $0x2d8] sm:$0xf]  ;;  %333 = vst [vmem:[%s3250_s27 + $0x164] sm:$0xf] %v332_v25 }
  0x51   : > { %335 = vst [vmem:[%s3250_s27 + $0x168] sm:$0xf] %v334_v26  ;;  %337 = vst [vmem:[%s3250_s27 + $0x16c] sm:$0xf] %v336_v27  ;;  %v338_v28 = vld [vmem:[%s3243_s26 + $0x2e0] sm:$0xf] }
  0x52   : > { %v340_v29 = vld [vmem:[%s3243_s26 + $0x2e8] sm:$0xf]  ;;  %v342_v30 = vld [vmem:[%s3243_s26 + $0x2f0] sm:$0xf]  ;;  %339 = vst [vmem:[%s3250_s27 + $0x170] sm:$0xf] %v338_v28 }
  0x53   : > { %341 = vst [vmem:[%s3250_s27 + $0x174] sm:$0xf] %v340_v29  ;;  %343 = vst [vmem:[%s3250_s27 + $0x178] sm:$0xf] %v342_v30  ;;  %v344_v31 = vld [vmem:[%s3243_s26 + $0x2f8] sm:$0xf] }
  0x54   : > { %v346_v32 = vld [vmem:[%s3243_s26 + $0x300] sm:$0xf]  ;;  %v348_v33 = vld [vmem:[%s3243_s26 + $0x308] sm:$0xf]  ;;  %345 = vst [vmem:[%s3250_s27 + $0x17c] sm:$0xf] %v344_v31 }
  0x55   : > { %347 = vst [vmem:[%s3250_s27 + $0x180] sm:$0xf] %v346_v32  ;;  %349 = vst [vmem:[%s3250_s27 + $0x184] sm:$0xf] %v348_v33  ;;  %v350_v34 = vld [vmem:[%s3243_s26 + $0x310] sm:$0xf] }
  0x56   : > { %v352_v35 = vld [vmem:[%s3243_s26 + $0x318] sm:$0xf]  ;;  %v354_v36 = vld [vmem:[%s3243_s26 + $0x320] sm:$0xf]  ;;  %351 = vst [vmem:[%s3250_s27 + $0x188] sm:$0xf] %v350_v34 }
  0x57   : > { %353 = vst [vmem:[%s3250_s27 + $0x18c] sm:$0xf] %v352_v35  ;;  %355 = vst [vmem:[%s3250_s27 + $0x190] sm:$0xf] %v354_v36  ;;  %v356_v37 = vld [vmem:[%s3243_s26 + $0x328] sm:$0xf] }
  0x58   : > { %v358_v38 = vld [vmem:[%s3243_s26 + $0x330] sm:$0xf]  ;;  %v360_v39 = vld [vmem:[%s3243_s26 + $0x338] sm:$0xf]  ;;  %357 = vst [vmem:[%s3250_s27 + $0x194] sm:$0xf] %v356_v37 }
  0x59   : > { %359 = vst [vmem:[%s3250_s27 + $0x198] sm:$0xf] %v358_v38  ;;  %361 = vst [vmem:[%s3250_s27 + $0x19c] sm:$0xf] %v360_v39  ;;  %v362_v40 = vld [vmem:[%s3243_s26 + $0x340] sm:$0xf] }
  0x5a   : > { %v364_v41 = vld [vmem:[%s3243_s26 + $0x348] sm:$0xf]  ;;  %v366_v42 = vld [vmem:[%s3243_s26 + $0x350] sm:$0xf]  ;;  %363 = vst [vmem:[%s3250_s27 + $0x1a0] sm:$0xf] %v362_v40 }
  0x5b   : > { %365 = vst [vmem:[%s3250_s27 + $0x1a4] sm:$0xf] %v364_v41  ;;  %367 = vst [vmem:[%s3250_s27 + $0x1a8] sm:$0xf] %v366_v42  ;;  %v368_v43 = vld [vmem:[%s3243_s26 + $0x358] sm:$0xf] }
  0x5c   : > { %v370_v44 = vld [vmem:[%s3243_s26 + $0x360] sm:$0xf]  ;;  %v372_v45 = vld [vmem:[%s3243_s26 + $0x368] sm:$0xf]  ;;  %369 = vst [vmem:[%s3250_s27 + $0x1ac] sm:$0xf] %v368_v43 }
  0x5d   : > { %371 = vst [vmem:[%s3250_s27 + $0x1b0] sm:$0xf] %v370_v44  ;;  %373 = vst [vmem:[%s3250_s27 + $0x1b4] sm:$0xf] %v372_v45  ;;  %v374_v46 = vld [vmem:[%s3243_s26 + $0x370] sm:$0xf] }
  0x5e   : > { %v376_v47 = vld [vmem:[%s3243_s26 + $0x378] sm:$0xf]  ;;  %v378_v48 = vld [vmem:[%s3243_s26 + $0x380] sm:$0xf]  ;;  %375 = vst [vmem:[%s3250_s27 + $0x1b8] sm:$0xf] %v374_v46 }
  0x5f   : > { %377 = vst [vmem:[%s3250_s27 + $0x1bc] sm:$0xf] %v376_v47  ;;  %379 = vst [vmem:[%s3250_s27 + $0x1c0] sm:$0xf] %v378_v48  ;;  %v380_v49 = vld [vmem:[%s3243_s26 + $0x388] sm:$0xf] }
  0x60   : > { %v382_v50 = vld [vmem:[%s3243_s26 + $0x390] sm:$0xf]  ;;  %v384_v51 = vld [vmem:[%s3243_s26 + $0x398] sm:$0xf]  ;;  %381 = vst [vmem:[%s3250_s27 + $0x1c4] sm:$0xf] %v380_v49 }
  0x61   : > { %383 = vst [vmem:[%s3250_s27 + $0x1c8] sm:$0xf] %v382_v50  ;;  %385 = vst [vmem:[%s3250_s27 + $0x1cc] sm:$0xf] %v384_v51  ;;  %v386_v52 = vld [vmem:[%s3243_s26 + $0x3a0] sm:$0xf] }
  0x62   : > { %v388_v53 = vld [vmem:[%s3243_s26 + $0x3a8] sm:$0xf]  ;;  %v390_v54 = vld [vmem:[%s3243_s26 + $0x3b0] sm:$0xf]  ;;  %387 = vst [vmem:[%s3250_s27 + $0x1d0] sm:$0xf] %v386_v52 }
  0x63   : > { %389 = vst [vmem:[%s3250_s27 + $0x1d4] sm:$0xf] %v388_v53  ;;  %391 = vst [vmem:[%s3250_s27 + $0x1d8] sm:$0xf] %v390_v54  ;;  %v392_v55 = vld [vmem:[%s3243_s26 + $0x3b8] sm:$0xf] }
  0x64   : > { %v394_v56 = vld [vmem:[%s3243_s26 + $0x3c0] sm:$0xf]  ;;  %v396_v57 = vld [vmem:[%s3243_s26 + $0x3c8] sm:$0xf]  ;;  %393 = vst [vmem:[%s3250_s27 + $0x1dc] sm:$0xf] %v392_v55 }
  0x65   : > { %395 = vst [vmem:[%s3250_s27 + $0x1e0] sm:$0xf] %v394_v56  ;;  %397 = vst [vmem:[%s3250_s27 + $0x1e4] sm:$0xf] %v396_v57  ;;  %v398_v58 = vld [vmem:[%s3243_s26 + $0x3d0] sm:$0xf] }
  0x66   : > { %v400_v59 = vld [vmem:[%s3243_s26 + $0x3d8] sm:$0xf]  ;;  %v402_v60 = vld [vmem:[%s3243_s26 + $0x3e0] sm:$0xf]  ;;  %399 = vst [vmem:[%s3250_s27 + $0x1e8] sm:$0xf] %v398_v58 }
  0x67   : > { %401 = vst [vmem:[%s3250_s27 + $0x1ec] sm:$0xf] %v400_v59  ;;  %403 = vst [vmem:[%s3250_s27 + $0x1f0] sm:$0xf] %v402_v60  ;;  %v404_v61 = vld [vmem:[%s3243_s26 + $0x3e8] sm:$0xf] }
  0x68   : > { %v406_v62 = vld [vmem:[%s3243_s26 + $0x3f0] sm:$0xf]  ;;  %v408_v63 = vld [vmem:[%s3243_s26 + $0x3f8] sm:$0xf]  ;;  %405 = vst [vmem:[%s3250_s27 + $0x1f4] sm:$0xf] %v404_v61 }
  0x69   : > { %407 = vst [vmem:[%s3250_s27 + $0x1f8] sm:$0xf] %v406_v62  ;;  %409 = vst [vmem:[%s3250_s27 + $0x1fc] sm:$0xf] %v408_v63  ;;  %v410_v0 = vld [vmem:[%s3243_s26 + $0x400] sm:$0xf] }
  0x6a   : > { %v412_v1 = vld [vmem:[%s3243_s26 + $0x408] sm:$0xf]  ;;  %v414_v2 = vld [vmem:[%s3243_s26 + $0x410] sm:$0xf]  ;;  %411 = vst [vmem:[%s3250_s27 + $0x200] sm:$0xf] %v410_v0 }
  0x6b   : > { %413 = vst [vmem:[%s3250_s27 + $0x204] sm:$0xf] %v412_v1  ;;  %415 = vst [vmem:[%s3250_s27 + $0x208] sm:$0xf] %v414_v2  ;;  %v416_v3 = vld [vmem:[%s3243_s26 + $0x418] sm:$0xf] }
  0x6c   : > { %v418_v4 = vld [vmem:[%s3243_s26 + $0x420] sm:$0xf]  ;;  %v420_v5 = vld [vmem:[%s3243_s26 + $0x428] sm:$0xf]  ;;  %417 = vst [vmem:[%s3250_s27 + $0x20c] sm:$0xf] %v416_v3 }
  0x6d   : > { %419 = vst [vmem:[%s3250_s27 + $0x210] sm:$0xf] %v418_v4  ;;  %421 = vst [vmem:[%s3250_s27 + $0x214] sm:$0xf] %v420_v5  ;;  %v422_v6 = vld [vmem:[%s3243_s26 + $0x430] sm:$0xf] }
  0x6e   : > { %v424_v7 = vld [vmem:[%s3243_s26 + $0x438] sm:$0xf]  ;;  %v426_v8 = vld [vmem:[%s3243_s26 + $0x440] sm:$0xf]  ;;  %423 = vst [vmem:[%s3250_s27 + $0x218] sm:$0xf] %v422_v6 }
  0x6f   : > { %425 = vst [vmem:[%s3250_s27 + $0x21c] sm:$0xf] %v424_v7  ;;  %427 = vst [vmem:[%s3250_s27 + $0x220] sm:$0xf] %v426_v8  ;;  %v428_v9 = vld [vmem:[%s3243_s26 + $0x448] sm:$0xf] }
  0x70   : > { %v430_v10 = vld [vmem:[%s3243_s26 + $0x450] sm:$0xf]  ;;  %v432_v11 = vld [vmem:[%s3243_s26 + $0x458] sm:$0xf]  ;;  %429 = vst [vmem:[%s3250_s27 + $0x224] sm:$0xf] %v428_v9 }
  0x71   : > { %431 = vst [vmem:[%s3250_s27 + $0x228] sm:$0xf] %v430_v10  ;;  %433 = vst [vmem:[%s3250_s27 + $0x22c] sm:$0xf] %v432_v11  ;;  %v434_v12 = vld [vmem:[%s3243_s26 + $0x460] sm:$0xf] }
  0x72   : > { %v436_v13 = vld [vmem:[%s3243_s26 + $0x468] sm:$0xf]  ;;  %v438_v14 = vld [vmem:[%s3243_s26 + $0x470] sm:$0xf]  ;;  %435 = vst [vmem:[%s3250_s27 + $0x230] sm:$0xf] %v434_v12 }
  0x73   : > { %437 = vst [vmem:[%s3250_s27 + $0x234] sm:$0xf] %v436_v13  ;;  %439 = vst [vmem:[%s3250_s27 + $0x238] sm:$0xf] %v438_v14  ;;  %v440_v15 = vld [vmem:[%s3243_s26 + $0x478] sm:$0xf] }
  0x74   : > { %441 = vst [vmem:[%s3250_s27 + $0x23c] sm:$0xf] %v440_v15 }
  0x75 PF: > { %p2460_p7 = scmp.ge.s32.totalorder %s3178_s14, 1  ;;  %p757_p8 = scmp.lt.s32.totalorder %s3178_s14, 3 }
  0x77   : > { %p758_p9 = pnand %p2460_p7, %p757_p8 }
  0x78   : > { %s764_s28 = sand.u32 (!%p758_p9), 1, %s3170_s12   ;;  %v3015_v16 = vld [vmem:[%s3933_s0 + $0x124] ss:$36 sps:$4 sm:$0xff] (!%p758_p9)   ;;  %v3028_v41 = vld [vmem:[%s3933_s0 + $0x4c] ss:$36 sps:$4 sm:$0xff] (!%p758_p9)   ;;  %vm3181_vm0 = vmmov (!%p758_p9), 0  }
  0x79   : > { %761 = sbr.rel (%p758_p9) target bundleno = 527 (0x20f), region = 69  ;;  %v3019_v17 = vld [vmem:[%s3933_s0 + $0x4] ss:$36 sps:$4 sm:$0xff] (!%p758_p9)   ;;  %1813 = vmatprep.mubr.bf16.mxu1 (!%p758_p9), %v3015_v16  ;;  %v3035_v43 = vld [vmem:[%s3933_s0 + $0x16c] ss:$36 sps:$4 sm:$0xff] (!%p758_p9)   ;;  %p789_p10 = scmp.lt.s32.totalorder (!%p758_p9), %s3218_s15, 1 }
  0x7a   : > { %s2969_s29 = smul.u32 (!%p758_p9), 576, %s764_s28  ;;  %1781 = vmatprep.mubr.bf16.mxu0 (!%p758_p9), %v3019_v17  ;;  %v3013_v35 = vld [vmem:[%s3933_s0 + $0x120] ss:$36 sps:$4 sm:$0xff] (!%p758_p9)   ;;  %v3031_v47 = vld [vmem:[%s3933_s0 + $0x48] ss:$36 sps:$4 sm:$0xff] (!%p758_p9)  }
  0x7b   : > { %v3017_v36 = vld [vmem:[%s3933_s0] ss:$36 sps:$4 sm:$0xff] (!%p758_p9)   ;;  %v3038_v51 = vld [vmem:[%s3933_s0 + $0x168] ss:$36 sps:$4 sm:$0xff] (!%p758_p9)   ;;  %v853_v53 = vld [vmem:[%s3933_s0 + $0x1b0] sm:$0x11] (!%p758_p9) }
  0x7c   : > { %s3546_s7 = scalar_lea.vmem (!%p758_p9), [#allocation2], %s2969_s29  ;;  %v3042_v56 = vld [vmem:[%s3933_s0 + $0x94] ss:$36 sps:$4 sm:$0xff] (!%p758_p9)   ;;  %v2517_v57 = vcombine.high (!%p758_p9), %v853_v53, %v853_v53  ;;  %v2516_v0 = vcombine.low (!%p758_p9), %v853_v53, %v853_v53  ;;  %v3055_v4 = vld [vmem:[%s3933_s0 + $0xdc] ss:$36 sps:$4 sm:$0xff] (!%p758_p9)   ;;  %s2970_s9 = smul.u32 (!%p758_p9), 52, %s764_s28 }
  0x7d   : > { %v2997_v18 = vld [vmem:[%s3546_s7 + $0x40] sm:$0xff] (!%p758_p9)   ;;  %v2999_v20 = vld [vmem:[%s3546_s7 + $0x48] sm:$0xff] (!%p758_p9)   ;;  %v3001_v22 = vld [vmem:[%s3546_s7 + $0x50] sm:$0xff] (!%p758_p9)  }
  0x7e   : > { %v2998_v19 = vld [vmem:[%s3546_s7] sm:$0xff] (!%p758_p9)   ;;  %2952 = vmatprep.subr.bf16.mxu1 (!%p758_p9), %v2997_v18  ;;  %2661 = vmatprep.subr.bf16.mxu0 (!%p758_p9), %v2997_v18  ;;  %v3000_v21 = vld [vmem:[%s3546_s7 + $0x8] sm:$0xff] (!%p758_p9)   ;;  %v3002_v23 = vld [vmem:[%s3546_s7 + $0x10] sm:$0xff] (!%p758_p9)   ;;  %s3886_s12 = scalar_lea.vmem (!%p758_p9), [#allocation3], %s2970_s9 }
  0x7f   : > { %2960 = vmatpush3.bf16.msra.mxu1 (!%p758_p9), %v2998_v19  ;;  %2662 = vmatpush3.bf16.msra.mxu0 (!%p758_p9), %v2998_v19  ;;  %v3003_v24 = vld [vmem:[%s3546_s7 + $0x58] sm:$0xff] (!%p758_p9)   ;;  %v3005_v26 = vld [vmem:[%s3546_s7 + $0x60] sm:$0xff] (!%p758_p9)   ;;  %v3007_v28 = vld [vmem:[%s3546_s7 + $0x68] sm:$0xff] (!%p758_p9)  }
  0x80   : > { %2953 = vmatprep.subr.bf16.mxu1 %v2999_v20  ;;  %2663 = vmatprep.subr.bf16.mxu0 %v2999_v20  ;;  %v3004_v25 = vld [vmem:[%s3546_s7 + $0x18] sm:$0xff]   ;;  %v3006_v27 = vld [vmem:[%s3546_s7 + $0x20] sm:$0xff]   ;;  %v3008_v29 = vld [vmem:[%s3546_s7 + $0x28] sm:$0xff]   ;;  %s790_s4 = scalar_select %p789_p10, %s3218_s15, 1 }
  0x81   : > { %v3009_v30 = vld [vmem:[%s3546_s7 + $0x70] sm:$0xff]   ;;  %v3011_v32 = vld [vmem:[%s3546_s7 + $0x78] sm:$0xff]   ;;  %v3016_v34 = vld [vmem:[%s3546_s7 + $0xc0] sm:$0xff]   ;;  %s2610_s28 = sshll.u32 (%p3233_p5), %s3218_s15, 2 }
  0x82   : > { %v3010_v31 = vld [vmem:[%s3546_s7 + $0x30] sm:$0xff]   ;;  %v3012_v33 = vld [vmem:[%s3546_s7 + $0x38] sm:$0xff]   ;;  %v3021_v37 = vld [vmem:[%s3546_s7 + $0x140] sm:$0xff]   ;;  %s791_s8 = scalar_lea.vmem %s3935_s2, %s790_s4  ;;  %s2302_s14 = scalar_lea.vmem (%p3233_p5), %s3936_s3, %s2610_s28 }
  0x83   : > { %2961 = vmatpush3.bf16.msra.mxu1 %v3000_v21  ;;  %2664 = vmatpush3.bf16.msra.mxu0 %v3000_v21  ;;  %v3020_v38 = vld [vmem:[%s3546_s7 + $0x80] sm:$0xff]   ;;  %v3023_v40 = vld [vmem:[%s3546_s7 + $0xc8] sm:$0xff]   ;;  %v3027_v46 = vld [vmem:[%s3546_s7 + $0xd0] sm:$0xff]  }
  0x84   : > { %2954 = vmatprep.subr.bf16.mxu1 %v3001_v22  ;;  %2665 = vmatprep.subr.bf16.mxu0 %v3001_v22  ;;  %v3022_v39 = vld [vmem:[%s3546_s7 + $0x100] sm:$0xff]   ;;  %v3025_v42 = vld [vmem:[%s3546_s7 + $0x148] sm:$0xff]   ;;  %v3032_v48 = vld [vmem:[%s3546_s7 + $0x150] sm:$0xff]  }
  0x85   : > { %v3024_v44 = vld [vmem:[%s3546_s7 + $0x88] sm:$0xff]   ;;  %v3030_v49 = vld [vmem:[%s3546_s7 + $0x90] sm:$0xff]   ;;  %v3034_v52 = vld [vmem:[%s3546_s7 + $0xd8] sm:$0xff]  }
  0x86   : > { %v3026_v45 = vld [vmem:[%s3546_s7 + $0x108] sm:$0xff]   ;;  %v3033_v50 = vld [vmem:[%s3546_s7 + $0x110] sm:$0xff]   ;;  %v3039_v54 = vld [vmem:[%s3546_s7 + $0x158] sm:$0xff]  }
  0x87   : > { %2962 = vmatpush3.bf16.msra.mxu1 %v3002_v23  ;;  %2666 = vmatpush3.bf16.msra.mxu0 %v3002_v23  ;;  %v3037_v55 = vld [vmem:[%s3546_s7 + $0x98] sm:$0xff]   ;;  %v3041_v59 = vld [vmem:[%s3546_s7 + $0xe0] sm:$0xff]   ;;  %v3045_v62 = vld [vmem:[%s3933_s0 + $0x90] ss:$36 sps:$4 sm:$0xff]   ;;  %v3180_v23 = vmov 0.0  }
  0x88   : > { %2955 = vmatprep.subr.bf16.mxu1 %v3003_v24  ;;  %2667 = vmatprep.subr.bf16.mxu0 %v3003_v24  ;;  %v3040_v58 = vld [vmem:[%s3546_s7 + $0x118] sm:$0xff]   ;;  %v3046_v60 = vld [vmem:[%s3546_s7 + $0x160] sm:$0xff]   ;;  %v3048_v1 = vld [vmem:[%s3546_s7 + $0xe8] sm:$0xff]  }
  0x89   : > { %v3044_v61 = vld [vmem:[%s3546_s7 + $0xa0] sm:$0xff]   ;;  %v3052_v2 = vld [vmem:[%s3546_s7 + $0x168] sm:$0xff]   ;;  %v3054_v6 = vld [vmem:[%s3546_s7 + $0xf0] sm:$0xff]  }
  0x8a   : > { %v3047_v63 = vld [vmem:[%s3546_s7 + $0x120] sm:$0xff]   ;;  %v3050_v3 = vld [vmem:[%s3546_s7 + $0xa8] sm:$0xff]   ;;  %v3059_v7 = vld [vmem:[%s3546_s7 + $0x170] sm:$0xff]  }
  0x8b   : > { %2963 = vmatpush3.bf16.msra.mxu1 %v3004_v25  ;;  %2668 = vmatpush3.bf16.msra.mxu0 %v3004_v25  ;;  %v3053_v5 = vld [vmem:[%s3546_s7 + $0x128] sm:$0xff]   ;;  %v3057_v9 = vld [vmem:[%s3546_s7 + $0xb0] sm:$0xff]   ;;  %v3058_v10 = vld [vmem:[%s3933_s0 + $0xd8] ss:$36 sps:$4 sm:$0xff]  }
  0x8c   : > { %2956 = vmatprep.subr.bf16.mxu1 %v3005_v26  ;;  %2669 = vmatprep.subr.bf16.mxu0 %v3005_v26  ;;  %v3066_v8 = vld [vmem:[%s3933_s0 + $0xc] ss:$36 sps:$4 sm:$0xff]   ;;  %v3061_v12 = vld [vmem:[%s3546_s7 + $0xf8] sm:$0xff]   ;;  %v3068_v18 = vld [vmem:[%s3546_s7 + $0x1c0] sm:$0xff]  }
  0x8d   : > { %v3060_v11 = vld [vmem:[%s3546_s7 + $0x130] sm:$0xff]   ;;  %v3063_v13 = vld [vmem:[%s3546_s7 + $0x178] sm:$0xff]   ;;  %v3064_v17 = vld [vmem:[%s3933_s0 + $0x8] ss:$36 sps:$4 sm:$0xff]  }
  0x8e   : > { %v3071_v14 = vld [vmem:[%s3933_s0 + $0x14] ss:$36 sps:$4 sm:$0xff]   ;;  %v3072_v20 = vld [vmem:[%s3546_s7 + $0x180] sm:$0xff]   ;;  %v3076_v24 = vld [vmem:[%s3546_s7 + $0x1c8] sm:$0xff]  }
  0x8f   : > { %2964 = vmatpush3.bf16.msra.mxu1 %v3006_v27  ;;  %2670 = vmatpush3.bf16.msra.mxu0 %v3006_v27  ;;  %v3062_v15 = vld [vmem:[%s3546_s7 + $0xb8] sm:$0xff]   ;;  %v3069_v19 = vld [vmem:[%s3933_s0 + $0x10] ss:$36 sps:$4 sm:$0xff]   ;;  %v3073_v21 = vld [vmem:[%s3546_s7 + $0x200] sm:$0xff]  }
  0x90   : > { %2957 = vmatprep.subr.bf16.mxu1 %v3007_v28  ;;  %2671 = vmatprep.subr.bf16.mxu0 %v3007_v28  ;;  %v3067_v16 = vld [vmem:[%s3546_s7 + $0x138] sm:$0xff]   ;;  %v3078_v26 = vld [vmem:[%s3546_s7 + $0x188] sm:$0xff]   ;;  %v3077_v28 = vld [vmem:[%s3933_s0 + $0x50] ss:$36 sps:$4 sm:$0xff]  }
  0x91   : > { %v3074_v22 = vld [vmem:[%s3933_s0 + $0x54] ss:$36 sps:$4 sm:$0xff]   ;;  %v3079_v25 = vld [vmem:[%s3933_s0 + $0x5c] ss:$36 sps:$4 sm:$0xff]   ;;  %v3082_v27 = vld [vmem:[%s3546_s7 + $0x208] sm:$0xff]  }
  0x92   : > { %v3120_v53 = vld [vmem:[%s3546_s7 + $0x1b0] sm:$0xff]  }
  0x93   : > { %2965 = vmatpush3.bf16.msra.mxu1 %v3008_v29  ;;  %2672 = vmatpush3.bf16.msra.mxu0 %v3008_v29  ;;  %v3083_v29 = vld [vmem:[%s3546_s7 + $0x1d0] sm:$0xff]  }
  0x94   : > { %2958 = vmatprep.subr.bf16.mxu1 %v3009_v30  ;;  %2673 = vmatprep.subr.bf16.mxu0 %v3009_v30  ;;  %v3081_v30 = vld [vmem:[%s3933_s0 + $0x58] ss:$36 sps:$4 sm:$0xff]  }
  0x97   : > { %2966 = vmatpush3.bf16.msra.mxu1 %v3010_v31  ;;  %2674 = vmatpush3.bf16.msra.mxu0 %v3010_v31  ;;  %v3084_v31 = vld [vmem:[%s3933_s0 + $0x9c] ss:$36 sps:$4 sm:$0xff]  }
  0x98   : > { %2959 = vmatprep.subr.bf16.mxu1 %v3011_v32  ;;  %2675 = vmatprep.subr.bf16.mxu0 %v3011_v32  ;;  %v3086_v32 = vld [vmem:[%s3546_s7 + $0x190] sm:$0xff]  }
  0x9b   : > { %2967 = vmatpush3.bf16.msra.mxu1 %v3012_v33  ;;  %2676 = vmatpush3.bf16.msra.mxu0 %v3012_v33  ;;  %v3088_v33 = vld [vmem:[%s3933_s0 + $0xa4] ss:$36 sps:$4 sm:$0xff]  }
  0x9c   : > { %2719 = vmatprep.subr.bf16.mxu1 %v3016_v34  ;;  %2777 = vmatprep.subr.bf16.mxu0 %v3021_v37  ;;  %v3091_v34 = vld [vmem:[%s3546_s7 + $0x210] sm:$0xff]   ;;  %v3100_v37 = vld [vmem:[%s3546_s7 + $0x218] sm:$0xff]  }
  0x9e   : > { %1814 = vmatmul.mubr.bf16.vlgmr.msra.gmra.mrb[0].mxu1 %v3013_v35  ;;  %1782 = vmatmul.mubr.bf16.vlgmr.msra.gmra.mrb[0].mxu0 %v3017_v36  ;;  %v3092_v35 = vld [vmem:[%s3546_s7 + $0x1d8] sm:$0xff]  }
  0x9f   : > { %2720 = vmatpush3.bf16.msra.mxu1 %v3020_v38  ;;  %2778 = vmatpush3.bf16.msra.mxu0 %v3022_v39  ;;  %v3093_v36 = vld [vmem:[%s3546_s7 + $0x198] sm:$0xff]   ;;  %v3101_v39 = vld [vmem:[%s3546_s7 + $0x1e0] sm:$0xff]  }
  0xa0   : > { %2721 = vmatprep.subr.bf16.mxu1 %v3023_v40  ;;  %2779 = vmatprep.subr.bf16.mxu0 %v3025_v42  ;;  %v3087_v38 = vld [vmem:[%s3933_s0 + $0x98] ss:$36 sps:$4 sm:$0xff]   ;;  %v3090_v40 = vld [vmem:[%s3933_s0 + $0xa0] ss:$36 sps:$4 sm:$0xff]   ;;  %v3097_v42 = vld [vmem:[%s3933_s0 + $0xec] ss:$36 sps:$4 sm:$0xff]  }
  0xa1   : > { %1789 = vmatprep.mubr.bf16.mxu0 %v3028_v41  ;;  %1821 = vmatprep.mubr.bf16.mxu1 %v3035_v43  ;;  %v3094_v41 = vld [vmem:[%s3933_s0 + $0xe4] ss:$36 sps:$4 sm:$0xff]  }
  0xa2   : > { %v3102_v43 = vld [vmem:[%s3546_s7 + $0x1a0] sm:$0xff]  }
  0xa3   : > { %2722 = vmatpush3.bf16.msra.mxu1 %v3024_v44  ;;  %2780 = vmatpush3.bf16.msra.mxu0 %v3026_v45  ;;  %v3109_v44 = vld [vmem:[%s3546_s7 + $0x220] sm:$0xff]   ;;  %v3110_v45 = vld [vmem:[%s3546_s7 + $0x1e8] sm:$0xff]  }
  0xa4   : > { %2723 = vmatprep.subr.bf16.mxu1 %v3027_v46  ;;  %2781 = vmatprep.subr.bf16.mxu0 %v3032_v48  ;;  %v3096_v46 = vld [vmem:[%s3933_s0 + $0xe0] ss:$36 sps:$4 sm:$0xff]   ;;  %v3111_v48 = vld [vmem:[%s3546_s7 + $0x1a8] sm:$0xff]  }
  0xa6   : > { %1790 = vmatmul.mubr.bf16.gmra.mrb[4].mxu0 %v3031_v47  ;;  %1822 = vmatmul.mubr.bf16.gmra.mrb[4].mxu1 %v3038_v51  ;;  %v3099_v47 = vld [vmem:[%s3933_s0 + $0xe8] ss:$36 sps:$4 sm:$0xff]   ;;  %v3106_v51 = vld [vmem:[%s3933_s0 + $0x134] ss:$36 sps:$4 sm:$0xff]  }
  0xa7   : > { %2724 = vmatpush3.bf16.msra.mxu1 %v3030_v49  ;;  %2782 = vmatpush3.bf16.msra.mxu0 %v3033_v50  ;;  %v3103_v49 = vld [vmem:[%s3933_s0 + $0x12c] ss:$36 sps:$4 sm:$0xff]  }
  0xa8   : > { %2725 = vmatprep.subr.bf16.mxu1 %v3034_v52  ;;  %2783 = vmatprep.subr.bf16.mxu0 %v3039_v54  ;;  %v3117_v50 = vld [vmem:[%s3546_s7 + $0x228] sm:$0xff]   ;;  %v3119_v52 = vld [vmem:[%s3546_s7 + $0x1f0] sm:$0xff]  }
  0xa9   : > { %1797 = vmatprep.mubr.bf16.mxu0 %v3042_v56  ;;  %1829 = vmatprep.mubr.bf16.mxu1 %v2517_v57  ;;  %v3123_v54 = vld [vmem:[%s3546_s7 + $0x230] sm:$0xff]   ;;  %v3105_v56 = vld [vmem:[%s3933_s0 + $0x128] ss:$36 sps:$4 sm:$0xff]  }
  0xaa   : > { %v3108_v57 = vld [vmem:[%s3933_s0 + $0x130] ss:$36 sps:$4 sm:$0xff]  }
  0xab   : > { %2726 = vmatpush3.bf16.msra.mxu1 %v3037_v55  ;;  %2784 = vmatpush3.bf16.msra.mxu0 %v3040_v58  ;;  %v3125_v55 = vld [vmem:[%s3546_s7 + $0x1f8] sm:$0xff]  }
  0xac   : > { %2727 = vmatprep.subr.bf16.mxu1 %v3041_v59  ;;  %2785 = vmatprep.subr.bf16.mxu0 %v3046_v60  ;;  %v3127_v58 = vld [vmem:[%s3546_s7 + $0x1b8] sm:$0xff]  }
  0xad   : > { %v3112_v59 = vld [vmem:[%s3933_s0 + $0x174] ss:$36 sps:$4 sm:$0xff]  }
  0xae   : > { %1798 = vmatmul.mubr.bf16.gmra.mrb[8].mxu0 %v3045_v62  ;;  %1830 = vmatmul.mubr.bf16.gmra.mrb[8].mxu1 %v2516_v0  ;;  %v3131_v60 = vld [vmem:[%s3546_s7 + $0x238] sm:$0xff]   ;;  %v3114_v0 = vld [vmem:[%s3933_s0 + $0x170] ss:$36 sps:$4 sm:$0xff]  }
  0xaf   : > { %2728 = vmatpush3.bf16.msra.mxu1 %v3044_v61  ;;  %2786 = vmatpush3.bf16.msra.mxu0 %v3047_v63  ;;  %v3115_v61 = vld [vmem:[%s3933_s0 + $0x17c] ss:$36 sps:$4 sm:$0xff]  }
  0xb0   : > { %2729 = vmatprep.subr.bf16.mxu1 %v3048_v1  ;;  %2787 = vmatprep.subr.bf16.mxu0 %v3052_v2  ;;  %v854_v62 = vld [vmem:[%s3933_s0 + $0x1b8] sm:$0x11]  ;;  %v855_v63 = vld [vmem:[%s3933_s0 + $0x1c0] sm:$0x11] }
  0xb1   : > { %1805 = vmatprep.mubr.bf16.mxu0 %v3055_v4  ;;  %1869 = vmatprep.mubr.bf16.mxu1 %v3066_v8  ;;  %v3118_v1 = vld [vmem:[%s3933_s0 + $0x178] ss:$36 sps:$4 sm:$0xff]   ;;  %v2519_v2 = vcombine.high %v854_v62, %v854_v62  ;;  %v2518_v4 = vcombine.low %v854_v62, %v854_v62  ;;  %v3132_v8 = vld [vmem:[%s3933_s0 + $0x20] ss:$36 sps:$4 sm:$0xff]  }
  0xb3   : > { %2730 = vmatpush3.bf16.msra.mxu1 %v3050_v3  ;;  %2788 = vmatpush3.bf16.msra.mxu0 %v3053_v5  ;;  %v2521_v3 = vcombine.high %v855_v63, %v855_v63  ;;  %v2520_v5 = vcombine.low %v855_v63, %v855_v63 }
  0xb4   : > { %2731 = vmatprep.subr.bf16.mxu1 %v3054_v6  ;;  %2789 = vmatprep.subr.bf16.mxu0 %v3059_v7  ;;  %v3130_v6 = vld [vmem:[%s3933_s0 + $0x1c] ss:$36 sps:$4 sm:$0xff]  }
  0xb5   : > { %v3128_v7 = vld [vmem:[%s3933_s0 + $0x18] ss:$36 sps:$4 sm:$0xff]  }
  0xb6   : > { %1806 = vmatmul.mubr.bf16.gmra.mrb[12].mxu0 %v3058_v10  ;;  %v3135_v10 = vld [vmem:[%s3933_s0 + $0x60] ss:$36 sps:$4 sm:$0xff]  }
  0xb7   : > { %2732 = vmatpush3.bf16.msra.mxu1 %v3057_v9  ;;  %2790 = vmatpush3.bf16.msra.mxu0 %v3060_v11  ;;  %v3133_v9 = vld [vmem:[%s3933_s0 + $0x64] ss:$36 sps:$4 sm:$0xff]  }
  0xb8   : > { %2733 = vmatprep.subr.bf16.mxu1 %v3061_v12  ;;  %2791 = vmatprep.subr.bf16.mxu0 %v3063_v13  ;;  %v3136_v11 = vld [vmem:[%s3933_s0 + $0x68] ss:$36 sps:$4 sm:$0xff]  }
  0xb9   : > { %1957 = vmatprep.mubr.bf16.mxu0 %v3071_v14  ;;  %v3137_v12 = vld [vmem:[%s3933_s0 + $0xac] ss:$36 sps:$4 sm:$0xff]  }
  0xba   : > { %v3139_v13 = vld [vmem:[%s3933_s0 + $0xa8] ss:$36 sps:$4 sm:$0xff]   ;;  %v3140_v14 = vld [vmem:[%s3933_s0 + $0xb0] ss:$36 sps:$4 sm:$0xff]  }
  0xbb   : > { %2734 = vmatpush3.bf16.msra.mxu1 %v3062_v15  ;;  %2792 = vmatpush3.bf16.msra.mxu0 %v3067_v16  ;;  %v3141_v15 = vld [vmem:[%s3933_s0 + $0xf4] ss:$36 sps:$4 sm:$0xff]  }
  0xbc   : > { %2835 = vmatprep.subr.bf16.mxu1 %v3068_v18  ;;  %2908 = vmatprep.subr.bf16.mxu0 %v3180_v23  ;;  %v3143_v16 = vld [vmem:[%s3933_s0 + $0xf0] ss:$36 sps:$4 sm:$0xff]   ;;  %v3145_v18 = vld [vmem:[%s3933_s0 + $0x13c] ss:$36 sps:$4 sm:$0xff]  }
  0xbe   : > { %1870 = vmatmul.mubr.bf16.vlgmr.msra.gmra.mrb[12].mxu1 %v3064_v17  ;;  %1958 = vmatmul.mubr.bf16.vlgmr.msra.gmra.mrb[16].mxu0 %v3069_v19  ;;  %v3144_v17 = vld [vmem:[%s3933_s0 + $0xf8] ss:$36 sps:$4 sm:$0xff]  }
  0xbf   : > { %2836 = vmatpush3.bf16.msra.mxu1 %v3072_v20  ;;  %2909 = vmatpush3.bf16.msra.mxu0 %v3073_v21  ;;  %v3147_v19 = vld [vmem:[%s3933_s0 + $0x138] ss:$36 sps:$4 sm:$0xff]   ;;  %v3148_v20 = vld [vmem:[%s3933_s0 + $0x140] ss:$36 sps:$4 sm:$0xff]  }
  0xc0   : > { %1877 = vmatprep.mubr.bf16.mxu1 %v3074_v22  ;;  %2837 = vmatprep.subr.bf16.mxu1 %v3076_v24  ;;  %v3149_v21 = vld [vmem:[%s3933_s0 + $0x184] ss:$36 sps:$4 sm:$0xff]  }
  0xc1   : > { %1965 = vmatprep.mubr.bf16.mxu0 %v3079_v25  ;;  %2910 = vmatprep.subr.bf16.mxu0 %v3180_v23  ;;  %v856_v22 = vld [vmem:[%s3933_s0 + $0x1c8] sm:$0x11]  ;;  %v3151_v24 = vld [vmem:[%s3933_s0 + $0x180] ss:$36 sps:$4 sm:$0xff]  }
  0xc2   : > { %v3152_v25 = vld [vmem:[%s3933_s0 + $0x188] ss:$36 sps:$4 sm:$0xff]  }
  0xc3   : > { %2838 = vmatpush3.bf16.msra.mxu1 %v3078_v26  ;;  %2911 = vmatpush3.bf16.msra.mxu0 %v3082_v27  ;;  %v2523_v26 = vcombine.high %v856_v22, %v856_v22  ;;  %v2522_v27 = vcombine.low %v856_v22, %v856_v22 }
  0xc4   : > { %2839 = vmatprep.subr.bf16.mxu1 %v3083_v29  ;;  %2912 = vmatprep.subr.bf16.mxu0 %v3180_v23 }
  0xc6   : > { %1878 = vmatmul.mubr.bf16.gmra.mrb[16].mxu1 %v3077_v28  ;;  %1966 = vmatmul.mubr.bf16.gmra.mrb[20].mxu0 %v3081_v30  ;;  %v3155_v28 = vld [vmem:[%s3933_s0 + $0x1d0] ss:$0 sps:$4 sm:$0x11]  }
  0xc7   : > { %1885 = vmatprep.mubr.bf16.mxu1 %v3084_v31  ;;  %2840 = vmatpush3.bf16.msra.mxu1 %v3086_v32 }
  0xc8   : > { %1973 = vmatprep.mubr.bf16.mxu0 %v3088_v33  ;;  %2913 = vmatpush3.bf16.msra.mxu0 %v3091_v34 }
  0xc9   : > { %2841 = vmatprep.subr.bf16.mxu1 %v3092_v35  ;;  %2914 = vmatprep.subr.bf16.mxu0 %v3180_v23 }
  0xcb   : > { %2842 = vmatpush3.bf16.msra.mxu1 %v3093_v36 }
  0xcc   : > { %2915 = vmatpush3.bf16.msra.mxu0 %v3100_v37  ;;  %2843 = vmatprep.subr.bf16.mxu1 %v3101_v39 }
  0xcd   : > { %2916 = vmatprep.subr.bf16.mxu0 %v3180_v23 }
  0xce   : > { %1886 = vmatmul.mubr.bf16.gmra.mrb[20].mxu1 %v3087_v38  ;;  %1974 = vmatmul.mubr.bf16.gmra.mrb[24].mxu0 %v3090_v40 }
  0xcf   : > { %1893 = vmatprep.mubr.bf16.mxu1 %v3094_v41  ;;  %1981 = vmatprep.mubr.bf16.mxu0 %v3097_v42 }
  0xd0   : > { %2844 = vmatpush3.bf16.msra.mxu1 %v3102_v43  ;;  %2917 = vmatpush3.bf16.msra.mxu0 %v3109_v44 }
  0xd1   : > { %2845 = vmatprep.subr.bf16.mxu1 %v3110_v45  ;;  %2918 = vmatprep.subr.bf16.mxu0 %v3180_v23 }
  0xd4   : > { %2846 = vmatpush3.bf16.msra.mxu1 %v3111_v48  ;;  %2919 = vmatpush3.bf16.msra.mxu0 %v3117_v50 }
  0xd5   : > { %2847 = vmatprep.subr.bf16.mxu1 %v3119_v52  ;;  %2920 = vmatprep.subr.bf16.mxu0 %v3180_v23 }
  0xd6   : > { %1894 = vmatmul.mubr.bf16.gmra.mrb[24].mxu1 %v3096_v46  ;;  %1982 = vmatmul.mubr.bf16.gmra.mrb[28].mxu0 %v3099_v47 }
  0xd7   : > { %1901 = vmatprep.mubr.bf16.mxu1 %v3103_v49  ;;  %1989 = vmatprep.mubr.bf16.mxu0 %v3106_v51 }
  0xd8   : > { %2848 = vmatpush3.bf16.msra.mxu1 %v3120_v53  ;;  %2921 = vmatpush3.bf16.msra.mxu0 %v3123_v54 }
  0xd9   : > { %2849 = vmatprep.subr.bf16.mxu1 %v3125_v55  ;;  %2922 = vmatprep.subr.bf16.mxu0 %v3180_v23 }
  0xdc   : > { %2850 = vmatpush3.bf16.msra.mxu1 %v3127_v58  ;;  %2923 = vmatpush3.bf16.msra.mxu0 %v3131_v60 }
  0xde   : > { %1902 = vmatmul.mubr.bf16.gmra.mrb[28].mxu1 %v3105_v56  ;;  %1990 = vmatmul.mubr.bf16.gmra.mrb[32].mxu0 %v3108_v57 }
  0xdf   : > { %1909 = vmatprep.mubr.bf16.mxu1 %v3112_v59  ;;  %1997 = vmatprep.mubr.bf16.mxu0 %v3115_v61 }
  0xe6   : > { %1910 = vmatmul.mubr.bf16.gmra.mrb[32].mxu1 %v3114_v0  ;;  %1998 = vmatmul.mubr.bf16.gmra.mrb[36].mxu0 %v3118_v1 }
  0xe7   : > { %1917 = vmatprep.mubr.bf16.mxu1 %v2519_v2  ;;  %2005 = vmatprep.mubr.bf16.mxu0 %v2521_v3 }
  0xee   : > { %1918 = vmatmul.mubr.bf16.gmra.mrb[36].mxu1 %v2518_v4  ;;  %2006 = vmatmul.mubr.bf16.gmra.mrb[40].mxu0 %v2520_v5 }
  0xef   : > { %2045 = vmatprep.mubr.bf16.mxu1 %v3130_v6  ;;  %2924 = vmatprep.mubr.msk.bf16.mxu0 %vm3181_vm0, %v3180_v23 }
  0xf6   : > { %2046 = vmatmul.mubr.bf16.vlgmr.msra.gmra.mrb[40].mxu1 %v3128_v7  ;;  %2925 = vmatmul.mubr.bf16.vlgmr.msra.gmra.mrb[44].mxu0 %v3132_v8  ;;  %v3832_v7 = vld [vmem:[%s791_s8] ss:$0 sm:$0xff] }
  0xf7   : > { %2053 = vmatprep.mubr.bf16.mxu1 %v3133_v9  ;;  %2928 = vmatprep.mubr.msk.bf16.mxu0 %vm3181_vm0, %v3180_v23 }
  0xfe   : > { %2054 = vmatmul.mubr.bf16.gmra.mrb[44].mxu1 %v3135_v10  ;;  %2929 = vmatmul.mubr.bf16.gmra.mrb[48].mxu0 %v3136_v11 }
  0xff   : > { %2061 = vmatprep.mubr.bf16.mxu1 %v3137_v12  ;;  %2932 = vmatprep.mubr.msk.bf16.mxu0 %vm3181_vm0, %v3180_v23 }
 0x106   : > { %2062 = vmatmul.mubr.bf16.gmra.mrb[48].mxu1 %v3139_v13  ;;  %2933 = vmatmul.mubr.bf16.gmra.mrb[52].mxu0 %v3140_v14 }
 0x107   : > { %2069 = vmatprep.mubr.bf16.mxu1 %v3141_v15  ;;  %2936 = vmatprep.mubr.msk.bf16.mxu0 %vm3181_vm0, %v3180_v23 }
 0x10e   : > { %2070 = vmatmul.mubr.bf16.gmra.mrb[52].mxu1 %v3143_v16  ;;  %2937 = vmatmul.mubr.bf16.gmra.mrb[56].mxu0 %v3144_v17 }
 0x10f   : > { %2077 = vmatprep.mubr.bf16.mxu1 %v3145_v18  ;;  %2940 = vmatprep.mubr.msk.bf16.mxu0 %vm3181_vm0, %v3180_v23 }
 0x116   : > { %2078 = vmatmul.mubr.bf16.gmra.mrb[56].mxu1 %v3147_v19  ;;  %2941 = vmatmul.mubr.bf16.gmra.mrb[60].mxu0 %v3148_v20 }
 0x117   : > { %2085 = vmatprep.mubr.bf16.mxu1 %v3149_v21  ;;  %2944 = vmatprep.mubr.msk.bf16.mxu0 %vm3181_vm0, %v3180_v23 }
 0x11e   : > { %2086 = vmatmul.mubr.bf16.gmra.mrb[60].mxu1 %v3151_v24  ;;  %2945 = vmatmul.mubr.bf16.gmra.mrb[64].mxu0 %v3152_v25 }
 0x11f   : > { %2093 = vmatprep.mubr.bf16.mxu1 %v2523_v26  ;;  %2948 = vmatprep.mubr.msk.bf16.mxu0 %vm3181_vm0, %v3180_v23 }
 0x126   : > { %2094 = vmatmul.mubr.bf16.gmra.mrb[64].mxu1 %v2522_v27  ;;  %2949 = vmatmul.mubr.bf16.gmra.mrb[68].mxu0 %v3155_v28 }
 0x171   : > { %v2701_v29 = vpop.f32.mrb[0].mxu1  ;;  %v2677_v30 = vpop.f32.mrb[0].mxu0 }
 0x172   : > { %v2702_v31 = vpop.f32.mrb[1].mxu1  ;;  %v2678_v32 = vpop.f32.mrb[1].mxu0 }
 0x173   : > { %v3813_v33 = vadd.f32 %v2702_v31, %v2701_v29  ;;  %v2704_v34 = vpop.f32.mrb[2].mxu1  ;;  %v2679_v35 = vadd.f32 %v2678_v32, %v2677_v30  ;;  %v2680_v36 = vpop.f32.mrb[2].mxu0 }
 0x174   : > { %v2705_v37 = vpop.f32.mrb[3].mxu1  ;;  %v2681_v38 = vpop.f32.mrb[3].mxu0 }
 0x175   : > { %v3815_v39 = vadd.f32 %v2705_v37, %v2704_v34  ;;  %v2682_v23 = vadd.f32 %v2681_v38, %v2680_v36  ;;  %v1784_v10 = vadd.f32 %v2679_v35, %v3832_v7 }
 0x177   : > { %v1787_v17 = vadd.f32 %v2682_v23, %v3832_v7 }
 0x179   : > { %v2683_v40 = vpop.f32.mrb[4].mxu0  ;;  %v2707_v41 = vpop.f32.mrb[4].mxu1 }
 0x17a   : > { %v2684_v42 = vpop.f32.mrb[5].mxu0  ;;  %v2708_v43 = vpop.f32.mrb[5].mxu1 }
 0x17b   : > { %v2685_v44 = vadd.f32 %v2684_v42, %v2683_v40  ;;  %v2686_v45 = vpop.f32.mrb[6].mxu0  ;;  %v3817_v46 = vadd.f32 %v2708_v43, %v2707_v41  ;;  %v2710_v47 = vpop.f32.mrb[6].mxu1 }
 0x17c   : > { %v2687_v48 = vpop.f32.mrb[7].mxu0  ;;  %v2711_v49 = vpop.f32.mrb[7].mxu1 }
 0x17d   : > { %v2688_v50 = vadd.f32 %v2687_v48, %v2686_v45  ;;  %v3819_v51 = vadd.f32 %v2711_v49, %v2710_v47  ;;  %v1792_v29 = vadd.f32 %v2685_v44, %v3832_v7 }
 0x17f   : > { %v1795_v37 = vadd.f32 %v2688_v50, %v3832_v7 }
 0x181   : > { %v2689_v52 = vpop.f32.mrb[8].mxu0  ;;  %v2713_v53 = vpop.f32.mrb[8].mxu1 }
 0x182   : > { %v2690_v54 = vpop.f32.mrb[9].mxu0  ;;  %v2714_v55 = vpop.f32.mrb[9].mxu1 }
 0x183   : > { %v2691_v56 = vadd.f32 %v2690_v54, %v2689_v52  ;;  %v2692_v57 = vpop.f32.mrb[10].mxu0  ;;  %v3821_v58 = vadd.f32 %v2714_v55, %v2713_v53  ;;  %v2716_v59 = vpop.f32.mrb[10].mxu1 }
 0x184   : > { %v2693_v60 = vpop.f32.mrb[11].mxu0  ;;  %v2717_v61 = vpop.f32.mrb[11].mxu1 }
 0x185   : > { %v2694_v62 = vadd.f32 %v2693_v60, %v2692_v57  ;;  %v1800_v49 = vadd.f32 %v2691_v56, %v3832_v7 }
 0x187   : > { %v1803_v59 = vadd.f32 %v2694_v62, %v3832_v7 }
 0x189   : > { %v2695_v63 = vpop.f32.mrb[12].mxu0 }
 0x18a   : > { %v2696_v0 = vpop.f32.mrb[13].mxu0 }
 0x18b   : > { %v3825_v1 = vadd.f32 %v2696_v0, %v2695_v63  ;;  %v2698_v2 = vpop.f32.mrb[14].mxu0 }
 0x18c   : > { %v2699_v3 = vpop.f32.mrb[15].mxu0 }
 0x18d   : > { %v3827_v4 = vadd.f32 %v2699_v3, %v2698_v2 }
 0x191   : > { %v2735_v5 = vpop.f32.mrb[12].mxu1  ;;  %v2793_v6 = vpop.f32.mrb[16].mxu0 }
 0x192   : > { %v2736_v8 = vpop.f32.mrb[13].mxu1  ;;  %v2794_v9 = vpop.f32.mrb[17].mxu0 }
 0x193   : > { %v2737_v11 = vadd.f32 %v2736_v8, %v2735_v5  ;;  %v2738_v12 = vpop.f32.mrb[14].mxu1  ;;  %v2795_v13 = vadd.f32 %v2794_v9, %v2793_v6  ;;  %v2796_v14 = vpop.f32.mrb[18].mxu0  ;;  %v1808_v9 = vadd.f32 %v3825_v1, %v3832_v7 }
 0x194   : > { %v2739_v15 = vpop.f32.mrb[15].mxu1  ;;  %v2797_v16 = vpop.f32.mrb[19].mxu0 }
 0x195   : > { %v1872_v18 = vadd.f32 %v2737_v11, %v1784_v10  ;;  %v2740_v19 = vadd.f32 %v2739_v15, %v2738_v12  ;;  %v2798_v20 = vadd.f32 %v2797_v16, %v2796_v14  ;;  %v1811_v15 = vadd.f32 %v3827_v4, %v3832_v7 }
 0x197   : > { %v1875_v21 = vadd.f32 %v2740_v19, %v1787_v17  ;;  %v3836_v22 = vadd.f32 %v2795_v13, %v1872_v18 }
 0x199   : > { %v3838_v24 = vadd.f32 %v2798_v20, %v1875_v21  ;;  %v2741_v25 = vpop.f32.mrb[16].mxu1  ;;  %v2799_v26 = vpop.f32.mrb[20].mxu0 }
 0x19a   : > { %v2742_v27 = vpop.f32.mrb[17].mxu1  ;;  %v2800_v28 = vpop.f32.mrb[21].mxu0 }
 0x19b   : > { %v2743_v30 = vadd.f32 %v2742_v27, %v2741_v25  ;;  %v2744_v31 = vpop.f32.mrb[18].mxu1  ;;  %v2801_v32 = vadd.f32 %v2800_v28, %v2799_v26  ;;  %v2802_v34 = vpop.f32.mrb[22].mxu0  ;;  %v1816_v28 = vadd.f32 %v3813_v33, %v3832_v7 }
 0x19c   : > { %v2745_v35 = vpop.f32.mrb[19].mxu1  ;;  %v2803_v36 = vpop.f32.mrb[23].mxu0 }
 0x19d   : > { %v1880_v38 = vadd.f32 %v2743_v30, %v1792_v29  ;;  %v2746_v23 = vadd.f32 %v2745_v35, %v2744_v31  ;;  %v2804_v40 = vadd.f32 %v2803_v36, %v2802_v34  ;;  %v1819_v35 = vadd.f32 %v3815_v39, %v3832_v7 }
 0x19f   : > { %v1883_v41 = vadd.f32 %v2746_v23, %v1795_v37  ;;  %v3842_v42 = vadd.f32 %v2801_v32, %v1880_v38 }
 0x1a1   : > { %v3844_v43 = vadd.f32 %v2804_v40, %v1883_v41  ;;  %v2747_v45 = vpop.f32.mrb[20].mxu1  ;;  %v2805_v47 = vpop.f32.mrb[24].mxu0 }
 0x1a2   : > { %v2748_v48 = vpop.f32.mrb[21].mxu1  ;;  %v2806_v44 = vpop.f32.mrb[25].mxu0 }
 0x1a3   : > { %v2749_v52 = vadd.f32 %v2748_v48, %v2747_v45  ;;  %v2750_v53 = vpop.f32.mrb[22].mxu1  ;;  %v2807_v54 = vadd.f32 %v2806_v44, %v2805_v47  ;;  %v2808_v55 = vpop.f32.mrb[26].mxu0  ;;  %v1824_v44 = vadd.f32 %v3817_v46, %v3832_v7 }
 0x1a4   : > { %v2751_v57 = vpop.f32.mrb[23].mxu1  ;;  %v2809_v50 = vpop.f32.mrb[27].mxu0 }
 0x1a5   : > { %v1888_v60 = vadd.f32 %v2749_v52, %v1800_v49  ;;  %v2752_v61 = vadd.f32 %v2751_v57, %v2750_v53  ;;  %v2810_v63 = vadd.f32 %v2809_v50, %v2808_v55  ;;  %v1827_v57 = vadd.f32 %v3819_v51, %v3832_v7 }
 0x1a7   : > { %v1891_v0 = vadd.f32 %v2752_v61, %v1803_v59  ;;  %v3848_v2 = vadd.f32 %v2807_v54, %v1888_v60 }
 0x1a9   : > { %v3850_v3 = vadd.f32 %v2810_v63, %v1891_v0  ;;  %v2753_v5 = vpop.f32.mrb[24].mxu1  ;;  %v2811_v6 = vpop.f32.mrb[28].mxu0 }
 0x1aa   : > { %v2754_v8 = vpop.f32.mrb[25].mxu1  ;;  %v2812_v56 = vpop.f32.mrb[29].mxu0 }
 0x1ab   : > { %v2755_v10 = vadd.f32 %v2754_v8, %v2753_v5  ;;  %v2756_v11 = vpop.f32.mrb[26].mxu1  ;;  %v2813_v12 = vadd.f32 %v2812_v56, %v2811_v6  ;;  %v2814_v13 = vpop.f32.mrb[30].mxu0  ;;  %v1832_v56 = vadd.f32 %v3821_v58, %v3832_v7 }
 0x1ac   : > { %v2757_v62 = vpop.f32.mrb[27].mxu1  ;;  %v2815_v14 = vpop.f32.mrb[31].mxu0 }
 0x1ad   : > { %v1896_v16 = vadd.f32 %v2755_v10, %v1808_v9  ;;  %v2758_v17 = vadd.f32 %v2757_v62, %v2756_v11  ;;  %v2816_v18 = vadd.f32 %v2815_v14, %v2814_v13 }
 0x1af   : > { %v1899_v19 = vadd.f32 %v2758_v17, %v1811_v15  ;;  %v3856_v20 = vadd.f32 %v2813_v12, %v1896_v16 }
 0x1b1   : > { %v3858_v21 = vadd.f32 %v2816_v18, %v1899_v19  ;;  %v2759_v25 = vpop.f32.mrb[28].mxu1  ;;  %v2817_v26 = vpop.f32.mrb[32].mxu0 }
 0x1b2   : > { %v2760_v1 = vpop.f32.mrb[29].mxu1  ;;  %v2818_v27 = vpop.f32.mrb[33].mxu0 }
 0x1b3   : > { %v2761_v29 = vadd.f32 %v2760_v1, %v2759_v25  ;;  %v2762_v30 = vpop.f32.mrb[30].mxu1  ;;  %v2819_v31 = vadd.f32 %v2818_v27, %v2817_v26  ;;  %v2820_v32 = vpop.f32.mrb[34].mxu0 }
 0x1b4   : > { %v2763_v4 = vpop.f32.mrb[31].mxu1  ;;  %v2821_v34 = vpop.f32.mrb[35].mxu0 }
 0x1b5   : > { %v1904_v36 = vadd.f32 %v2761_v29, %v1816_v28  ;;  %v2764_v37 = vadd.f32 %v2763_v4, %v2762_v30  ;;  %v2822_v38 = vadd.f32 %v2821_v34, %v2820_v32 }
 0x1b7   : > { %v1907_v23 = vadd.f32 %v2764_v37, %v1819_v35  ;;  %v3864_v40 = vadd.f32 %v2819_v31, %v1904_v36 }
 0x1b9   : > { %v3866_v41 = vadd.f32 %v2822_v38, %v1907_v23  ;;  %v2765_v45 = vpop.f32.mrb[32].mxu1  ;;  %v2823_v47 = vpop.f32.mrb[36].mxu0 }
 0x1ba   : > { %v2766_v33 = vpop.f32.mrb[33].mxu1  ;;  %v2824_v48 = vpop.f32.mrb[37].mxu0 }
 0x1bb   : > { %v2767_v49 = vadd.f32 %v2766_v33, %v2765_v45  ;;  %v2768_v52 = vpop.f32.mrb[34].mxu1  ;;  %v2825_v53 = vadd.f32 %v2824_v48, %v2823_v47  ;;  %v2826_v54 = vpop.f32.mrb[38].mxu0 }
 0x1bc   : > { %v2769_v39 = vpop.f32.mrb[35].mxu1  ;;  %v2827_v55 = vpop.f32.mrb[39].mxu0 }
 0x1bd   : > { %v1912_v50 = vadd.f32 %v2767_v49, %v1824_v44  ;;  %v2770_v59 = vadd.f32 %v2769_v39, %v2768_v52  ;;  %v2828_v60 = vadd.f32 %v2827_v55, %v2826_v54 }
 0x1bf   : > { %v1915_v61 = vadd.f32 %v2770_v59, %v1827_v57  ;;  %v3872_v63 = vadd.f32 %v2825_v53, %v1912_v50 }
 0x1c1   : > { %v3874_v0 = vadd.f32 %v2828_v60, %v1915_v61  ;;  %v2771_v5 = vpop.f32.mrb[36].mxu1  ;;  %v2829_v6 = vpop.f32.mrb[40].mxu0 }
 0x1c2   : > { %v2772_v46 = vpop.f32.mrb[37].mxu1  ;;  %v2830_v8 = vpop.f32.mrb[41].mxu0 }
 0x1c3   : > { %v2773_v9 = vadd.f32 %v2772_v46, %v2771_v5  ;;  %v2774_v10 = vpop.f32.mrb[38].mxu1  ;;  %v2831_v11 = vadd.f32 %v2830_v8, %v2829_v6  ;;  %v2832_v12 = vpop.f32.mrb[42].mxu0 }
 0x1c4   : > { %v2775_v51 = vpop.f32.mrb[39].mxu1  ;;  %v2833_v13 = vpop.f32.mrb[43].mxu0 }
 0x1c5   : > { %v1920_v62 = vadd.f32 %v2773_v9, %v1832_v56 }
 0x1c7   : > { %v3878_v14 = vadd.f32 %v2831_v11, %v1920_v62 }
 0x1c9   : > { %v2851_v15 = vpop.f32.mrb[40].mxu1  ;;  %v2135_v16 = vpop.f32.mrb[44].mxu0 }
 0x1ca   : > { %v2852_v17 = vpop.f32.mrb[41].mxu1  ;;  %v2926_v18 = vpop.f32.mrb[45].mxu0 }
 0x1cb   : > { %v2853_v19 = vadd.f32 %v2852_v17, %v2851_v15  ;;  %v2854_v25 = vpop.f32.mrb[42].mxu1  ;;  %v2138_v26 = vpop.f32.mrb[46].mxu0 }
 0x1cc   : > { %v2855_v1 = vpop.f32.mrb[43].mxu1  ;;  %v2927_v27 = vpop.f32.mrb[47].mxu0 }
 0x1cd   : > { %v2856_v58 = vadd.f32 %v2855_v1, %v2854_v25  ;;  %v2048_v7 = vadd.f32 %v2853_v19, %v3836_v22 }
 0x1cf   : > { %v2136_v28 = vadd.f32 %v2135_v16, %v2048_v7  ;;  %v2051_v29 = vadd.f32 %v2856_v58, %v3838_v24 }
 0x1d1   : > { %v2202_v30 = vmul.f32 0.2, %v2136_v28  ;;  %v2139_v31 = vadd.f32 %v2138_v26, %v2051_v29  ;;  %v2857_v32 = vpop.f32.mrb[44].mxu1  ;;  %v2143_v4 = vpop.f32.mrb[48].mxu0  ;;  %vm2189_vm1 = vcmp.ge.f32.partialorder %v2136_v28, 0.0 }
 0x1d2   : > { %v2858_v34 = vpop.f32.mrb[45].mxu1  ;;  %v2930_v35 = vpop.f32.mrb[49].mxu0 }
 0x1d3   : > { %vm2190_vm2 = vcmp.ge.f32.partialorder %v2139_v31, 0.0  ;;  %v2203_v36 = vmul.f32 0.2, %v2139_v31  ;;  %v2859_v37 = vadd.f32 %v2858_v34, %v2857_v32  ;;  %v2860_v38 = vpop.f32.mrb[46].mxu1  ;;  %v2146_v23 = vpop.f32.mrb[50].mxu0  ;;  %v2215_v22 = vsel %vm2189_vm1, %v2136_v28, %v2202_v30 }
 0x1d4   : > { %v2861_v45 = vpop.f32.mrb[47].mxu1  ;;  %v2931_v47 = vpop.f32.mrb[51].mxu0 }
 0x1d5   : > { %v2216_v33 = vsel %vm2190_vm2, %v2139_v31, %v2203_v36  ;;  %v2862_v48 = vadd.f32 %v2861_v45, %v2860_v38  ;;  %v2056_v24 = vadd.f32 %v2859_v37, %v3842_v42 }
 0x1d6   : > { %v2629_v44 = vpack.c.bf16 %v2216_v33, %v2215_v22 }
 0x1d7   : > { %v2144_v49 = vadd.f32 %v2143_v4, %v2056_v24  ;;  %v2059_v52 = vadd.f32 %v2862_v48, %v3844_v43 }
 0x1d8   : > { %2630 = vst [vmem:[%s3886_s12] sm:$0xff] %v2629_v44  }
 0x1d9   : > { %v2204_v53 = vmul.f32 0.2, %v2144_v49  ;;  %v2147_v54 = vadd.f32 %v2146_v23, %v2059_v52  ;;  %v2863_v39 = vpop.f32.mrb[48].mxu1  ;;  %v2151_v55 = vpop.f32.mrb[52].mxu0  ;;  %vm2191_vm3 = vcmp.ge.f32.partialorder %v2144_v49, 0.0 }
 0x1da   : > { %v2864_v57 = vpop.f32.mrb[49].mxu1  ;;  %v2934_v50 = vpop.f32.mrb[53].mxu0 }
 0x1db   : > { %vm2192_vm4 = vcmp.ge.f32.partialorder %v2147_v54, 0.0  ;;  %v2205_v59 = vmul.f32 0.2, %v2147_v54  ;;  %v2865_v60 = vadd.f32 %v2864_v57, %v2863_v39  ;;  %v2866_v42 = vpop.f32.mrb[50].mxu1  ;;  %v2154_v61 = vpop.f32.mrb[54].mxu0  ;;  %v2217_v43 = vsel %vm2191_vm3, %v2144_v49, %v2204_v53 }
 0x1dc   : > { %v2867_v5 = vpop.f32.mrb[51].mxu1  ;;  %v2935_v6 = vpop.f32.mrb[55].mxu0 }
 0x1dd   : > { %v2218_v46 = vsel %vm2192_vm4, %v2147_v54, %v2205_v59  ;;  %v2868_v8 = vadd.f32 %v2867_v5, %v2866_v42  ;;  %v2064_v56 = vadd.f32 %v2865_v60, %v3848_v2 }
 0x1de   : > { %v2634_v9 = vpack.c.bf16 %v2218_v46, %v2217_v43 }
 0x1df   : > { %v2152_v10 = vadd.f32 %v2151_v55, %v2064_v56  ;;  %v2067_v11 = vadd.f32 %v2868_v8, %v3850_v3 }
 0x1e0   : > { %2656 = vst [vmem:[%s3886_s12 + $0x8] sm:$0xff] %v2634_v9  }
 0x1e1   : > { %v2206_v12 = vmul.f32 0.2, %v2152_v10  ;;  %v2155_v51 = vadd.f32 %v2154_v61, %v2067_v11  ;;  %v2869_v13 = vpop.f32.mrb[52].mxu1  ;;  %v2159_v62 = vpop.f32.mrb[56].mxu0  ;;  %vm2193_vm5 = vcmp.ge.f32.partialorder %v2152_v10, 0.0 }
 0x1e2   : > { %v2870_v15 = vpop.f32.mrb[53].mxu1  ;;  %v2938_v16 = vpop.f32.mrb[57].mxu0 }
 0x1e3   : > { %vm2194_vm6 = vcmp.ge.f32.partialorder %v2155_v51, 0.0  ;;  %v2207_v17 = vmul.f32 0.2, %v2155_v51  ;;  %v2871_v18 = vadd.f32 %v2870_v15, %v2869_v13  ;;  %v2872_v19 = vpop.f32.mrb[54].mxu1  ;;  %v2162_v25 = vpop.f32.mrb[58].mxu0  ;;  %v2219_v1 = vsel %vm2193_vm5, %v2152_v10, %v2206_v12 }
 0x1e4   : > { %v2873_v26 = vpop.f32.mrb[55].mxu1  ;;  %v2939_v2 = vpop.f32.mrb[59].mxu0 }
 0x1e5   : > { %v2220_v27 = vsel %vm2194_vm6, %v2155_v51, %v2207_v17  ;;  %v2874_v58 = vadd.f32 %v2873_v26, %v2872_v19  ;;  %v2072_v3 = vadd.f32 %v2871_v18, %v3856_v20 }
 0x1e6   : > { %v2639_v7 = vpack.c.bf16 %v2220_v27, %v2219_v1 }
 0x1e7   : > { %v2160_v28 = vadd.f32 %v2159_v62, %v2072_v3  ;;  %v2075_v29 = vadd.f32 %v2874_v58, %v3858_v21  ;;  %v2320_v58 = vld [vmem:[%s3886_s12 + $0x4] sm:$0xf] (%p3233_p5)  ;;  %v2322_v3 = vld [vmem:[%s3886_s12 + $0x8] sm:$0xf] (%p3233_p5) }
 0x1e8   : > { %2657 = vst [vmem:[%s3886_s12 + $0x10] sm:$0xff] %v2639_v7   ;;  %v2324_v7 = vld [vmem:[%s3886_s12 + $0xc] sm:$0xf] (%p3233_p5)  ;;  %2321 = vst [vmem:[%s2302_s14 + $0x8] sm:$0xf] (%p3233_p5), %v2320_v58 }
 0x1e9   : > { %v2208_v30 = vmul.f32 0.2, %v2160_v28  ;;  %v2163_v31 = vadd.f32 %v2162_v25, %v2075_v29  ;;  %v2875_v32 = vpop.f32.mrb[56].mxu1  ;;  %v2167_v4 = vpop.f32.mrb[60].mxu0  ;;  %vm2195_vm7 = vcmp.ge.f32.partialorder %v2160_v28, 0.0 }
 0x1ea   : > { %v2876_v34 = vpop.f32.mrb[57].mxu1  ;;  %v2942_v35 = vpop.f32.mrb[61].mxu0  ;;  %2323 = vst [vmem:[%s2302_s14 + $0x10] sm:$0xf] (%p3233_p5), %v2322_v3  ;;  %2325 = vst [vmem:[%s2302_s14 + $0x18] sm:$0xf] (%p3233_p5), %v2324_v7 }
 0x1eb   : > { %vm2196_vm8 = vcmp.ge.f32.partialorder %v2163_v31, 0.0  ;;  %v2209_v36 = vmul.f32 0.2, %v2163_v31  ;;  %v2877_v37 = vadd.f32 %v2876_v34, %v2875_v32  ;;  %v2878_v38 = vpop.f32.mrb[58].mxu1  ;;  %v2170_v23 = vpop.f32.mrb[62].mxu0  ;;  %v2221_v47 = vsel %vm2195_vm7, %v2160_v28, %v2208_v30 }
 0x1ec   : > { %v2879_v45 = vpop.f32.mrb[59].mxu1  ;;  %v2943_v20 = vpop.f32.mrb[63].mxu0 }
 0x1ed   : > { %v2222_v22 = vsel %vm2196_vm8, %v2163_v31, %v2209_v36  ;;  %v2880_v33 = vadd.f32 %v2879_v45, %v2878_v38  ;;  %v2080_v21 = vadd.f32 %v2877_v37, %v3864_v40 }
 0x1ee   : > { %v2644_v48 = vpack.c.bf16 %v2222_v22, %v2221_v47 }
 0x1ef   : > { %v2168_v24 = vadd.f32 %v2167_v4, %v2080_v21  ;;  %v2083_v44 = vadd.f32 %v2880_v33, %v3866_v41  ;;  %v2326_v28 = vld [vmem:[%s3886_s12 + $0x10] sm:$0xf] (%p3233_p5)  ;;  %v2328_v29 = vld [vmem:[%s3886_s12 + $0x14] sm:$0xf] (%p3233_p5) }
 0x1f0   : > { %2658 = vst [vmem:[%s3886_s12 + $0x18] sm:$0xff] %v2644_v48   ;;  %2327 = vst [vmem:[%s2302_s14 + $0x20] sm:$0xf] (%p3233_p5), %v2326_v28 }
 0x1f1   : > { %v2210_v49 = vmul.f32 0.2, %v2168_v24  ;;  %v2171_v52 = vadd.f32 %v2170_v23, %v2083_v44  ;;  %v2881_v53 = vpop.f32.mrb[60].mxu1  ;;  %v2175_v54 = vpop.f32.mrb[64].mxu0  ;;  %vm2197_vm9 = vcmp.ge.f32.partialorder %v2168_v24, 0.0 }
 0x1f2   : > { %v2882_v39 = vpop.f32.mrb[61].mxu1  ;;  %v2946_v55 = vpop.f32.mrb[65].mxu0  ;;  %2329 = vst [vmem:[%s2302_s14 + $0x28] sm:$0xf] (%p3233_p5), %v2328_v29 }
 0x1f3   : > { %vm2198_vm10 = vcmp.ge.f32.partialorder %v2171_v52, 0.0  ;;  %v2211_v57 = vmul.f32 0.2, %v2171_v52  ;;  %v2883_v50 = vadd.f32 %v2882_v39, %v2881_v53  ;;  %v2884_v59 = vpop.f32.mrb[62].mxu1  ;;  %v2178_v60 = vpop.f32.mrb[66].mxu0  ;;  %v2223_v61 = vsel %vm2197_vm9, %v2168_v24, %v2210_v49 }
 0x1f4   : > { %v2885_v42 = vpop.f32.mrb[63].mxu1  ;;  %v2947_v40 = vpop.f32.mrb[67].mxu0 }
 0x1f5   : > { %v2224_v5 = vsel %vm2198_vm10, %v2171_v52, %v2211_v57  ;;  %v2886_v6 = vadd.f32 %v2885_v42, %v2884_v59  ;;  %v2088_v41 = vadd.f32 %v2883_v50, %v3872_v63 }
 0x1f6   : > { %v2649_v43 = vpack.c.bf16 %v2224_v5, %v2223_v61 }
 0x1f7   : > { %v2176_v46 = vadd.f32 %v2175_v54, %v2088_v41  ;;  %v2091_v8 = vadd.f32 %v2886_v6, %v3874_v0  ;;  %v2330_v30 = vld [vmem:[%s3886_s12 + $0x18] sm:$0xf] (%p3233_p5)  ;;  %v2332_v31 = vld [vmem:[%s3886_s12 + $0x1c] sm:$0xf] (%p3233_p5) }
 0x1f8   : > { %2659 = vst [vmem:[%s3886_s12 + $0x20] sm:$0xff] %v2649_v43   ;;  %2331 = vst [vmem:[%s2302_s14 + $0x30] sm:$0xf] (%p3233_p5), %v2330_v30 }
 0x1f9   : > { %v2212_v56 = vmul.f32 0.2, %v2176_v46  ;;  %v2179_v9 = vadd.f32 %v2178_v60, %v2091_v8  ;;  %v2887_v10 = vpop.f32.mrb[64].mxu1  ;;  %v2183_v11 = vpop.f32.mrb[68].mxu0  ;;  %vm2199_vm11 = vcmp.ge.f32.partialorder %v2176_v46, 0.0 }
 0x1fa   : > { %v2888_v12 = vpop.f32.mrb[65].mxu1  ;;  %v2950_v51 = vpop.f32.mrb[69].mxu0  ;;  %2333 = vst [vmem:[%s2302_s14 + $0x38] sm:$0xf] (%p3233_p5), %v2332_v31 }
 0x1fb   : > { %vm2200_vm12 = vcmp.ge.f32.partialorder %v2179_v9, 0.0  ;;  %v2213_v13 = vmul.f32 0.2, %v2179_v9  ;;  %v2889_v62 = vadd.f32 %v2888_v12, %v2887_v10  ;;  %v2890_v15 = vpop.f32.mrb[66].mxu1  ;;  %v2186_v16 = vpop.f32.mrb[70].mxu0  ;;  %v2225_v18 = vsel %vm2199_vm11, %v2176_v46, %v2212_v56 }
 0x1fc   : > { %v2891_v63 = vpop.f32.mrb[67].mxu1  ;;  %v2951_v17 = vpop.f32.mrb[71].mxu0 }
 0x1fd   : > { %v2226_v19 = vsel %vm2200_vm12, %v2179_v9, %v2213_v13  ;;  %v2096_v0 = vadd.f32 %v2889_v62, %v3878_v14  ;;  %v2318_v14 = vld [vmem:[%s3886_s12] sm:$0xf] (%p3233_p5) }
 0x1fe   : > { %v2654_v25 = vpack.c.bf16 %v2226_v19, %v2225_v18  ;;  %2319 = vst [vmem:[%s2302_s14] sm:$0xf] (%p3233_p5), %v2318_v14 }
 0x1ff   : > { %v2184_v26 = vadd.f32 %v2183_v11, %v2096_v0  ;;  %v2334_v32 = vld [vmem:[%s3886_s12 + $0x20] sm:$0xf] (%p3233_p5)  ;;  %v2336_v4 = vld [vmem:[%s3886_s12 + $0x24] sm:$0xf] (%p3233_p5) }
 0x200   : > { %2660 = vst [vmem:[%s3886_s12 + $0x28] sm:$0xff] %v2654_v25   ;;  %2300 = sbr.rel (!%p3233_p5) target bundleno = 527 (0x20f), region = 77  ;;  %2335 = vst [vmem:[%s2302_s14 + $0x40] sm:$0xf] (%p3233_p5), %v2334_v32 }
 0x201   : > { %vm2201_vm13 = vcmp.ge.f32.partialorder %v2184_v26, 0.0  ;;  %v2214_v2 = vmul.f32 0.2, %v2184_v26  ;;  %2337 = vst [vmem:[%s2302_s14 + $0x48] sm:$0xf] (%p3233_p5), %v2336_v4 }
 0x203   : > { %v2227_v1 = vsel %vm2201_vm13, %v2184_v26, %v2214_v2 }
 0x204   : > { %v2625_v27 = vpack.c.bf16 %v2227_v1, %v2227_v1 }
 0x206   : > { %2293 = vst [vmem:[%s3886_s12 + $0x30] sm:$0x1] %v2625_v27 }
 0x207   : > { %v2338_v34 = vld [vmem:[%s3886_s12 + $0x28] sm:$0xf]  ;;  %v2340_v35 = vld [vmem:[%s3886_s12 + $0x2c] sm:$0xf] }
 0x208   : > { %2339 = vst [vmem:[%s2302_s14 + $0x50] sm:$0xf] %v2338_v34  ;;  %2341 = vst [vmem:[%s2302_s14 + $0x58] sm:$0xf] %v2340_v35 }
 0x20d   : > { %v2342_v36 = vld [vmem:[%s3886_s12 + $0x30] sm:$0xf] }
 0x20e   : > { %2343 = vst [vmem:[%s2302_s14 + $0x60] sm:$0xf] %v2342_v36 }
 0x20f PF: > { %p10_p11 = scmp.ge.s32.totalorder %s3221_s16, 4   ;;  %s3938_s12 = smov %s3174_s13 }
 0x210   : > { %s3939_s13 = smov %s3231_s19  ;;  %s3940_s14 = smov %s3221_s16 }
 0x211   :  { %12 = sbr.rel (!%p10_p11) target bundleno = 2 (0x2), region = 152 }

// kernel: discriminator_forward.7
= control target key start
LH: loop header
LB: loop body
LE: loop exit
PB: predicated region body
PF: predicated region fallthrough
CT: control target
= control target key end

     0   :  { %v11655_v21 = vmov 1966171168   ;;  %v1620_v23 = vlaneseq  ;;  %vm8988_vm0 = vcmask 82944   ;;  %s14257_s1 = inlined_call_operand.vmem [shape: bf16[12544,11], index: 1, kind: input, shape index: {}]   ;;  %s14258_s0 = inlined_call_operand.vmem [shape: bf16[2,12544], index: 0, kind: input, shape index: {}]   ;;  %s14259_s2 = inlined_call_operand.vmem [shape: f32[1,11], index: 2, kind: input, shape index: {}]   ;;  %s14260_s3 = inlined_call_operand.vmem [shape: f32[2,11], index: 3, kind: output, shape index: {}]  }
   0x1   :  { %v10859_v0 = vld [vmem:[%s14257_s1 + $0x40] sm:$0xff]   ;;  %v10863_v4 = vld [vmem:[%s14257_s1 + $0x48] sm:$0xff]   ;;  %v10867_v8 = vld [vmem:[%s14257_s1 + $0x50] sm:$0xff]   ;;  %v1618_v22 = vunpack.c.l.s4 %v11655_v21 }
   0x2   :  { %v10860_v1 = vld [vmem:[%s14257_s1] sm:$0xff]   ;;  %9780 = vmatprep.subr.bf16.mxu0 %v10859_v0  ;;  %v10864_v5 = vld [vmem:[%s14257_s1 + $0x8] sm:$0xff]   ;;  %v10868_v9 = vld [vmem:[%s14257_s1 + $0x10] sm:$0xff]   ;;  %v1621_v29 = vshrl.u32 %v1620_v23, 7 }
   0x3   :  { %v10861_v2 = vld [vmem:[%s14257_s1 + $0xc0] sm:$0xff]   ;;  %9781 = vmatpush3.bf16.msra.mxu0 %v10860_v1  ;;  %v10865_v6 = vld [vmem:[%s14257_s1 + $0xc8] sm:$0xff]   ;;  %v10869_v10 = vld [vmem:[%s14257_s1 + $0xd0] sm:$0xff]   ;;  %v1619_v28 = vunpack.c.0.s8 %v1618_v22 }
   0x4   :  { %v10862_v3 = vld [vmem:[%s14257_s1 + $0x80] sm:$0xff]   ;;  %9802 = vmatprep.subr.bf16.mxu1 %v10861_v2  ;;  %9782 = vmatprep.subr.bf16.mxu0 %v10863_v4  ;;  %v10866_v7 = vld [vmem:[%s14257_s1 + $0x88] sm:$0xff]   ;;  %v10870_v11 = vld [vmem:[%s14257_s1 + $0x90] sm:$0xff]  }
   0x5   :  { %9803 = vmatpush3.bf16.msra.mxu1 %v10862_v3  ;;  %v10871_v12 = vld [vmem:[%s14257_s1 + $0x58] sm:$0xff]   ;;  %v10875_v16 = vld [vmem:[%s14257_s1 + $0x60] sm:$0xff]   ;;  %v10879_v20 = vld [vmem:[%s14257_s1 + $0x68] sm:$0xff]   ;;  %v11763_v34 = vsub.s32 %v1619_v28, %v1621_v29 }
   0x6   :  { %9804 = vmatprep.subr.bf16.mxu1 %v10865_v6  ;;  %v10872_v13 = vld [vmem:[%s14257_s1 + $0x18] sm:$0xff]   ;;  %v10876_v17 = vld [vmem:[%s14257_s1 + $0x20] sm:$0xff]   ;;  %v10880_v24 = vld [vmem:[%s14257_s1 + $0x28] sm:$0xff]  }
   0x7   :  { %9783 = vmatpush3.bf16.msra.mxu0 %v10864_v5  ;;  %v10873_v14 = vld [vmem:[%s14257_s1 + $0xd8] sm:$0xff]   ;;  %v10877_v18 = vld [vmem:[%s14257_s1 + $0xe0] sm:$0xff]   ;;  %v10881_v25 = vld [vmem:[%s14257_s1 + $0xe8] sm:$0xff]  }
   0x8   :  { %9784 = vmatprep.subr.bf16.mxu0 %v10867_v8  ;;  %v10874_v15 = vld [vmem:[%s14257_s1 + $0x98] sm:$0xff]   ;;  %v10878_v19 = vld [vmem:[%s14257_s1 + $0xa0] sm:$0xff]   ;;  %v10882_v26 = vld [vmem:[%s14257_s1 + $0xa8] sm:$0xff]  }
   0x9   :  { %9805 = vmatpush3.bf16.msra.mxu1 %v10866_v7  ;;  %v10883_v27 = vld [vmem:[%s14257_s1 + $0x70] sm:$0xff]   ;;  %v10887_v33 = vld [vmem:[%s14257_s1 + $0x78] sm:$0xff]   ;;  %v15_v37 = vld [vmem:[%s14258_s0] sm:$0xff] }
   0xa   :  { %9806 = vmatprep.subr.bf16.mxu1 %v10869_v10  ;;  %v10884_v30 = vld [vmem:[%s14257_s1 + $0x30] sm:$0xff]   ;;  %v10888_v35 = vld [vmem:[%s14257_s1 + $0x38] sm:$0xff]   ;;  %v1616_v38 = vcombine.high %v15_v37, %v15_v37  ;;  %v1623_v39 = vrot.slane %v15_v37, %v11763_v34  ;;  %v10892_v41 = vld [vmem:[%s14257_s1 + $0x140] sm:$0xff]  }
   0xb   :  { %9785 = vmatpush3.bf16.msra.mxu0 %v10868_v9  ;;  %v10885_v31 = vld [vmem:[%s14257_s1 + $0xf0] sm:$0xff]   ;;  %v10889_v36 = vld [vmem:[%s14257_s1 + $0xf8] sm:$0xff]   ;;  %v10893_v44 = vld [vmem:[%s14257_s1 + $0x100] sm:$0xff]  }
   0xc   :  { %9786 = vmatprep.subr.bf16.mxu0 %v10871_v12  ;;  %v10886_v32 = vld [vmem:[%s14257_s1 + $0xb0] sm:$0xff]   ;;  %v10891_v40 = vld [vmem:[%s14257_s1 + $0xb8] sm:$0xff]   ;;  %v1631_v42 = vcombine.high %v1623_v39, %v1623_v39  ;;  %v1639_v43 = vrot.slane %v1623_v39, %v11763_v34  ;;  %v11786_v45 = vrot.slane %v1616_v38, %v11763_v34  ;;  %v10894_v46 = vld [vmem:[%s14257_s1 + $0x1c0] sm:$0xff]  }
   0xd   :  { %9807 = vmatpush3.bf16.msra.mxu1 %v10870_v11  ;;  %v10895_v48 = vld [vmem:[%s14257_s1 + $0x180] sm:$0xff]   ;;  %v10896_v51 = vld [vmem:[%s14257_s1 + $0x148] sm:$0xff]   ;;  %v10900_v58 = vld [vmem:[%s14257_s1 + $0x150] sm:$0xff]  }
   0xe   :  { %9808 = vmatprep.subr.bf16.mxu1 %v10873_v14  ;;  %v1653_v47 = vrot.slane %v1631_v42, %v11763_v34  ;;  %v1632_v49 = vcombine.high %v11786_v45, %v11786_v45  ;;  %v1661_v50 = vcombine.high %v1639_v43, %v1639_v43  ;;  %v10897_v53 = vld [vmem:[%s14257_s1 + $0x108] sm:$0xff]   ;;  %v10901_v59 = vld [vmem:[%s14257_s1 + $0x110] sm:$0xff]   ;;  %v10904_v62 = vld [vmem:[%s14257_s1 + $0x158] sm:$0xff]  }
   0xf   :  { %9787 = vmatpush3.bf16.msra.mxu0 %v10872_v13  ;;  %v10898_v55 = vld [vmem:[%s14257_s1 + $0x1c8] sm:$0xff]   ;;  %v10902_v60 = vld [vmem:[%s14257_s1 + $0x1d0] sm:$0xff]   ;;  %v10905_v63 = vld [vmem:[%s14257_s1 + $0x118] sm:$0xff]  }
  0x10   :  { %9788 = vmatprep.subr.bf16.mxu0 %v10875_v16  ;;  %7060 = vmatprep.mubr.bf16.mxu0 %v1653_v47  ;;  %v1663_v52 = vcombine.high %v1653_v47, %v1653_v47  ;;  %v1660_v54 = vrot.slane %v1632_v49, %v11763_v34  ;;  %v10899_v56 = vld [vmem:[%s14257_s1 + $0x188] sm:$0xff]   ;;  %v10903_v61 = vld [vmem:[%s14257_s1 + $0x190] sm:$0xff]   ;;  %v10906_v0 = vld [vmem:[%s14257_s1 + $0x1d8] sm:$0xff]  }
  0x11   :  { %9809 = vmatpush3.bf16.msra.mxu1 %v10874_v15  ;;  %v10907_v1 = vld [vmem:[%s14257_s1 + $0x198] sm:$0xff]   ;;  %v10908_v2 = vld [vmem:[%s14257_s1 + $0x160] sm:$0xff]   ;;  %v10912_v6 = vld [vmem:[%s14257_s1 + $0x168] sm:$0xff]  }
  0x12   :  { %9810 = vmatprep.subr.bf16.mxu1 %v10877_v18  ;;  %7100 = vmatprep.mubr.bf16.mxu1 %v1663_v52  ;;  %v1664_v57 = vcombine.high %v1660_v54, %v1660_v54  ;;  %v10909_v3 = vld [vmem:[%s14257_s1 + $0x120] sm:$0xff]   ;;  %v10913_v7 = vld [vmem:[%s14257_s1 + $0x128] sm:$0xff]   ;;  %v10916_v10 = vld [vmem:[%s14257_s1 + $0x170] sm:$0xff]   ;;  %v1646_v18 = vrot.slane %v11786_v45, %v11763_v34 }
  0x13   :  { %9789 = vmatpush3.bf16.msra.mxu0 %v10876_v17  ;;  %v10910_v4 = vld [vmem:[%s14257_s1 + $0x1e0] sm:$0xff]   ;;  %v10914_v8 = vld [vmem:[%s14257_s1 + $0x1e8] sm:$0xff]   ;;  %v10917_v11 = vld [vmem:[%s14257_s1 + $0x130] sm:$0xff]  }
  0x14   :  { %9790 = vmatprep.subr.bf16.mxu0 %v10879_v20  ;;  %v10911_v5 = vld [vmem:[%s14257_s1 + $0x1a0] sm:$0xff]   ;;  %v10915_v9 = vld [vmem:[%s14257_s1 + $0x1a8] sm:$0xff]   ;;  %v10918_v12 = vld [vmem:[%s14257_s1 + $0x1f0] sm:$0xff]   ;;  %v1662_v23 = vcombine.high %v1646_v18, %v1646_v18 }
  0x15   :  { %9811 = vmatpush3.bf16.msra.mxu1 %v10878_v19  ;;  %v10919_v13 = vld [vmem:[%s14257_s1 + $0x1b0] sm:$0xff]   ;;  %v10920_v14 = vld [vmem:[%s14257_s1 + $0x178] sm:$0xff]   ;;  %v10924_v19 = vld [vmem:[%s14257_s1 + $0x240] sm:$0xff]  }
  0x16   :  { %9812 = vmatprep.subr.bf16.mxu1 %v10881_v25  ;;  %v10921_v15 = vld [vmem:[%s14257_s1 + $0x138] sm:$0xff]   ;;  %v10925_v20 = vld [vmem:[%s14257_s1 + $0x200] sm:$0xff]   ;;  %v10929_v25 = vld [vmem:[%s14257_s1 + $0x208] sm:$0xff]  }
  0x17   :  { %9791 = vmatpush3.bf16.msra.mxu0 %v10880_v24  ;;  %v10922_v16 = vld [vmem:[%s14257_s1 + $0x1f8] sm:$0xff]   ;;  %v10926_v21 = vld [vmem:[%s14257_s1 + $0x2c0] sm:$0xff]   ;;  %v10928_v24 = vld [vmem:[%s14257_s1 + $0x248] sm:$0xff]  }
  0x18   :  { %9792 = vmatprep.subr.bf16.mxu0 %v10883_v27  ;;  %v10923_v17 = vld [vmem:[%s14257_s1 + $0x1b8] sm:$0xff]   ;;  %v10927_v22 = vld [vmem:[%s14257_s1 + $0x280] sm:$0xff]   ;;  %v10931_v27 = vld [vmem:[%s14257_s1 + $0x288] sm:$0xff]  }
  0x19   :  { %9813 = vmatpush3.bf16.msra.mxu1 %v10882_v26  ;;  %v10930_v26 = vld [vmem:[%s14257_s1 + $0x2c8] sm:$0xff]   ;;  %v10932_v28 = vld [vmem:[%s14257_s1 + $0x250] sm:$0xff]   ;;  %v10940_v37 = vld [vmem:[%s14257_s1 + $0x260] sm:$0xff]  }
  0x1a   :  { %9814 = vmatprep.subr.bf16.mxu1 %v10885_v31  ;;  %v10933_v29 = vld [vmem:[%s14257_s1 + $0x210] sm:$0xff]   ;;  %v10941_v38 = vld [vmem:[%s14257_s1 + $0x220] sm:$0xff]   ;;  %v10945_v42 = vld [vmem:[%s14257_s1 + $0x228] sm:$0xff]  }
  0x1b   :  { %9793 = vmatpush3.bf16.msra.mxu0 %v10884_v30  ;;  %v10934_v30 = vld [vmem:[%s14257_s1 + $0x2d0] sm:$0xff]   ;;  %v10942_v39 = vld [vmem:[%s14257_s1 + $0x2e0] sm:$0xff]   ;;  %v10952_v49 = vld [vmem:[%s14257_s1 + $0x278] sm:$0xff]  }
  0x1c   :  { %9794 = vmatprep.subr.bf16.mxu0 %v10887_v33  ;;  %v10935_v31 = vld [vmem:[%s14257_s1 + $0x290] sm:$0xff]   ;;  %v10937_v33 = vld [vmem:[%s14257_s1 + $0x218] sm:$0xff]   ;;  %v16_v52 = vld [vmem:[%s14258_s0 + $0x8] sm:$0xff] }
  0x1d   :  { %9815 = vmatpush3.bf16.msra.mxu1 %v10886_v32  ;;  %v10936_v32 = vld [vmem:[%s14257_s1 + $0x258] sm:$0xff]   ;;  %v10948_v45 = vld [vmem:[%s14257_s1 + $0x270] sm:$0xff]  }
  0x1e   :  { %9816 = vmatprep.subr.bf16.mxu1 %v10889_v36  ;;  %v10939_v36 = vld [vmem:[%s14257_s1 + $0x298] sm:$0xff]   ;;  %v10950_v47 = vld [vmem:[%s14257_s1 + $0x2f0] sm:$0xff]  }
  0x1f   :  { %9795 = vmatpush3.bf16.msra.mxu0 %v10888_v35  ;;  %v10938_v35 = vld [vmem:[%s14257_s1 + $0x2d8] sm:$0xff]  }
  0x20   :  { %9824 = vmatprep.subr.bf16.mxu0 %v10892_v41  ;;  %v10944_v41 = vld [vmem:[%s14257_s1 + $0x268] sm:$0xff]  }
  0x21   :  { %9817 = vmatpush3.bf16.msra.mxu1 %v10891_v40  ;;  %v10943_v40 = vld [vmem:[%s14257_s1 + $0x2a0] sm:$0xff]  }
  0x22   :  { %9846 = vmatprep.subr.bf16.mxu1 %v10894_v46  ;;  %7061 = vmatmul.mubr.bf16.vlgmr.msra.gmra.mrb[0].mxu0 %v1639_v43  ;;  %v10946_v43 = vld [vmem:[%s14257_s1 + $0x2e8] sm:$0xff]   ;;  %v10949_v46 = vld [vmem:[%s14257_s1 + $0x230] sm:$0xff]  }
  0x23   :  { %9825 = vmatpush3.bf16.msra.mxu0 %v10893_v44  ;;  %7140 = vmatprep.mubr.bf16.mxu0 %v1660_v54  ;;  %v10947_v44 = vld [vmem:[%s14257_s1 + $0x2a8] sm:$0xff]   ;;  %v10955_v54 = vld [vmem:[%s14257_s1 + $0x2b8] sm:$0xff]  }
  0x24   :  { %7101 = vmatmul.mubr.bf16.vlgmr.msra.gmra.mrb[0].mxu1 %v1661_v50  ;;  %9826 = vmatprep.subr.bf16.mxu0 %v10896_v51  ;;  %v10953_v50 = vld [vmem:[%s14257_s1 + $0x238] sm:$0xff]  }
  0x25   :  { %9847 = vmatpush3.bf16.msra.mxu1 %v10895_v48  ;;  %7180 = vmatprep.mubr.bf16.mxu1 %v1664_v57  ;;  %v10951_v48 = vld [vmem:[%s14257_s1 + $0x2b0] sm:$0xff]   ;;  %v10954_v51 = vld [vmem:[%s14257_s1 + $0x2f8] sm:$0xff]  }
  0x26   :  { %9848 = vmatprep.subr.bf16.mxu1 %v10898_v55  ;;  %v1665_v55 = vcombine.high %v16_v52, %v16_v52 }
  0x27   :  { %9827 = vmatpush3.bf16.msra.mxu0 %v10897_v53  ;;  %v1672_v53 = vrot.slane %v16_v52, %v11763_v34  ;;  %v11005_v52 = vld [vmem:[%s14257_s1 + $0x460] sm:$0xff]  }
  0x28   :  { %9828 = vmatprep.subr.bf16.mxu0 %v10900_v58 }
  0x29   :  { %9849 = vmatpush3.bf16.msra.mxu1 %v10899_v56  ;;  %v10956_v56 = vld [vmem:[%s14257_s1 + $0x340] sm:$0xff]   ;;  %v1680_v57 = vcombine.high %v1672_v53, %v1672_v53  ;;  %v1688_v58 = vrot.slane %v1672_v53, %v11763_v34 }
  0x2a   :  { %9850 = vmatprep.subr.bf16.mxu1 %v10902_v60  ;;  %v11992_v60 = vrot.slane %v1665_v55, %v11763_v34  ;;  %v11006_v53 = vld [vmem:[%s14257_s1 + $0x420] sm:$0xff]  }
  0x2b   :  { %9829 = vmatpush3.bf16.msra.mxu0 %v10901_v59  ;;  %v10957_v59 = vld [vmem:[%s14257_s1 + $0x300] sm:$0xff]  }
  0x2c   :  { %9830 = vmatprep.subr.bf16.mxu0 %v10904_v62  ;;  %v1702_v62 = vrot.slane %v1680_v57, %v11763_v34  ;;  %v11008_v55 = vld [vmem:[%s14257_s1 + $0x4a0] sm:$0xff]   ;;  %v11010_v57 = vld [vmem:[%s14257_s1 + $0x428] sm:$0xff]  }
  0x2d   :  { %9851 = vmatpush3.bf16.msra.mxu1 %v10903_v61  ;;  %v10958_v61 = vld [vmem:[%s14257_s1 + $0x3c0] sm:$0xff]  }
  0x2e   :  { %9852 = vmatprep.subr.bf16.mxu1 %v10906_v0  ;;  %v1681_v0 = vcombine.high %v11992_v60, %v11992_v60 }
  0x2f   :  { %9831 = vmatpush3.bf16.msra.mxu0 %v10905_v63  ;;  %v10959_v63 = vld [vmem:[%s14257_s1 + $0x380] sm:$0xff]  }
  0x30   :  { %9832 = vmatprep.subr.bf16.mxu0 %v10908_v2  ;;  %v10960_v2 = vld [vmem:[%s14257_s1 + $0x348] sm:$0xff]  }
  0x31   :  { %9853 = vmatpush3.bf16.msra.mxu1 %v10907_v1  ;;  %v1710_v1 = vcombine.high %v1688_v58, %v1688_v58 }
  0x32   :  { %9854 = vmatprep.subr.bf16.mxu1 %v10910_v4  ;;  %v10961_v4 = vld [vmem:[%s14257_s1 + $0x308] sm:$0xff]  }
  0x33   :  { %9833 = vmatpush3.bf16.msra.mxu0 %v10909_v3  ;;  %v1712_v3 = vcombine.high %v1702_v62, %v1702_v62 }
  0x34   :  { %9834 = vmatprep.subr.bf16.mxu0 %v10912_v6  ;;  %v10962_v6 = vld [vmem:[%s14257_s1 + $0x3c8] sm:$0xff]  }
  0x35   :  { %9855 = vmatpush3.bf16.msra.mxu1 %v10911_v5  ;;  %v1709_v5 = vrot.slane %v1681_v0, %v11763_v34  ;;  %v11017_v0 = vld [vmem:[%s14257_s1 + $0x478] sm:$0xff]  }
  0x36   :  { %9856 = vmatprep.subr.bf16.mxu1 %v10914_v8 }
  0x37   :  { %9835 = vmatpush3.bf16.msra.mxu0 %v10913_v7  ;;  %v10963_v7 = vld [vmem:[%s14257_s1 + $0x388] sm:$0xff]   ;;  %v1713_v8 = vcombine.high %v1709_v5, %v1709_v5 }
  0x38   :  { %9836 = vmatprep.subr.bf16.mxu0 %v10916_v10  ;;  %v10965_v10 = vld [vmem:[%s14257_s1 + $0x310] sm:$0xff]  }
  0x39   :  { %9857 = vmatpush3.bf16.msra.mxu1 %v10915_v9  ;;  %v10964_v9 = vld [vmem:[%s14257_s1 + $0x350] sm:$0xff]  }
  0x3a   :  { %9858 = vmatprep.subr.bf16.mxu1 %v10918_v12  ;;  %v10967_v12 = vld [vmem:[%s14257_s1 + $0x390] sm:$0xff]  }
  0x3b   :  { %9837 = vmatpush3.bf16.msra.mxu0 %v10917_v11  ;;  %v10966_v11 = vld [vmem:[%s14257_s1 + $0x3d0] sm:$0xff]  }
  0x3c   :  { %9838 = vmatprep.subr.bf16.mxu0 %v10920_v14  ;;  %v10969_v14 = vld [vmem:[%s14257_s1 + $0x318] sm:$0xff]  }
  0x3d   :  { %9859 = vmatpush3.bf16.msra.mxu1 %v10919_v13  ;;  %v10968_v13 = vld [vmem:[%s14257_s1 + $0x358] sm:$0xff]  }
  0x3e   :  { %9860 = vmatprep.subr.bf16.mxu1 %v10922_v16  ;;  %v10971_v16 = vld [vmem:[%s14257_s1 + $0x398] sm:$0xff]  }
  0x3f   :  { %9839 = vmatpush3.bf16.msra.mxu0 %v10921_v15  ;;  %v10970_v15 = vld [vmem:[%s14257_s1 + $0x3d8] sm:$0xff]  }
  0x40   :  { %9868 = vmatprep.subr.bf16.mxu0 %v10924_v19  ;;  %v10974_v19 = vld [vmem:[%s14257_s1 + $0x3e0] sm:$0xff]  }
  0x41   :  { %9861 = vmatpush3.bf16.msra.mxu1 %v10923_v17  ;;  %v10972_v17 = vld [vmem:[%s14257_s1 + $0x360] sm:$0xff]  }
  0x42   :  { %7141 = vmatmul.mubr.bf16.vlgmr.msra.gmra.mrb[4].mxu0 %v1646_v18  ;;  %9890 = vmatprep.subr.bf16.mxu1 %v10926_v21  ;;  %v10973_v18 = vld [vmem:[%s14257_s1 + $0x320] sm:$0xff]   ;;  %v10976_v21 = vld [vmem:[%s14257_s1 + $0x368] sm:$0xff]  }
  0x43   :  { %9869 = vmatpush3.bf16.msra.mxu0 %v10925_v20  ;;  %7220 = vmatprep.mubr.bf16.mxu0 %v1702_v62  ;;  %v10975_v20 = vld [vmem:[%s14257_s1 + $0x3a0] sm:$0xff]   ;;  %v11015_v62 = vld [vmem:[%s14257_s1 + $0x4f0] sm:$0xff]  }
  0x44   :  { %7181 = vmatmul.mubr.bf16.vlgmr.msra.gmra.mrb[4].mxu1 %v1662_v23  ;;  %9870 = vmatprep.subr.bf16.mxu0 %v10928_v24  ;;  %v10978_v23 = vld [vmem:[%s14257_s1 + $0x3e8] sm:$0xff]  }
  0x45   :  { %9891 = vmatpush3.bf16.msra.mxu1 %v10927_v22  ;;  %7260 = vmatprep.mubr.bf16.mxu1 %v1712_v3  ;;  %v10977_v22 = vld [vmem:[%s14257_s1 + $0x328] sm:$0xff]   ;;  %v17_v3 = vld [vmem:[%s14258_s0 + $0x10] sm:$0xff] }
  0x46   :  { %9892 = vmatprep.subr.bf16.mxu1 %v10930_v26  ;;  %v10979_v24 = vld [vmem:[%s14257_s1 + $0x3a8] sm:$0xff]   ;;  %v10981_v26 = vld [vmem:[%s14257_s1 + $0x330] sm:$0xff]  }
  0x47   :  { %9871 = vmatpush3.bf16.msra.mxu0 %v10929_v25  ;;  %v10980_v25 = vld [vmem:[%s14257_s1 + $0x370] sm:$0xff]  }
  0x48   :  { %9872 = vmatprep.subr.bf16.mxu0 %v10932_v28  ;;  %v10983_v28 = vld [vmem:[%s14257_s1 + $0x3b0] sm:$0xff]  }
  0x49   :  { %9893 = vmatpush3.bf16.msra.mxu1 %v10931_v27  ;;  %v10982_v27 = vld [vmem:[%s14257_s1 + $0x3f0] sm:$0xff]  }
  0x4a   :  { %9894 = vmatprep.subr.bf16.mxu1 %v10934_v30  ;;  %v10985_v30 = vld [vmem:[%s14257_s1 + $0x338] sm:$0xff]  }
  0x4b   :  { %9873 = vmatpush3.bf16.msra.mxu0 %v10933_v29  ;;  %v10984_v29 = vld [vmem:[%s14257_s1 + $0x378] sm:$0xff]  }
  0x4c   :  { %9874 = vmatprep.subr.bf16.mxu0 %v10936_v32  ;;  %v10988_v32 = vld [vmem:[%s14257_s1 + $0x3b8] sm:$0xff]  }
  0x4d   :  { %9895 = vmatpush3.bf16.msra.mxu1 %v10935_v31  ;;  %v10986_v31 = vld [vmem:[%s14257_s1 + $0x3f8] sm:$0xff]  }
  0x4e   :  { %9896 = vmatprep.subr.bf16.mxu1 %v10938_v35  ;;  %v10989_v35 = vld [vmem:[%s14257_s1 + $0x440] sm:$0xff]  }
  0x4f   :  { %9875 = vmatpush3.bf16.msra.mxu0 %v10937_v33  ;;  %v1695_v33 = vrot.slane %v11992_v60, %v11763_v34  ;;  %v11013_v60 = vld [vmem:[%s14257_s1 + $0x470] sm:$0xff]  }
  0x50   :  { %9876 = vmatprep.subr.bf16.mxu0 %v10940_v37  ;;  %v10991_v37 = vld [vmem:[%s14257_s1 + $0x4c0] sm:$0xff]  }
  0x51   :  { %9897 = vmatpush3.bf16.msra.mxu1 %v10939_v36  ;;  %v10990_v36 = vld [vmem:[%s14257_s1 + $0x400] sm:$0xff]  }
  0x52   :  { %9898 = vmatprep.subr.bf16.mxu1 %v10942_v39  ;;  %v1711_v39 = vcombine.high %v1695_v33, %v1695_v33 }
  0x53   :  { %9877 = vmatpush3.bf16.msra.mxu0 %v10941_v38  ;;  %v10992_v38 = vld [vmem:[%s14257_s1 + $0x480] sm:$0xff]  }
  0x54   :  { %9878 = vmatprep.subr.bf16.mxu0 %v10944_v41  ;;  %v10994_v41 = vld [vmem:[%s14257_s1 + $0x408] sm:$0xff]  }
  0x55   :  { %9899 = vmatpush3.bf16.msra.mxu1 %v10943_v40  ;;  %v10993_v40 = vld [vmem:[%s14257_s1 + $0x448] sm:$0xff]  }
  0x56   :  { %9900 = vmatprep.subr.bf16.mxu1 %v10946_v43  ;;  %v10996_v43 = vld [vmem:[%s14257_s1 + $0x488] sm:$0xff]  }
  0x57   :  { %9879 = vmatpush3.bf16.msra.mxu0 %v10945_v42  ;;  %v10995_v42 = vld [vmem:[%s14257_s1 + $0x4c8] sm:$0xff]  }
  0x58   :  { %9880 = vmatprep.subr.bf16.mxu0 %v10948_v45  ;;  %v10998_v45 = vld [vmem:[%s14257_s1 + $0x410] sm:$0xff]  }
  0x59   :  { %9901 = vmatpush3.bf16.msra.mxu1 %v10947_v44  ;;  %v10997_v44 = vld [vmem:[%s14257_s1 + $0x450] sm:$0xff]  }
  0x5a   :  { %9902 = vmatprep.subr.bf16.mxu1 %v10950_v47  ;;  %v11000_v47 = vld [vmem:[%s14257_s1 + $0x490] sm:$0xff]  }
  0x5b   :  { %9881 = vmatpush3.bf16.msra.mxu0 %v10949_v46  ;;  %v10999_v46 = vld [vmem:[%s14257_s1 + $0x4d0] sm:$0xff]  }
  0x5c   :  { %9882 = vmatprep.subr.bf16.mxu0 %v10952_v49  ;;  %v11002_v49 = vld [vmem:[%s14257_s1 + $0x418] sm:$0xff]  }
  0x5d   :  { %9903 = vmatpush3.bf16.msra.mxu1 %v10951_v48  ;;  %v11001_v48 = vld [vmem:[%s14257_s1 + $0x458] sm:$0xff]  }
  0x5e   :  { %9904 = vmatprep.subr.bf16.mxu1 %v10954_v51  ;;  %v11004_v51 = vld [vmem:[%s14257_s1 + $0x498] sm:$0xff]  }
  0x5f   :  { %9883 = vmatpush3.bf16.msra.mxu0 %v10953_v50  ;;  %v11003_v50 = vld [vmem:[%s14257_s1 + $0x4d8] sm:$0xff]  }
  0x60   :  { %9912 = vmatprep.subr.bf16.mxu0 %v10956_v56  ;;  %v11009_v56 = vld [vmem:[%s14257_s1 + $0x468] sm:$0xff]  }
  0x61   :  { %9905 = vmatpush3.bf16.msra.mxu1 %v10955_v54  ;;  %v11007_v54 = vld [vmem:[%s14257_s1 + $0x4e0] sm:$0xff]  }
  0x62   :  { %7221 = vmatmul.mubr.bf16.vlgmr.msra.gmra.mrb[8].mxu0 %v1688_v58  ;;  %9934 = vmatprep.subr.bf16.mxu1 %v10958_v61  ;;  %v11011_v58 = vld [vmem:[%s14257_s1 + $0x4e8] sm:$0xff]   ;;  %v11014_v61 = vld [vmem:[%s14257_s1 + $0x430] sm:$0xff]  }
  0x63   :  { %9913 = vmatpush3.bf16.msra.mxu0 %v10957_v59  ;;  %7300 = vmatprep.mubr.bf16.mxu0 %v1709_v5  ;;  %v11012_v59 = vld [vmem:[%s14257_s1 + $0x4a8] sm:$0xff]   ;;  %v11020_v5 = vld [vmem:[%s14257_s1 + $0x4b8] sm:$0xff]  }
  0x64   :  { %7261 = vmatmul.mubr.bf16.vlgmr.msra.gmra.mrb[8].mxu1 %v1710_v1  ;;  %9914 = vmatprep.subr.bf16.mxu0 %v10960_v2  ;;  %v11018_v1 = vld [vmem:[%s14257_s1 + $0x438] sm:$0xff]  }
  0x65   :  { %9935 = vmatpush3.bf16.msra.mxu1 %v10959_v63  ;;  %7340 = vmatprep.mubr.bf16.mxu1 %v1713_v8  ;;  %v11016_v63 = vld [vmem:[%s14257_s1 + $0x4b0] sm:$0xff]   ;;  %v11019_v2 = vld [vmem:[%s14257_s1 + $0x4f8] sm:$0xff]  }
  0x66   :  { %9936 = vmatprep.subr.bf16.mxu1 %v10962_v6  ;;  %v1714_v6 = vcombine.high %v17_v3, %v17_v3 }
  0x67   :  { %9915 = vmatpush3.bf16.msra.mxu0 %v10961_v4  ;;  %v1721_v4 = vrot.slane %v17_v3, %v11763_v34  ;;  %v11070_v3 = vld [vmem:[%s14257_s1 + $0x660] sm:$0xff]  }
  0x68   :  { %9916 = vmatprep.subr.bf16.mxu0 %v10964_v9 }
  0x69   :  { %9937 = vmatpush3.bf16.msra.mxu1 %v10963_v7  ;;  %v11021_v7 = vld [vmem:[%s14257_s1 + $0x540] sm:$0xff]   ;;  %v1729_v8 = vcombine.high %v1721_v4, %v1721_v4  ;;  %v1737_v9 = vrot.slane %v1721_v4, %v11763_v34 }
  0x6a   :  { %9938 = vmatprep.subr.bf16.mxu1 %v10966_v11  ;;  %v12198_v11 = vrot.slane %v1714_v6, %v11763_v34  ;;  %v11071_v4 = vld [vmem:[%s14257_s1 + $0x620] sm:$0xff]  }
  0x6b   :  { %9917 = vmatpush3.bf16.msra.mxu0 %v10965_v10  ;;  %v11022_v10 = vld [vmem:[%s14257_s1 + $0x500] sm:$0xff]  }
  0x6c   :  { %9918 = vmatprep.subr.bf16.mxu0 %v10968_v13  ;;  %v1751_v13 = vrot.slane %v1729_v8, %v11763_v34  ;;  %v11073_v6 = vld [vmem:[%s14257_s1 + $0x6a0] sm:$0xff]   ;;  %v11075_v8 = vld [vmem:[%s14257_s1 + $0x628] sm:$0xff]  }
  0x6d   :  { %9939 = vmatpush3.bf16.msra.mxu1 %v10967_v12  ;;  %v11023_v12 = vld [vmem:[%s14257_s1 + $0x5c0] sm:$0xff]  }
  0x6e   :  { %9940 = vmatprep.subr.bf16.mxu1 %v10970_v15  ;;  %v1730_v15 = vcombine.high %v12198_v11, %v12198_v11 }
  0x6f   :  { %9919 = vmatpush3.bf16.msra.mxu0 %v10969_v14  ;;  %v11024_v14 = vld [vmem:[%s14257_s1 + $0x580] sm:$0xff]  }
  0x70   :  { %9920 = vmatprep.subr.bf16.mxu0 %v10972_v17  ;;  %v11025_v17 = vld [vmem:[%s14257_s1 + $0x548] sm:$0xff]  }
  0x71   :  { %9941 = vmatpush3.bf16.msra.mxu1 %v10971_v16  ;;  %v1759_v16 = vcombine.high %v1737_v9, %v1737_v9 }
  0x72   :  { %9942 = vmatprep.subr.bf16.mxu1 %v10974_v19  ;;  %v11026_v19 = vld [vmem:[%s14257_s1 + $0x508] sm:$0xff]  }
  0x73   :  { %9921 = vmatpush3.bf16.msra.mxu0 %v10973_v18  ;;  %v1761_v18 = vcombine.high %v1751_v13, %v1751_v13 }
  0x74   :  { %9922 = vmatprep.subr.bf16.mxu0 %v10976_v21  ;;  %v11027_v21 = vld [vmem:[%s14257_s1 + $0x5c8] sm:$0xff]  }
  0x75   :  { %9943 = vmatpush3.bf16.msra.mxu1 %v10975_v20  ;;  %v1758_v20 = vrot.slane %v1730_v15, %v11763_v34  ;;  %v11082_v15 = vld [vmem:[%s14257_s1 + $0x678] sm:$0xff]  }
  0x76   :  { %9944 = vmatprep.subr.bf16.mxu1 %v10978_v23 }
  0x77   :  { %9923 = vmatpush3.bf16.msra.mxu0 %v10977_v22  ;;  %v11028_v22 = vld [vmem:[%s14257_s1 + $0x588] sm:$0xff]   ;;  %v1762_v23 = vcombine.high %v1758_v20, %v1758_v20 }
  0x78   :  { %9924 = vmatprep.subr.bf16.mxu0 %v10980_v25  ;;  %v11030_v25 = vld [vmem:[%s14257_s1 + $0x510] sm:$0xff]  }
  0x79   :  { %9945 = vmatpush3.bf16.msra.mxu1 %v10979_v24  ;;  %v11029_v24 = vld [vmem:[%s14257_s1 + $0x550] sm:$0xff]  }
  0x7a   :  { %9946 = vmatprep.subr.bf16.mxu1 %v10982_v27  ;;  %v11032_v27 = vld [vmem:[%s14257_s1 + $0x590] sm:$0xff]  }
  0x7b   :  { %9925 = vmatpush3.bf16.msra.mxu0 %v10981_v26  ;;  %v11031_v26 = vld [vmem:[%s14257_s1 + $0x5d0] sm:$0xff]  }
  0x7c   :  { %9926 = vmatprep.subr.bf16.mxu0 %v10984_v29  ;;  %v11034_v29 = vld [vmem:[%s14257_s1 + $0x518] sm:$0xff]  }
  0x7d   :  { %9947 = vmatpush3.bf16.msra.mxu1 %v10983_v28  ;;  %v11033_v28 = vld [vmem:[%s14257_s1 + $0x558] sm:$0xff]  }
  0x7e   :  { %9948 = vmatprep.subr.bf16.mxu1 %v10986_v31  ;;  %v11036_v31 = vld [vmem:[%s14257_s1 + $0x598] sm:$0xff]  }
  0x7f   :  { %9927 = vmatpush3.bf16.msra.mxu0 %v10985_v30  ;;  %v11035_v30 = vld [vmem:[%s14257_s1 + $0x5d8] sm:$0xff]  }
  0x80   :  { %9956 = vmatprep.subr.bf16.mxu0 %v10989_v35  ;;  %v11039_v35 = vld [vmem:[%s14257_s1 + $0x5e0] sm:$0xff]  }
  0x81   :  { %9949 = vmatpush3.bf16.msra.mxu1 %v10988_v32  ;;  %v11037_v32 = vld [vmem:[%s14257_s1 + $0x560] sm:$0xff]  }
  0x82   :  { %7301 = vmatmul.mubr.bf16.vlgmr.msra.gmra.mrb[12].mxu0 %v1695_v33  ;;  %9978 = vmatprep.subr.bf16.mxu1 %v10991_v37  ;;  %v11038_v33 = vld [vmem:[%s14257_s1 + $0x520] sm:$0xff]   ;;  %v11041_v37 = vld [vmem:[%s14257_s1 + $0x568] sm:$0xff]  }
  0x83   :  { %9957 = vmatpush3.bf16.msra.mxu0 %v10990_v36  ;;  %7380 = vmatprep.mubr.bf16.mxu0 %v1751_v13  ;;  %v11040_v36 = vld [vmem:[%s14257_s1 + $0x5a0] sm:$0xff]   ;;  %v11080_v13 = vld [vmem:[%s14257_s1 + $0x6f0] sm:$0xff]  }
  0x84   :  { %7341 = vmatmul.mubr.bf16.vlgmr.msra.gmra.mrb[12].mxu1 %v1711_v39  ;;  %9958 = vmatprep.subr.bf16.mxu0 %v10993_v40  ;;  %v11043_v39 = vld [vmem:[%s14257_s1 + $0x5e8] sm:$0xff]  }
  0x85   :  { %9979 = vmatpush3.bf16.msra.mxu1 %v10992_v38  ;;  %7420 = vmatprep.mubr.bf16.mxu1 %v1761_v18  ;;  %v11042_v38 = vld [vmem:[%s14257_s1 + $0x528] sm:$0xff]   ;;  %v18_v18 = vld [vmem:[%s14258_s0 + $0x18] sm:$0xff] }
  0x86   :  { %9980 = vmatprep.subr.bf16.mxu1 %v10995_v42  ;;  %v11044_v40 = vld [vmem:[%s14257_s1 + $0x5a8] sm:$0xff]   ;;  %v11046_v42 = vld [vmem:[%s14257_s1 + $0x530] sm:$0xff]  }
  0x87   :  { %9959 = vmatpush3.bf16.msra.mxu0 %v10994_v41  ;;  %v11045_v41 = vld [vmem:[%s14257_s1 + $0x570] sm:$0xff]  }
  0x88   :  { %9960 = vmatprep.subr.bf16.mxu0 %v10997_v44  ;;  %v11048_v44 = vld [vmem:[%s14257_s1 + $0x5b0] sm:$0xff]  }
  0x89   :  { %9981 = vmatpush3.bf16.msra.mxu1 %v10996_v43  ;;  %v11047_v43 = vld [vmem:[%s14257_s1 + $0x5f0] sm:$0xff]  }
  0x8a   :  { %9982 = vmatprep.subr.bf16.mxu1 %v10999_v46  ;;  %v11050_v46 = vld [vmem:[%s14257_s1 + $0x538] sm:$0xff]  }
  0x8b   :  { %9961 = vmatpush3.bf16.msra.mxu0 %v10998_v45  ;;  %v11049_v45 = vld [vmem:[%s14257_s1 + $0x578] sm:$0xff]  }
  0x8c   :  { %9962 = vmatprep.subr.bf16.mxu0 %v11001_v48  ;;  %v11053_v48 = vld [vmem:[%s14257_s1 + $0x5b8] sm:$0xff]  }
  0x8d   :  { %9983 = vmatpush3.bf16.msra.mxu1 %v11000_v47  ;;  %v11051_v47 = vld [vmem:[%s14257_s1 + $0x5f8] sm:$0xff]  }
  0x8e   :  { %9984 = vmatprep.subr.bf16.mxu1 %v11003_v50  ;;  %v11054_v50 = vld [vmem:[%s14257_s1 + $0x640] sm:$0xff]  }
  0x8f   :  { %9963 = vmatpush3.bf16.msra.mxu0 %v11002_v49  ;;  %v1744_v49 = vrot.slane %v12198_v11, %v11763_v34  ;;  %v11078_v11 = vld [vmem:[%s14257_s1 + $0x670] sm:$0xff]  }
  0x90   :  { %9964 = vmatprep.subr.bf16.mxu0 %v11005_v52  ;;  %v11056_v52 = vld [vmem:[%s14257_s1 + $0x6c0] sm:$0xff]  }
  0x91   :  { %9985 = vmatpush3.bf16.msra.mxu1 %v11004_v51  ;;  %v11055_v51 = vld [vmem:[%s14257_s1 + $0x600] sm:$0xff]  }
  0x92   :  { %9986 = vmatprep.subr.bf16.mxu1 %v11007_v54  ;;  %v1760_v54 = vcombine.high %v1744_v49, %v1744_v49 }
  0x93   :  { %9965 = vmatpush3.bf16.msra.mxu0 %v11006_v53  ;;  %v11057_v53 = vld [vmem:[%s14257_s1 + $0x680] sm:$0xff]  }
  0x94   :  { %9966 = vmatprep.subr.bf16.mxu0 %v11009_v56  ;;  %v11059_v56 = vld [vmem:[%s14257_s1 + $0x608] sm:$0xff]  }
  0x95   :  { %9987 = vmatpush3.bf16.msra.mxu1 %v11008_v55  ;;  %v11058_v55 = vld [vmem:[%s14257_s1 + $0x648] sm:$0xff]  }
  0x96   :  { %9988 = vmatprep.subr.bf16.mxu1 %v11011_v58  ;;  %v11061_v58 = vld [vmem:[%s14257_s1 + $0x688] sm:$0xff]  }
  0x97   :  { %9967 = vmatpush3.bf16.msra.mxu0 %v11010_v57  ;;  %v11060_v57 = vld [vmem:[%s14257_s1 + $0x6c8] sm:$0xff]  }
  0x98   :  { %9968 = vmatprep.subr.bf16.mxu0 %v11013_v60  ;;  %v11063_v60 = vld [vmem:[%s14257_s1 + $0x610] sm:$0xff]  }
  0x99   :  { %9989 = vmatpush3.bf16.msra.mxu1 %v11012_v59  ;;  %v11062_v59 = vld [vmem:[%s14257_s1 + $0x650] sm:$0xff]  }
  0x9a   :  { %9990 = vmatprep.subr.bf16.mxu1 %v11015_v62  ;;  %v11065_v62 = vld [vmem:[%s14257_s1 + $0x690] sm:$0xff]  }
  0x9b   :  { %9969 = vmatpush3.bf16.msra.mxu0 %v11014_v61  ;;  %v11064_v61 = vld [vmem:[%s14257_s1 + $0x6d0] sm:$0xff]  }
  0x9c   :  { %9970 = vmatprep.subr.bf16.mxu0 %v11017_v0  ;;  %v11067_v0 = vld [vmem:[%s14257_s1 + $0x618] sm:$0xff]  }
  0x9d   :  { %9991 = vmatpush3.bf16.msra.mxu1 %v11016_v63  ;;  %v11066_v63 = vld [vmem:[%s14257_s1 + $0x658] sm:$0xff]  }
  0x9e   :  { %9992 = vmatprep.subr.bf16.mxu1 %v11019_v2  ;;  %v11069_v2 = vld [vmem:[%s14257_s1 + $0x698] sm:$0xff]  }
  0x9f   :  { %9971 = vmatpush3.bf16.msra.mxu0 %v11018_v1  ;;  %v11068_v1 = vld [vmem:[%s14257_s1 + $0x6d8] sm:$0xff]  }
  0xa0   :  { %10000 = vmatprep.subr.bf16.mxu0 %v11021_v7  ;;  %v11074_v7 = vld [vmem:[%s14257_s1 + $0x668] sm:$0xff]  }
  0xa1   :  { %9993 = vmatpush3.bf16.msra.mxu1 %v11020_v5  ;;  %v11072_v5 = vld [vmem:[%s14257_s1 + $0x6e0] sm:$0xff]  }
  0xa2   :  { %7381 = vmatmul.mubr.bf16.vlgmr.msra.gmra.mrb[16].mxu0 %v1737_v9  ;;  %10022 = vmatprep.subr.bf16.mxu1 %v11023_v12  ;;  %v11076_v9 = vld [vmem:[%s14257_s1 + $0x6e8] sm:$0xff]   ;;  %v11079_v12 = vld [vmem:[%s14257_s1 + $0x630] sm:$0xff]  }
  0xa3   :  { %10001 = vmatpush3.bf16.msra.mxu0 %v11022_v10  ;;  %7460 = vmatprep.mubr.bf16.mxu0 %v1758_v20  ;;  %v11077_v10 = vld [vmem:[%s14257_s1 + $0x6a8] sm:$0xff]   ;;  %v11085_v20 = vld [vmem:[%s14257_s1 + $0x6b8] sm:$0xff]  }
  0xa4   :  { %7421 = vmatmul.mubr.bf16.vlgmr.msra.gmra.mrb[16].mxu1 %v1759_v16  ;;  %10002 = vmatprep.subr.bf16.mxu0 %v11025_v17  ;;  %v11083_v16 = vld [vmem:[%s14257_s1 + $0x638] sm:$0xff]  }
  0xa5   :  { %10023 = vmatpush3.bf16.msra.mxu1 %v11024_v14  ;;  %7500 = vmatprep.mubr.bf16.mxu1 %v1762_v23  ;;  %v11081_v14 = vld [vmem:[%s14257_s1 + $0x6b0] sm:$0xff]   ;;  %v11084_v17 = vld [vmem:[%s14257_s1 + $0x6f8] sm:$0xff]  }
  0xa6   :  { %10024 = vmatprep.subr.bf16.mxu1 %v11027_v21  ;;  %v1763_v21 = vcombine.high %v18_v18, %v18_v18 }
  0xa7   :  { %10003 = vmatpush3.bf16.msra.mxu0 %v11026_v19  ;;  %v1770_v19 = vrot.slane %v18_v18, %v11763_v34 }
  0xa8   :  { %10004 = vmatprep.subr.bf16.mxu0 %v11029_v24 }
  0xa9   :  { %10025 = vmatpush3.bf16.msra.mxu1 %v11028_v22  ;;  %v11086_v22 = vld [vmem:[%s14257_s1 + $0x740] sm:$0xff]   ;;  %v1778_v23 = vcombine.high %v1770_v19, %v1770_v19  ;;  %v1786_v24 = vrot.slane %v1770_v19, %v11763_v34  ;;  %v11123_v19 = vld [vmem:[%s14257_s1 + $0x848] sm:$0xff]  }
  0xaa   :  { %10026 = vmatprep.subr.bf16.mxu1 %v11031_v26  ;;  %v11088_v26 = vld [vmem:[%s14257_s1 + $0x7c0] sm:$0xff]  }
  0xab   :  { %10005 = vmatpush3.bf16.msra.mxu0 %v11030_v25  ;;  %v12401_v25 = vrot.slane %v1763_v21, %v11763_v34  ;;  %v11125_v21 = vld [vmem:[%s14257_s1 + $0x8c8] sm:$0xff]  }
  0xac   :  { %10006 = vmatprep.subr.bf16.mxu0 %v11033_v28  ;;  %v11087_v28 = vld [vmem:[%s14257_s1 + $0x700] sm:$0xff]  }
  0xad   :  { %10027 = vmatpush3.bf16.msra.mxu1 %v11032_v27  ;;  %v1800_v27 = vrot.slane %v1778_v23, %v11763_v34  ;;  %v11127_v23 = vld [vmem:[%s14257_s1 + $0x850] sm:$0xff]  }
  0xae   :  { %10028 = vmatprep.subr.bf16.mxu1 %v11035_v30  ;;  %v1808_v30 = vcombine.high %v1786_v24, %v1786_v24 }
  0xaf   :  { %10007 = vmatpush3.bf16.msra.mxu0 %v11034_v29  ;;  %v1779_v29 = vcombine.high %v12401_v25, %v12401_v25 }
  0xb0   :  { %10008 = vmatprep.subr.bf16.mxu0 %v11037_v32  ;;  %v1810_v32 = vcombine.high %v1800_v27, %v1800_v27 }
  0xb1   :  { %10029 = vmatpush3.bf16.msra.mxu1 %v11036_v31  ;;  %v11090_v31 = vld [vmem:[%s14257_s1 + $0x748] sm:$0xff]  }
  0xb2   :  { %10030 = vmatprep.subr.bf16.mxu1 %v11039_v35  ;;  %v1807_v35 = vrot.slane %v1779_v29, %v11763_v34  ;;  %v11133_v29 = vld [vmem:[%s14257_s1 + $0x8d8] sm:$0xff]  }
  0xb3   :  { %10009 = vmatpush3.bf16.msra.mxu0 %v11038_v33  ;;  %v11089_v33 = vld [vmem:[%s14257_s1 + $0x780] sm:$0xff]  }
  0xb4   :  { %10010 = vmatprep.subr.bf16.mxu0 %v11041_v37  ;;  %v11091_v37 = vld [vmem:[%s14257_s1 + $0x708] sm:$0xff]  }
  0xb5   :  { %10031 = vmatpush3.bf16.msra.mxu1 %v11040_v36  ;;  %v11092_v36 = vld [vmem:[%s14257_s1 + $0x7c8] sm:$0xff]  }
  0xb6   :  { %10032 = vmatprep.subr.bf16.mxu1 %v11043_v39  ;;  %v11094_v39 = vld [vmem:[%s14257_s1 + $0x750] sm:$0xff]  }
  0xb7   :  { %10011 = vmatpush3.bf16.msra.mxu0 %v11042_v38  ;;  %v1811_v38 = vcombine.high %v1807_v35, %v1807_v35 }
  0xb8   :  { %10012 = vmatprep.subr.bf16.mxu0 %v11045_v41  ;;  %v11096_v41 = vld [vmem:[%s14257_s1 + $0x7d0] sm:$0xff]  }
  0xb9   :  { %10033 = vmatpush3.bf16.msra.mxu1 %v11044_v40  ;;  %v11093_v40 = vld [vmem:[%s14257_s1 + $0x788] sm:$0xff]  }
  0xba   :  { %10034 = vmatprep.subr.bf16.mxu1 %v11047_v43  ;;  %v11098_v43 = vld [vmem:[%s14257_s1 + $0x758] sm:$0xff]  }
  0xbb   :  { %10013 = vmatpush3.bf16.msra.mxu0 %v11046_v42  ;;  %v11095_v42 = vld [vmem:[%s14257_s1 + $0x710] sm:$0xff]  }
  0xbc   :  { %10014 = vmatprep.subr.bf16.mxu0 %v11049_v45  ;;  %v11100_v45 = vld [vmem:[%s14257_s1 + $0x7d8] sm:$0xff]  }
  0xbd   :  { %10035 = vmatpush3.bf16.msra.mxu1 %v11048_v44  ;;  %v11097_v44 = vld [vmem:[%s14257_s1 + $0x790] sm:$0xff]  }
  0xbe   :  { %10036 = vmatprep.subr.bf16.mxu1 %v11051_v47  ;;  %v11102_v47 = vld [vmem:[%s14257_s1 + $0x760] sm:$0xff]  }
  0xbf   :  { %10015 = vmatpush3.bf16.msra.mxu0 %v11050_v46  ;;  %v11099_v46 = vld [vmem:[%s14257_s1 + $0x718] sm:$0xff]  }
  0xc0   :  { %10044 = vmatprep.subr.bf16.mxu0 %v11054_v50  ;;  %v11103_v50 = vld [vmem:[%s14257_s1 + $0x720] sm:$0xff]  }
  0xc1   :  { %10037 = vmatpush3.bf16.msra.mxu1 %v11053_v48  ;;  %v11101_v48 = vld [vmem:[%s14257_s1 + $0x798] sm:$0xff]  }
  0xc2   :  { %7461 = vmatmul.mubr.bf16.vlgmr.msra.gmra.mrb[20].mxu0 %v1744_v49  ;;  %10066 = vmatprep.subr.bf16.mxu1 %v11056_v52  ;;  %v11104_v49 = vld [vmem:[%s14257_s1 + $0x7e0] sm:$0xff]  }
  0xc3   :  { %10045 = vmatpush3.bf16.msra.mxu0 %v11055_v51  ;;  %7540 = vmatprep.mubr.bf16.mxu0 %v1800_v27  ;;  %v11106_v51 = vld [vmem:[%s14257_s1 + $0x768] sm:$0xff]   ;;  %v11105_v52 = vld [vmem:[%s14257_s1 + $0x7a0] sm:$0xff]   ;;  %v11131_v27 = vld [vmem:[%s14257_s1 + $0x858] sm:$0xff]  }
  0xc4   :  { %7501 = vmatmul.mubr.bf16.vlgmr.msra.gmra.mrb[20].mxu1 %v1760_v54  ;;  %10046 = vmatprep.subr.bf16.mxu0 %v11058_v55  ;;  %v8994_v54 = vld [vmem:[%s14259_s2] ss:$0 sm:$0xff]  ;;  %v11107_v55 = vld [vmem:[%s14257_s1 + $0x728] sm:$0xff]  }
  0xc5   :  { %10067 = vmatpush3.bf16.msra.mxu1 %v11057_v53  ;;  %7580 = vmatprep.mubr.bf16.mxu1 %v1810_v32  ;;  %v11108_v53 = vld [vmem:[%s14257_s1 + $0x7e8] sm:$0xff]   ;;  %v11136_v32 = vld [vmem:[%s14257_s1 + $0x820] sm:$0xff]  }
  0xc6   :  { %10068 = vmatprep.subr.bf16.mxu1 %v11060_v57  ;;  %v11110_v57 = vld [vmem:[%s14257_s1 + $0x770] sm:$0xff]  }
  0xc7   :  { %10047 = vmatpush3.bf16.msra.mxu0 %v11059_v56 }
  0xc8   :  { %10048 = vmatprep.subr.bf16.mxu0 %v11062_v59  ;;  %v11109_v59 = vld [vmem:[%s14257_s1 + $0x7a8] sm:$0xff]  }
  0xc9   :  { %10069 = vmatpush3.bf16.msra.mxu1 %v11061_v58 }
  0xca   :  { %10070 = vmatprep.subr.bf16.mxu1 %v11064_v61 }
  0xcb   :  { %10049 = vmatpush3.bf16.msra.mxu0 %v11063_v60 }
  0xcc   :  { %10050 = vmatprep.subr.bf16.mxu0 %v11066_v63  ;;  %v11111_v63 = vld [vmem:[%s14257_s1 + $0x730] sm:$0xff]  }
  0xcd   :  { %10071 = vmatpush3.bf16.msra.mxu1 %v11065_v62 }
  0xce   :  { %10072 = vmatprep.subr.bf16.mxu1 %v11068_v1 }
  0xcf   :  { %10051 = vmatpush3.bf16.msra.mxu0 %v11067_v0  ;;  %v11112_v0 = vld [vmem:[%s14257_s1 + $0x7f0] sm:$0xff]  }
  0xd0   :  { %10052 = vmatprep.subr.bf16.mxu0 %v11070_v3  ;;  %v11113_v3 = vld [vmem:[%s14257_s1 + $0x7b0] sm:$0xff]  }
  0xd1   :  { %10073 = vmatpush3.bf16.msra.mxu1 %v11069_v2 }
  0xd2   :  { %10074 = vmatprep.subr.bf16.mxu1 %v11072_v5 }
  0xd3   :  { %10053 = vmatpush3.bf16.msra.mxu0 %v11071_v4 }
  0xd4   :  { %10054 = vmatprep.subr.bf16.mxu0 %v11074_v7 }
  0xd5   :  { %10075 = vmatpush3.bf16.msra.mxu1 %v11073_v6  ;;  %v11114_v6 = vld [vmem:[%s14257_s1 + $0x778] sm:$0xff]  }
  0xd6   :  { %10076 = vmatprep.subr.bf16.mxu1 %v11076_v9 }
  0xd7   :  { %10055 = vmatpush3.bf16.msra.mxu0 %v11075_v8  ;;  %v11115_v8 = vld [vmem:[%s14257_s1 + $0x738] sm:$0xff]  }
  0xd8   :  { %10056 = vmatprep.subr.bf16.mxu0 %v11078_v11  ;;  %v11116_v11 = vld [vmem:[%s14257_s1 + $0x7f8] sm:$0xff]  }
  0xd9   :  { %10077 = vmatpush3.bf16.msra.mxu1 %v11077_v10 }
  0xda   :  { %10078 = vmatprep.subr.bf16.mxu1 %v11080_v13  ;;  %v1793_v13 = vrot.slane %v12401_v25, %v11763_v34  ;;  %v11129_v25 = vld [vmem:[%s14257_s1 + $0x8d0] sm:$0xff]  }
  0xdb   :  { %10057 = vmatpush3.bf16.msra.mxu0 %v11079_v12  ;;  %v11118_v12 = vld [vmem:[%s14257_s1 + $0x7b8] sm:$0xff]  }
  0xdc   :  { %10058 = vmatprep.subr.bf16.mxu0 %v11082_v15  ;;  %v11120_v15 = vld [vmem:[%s14257_s1 + $0x800] sm:$0xff]   ;;  %v1809_v18 = vcombine.high %v1793_v13, %v1793_v13 }
  0xdd   :  { %10079 = vmatpush3.bf16.msra.mxu1 %v11081_v14  ;;  %v11119_v14 = vld [vmem:[%s14257_s1 + $0x840] sm:$0xff]  }
  0xde   :  { %10080 = vmatprep.subr.bf16.mxu1 %v11084_v17  ;;  %v11122_v17 = vld [vmem:[%s14257_s1 + $0x880] sm:$0xff]  }
  0xdf   :  { %10059 = vmatpush3.bf16.msra.mxu0 %v11083_v16  ;;  %v11121_v16 = vld [vmem:[%s14257_s1 + $0x8c0] sm:$0xff]  }
  0xe0   :  { %10088 = vmatprep.subr.bf16.mxu0 %v11086_v22  ;;  %v11126_v22 = vld [vmem:[%s14257_s1 + $0x888] sm:$0xff]  }
  0xe1   :  { %10081 = vmatpush3.bf16.msra.mxu1 %v11085_v20  ;;  %v11124_v20 = vld [vmem:[%s14257_s1 + $0x808] sm:$0xff]  }
  0xe2   :  { %10110 = vmatprep.subr.bf16.mxu1 %v11088_v26  ;;  %7541 = vmatmul.mubr.bf16.vlgmr.msra.gmra.mrb[24].mxu0 %v1786_v24  ;;  %v11128_v24 = vld [vmem:[%s14257_s1 + $0x810] sm:$0xff]  }
  0xe3   :  { %10089 = vmatpush3.bf16.msra.mxu0 %v11087_v28  ;;  %7620 = vmatprep.mubr.bf16.mxu0 %v1807_v35  ;;  %v11130_v26 = vld [vmem:[%s14257_s1 + $0x890] sm:$0xff]   ;;  %v11132_v28 = vld [vmem:[%s14257_s1 + $0x818] sm:$0xff]   ;;  %v11138_v35 = vld [vmem:[%s14257_s1 + $0x8a0] sm:$0xff]  }
  0xe4   :  { %7581 = vmatmul.mubr.bf16.vlgmr.msra.gmra.mrb[24].mxu1 %v1808_v30  ;;  %10090 = vmatprep.subr.bf16.mxu0 %v11090_v31  ;;  %v11134_v30 = vld [vmem:[%s14257_s1 + $0x898] sm:$0xff]   ;;  %v11135_v31 = vld [vmem:[%s14257_s1 + $0x860] sm:$0xff]  }
  0xe5   :  { %10111 = vmatpush3.bf16.msra.mxu1 %v11089_v33  ;;  %7660 = vmatprep.mubr.bf16.mxu1 %v1811_v38  ;;  %v11137_v33 = vld [vmem:[%s14257_s1 + $0x8e0] sm:$0xff]   ;;  %v11141_v38 = vld [vmem:[%s14257_s1 + $0x8e8] sm:$0xff]  }
  0xe6   :  { %10112 = vmatprep.subr.bf16.mxu1 %v11092_v36  ;;  %v11139_v36 = vld [vmem:[%s14257_s1 + $0x868] sm:$0xff]  }
  0xe7   :  { %10091 = vmatpush3.bf16.msra.mxu0 %v11091_v37  ;;  %v11140_v37 = vld [vmem:[%s14257_s1 + $0x828] sm:$0xff]  }
  0xe8   :  { %10092 = vmatprep.subr.bf16.mxu0 %v11094_v39  ;;  %v11142_v39 = vld [vmem:[%s14257_s1 + $0x8a8] sm:$0xff]  }
  0xe9   :  { %10113 = vmatpush3.bf16.msra.mxu1 %v11093_v40 }
  0xea   :  { %10114 = vmatprep.subr.bf16.mxu1 %v11096_v41  ;;  %v11143_v41 = vld [vmem:[%s14257_s1 + $0x870] sm:$0xff]  }
  0xeb   :  { %10093 = vmatpush3.bf16.msra.mxu0 %v11095_v42 }
  0xec   :  { %10094 = vmatprep.subr.bf16.mxu0 %v11098_v43  ;;  %v11144_v43 = vld [vmem:[%s14257_s1 + $0x830] sm:$0xff]  }
  0xed   :  { %10115 = vmatpush3.bf16.msra.mxu1 %v11097_v44 }
  0xee   :  { %10116 = vmatprep.subr.bf16.mxu1 %v11100_v45 }
  0xef   :  { %10095 = vmatpush3.bf16.msra.mxu0 %v11099_v46 }
  0xf0   :  { %10096 = vmatprep.subr.bf16.mxu0 %v11102_v47 }
  0xf1   :  { %10117 = vmatpush3.bf16.msra.mxu1 %v11101_v48 }
  0xf2   :  { %10118 = vmatprep.subr.bf16.mxu1 %v11104_v49  ;;  %v11145_v49 = vld [vmem:[%s14257_s1 + $0x8f0] sm:$0xff]  }
  0xf3   :  { %10097 = vmatpush3.bf16.msra.mxu0 %v11103_v50  ;;  %v11146_v50 = vld [vmem:[%s14257_s1 + $0x8b0] sm:$0xff]  }
  0xf4   :  { %10098 = vmatprep.subr.bf16.mxu0 %v11106_v51 }
  0xf5   :  { %v9796_v56 = vpop.f32.mrb[0].mxu0  ;;  %10119 = vmatpush3.bf16.msra.mxu1 %v11105_v52 }
  0xf6   :  { %v9797_v58 = vpop.f32.mrb[1].mxu0  ;;  %10120 = vmatprep.subr.bf16.mxu1 %v11108_v53  ;;  %v11147_v53 = vld [vmem:[%s14257_s1 + $0x878] sm:$0xff]  }
  0xf7   :  { %v9798_v60 = vadd.f32 %v9797_v58, %v9796_v56  ;;  %v9799_v61 = vpop.f32.mrb[2].mxu0  ;;  %v9818_v62 = vpop.f32.mrb[0].mxu1  ;;  %10099 = vmatpush3.bf16.msra.mxu0 %v11107_v55  ;;  %v11148_v56 = vld [vmem:[%s14257_s1 + $0x838] sm:$0xff]  }
  0xf8   :  { %v9800_v1 = vpop.f32.mrb[3].mxu0  ;;  %v9819_v2 = vpop.f32.mrb[1].mxu1  ;;  %10100 = vmatprep.subr.bf16.mxu0 %v11110_v57  ;;  %v11149_v58 = vld [vmem:[%s14257_s1 + $0x8f8] sm:$0xff]  }
  0xf9   :  { %v7063_v4 = vadd.f32 %v9798_v60, %v8994_v54  ;;  %v9820_v5 = vadd.f32 %v9819_v2, %v9818_v62  ;;  %v9821_v7 = vpop.f32.mrb[2].mxu1  ;;  %10121 = vmatpush3.bf16.msra.mxu1 %v11109_v59  ;;  %v19_v59 = vld [vmem:[%s14258_s0 + $0x20] sm:$0xff]  ;;  %v11150_v61 = vld [vmem:[%s14257_s1 + $0x8b8] sm:$0xff]  }
  0xfa   :  { %v9822_v9 = vpop.f32.mrb[3].mxu1  ;;  %10122 = vmatprep.subr.bf16.mxu1 %v11112_v0  ;;  %v1819_v60 = vrot.slane %v19_v59, %v11763_v34  ;;  %v1812_v62 = vcombine.high %v19_v59, %v19_v59  ;;  %v11152_v2 = vld [vmem:[%s14257_s1 + $0x900] sm:$0xff]   ;;  %v11188_v59 = vld [vmem:[%s14257_s1 + $0xa48] sm:$0xff]  }
  0xfb   :  { %v12497_v10 = vadd.f32 %v9820_v5, %v7063_v4  ;;  %10101 = vmatpush3.bf16.msra.mxu0 %v11111_v63  ;;  %v11151_v63 = vld [vmem:[%s14257_s1 + $0x940] sm:$0xff]   ;;  %v11155_v9 = vld [vmem:[%s14257_s1 + $0x948] sm:$0xff]  }
  0xfc   :  { %10102 = vmatprep.subr.bf16.mxu0 %v11114_v6  ;;  %v1827_v0 = vcombine.high %v1819_v60, %v1819_v60  ;;  %v1835_v1 = vrot.slane %v1819_v60, %v11763_v34  ;;  %v11153_v4 = vld [vmem:[%s14257_s1 + $0x9c0] sm:$0xff]   ;;  %v11189_v60 = vld [vmem:[%s14257_s1 + $0xa08] sm:$0xff]  }
  0xfd   :  { %10123 = vmatpush3.bf16.msra.mxu1 %v11113_v3  ;;  %v12618_v3 = vrot.slane %v1812_v62, %v11763_v34  ;;  %v11154_v6 = vld [vmem:[%s14257_s1 + $0x980] sm:$0xff]   ;;  %v11191_v62 = vld [vmem:[%s14257_s1 + $0xa88] sm:$0xff]  }
  0xfe   :  { %10124 = vmatprep.subr.bf16.mxu1 %v11116_v11  ;;  %v1849_v5 = vrot.slane %v1827_v0, %v11763_v34  ;;  %v11156_v11 = vld [vmem:[%s14257_s1 + $0x908] sm:$0xff]   ;;  %v11193_v0 = vld [vmem:[%s14257_s1 + $0xa10] sm:$0xff]  }
  0xff   :  { %10103 = vmatpush3.bf16.msra.mxu0 %v11115_v8  ;;  %v1828_v7 = vcombine.high %v12618_v3, %v12618_v3  ;;  %v1857_v8 = vcombine.high %v1835_v1, %v1835_v1 }
 0x100   :  { %10132 = vmatprep.subr.bf16.mxu0 %v11119_v14  ;;  %v11158_v14 = vld [vmem:[%s14257_s1 + $0x988] sm:$0xff]  }
 0x101   :  { %10125 = vmatpush3.bf16.msra.mxu1 %v11118_v12  ;;  %v1856_v12 = vrot.slane %v1828_v7, %v11763_v34  ;;  %v11200_v7 = vld [vmem:[%s14257_s1 + $0xa60] sm:$0xff]  }
 0x102   :  { %7621 = vmatmul.mubr.bf16.vlgmr.msra.gmra.mrb[28].mxu0 %v1793_v13  ;;  %10154 = vmatprep.subr.bf16.mxu1 %v11121_v16  ;;  %v11157_v13 = vld [vmem:[%s14257_s1 + $0x9c8] sm:$0xff]   ;;  %v11159_v16 = vld [vmem:[%s14257_s1 + $0x950] sm:$0xff]  }
 0x103   :  { %10133 = vmatpush3.bf16.msra.mxu0 %v11120_v15  ;;  %7700 = vmatprep.mubr.bf16.mxu0 %v1849_v5  ;;  %v1860_v15 = vcombine.high %v1856_v12, %v1856_v12 }
 0x104   :  { %7661 = vmatmul.mubr.bf16.vlgmr.msra.gmra.mrb[28].mxu1 %v1809_v18  ;;  %10134 = vmatprep.subr.bf16.mxu0 %v11123_v19  ;;  %v11161_v18 = vld [vmem:[%s14257_s1 + $0x9d0] sm:$0xff]  }
 0x105   :  { %10155 = vmatpush3.bf16.msra.mxu1 %v11122_v17  ;;  %v11160_v17 = vld [vmem:[%s14257_s1 + $0x910] sm:$0xff]  }
 0x106   :  { %10156 = vmatprep.subr.bf16.mxu1 %v11125_v21  ;;  %v11162_v19 = vld [vmem:[%s14257_s1 + $0x990] sm:$0xff]   ;;  %v11164_v21 = vld [vmem:[%s14257_s1 + $0x918] sm:$0xff]  }
 0x107   :  { %10135 = vmatpush3.bf16.msra.mxu0 %v11124_v20  ;;  %v11163_v20 = vld [vmem:[%s14257_s1 + $0x958] sm:$0xff]  }
 0x108   :  { %10136 = vmatprep.subr.bf16.mxu0 %v11127_v23  ;;  %v11166_v23 = vld [vmem:[%s14257_s1 + $0x998] sm:$0xff]  }
 0x109   :  { %10157 = vmatpush3.bf16.msra.mxu1 %v11126_v22  ;;  %v11165_v22 = vld [vmem:[%s14257_s1 + $0x9d8] sm:$0xff]  }
 0x10a   :  { %10158 = vmatprep.subr.bf16.mxu1 %v11129_v25  ;;  %v11168_v25 = vld [vmem:[%s14257_s1 + $0x920] sm:$0xff]  }
 0x10b   :  { %10137 = vmatpush3.bf16.msra.mxu0 %v11128_v24  ;;  %v11167_v24 = vld [vmem:[%s14257_s1 + $0x960] sm:$0xff]  }
 0x10c   :  { %10138 = vmatprep.subr.bf16.mxu0 %v11131_v27  ;;  %v11170_v27 = vld [vmem:[%s14257_s1 + $0x9a0] sm:$0xff]  }
 0x10d   :  { %10159 = vmatpush3.bf16.msra.mxu1 %v11130_v26  ;;  %v11169_v26 = vld [vmem:[%s14257_s1 + $0x9e0] sm:$0xff]  }
 0x10e   :  { %10160 = vmatprep.subr.bf16.mxu1 %v11133_v29  ;;  %v11172_v29 = vld [vmem:[%s14257_s1 + $0x928] sm:$0xff]  }
 0x10f   :  { %10139 = vmatpush3.bf16.msra.mxu0 %v11132_v28  ;;  %v11171_v28 = vld [vmem:[%s14257_s1 + $0x968] sm:$0xff]  }
 0x110   :  { %10140 = vmatprep.subr.bf16.mxu0 %v11135_v31 }
 0x111   :  { %10161 = vmatpush3.bf16.msra.mxu1 %v11134_v30  ;;  %v11173_v30 = vld [vmem:[%s14257_s1 + $0x9e8] sm:$0xff]  }
 0x112   :  { %10162 = vmatprep.subr.bf16.mxu1 %v11137_v33 }
 0x113   :  { %10141 = vmatpush3.bf16.msra.mxu0 %v11136_v32  ;;  %v11174_v32 = vld [vmem:[%s14257_s1 + $0x9a8] sm:$0xff]  }
 0x114   :  { %10142 = vmatprep.subr.bf16.mxu0 %v11139_v36 }
 0x115   :  { %v9840_v40 = vpop.f32.mrb[4].mxu0  ;;  %10163 = vmatpush3.bf16.msra.mxu1 %v11138_v35  ;;  %v11175_v35 = vld [vmem:[%s14257_s1 + $0x970] sm:$0xff]  }
 0x116   :  { %v9841_v42 = vpop.f32.mrb[5].mxu0  ;;  %10164 = vmatprep.subr.bf16.mxu1 %v11141_v38 }
 0x117   :  { %v9842_v44 = vadd.f32 %v9841_v42, %v9840_v40  ;;  %v9843_v45 = vpop.f32.mrb[6].mxu0  ;;  %v9862_v46 = vpop.f32.mrb[4].mxu1  ;;  %10143 = vmatpush3.bf16.msra.mxu0 %v11140_v37  ;;  %v11177_v40 = vld [vmem:[%s14257_s1 + $0x9f0] sm:$0xff]  }
 0x118   :  { %v9844_v47 = vpop.f32.mrb[7].mxu0  ;;  %v9863_v48 = vpop.f32.mrb[5].mxu1  ;;  %10144 = vmatprep.subr.bf16.mxu0 %v11143_v41  ;;  %v11178_v45 = vld [vmem:[%s14257_s1 + $0x9b0] sm:$0xff]  }
 0x119   :  { %v7143_v51 = vadd.f32 %v9842_v44, %v12497_v10  ;;  %v9864_v52 = vadd.f32 %v9863_v48, %v9862_v46  ;;  %10165 = vmatpush3.bf16.msra.mxu1 %v11142_v39  ;;  %v9865_v54 = vpop.f32.mrb[6].mxu1  ;;  %v1859_v10 = vcombine.high %v1849_v5, %v1849_v5  ;;  %v11176_v39 = vld [vmem:[%s14257_s1 + $0x930] sm:$0xff]   ;;  %v11179_v47 = vld [vmem:[%s14257_s1 + $0x978] sm:$0xff]  }
 0x11a   :  { %10166 = vmatprep.subr.bf16.mxu1 %v11145_v49  ;;  %v9866_v57 = vpop.f32.mrb[7].mxu1  ;;  %v11184_v54 = vld [vmem:[%s14257_s1 + $0xa40] sm:$0xff]   ;;  %v11198_v5 = vld [vmem:[%s14257_s1 + $0xad8] sm:$0xff]  }
 0x11b   :  { %v12595_v55 = vadd.f32 %v9864_v52, %v7143_v51  ;;  %10145 = vmatpush3.bf16.msra.mxu0 %v11144_v43  ;;  %7740 = vmatprep.mubr.bf16.mxu1 %v1859_v10  ;;  %v11181_v51 = vld [vmem:[%s14257_s1 + $0x9f8] sm:$0xff]   ;;  %v11187_v57 = vld [vmem:[%s14257_s1 + $0xa80] sm:$0xff]  }
 0x11c   :  { %10146 = vmatprep.subr.bf16.mxu0 %v11147_v53  ;;  %v11183_v52 = vld [vmem:[%s14257_s1 + $0x9b8] sm:$0xff]   ;;  %v1842_v53 = vrot.slane %v12618_v3, %v11763_v34  ;;  %v11203_v10 = vld [vmem:[%s14257_s1 + $0xaa0] sm:$0xff]  }
 0x11d   :  { %10167 = vmatpush3.bf16.msra.mxu1 %v11146_v50  ;;  %v11180_v50 = vld [vmem:[%s14257_s1 + $0x938] sm:$0xff]  }
 0x11e   :  { %10168 = vmatprep.subr.bf16.mxu1 %v11149_v58  ;;  %v1858_v58 = vcombine.high %v1842_v53, %v1842_v53  ;;  %v11196_v3 = vld [vmem:[%s14257_s1 + $0xa58] sm:$0xff]  }
 0x11f   :  { %10147 = vmatpush3.bf16.msra.mxu0 %v11148_v56  ;;  %v11186_v56 = vld [vmem:[%s14257_s1 + $0xac0] sm:$0xff]  }
 0x120   :  { %10176 = vmatprep.subr.bf16.mxu0 %v11151_v63  ;;  %v11192_v63 = vld [vmem:[%s14257_s1 + $0xa50] sm:$0xff]  }
 0x121   :  { %10169 = vmatpush3.bf16.msra.mxu1 %v11150_v61  ;;  %v11190_v61 = vld [vmem:[%s14257_s1 + $0xac8] sm:$0xff]  }
 0x122   :  { %10198 = vmatprep.subr.bf16.mxu1 %v11153_v4  ;;  %7701 = vmatmul.mubr.bf16.vlgmr.msra.gmra.mrb[32].mxu0 %v1835_v1  ;;  %v11194_v1 = vld [vmem:[%s14257_s1 + $0xad0] sm:$0xff]   ;;  %v11197_v4 = vld [vmem:[%s14257_s1 + $0xa18] sm:$0xff]  }
 0x123   :  { %10177 = vmatpush3.bf16.msra.mxu0 %v11152_v2  ;;  %7780 = vmatprep.mubr.bf16.mxu0 %v1856_v12  ;;  %v11195_v2 = vld [vmem:[%s14257_s1 + $0xa90] sm:$0xff]   ;;  %v11205_v12 = vld [vmem:[%s14257_s1 + $0xa28] sm:$0xff]  }
 0x124   :  { %7741 = vmatmul.mubr.bf16.vlgmr.msra.gmra.mrb[32].mxu1 %v1857_v8  ;;  %10178 = vmatprep.subr.bf16.mxu0 %v11155_v9  ;;  %v11201_v8 = vld [vmem:[%s14257_s1 + $0xa20] sm:$0xff]  }
 0x125   :  { %10199 = vmatpush3.bf16.msra.mxu1 %v11154_v6  ;;  %7820 = vmatprep.mubr.bf16.mxu1 %v1860_v15  ;;  %v11199_v6 = vld [vmem:[%s14257_s1 + $0xa98] sm:$0xff]   ;;  %v11202_v9 = vld [vmem:[%s14257_s1 + $0xae0] sm:$0xff]   ;;  %v11207_v15 = vld [vmem:[%s14257_s1 + $0xaa8] sm:$0xff]  }
 0x126   :  { %10200 = vmatprep.subr.bf16.mxu1 %v11157_v13  ;;  %v11206_v13 = vld [vmem:[%s14257_s1 + $0xae8] sm:$0xff]  }
 0x127   :  { %10179 = vmatpush3.bf16.msra.mxu0 %v11156_v11  ;;  %v11204_v11 = vld [vmem:[%s14257_s1 + $0xa68] sm:$0xff]  }
 0x128   :  { %10180 = vmatprep.subr.bf16.mxu0 %v11159_v16 }
 0x129   :  { %10201 = vmatpush3.bf16.msra.mxu1 %v11158_v14 }
 0x12a   :  { %10202 = vmatprep.subr.bf16.mxu1 %v11161_v18 }
 0x12b   :  { %10181 = vmatpush3.bf16.msra.mxu0 %v11160_v17  ;;  %v11208_v17 = vld [vmem:[%s14257_s1 + $0xa70] sm:$0xff]  }
 0x12c   :  { %10182 = vmatprep.subr.bf16.mxu0 %v11163_v20 }
 0x12d   :  { %10203 = vmatpush3.bf16.msra.mxu1 %v11162_v19 }
 0x12e   :  { %10204 = vmatprep.subr.bf16.mxu1 %v11165_v22 }
 0x12f   :  { %10183 = vmatpush3.bf16.msra.mxu0 %v11164_v21 }
 0x130   :  { %10184 = vmatprep.subr.bf16.mxu0 %v11167_v24  ;;  %v11210_v24 = vld [vmem:[%s14257_s1 + $0xaf0] sm:$0xff]  }
 0x131   :  { %10205 = vmatpush3.bf16.msra.mxu1 %v11166_v23  ;;  %v11209_v23 = vld [vmem:[%s14257_s1 + $0xa30] sm:$0xff]  }
 0x132   :  { %10206 = vmatprep.subr.bf16.mxu1 %v11169_v26 }
 0x133   :  { %10185 = vmatpush3.bf16.msra.mxu0 %v11168_v25 }
 0x134   :  { %10186 = vmatprep.subr.bf16.mxu0 %v11171_v28 }
 0x135   :  { %v9884_v31 = vpop.f32.mrb[8].mxu0  ;;  %10207 = vmatpush3.bf16.msra.mxu1 %v11170_v27  ;;  %v11211_v27 = vld [vmem:[%s14257_s1 + $0xab0] sm:$0xff]  }
 0x136   :  { %v9885_v33 = vpop.f32.mrb[9].mxu0  ;;  %10208 = vmatprep.subr.bf16.mxu1 %v11173_v30  ;;  %v11212_v30 = vld [vmem:[%s14257_s1 + $0xa78] sm:$0xff]  }
 0x137   :  { %v9886_v36 = vadd.f32 %v9885_v33, %v9884_v31  ;;  %v9887_v37 = vpop.f32.mrb[10].mxu0  ;;  %v9906_v38 = vpop.f32.mrb[8].mxu1  ;;  %10187 = vmatpush3.bf16.msra.mxu0 %v11172_v29  ;;  %v11214_v33 = vld [vmem:[%s14257_s1 + $0xaf8] sm:$0xff]  }
 0x138   :  { %v9888_v41 = vpop.f32.mrb[11].mxu0  ;;  %v9907_v42 = vpop.f32.mrb[9].mxu1  ;;  %10188 = vmatprep.subr.bf16.mxu0 %v11175_v35  ;;  %v20_v35 = vld [vmem:[%s14258_s0 + $0x28] sm:$0xff]  ;;  %v11215_v37 = vld [vmem:[%s14257_s1 + $0xab8] sm:$0xff]  }
 0x139   :  { %v7223_v43 = vadd.f32 %v9886_v36, %v12595_v55  ;;  %v9908_v44 = vadd.f32 %v9907_v42, %v9906_v38  ;;  %v9909_v46 = vpop.f32.mrb[10].mxu1  ;;  %10209 = vmatpush3.bf16.msra.mxu1 %v11174_v32  ;;  %v11185_v55 = vld [vmem:[%s14257_s1 + $0xa00] sm:$0xff]   ;;  %v11213_v32 = vld [vmem:[%s14257_s1 + $0xa38] sm:$0xff]   ;;  %v1868_v36 = vrot.slane %v20_v35, %v11763_v34  ;;  %v1861_v38 = vcombine.high %v20_v35, %v20_v35  ;;  %v11253_v35 = vld [vmem:[%s14257_s1 + $0xc48] sm:$0xff]  }
 0x13a   :  { %v9910_v48 = vpop.f32.mrb[11].mxu1  ;;  %10210 = vmatprep.subr.bf16.mxu1 %v11177_v40 }
 0x13b   :  { %v12706_v49 = vadd.f32 %v9908_v44, %v7223_v43  ;;  %10189 = vmatpush3.bf16.msra.mxu0 %v11176_v39  ;;  %v11216_v39 = vld [vmem:[%s14257_s1 + $0xb40] sm:$0xff]   ;;  %v1876_v40 = vcombine.high %v1868_v36, %v1868_v36  ;;  %v1884_v41 = vrot.slane %v1868_v36, %v11763_v34  ;;  %v12827_v42 = vrot.slane %v1861_v38, %v11763_v34  ;;  %v11220_v48 = vld [vmem:[%s14257_s1 + $0xb48] sm:$0xff]  }
 0x13c   :  { %10190 = vmatprep.subr.bf16.mxu0 %v11179_v47  ;;  %v11218_v43 = vld [vmem:[%s14257_s1 + $0xbc0] sm:$0xff]   ;;  %v11254_v36 = vld [vmem:[%s14257_s1 + $0xc08] sm:$0xff]  }
 0x13d   :  { %10211 = vmatpush3.bf16.msra.mxu1 %v11178_v45  ;;  %v1898_v44 = vrot.slane %v1876_v40, %v11763_v34  ;;  %v11217_v45 = vld [vmem:[%s14257_s1 + $0xb00] sm:$0xff]   ;;  %v1877_v46 = vcombine.high %v12827_v42, %v12827_v42  ;;  %v1906_v47 = vcombine.high %v1884_v41, %v1884_v41  ;;  %v11256_v38 = vld [vmem:[%s14257_s1 + $0xc88] sm:$0xff]   ;;  %v11258_v40 = vld [vmem:[%s14257_s1 + $0xc10] sm:$0xff]  }
 0x13e   :  { %10212 = vmatprep.subr.bf16.mxu1 %v11181_v51 }
 0x13f   :  { %10191 = vmatpush3.bf16.msra.mxu0 %v11180_v50  ;;  %v11219_v50 = vld [vmem:[%s14257_s1 + $0xb80] sm:$0xff]   ;;  %v1905_v51 = vrot.slane %v1877_v46, %v11763_v34  ;;  %v11264_v46 = vld [vmem:[%s14257_s1 + $0xc98] sm:$0xff]  }
 0x140   :  { %10220 = vmatprep.subr.bf16.mxu0 %v11184_v54 }
 0x141   :  { %10213 = vmatpush3.bf16.msra.mxu1 %v11183_v52  ;;  %v11222_v52 = vld [vmem:[%s14257_s1 + $0xbc8] sm:$0xff]   ;;  %v1909_v54 = vcombine.high %v1905_v51, %v1905_v51 }
 0x142   :  { %7781 = vmatmul.mubr.bf16.vlgmr.msra.gmra.mrb[36].mxu0 %v1842_v53  ;;  %10242 = vmatprep.subr.bf16.mxu1 %v11186_v56  ;;  %v11221_v53 = vld [vmem:[%s14257_s1 + $0xb08] sm:$0xff]  }
 0x143   :  { %10221 = vmatpush3.bf16.msra.mxu0 %v11185_v55  ;;  %7860 = vmatprep.mubr.bf16.mxu0 %v1898_v44  ;;  %v11224_v55 = vld [vmem:[%s14257_s1 + $0xb50] sm:$0xff]   ;;  %v11223_v56 = vld [vmem:[%s14257_s1 + $0xb88] sm:$0xff]  }
 0x144   :  { %7821 = vmatmul.mubr.bf16.vlgmr.msra.gmra.mrb[36].mxu1 %v1858_v58  ;;  %10222 = vmatprep.subr.bf16.mxu0 %v11188_v59  ;;  %v11225_v58 = vld [vmem:[%s14257_s1 + $0xb10] sm:$0xff]   ;;  %v11228_v59 = vld [vmem:[%s14257_s1 + $0xb58] sm:$0xff]  }
 0x145   :  { %10243 = vmatpush3.bf16.msra.mxu1 %v11187_v57  ;;  %v11226_v57 = vld [vmem:[%s14257_s1 + $0xbd0] sm:$0xff]  }
 0x146   :  { %10244 = vmatprep.subr.bf16.mxu1 %v11190_v61  ;;  %v11230_v61 = vld [vmem:[%s14257_s1 + $0xbd8] sm:$0xff]  }
 0x147   :  { %10223 = vmatpush3.bf16.msra.mxu0 %v11189_v60  ;;  %v11227_v60 = vld [vmem:[%s14257_s1 + $0xb90] sm:$0xff]  }
 0x148   :  { %10224 = vmatprep.subr.bf16.mxu0 %v11192_v63  ;;  %v11232_v63 = vld [vmem:[%s14257_s1 + $0xb60] sm:$0xff]  }
 0x149   :  { %10245 = vmatpush3.bf16.msra.mxu1 %v11191_v62  ;;  %v11229_v62 = vld [vmem:[%s14257_s1 + $0xb18] sm:$0xff]  }
 0x14a   :  { %10246 = vmatprep.subr.bf16.mxu1 %v11194_v1  ;;  %v11234_v1 = vld [vmem:[%s14257_s1 + $0xbe0] sm:$0xff]  }
 0x14b   :  { %10225 = vmatpush3.bf16.msra.mxu0 %v11193_v0  ;;  %v11231_v0 = vld [vmem:[%s14257_s1 + $0xb98] sm:$0xff]  }
 0x14c   :  { %10226 = vmatprep.subr.bf16.mxu0 %v11196_v3  ;;  %v11236_v3 = vld [vmem:[%s14257_s1 + $0xb68] sm:$0xff]  }
 0x14d   :  { %10247 = vmatpush3.bf16.msra.mxu1 %v11195_v2  ;;  %v11233_v2 = vld [vmem:[%s14257_s1 + $0xb20] sm:$0xff]  }
 0x14e   :  { %10248 = vmatprep.subr.bf16.mxu1 %v11198_v5 }
 0x14f   :  { %10227 = vmatpush3.bf16.msra.mxu0 %v11197_v4  ;;  %v11235_v4 = vld [vmem:[%s14257_s1 + $0xba0] sm:$0xff]  }
 0x150   :  { %10228 = vmatprep.subr.bf16.mxu0 %v11200_v7 }
 0x151   :  { %10249 = vmatpush3.bf16.msra.mxu1 %v11199_v6  ;;  %v11238_v6 = vld [vmem:[%s14257_s1 + $0xbe8] sm:$0xff]  }
 0x152   :  { %10250 = vmatprep.subr.bf16.mxu1 %v11202_v9 }
 0x153   :  { %10229 = vmatpush3.bf16.msra.mxu0 %v11201_v8  ;;  %v11237_v8 = vld [vmem:[%s14257_s1 + $0xb28] sm:$0xff]  }
 0x154   :  { %10230 = vmatprep.subr.bf16.mxu0 %v11204_v11 }
 0x155   :  { %v9928_v14 = vpop.f32.mrb[12].mxu0  ;;  %10251 = vmatpush3.bf16.msra.mxu1 %v11203_v10 }
 0x156   :  { %v9929_v16 = vpop.f32.mrb[13].mxu0  ;;  %10252 = vmatprep.subr.bf16.mxu1 %v11206_v13  ;;  %v11240_v13 = vld [vmem:[%s14257_s1 + $0xb70] sm:$0xff]  }
 0x157   :  { %v9930_v18 = vadd.f32 %v9929_v16, %v9928_v14  ;;  %v9931_v19 = vpop.f32.mrb[14].mxu0  ;;  %v9950_v20 = vpop.f32.mrb[12].mxu1  ;;  %10231 = vmatpush3.bf16.msra.mxu0 %v11205_v12  ;;  %v11239_v12 = vld [vmem:[%s14257_s1 + $0xba8] sm:$0xff]   ;;  %v11241_v16 = vld [vmem:[%s14257_s1 + $0xb30] sm:$0xff]  }
 0x158   :  { %v9932_v21 = vpop.f32.mrb[15].mxu0  ;;  %v9951_v22 = vpop.f32.mrb[13].mxu1  ;;  %10232 = vmatprep.subr.bf16.mxu0 %v11208_v17  ;;  %v11242_v19 = vld [vmem:[%s14257_s1 + $0xbf0] sm:$0xff]  }
 0x159   :  { %v7303_v25 = vadd.f32 %v9930_v18, %v12706_v49  ;;  %v9952_v26 = vadd.f32 %v9951_v22, %v9950_v20  ;;  %v9953_v28 = vpop.f32.mrb[14].mxu1  ;;  %10253 = vmatpush3.bf16.msra.mxu1 %v11207_v15  ;;  %v1908_v49 = vcombine.high %v1898_v44, %v1898_v44  ;;  %v11243_v21 = vld [vmem:[%s14257_s1 + $0xbb0] sm:$0xff]   ;;  %v11262_v44 = vld [vmem:[%s14257_s1 + $0xc18] sm:$0xff]  }
 0x15a   :  { %v9954_v31 = vpop.f32.mrb[15].mxu1  ;;  %10254 = vmatprep.subr.bf16.mxu1 %v11210_v24  ;;  %v11244_v24 = vld [vmem:[%s14257_s1 + $0xb78] sm:$0xff]   ;;  %v1891_v28 = vrot.slane %v12827_v42, %v11763_v34  ;;  %v11260_v42 = vld [vmem:[%s14257_s1 + $0xc90] sm:$0xff]  }
 0x15b   :  { %v12804_v29 = vadd.f32 %v9952_v26, %v7303_v25  ;;  %10233 = vmatpush3.bf16.msra.mxu0 %v11209_v23  ;;  %7900 = vmatprep.mubr.bf16.mxu1 %v1908_v49  ;;  %v11245_v25 = vld [vmem:[%s14257_s1 + $0xb38] sm:$0xff]   ;;  %v11251_v31 = vld [vmem:[%s14257_s1 + $0xcc0] sm:$0xff]  }
 0x15c   :  { %10234 = vmatprep.subr.bf16.mxu0 %v11212_v30  ;;  %v11246_v26 = vld [vmem:[%s14257_s1 + $0xbf8] sm:$0xff]   ;;  %v11250_v30 = vld [vmem:[%s14257_s1 + $0xc00] sm:$0xff]  }
 0x15d   :  { %10255 = vmatpush3.bf16.msra.mxu1 %v11211_v27  ;;  %v11248_v27 = vld [vmem:[%s14257_s1 + $0xbb8] sm:$0xff]   ;;  %v11267_v49 = vld [vmem:[%s14257_s1 + $0xce0] sm:$0xff]  }
 0x15e   :  { %10256 = vmatprep.subr.bf16.mxu1 %v11214_v33  ;;  %v1907_v33 = vcombine.high %v1891_v28, %v1891_v28 }
 0x15f   :  { %10235 = vmatpush3.bf16.msra.mxu0 %v11213_v32  ;;  %v11252_v32 = vld [vmem:[%s14257_s1 + $0xc80] sm:$0xff]  }
 0x160   :  { %10264 = vmatprep.subr.bf16.mxu0 %v11216_v39  ;;  %v11257_v39 = vld [vmem:[%s14257_s1 + $0xc50] sm:$0xff]  }
 0x161   :  { %10257 = vmatpush3.bf16.msra.mxu1 %v11215_v37  ;;  %v11255_v37 = vld [vmem:[%s14257_s1 + $0xcc8] sm:$0xff]  }
 0x162   :  { %10286 = vmatprep.subr.bf16.mxu1 %v11218_v43  ;;  %7861 = vmatmul.mubr.bf16.vlgmr.msra.gmra.mrb[40].mxu0 %v1884_v41  ;;  %v11259_v41 = vld [vmem:[%s14257_s1 + $0xcd0] sm:$0xff]   ;;  %v11261_v43 = vld [vmem:[%s14257_s1 + $0xc58] sm:$0xff]  }
 0x163   :  { %10265 = vmatpush3.bf16.msra.mxu0 %v11217_v45  ;;  %7940 = vmatprep.mubr.bf16.mxu0 %v1905_v51  ;;  %v11263_v45 = vld [vmem:[%s14257_s1 + $0xcd8] sm:$0xff]   ;;  %v11269_v51 = vld [vmem:[%s14257_s1 + $0xc68] sm:$0xff]  }
 0x164   :  { %7901 = vmatmul.mubr.bf16.vlgmr.msra.gmra.mrb[40].mxu1 %v1906_v47  ;;  %10266 = vmatprep.subr.bf16.mxu0 %v11220_v48  ;;  %v11265_v47 = vld [vmem:[%s14257_s1 + $0xc60] sm:$0xff]  }
 0x165   :  { %10287 = vmatpush3.bf16.msra.mxu1 %v11219_v50  ;;  %7980 = vmatprep.mubr.bf16.mxu1 %v1909_v54  ;;  %v11266_v48 = vld [vmem:[%s14257_s1 + $0xc20] sm:$0xff]   ;;  %v11271_v54 = vld [vmem:[%s14257_s1 + $0xce8] sm:$0xff]  }
 0x166   :  { %10288 = vmatprep.subr.bf16.mxu1 %v11222_v52  ;;  %v11268_v50 = vld [vmem:[%s14257_s1 + $0xca0] sm:$0xff]   ;;  %v11270_v52 = vld [vmem:[%s14257_s1 + $0xc28] sm:$0xff]  }
 0x167   :  { %10267 = vmatpush3.bf16.msra.mxu0 %v11221_v53 }
 0x168   :  { %10268 = vmatprep.subr.bf16.mxu0 %v11224_v55 }
 0x169   :  { %10289 = vmatpush3.bf16.msra.mxu1 %v11223_v56  ;;  %v11272_v56 = vld [vmem:[%s14257_s1 + $0xca8] sm:$0xff]  }
 0x16a   :  { %10290 = vmatprep.subr.bf16.mxu1 %v11226_v57 }
 0x16b   :  { %10269 = vmatpush3.bf16.msra.mxu0 %v11225_v58 }
 0x16c   :  { %10270 = vmatprep.subr.bf16.mxu0 %v11228_v59 }
 0x16d   :  { %10291 = vmatpush3.bf16.msra.mxu1 %v11227_v60 }
 0x16e   :  { %10292 = vmatprep.subr.bf16.mxu1 %v11230_v61 }
 0x16f   :  { %10271 = vmatpush3.bf16.msra.mxu0 %v11229_v62  ;;  %v11273_v62 = vld [vmem:[%s14257_s1 + $0xc70] sm:$0xff]  }
 0x170   :  { %10272 = vmatprep.subr.bf16.mxu0 %v11232_v63  ;;  %v11274_v63 = vld [vmem:[%s14257_s1 + $0xc30] sm:$0xff]  }
 0x171   :  { %10293 = vmatpush3.bf16.msra.mxu1 %v11231_v0 }
 0x172   :  { %10294 = vmatprep.subr.bf16.mxu1 %v11234_v1 }
 0x173   :  { %10273 = vmatpush3.bf16.msra.mxu0 %v11233_v2  ;;  %v11275_v2 = vld [vmem:[%s14257_s1 + $0xcf0] sm:$0xff]  }
 0x174   :  { %10274 = vmatprep.subr.bf16.mxu0 %v11236_v3 }
 0x175   :  { %v9972_v5 = vpop.f32.mrb[16].mxu0  ;;  %10295 = vmatpush3.bf16.msra.mxu1 %v11235_v4 }
 0x176   :  { %v9973_v7 = vpop.f32.mrb[17].mxu0  ;;  %10296 = vmatprep.subr.bf16.mxu1 %v11238_v6 }
 0x177   :  { %v9974_v9 = vadd.f32 %v9973_v7, %v9972_v5  ;;  %v9975_v10 = vpop.f32.mrb[18].mxu0  ;;  %v9994_v11 = vpop.f32.mrb[16].mxu1  ;;  %10275 = vmatpush3.bf16.msra.mxu0 %v11237_v8  ;;  %v11276_v5 = vld [vmem:[%s14257_s1 + $0xcb0] sm:$0xff]   ;;  %v11277_v7 = vld [vmem:[%s14257_s1 + $0xc78] sm:$0xff]  }
 0x178   :  { %v9976_v14 = vpop.f32.mrb[19].mxu0  ;;  %v9995_v15 = vpop.f32.mrb[17].mxu1  ;;  %10276 = vmatprep.subr.bf16.mxu0 %v11240_v13  ;;  %v11278_v8 = vld [vmem:[%s14257_s1 + $0xc38] sm:$0xff]   ;;  %v21_v10 = vld [vmem:[%s14258_s0 + $0x30] sm:$0xff] }
 0x179   :  { %v7383_v17 = vadd.f32 %v9974_v9, %v12804_v29  ;;  %v9996_v18 = vadd.f32 %v9995_v15, %v9994_v11  ;;  %v9997_v20 = vpop.f32.mrb[18].mxu1  ;;  %10297 = vmatpush3.bf16.msra.mxu1 %v11239_v12  ;;  %v11249_v29 = vld [vmem:[%s14257_s1 + $0xc40] sm:$0xff]   ;;  %v11279_v9 = vld [vmem:[%s14257_s1 + $0xcf8] sm:$0xff]   ;;  %v1917_v11 = vrot.slane %v21_v10, %v11763_v34  ;;  %v1910_v13 = vcombine.high %v21_v10, %v21_v10  ;;  %v11318_v10 = vld [vmem:[%s14257_s1 + $0xe48] sm:$0xff]  }
 0x17a   :  { %v9998_v22 = vpop.f32.mrb[19].mxu1  ;;  %10298 = vmatprep.subr.bf16.mxu1 %v11242_v19  ;;  %v11280_v12 = vld [vmem:[%s14257_s1 + $0xcb8] sm:$0xff]   ;;  %v11281_v14 = vld [vmem:[%s14257_s1 + $0xd40] sm:$0xff]  }
 0x17b   :  { %v12915_v23 = vadd.f32 %v9996_v18, %v7383_v17  ;;  %10277 = vmatpush3.bf16.msra.mxu0 %v11241_v16  ;;  %v1925_v15 = vcombine.high %v1917_v11, %v1917_v11  ;;  %v1933_v16 = vrot.slane %v1917_v11, %v11763_v34  ;;  %v13039_v17 = vrot.slane %v1910_v13, %v11763_v34  ;;  %v11283_v18 = vld [vmem:[%s14257_s1 + $0xdc0] sm:$0xff]   ;;  %v11319_v11 = vld [vmem:[%s14257_s1 + $0xe08] sm:$0xff]  }
 0x17c   :  { %10278 = vmatprep.subr.bf16.mxu0 %v11244_v24  ;;  %v11282_v20 = vld [vmem:[%s14257_s1 + $0xd00] sm:$0xff]   ;;  %v11321_v13 = vld [vmem:[%s14257_s1 + $0xe88] sm:$0xff]  }
 0x17d   :  { %10299 = vmatpush3.bf16.msra.mxu1 %v11243_v21  ;;  %v1947_v19 = vrot.slane %v1925_v15, %v11763_v34  ;;  %v1926_v21 = vcombine.high %v13039_v17, %v13039_v17  ;;  %v1955_v22 = vcombine.high %v1933_v16, %v1933_v16  ;;  %v11323_v15 = vld [vmem:[%s14257_s1 + $0xe10] sm:$0xff]  }
 0x17e   :  { %10300 = vmatprep.subr.bf16.mxu1 %v11246_v26 }
 0x17f   :  { %10279 = vmatpush3.bf16.msra.mxu0 %v11245_v25  ;;  %v1957_v24 = vcombine.high %v1947_v19, %v1947_v19  ;;  %v11284_v25 = vld [vmem:[%s14257_s1 + $0xd80] sm:$0xff]   ;;  %v1954_v26 = vrot.slane %v1926_v21, %v11763_v34  ;;  %v11329_v21 = vld [vmem:[%s14257_s1 + $0xe98] sm:$0xff]  }
 0x180   :  { %10308 = vmatprep.subr.bf16.mxu0 %v11249_v29 }
 0x181   :  { %10301 = vmatpush3.bf16.msra.mxu1 %v11248_v27  ;;  %v11287_v27 = vld [vmem:[%s14257_s1 + $0xdc8] sm:$0xff]   ;;  %v1958_v29 = vcombine.high %v1954_v26, %v1954_v26 }
 0x182   :  { %7941 = vmatmul.mubr.bf16.vlgmr.msra.gmra.mrb[44].mxu0 %v1891_v28  ;;  %10330 = vmatprep.subr.bf16.mxu1 %v11251_v31  ;;  %v11286_v28 = vld [vmem:[%s14257_s1 + $0xd08] sm:$0xff]  }
 0x183   :  { %10309 = vmatpush3.bf16.msra.mxu0 %v11250_v30  ;;  %8020 = vmatprep.mubr.bf16.mxu0 %v1947_v19  ;;  %v11289_v30 = vld [vmem:[%s14257_s1 + $0xd50] sm:$0xff]   ;;  %v11288_v31 = vld [vmem:[%s14257_s1 + $0xd88] sm:$0xff]   ;;  %v11327_v19 = vld [vmem:[%s14257_s1 + $0xe18] sm:$0xff]  }
 0x184   :  { %7981 = vmatmul.mubr.bf16.vlgmr.msra.gmra.mrb[44].mxu1 %v1907_v33  ;;  %10310 = vmatprep.subr.bf16.mxu0 %v11253_v35  ;;  %v11290_v33 = vld [vmem:[%s14257_s1 + $0xd10] sm:$0xff]   ;;  %v11293_v35 = vld [vmem:[%s14257_s1 + $0xd58] sm:$0xff]  }
 0x185   :  { %10331 = vmatpush3.bf16.msra.mxu1 %v11252_v32  ;;  %8060 = vmatprep.mubr.bf16.mxu1 %v1957_v24  ;;  %v11291_v32 = vld [vmem:[%s14257_s1 + $0xdd0] sm:$0xff]   ;;  %v11332_v24 = vld [vmem:[%s14257_s1 + $0xee0] sm:$0xff]  }
 0x186   :  { %10332 = vmatprep.subr.bf16.mxu1 %v11255_v37  ;;  %v11295_v37 = vld [vmem:[%s14257_s1 + $0xdd8] sm:$0xff]  }
 0x187   :  { %10311 = vmatpush3.bf16.msra.mxu0 %v11254_v36  ;;  %v11292_v36 = vld [vmem:[%s14257_s1 + $0xd90] sm:$0xff]  }
 0x188   :  { %10312 = vmatprep.subr.bf16.mxu0 %v11257_v39  ;;  %v11297_v39 = vld [vmem:[%s14257_s1 + $0xd60] sm:$0xff]  }
 0x189   :  { %10333 = vmatpush3.bf16.msra.mxu1 %v11256_v38  ;;  %v11294_v38 = vld [vmem:[%s14257_s1 + $0xd18] sm:$0xff]  }
 0x18a   :  { %10334 = vmatprep.subr.bf16.mxu1 %v11259_v41  ;;  %v11299_v41 = vld [vmem:[%s14257_s1 + $0xde0] sm:$0xff]  }
 0x18b   :  { %10313 = vmatpush3.bf16.msra.mxu0 %v11258_v40  ;;  %v11296_v40 = vld [vmem:[%s14257_s1 + $0xd98] sm:$0xff]  }
 0x18c   :  { %10314 = vmatprep.subr.bf16.mxu0 %v11261_v43  ;;  %v11301_v43 = vld [vmem:[%s14257_s1 + $0xd68] sm:$0xff]  }
 0x18d   :  { %10335 = vmatpush3.bf16.msra.mxu1 %v11260_v42  ;;  %v11298_v42 = vld [vmem:[%s14257_s1 + $0xd20] sm:$0xff]  }
 0x18e   :  { %10336 = vmatprep.subr.bf16.mxu1 %v11263_v45 }
 0x18f   :  { %10315 = vmatpush3.bf16.msra.mxu0 %v11262_v44  ;;  %v11300_v44 = vld [vmem:[%s14257_s1 + $0xda0] sm:$0xff]  }
 0x190   :  { %10316 = vmatprep.subr.bf16.mxu0 %v11265_v47 }
 0x191   :  { %10337 = vmatpush3.bf16.msra.mxu1 %v11264_v46  ;;  %v11303_v46 = vld [vmem:[%s14257_s1 + $0xde8] sm:$0xff]  }
 0x192   :  { %10338 = vmatprep.subr.bf16.mxu1 %v11267_v49 }
 0x193   :  { %10317 = vmatpush3.bf16.msra.mxu0 %v11266_v48  ;;  %v11302_v48 = vld [vmem:[%s14257_s1 + $0xd28] sm:$0xff]  }
 0x194   :  { %10318 = vmatprep.subr.bf16.mxu0 %v11269_v51 }
 0x195   :  { %v10016_v53 = vpop.f32.mrb[20].mxu0  ;;  %10339 = vmatpush3.bf16.msra.mxu1 %v11268_v50 }
 0x196   :  { %v10017_v55 = vpop.f32.mrb[21].mxu0  ;;  %10340 = vmatprep.subr.bf16.mxu1 %v11271_v54 }
 0x197   :  { %v10018_v57 = vadd.f32 %v10017_v55, %v10016_v53  ;;  %v10019_v58 = vpop.f32.mrb[22].mxu0  ;;  %v10038_v59 = vpop.f32.mrb[20].mxu1  ;;  %10319 = vmatpush3.bf16.msra.mxu0 %v11270_v52  ;;  %v11304_v52 = vld [vmem:[%s14257_s1 + $0xda8] sm:$0xff]   ;;  %v11305_v53 = vld [vmem:[%s14257_s1 + $0xd70] sm:$0xff]  }
 0x198   :  { %v10020_v60 = vpop.f32.mrb[23].mxu0  ;;  %v10039_v61 = vpop.f32.mrb[21].mxu1  ;;  %10320 = vmatprep.subr.bf16.mxu0 %v11273_v62 }
 0x199   :  { %v7463_v0 = vadd.f32 %v10018_v57, %v12915_v23  ;;  %v10040_v1 = vadd.f32 %v10039_v61, %v10038_v59  ;;  %v10041_v3 = vpop.f32.mrb[22].mxu1  ;;  %10341 = vmatpush3.bf16.msra.mxu1 %v11272_v56  ;;  %v11285_v23 = vld [vmem:[%s14257_s1 + $0xd48] sm:$0xff]   ;;  %v11306_v56 = vld [vmem:[%s14257_s1 + $0xd30] sm:$0xff]  }
 0x19a   :  { %v10042_v6 = vpop.f32.mrb[23].mxu1  ;;  %10342 = vmatprep.subr.bf16.mxu1 %v11275_v2  ;;  %v11307_v59 = vld [vmem:[%s14257_s1 + $0xdf0] sm:$0xff]   ;;  %v11311_v2 = vld [vmem:[%s14257_s1 + $0xdf8] sm:$0xff]  }
 0x19b   :  { %v13013_v4 = vadd.f32 %v10040_v1, %v7463_v0  ;;  %10321 = vmatpush3.bf16.msra.mxu0 %v11274_v63  ;;  %v11308_v61 = vld [vmem:[%s14257_s1 + $0xdb0] sm:$0xff]   ;;  %v11309_v0 = vld [vmem:[%s14257_s1 + $0xd78] sm:$0xff]   ;;  %v11315_v6 = vld [vmem:[%s14257_s1 + $0xe00] sm:$0xff]  }
 0x19c   :  { %10322 = vmatprep.subr.bf16.mxu0 %v11277_v7  ;;  %v11310_v1 = vld [vmem:[%s14257_s1 + $0xd38] sm:$0xff]   ;;  %v11316_v7 = vld [vmem:[%s14257_s1 + $0xec0] sm:$0xff]  }
 0x19d   :  { %10343 = vmatpush3.bf16.msra.mxu1 %v11276_v5  ;;  %v11313_v3 = vld [vmem:[%s14257_s1 + $0xdb8] sm:$0xff]   ;;  %v11314_v5 = vld [vmem:[%s14257_s1 + $0xe40] sm:$0xff]  }
 0x19e   :  { %10344 = vmatprep.subr.bf16.mxu1 %v11279_v9 }
 0x19f   :  { %10323 = vmatpush3.bf16.msra.mxu0 %v11278_v8  ;;  %v11317_v8 = vld [vmem:[%s14257_s1 + $0xe80] sm:$0xff]  }
 0x1a0   :  { %10352 = vmatprep.subr.bf16.mxu0 %v11281_v14  ;;  %v11322_v14 = vld [vmem:[%s14257_s1 + $0xe50] sm:$0xff]  }
 0x1a1   :  { %10345 = vmatpush3.bf16.msra.mxu1 %v11280_v12  ;;  %v11320_v12 = vld [vmem:[%s14257_s1 + $0xec8] sm:$0xff]  }
 0x1a2   :  { %10374 = vmatprep.subr.bf16.mxu1 %v11283_v18  ;;  %8021 = vmatmul.mubr.bf16.vlgmr.msra.gmra.mrb[48].mxu0 %v1933_v16  ;;  %v11324_v16 = vld [vmem:[%s14257_s1 + $0xed0] sm:$0xff]   ;;  %v11326_v18 = vld [vmem:[%s14257_s1 + $0xe58] sm:$0xff]  }
 0x1a3   :  { %10353 = vmatpush3.bf16.msra.mxu0 %v11282_v20  ;;  %8100 = vmatprep.mubr.bf16.mxu0 %v1954_v26  ;;  %v11328_v20 = vld [vmem:[%s14257_s1 + $0xed8] sm:$0xff]   ;;  %v11334_v26 = vld [vmem:[%s14257_s1 + $0xe68] sm:$0xff]  }
 0x1a4   :  { %8061 = vmatmul.mubr.bf16.vlgmr.msra.gmra.mrb[48].mxu1 %v1955_v22  ;;  %10354 = vmatprep.subr.bf16.mxu0 %v11285_v23  ;;  %v11330_v22 = vld [vmem:[%s14257_s1 + $0xe60] sm:$0xff]  }
 0x1a5   :  { %10375 = vmatpush3.bf16.msra.mxu1 %v11284_v25  ;;  %8140 = vmatprep.mubr.bf16.mxu1 %v1958_v29  ;;  %v11331_v23 = vld [vmem:[%s14257_s1 + $0xe20] sm:$0xff]   ;;  %v11336_v29 = vld [vmem:[%s14257_s1 + $0xee8] sm:$0xff]  }
 0x1a6   :  { %10376 = vmatprep.subr.bf16.mxu1 %v11287_v27  ;;  %v11333_v25 = vld [vmem:[%s14257_s1 + $0xea0] sm:$0xff]   ;;  %v11335_v27 = vld [vmem:[%s14257_s1 + $0xe28] sm:$0xff]  }
 0x1a7   :  { %10355 = vmatpush3.bf16.msra.mxu0 %v11286_v28 }
 0x1a8   :  { %10356 = vmatprep.subr.bf16.mxu0 %v11289_v30 }
 0x1a9   :  { %10377 = vmatpush3.bf16.msra.mxu1 %v11288_v31  ;;  %v11337_v31 = vld [vmem:[%s14257_s1 + $0xea8] sm:$0xff]  }
 0x1aa   :  { %10378 = vmatprep.subr.bf16.mxu1 %v11291_v32 }
 0x1ab   :  { %10357 = vmatpush3.bf16.msra.mxu0 %v11290_v33 }
 0x1ac   :  { %10358 = vmatprep.subr.bf16.mxu0 %v11293_v35 }
 0x1ad   :  { %10379 = vmatpush3.bf16.msra.mxu1 %v11292_v36 }
 0x1ae   :  { %10380 = vmatprep.subr.bf16.mxu1 %v11295_v37 }
 0x1af   :  { %10359 = vmatpush3.bf16.msra.mxu0 %v11294_v38  ;;  %v11338_v38 = vld [vmem:[%s14257_s1 + $0xe70] sm:$0xff]  }
 0x1b0   :  { %10360 = vmatprep.subr.bf16.mxu0 %v11297_v39  ;;  %v11339_v39 = vld [vmem:[%s14257_s1 + $0xe30] sm:$0xff]  }
 0x1b1   :  { %10381 = vmatpush3.bf16.msra.mxu1 %v11296_v40 }
 0x1b2   :  { %10382 = vmatprep.subr.bf16.mxu1 %v11299_v41 }
 0x1b3   :  { %10361 = vmatpush3.bf16.msra.mxu0 %v11298_v42  ;;  %v11340_v42 = vld [vmem:[%s14257_s1 + $0xef0] sm:$0xff]  }
 0x1b4   :  { %10362 = vmatprep.subr.bf16.mxu0 %v11301_v43 }
 0x1b5   :  { %v10060_v45 = vpop.f32.mrb[24].mxu0  ;;  %10383 = vmatpush3.bf16.msra.mxu1 %v11300_v44 }
 0x1b6   :  { %v10061_v47 = vpop.f32.mrb[25].mxu0  ;;  %10384 = vmatprep.subr.bf16.mxu1 %v11303_v46 }
 0x1b7   :  { %v10062_v49 = vadd.f32 %v10061_v47, %v10060_v45  ;;  %v10063_v50 = vpop.f32.mrb[26].mxu0  ;;  %v10082_v51 = vpop.f32.mrb[24].mxu1  ;;  %10363 = vmatpush3.bf16.msra.mxu0 %v11302_v48  ;;  %v11341_v45 = vld [vmem:[%s14257_s1 + $0xeb0] sm:$0xff]   ;;  %v11342_v47 = vld [vmem:[%s14257_s1 + $0xe78] sm:$0xff]  }
 0x1b8   :  { %v10064_v54 = vpop.f32.mrb[27].mxu0  ;;  %v10083_v55 = vpop.f32.mrb[25].mxu1  ;;  %10364 = vmatprep.subr.bf16.mxu0 %v11305_v53  ;;  %v11343_v48 = vld [vmem:[%s14257_s1 + $0xe38] sm:$0xff]  }
 0x1b9   :  { %v7543_v57 = vadd.f32 %v10062_v49, %v13013_v4  ;;  %v10084_v58 = vadd.f32 %v10083_v55, %v10082_v51  ;;  %v10085_v60 = vpop.f32.mrb[26].mxu1  ;;  %10385 = vmatpush3.bf16.msra.mxu1 %v11304_v52  ;;  %v1940_v4 = vrot.slane %v13039_v17, %v11763_v34  ;;  %v11325_v17 = vld [vmem:[%s14257_s1 + $0xe90] sm:$0xff]   ;;  %v11344_v49 = vld [vmem:[%s14257_s1 + $0xef8] sm:$0xff]   ;;  %v11346_v54 = vld [vmem:[%s14257_s1 + $0xf40] sm:$0xff]  }
 0x1ba   :  { %v10086_v62 = vpop.f32.mrb[27].mxu1  ;;  %10386 = vmatprep.subr.bf16.mxu1 %v11307_v59  ;;  %v22_v50 = vld [vmem:[%s14258_s0 + $0x38] sm:$0xff]  ;;  %v11347_v60 = vld [vmem:[%s14257_s1 + $0xf00] sm:$0xff]  }
 0x1bb   :  { %v13127_v63 = vadd.f32 %v10084_v58, %v7543_v57  ;;  %10365 = vmatpush3.bf16.msra.mxu0 %v11306_v56  ;;  %v1956_v9 = vcombine.high %v1940_v4, %v1940_v4  ;;  %v1966_v51 = vrot.slane %v22_v50, %v11763_v34  ;;  %v11345_v52 = vld [vmem:[%s14257_s1 + $0xeb8] sm:$0xff]   ;;  %v1959_v53 = vcombine.high %v22_v50, %v22_v50  ;;  %v11348_v58 = vld [vmem:[%s14257_s1 + $0xfc0] sm:$0xff]   ;;  %v11383_v50 = vld [vmem:[%s14257_s1 + $0x1048] sm:$0xff]  }
 0x1bc   :  { %10366 = vmatprep.subr.bf16.mxu0 %v11309_v0 }
 0x1bd   :  { %10387 = vmatpush3.bf16.msra.mxu1 %v11308_v61  ;;  %v1974_v55 = vcombine.high %v1966_v51, %v1966_v51  ;;  %v1982_v56 = vrot.slane %v1966_v51, %v11763_v34  ;;  %v13251_v57 = vrot.slane %v1959_v53, %v11763_v34  ;;  %v11384_v51 = vld [vmem:[%s14257_s1 + $0x1008] sm:$0xff]  }
 0x1be   :  { %10388 = vmatprep.subr.bf16.mxu1 %v11311_v2  ;;  %v11386_v53 = vld [vmem:[%s14257_s1 + $0x1088] sm:$0xff]  }
 0x1bf   :  { %10367 = vmatpush3.bf16.msra.mxu0 %v11310_v1  ;;  %v1996_v59 = vrot.slane %v1974_v55, %v11763_v34  ;;  %v1975_v61 = vcombine.high %v13251_v57, %v13251_v57  ;;  %v2004_v62 = vcombine.high %v1982_v56, %v1982_v56  ;;  %v11349_v1 = vld [vmem:[%s14257_s1 + $0xf80] sm:$0xff]   ;;  %v11388_v55 = vld [vmem:[%s14257_s1 + $0x1010] sm:$0xff]  }
 0x1c0   :  { %10396 = vmatprep.subr.bf16.mxu0 %v11314_v5 }
 0x1c1   :  { %10389 = vmatpush3.bf16.msra.mxu1 %v11313_v3  ;;  %v2006_v0 = vcombine.high %v1996_v59, %v1996_v59  ;;  %v2003_v2 = vrot.slane %v1975_v61, %v11763_v34  ;;  %v11352_v3 = vld [vmem:[%s14257_s1 + $0xfc8] sm:$0xff]   ;;  %v11394_v61 = vld [vmem:[%s14257_s1 + $0x1098] sm:$0xff]  }
 0x1c2   :  { %8101 = vmatmul.mubr.bf16.vlgmr.msra.gmra.mrb[52].mxu0 %v1940_v4  ;;  %10418 = vmatprep.subr.bf16.mxu1 %v11316_v7  ;;  %v11351_v4 = vld [vmem:[%s14257_s1 + $0xf08] sm:$0xff]  }
 0x1c3   :  { %10397 = vmatpush3.bf16.msra.mxu0 %v11315_v6  ;;  %8180 = vmatprep.mubr.bf16.mxu0 %v1996_v59  ;;  %v2007_v5 = vcombine.high %v2003_v2, %v2003_v2  ;;  %v11354_v6 = vld [vmem:[%s14257_s1 + $0xf50] sm:$0xff]   ;;  %v11353_v7 = vld [vmem:[%s14257_s1 + $0xf88] sm:$0xff]   ;;  %v11392_v59 = vld [vmem:[%s14257_s1 + $0x1018] sm:$0xff]  }
 0x1c4   :  { %8141 = vmatmul.mubr.bf16.vlgmr.msra.gmra.mrb[52].mxu1 %v1956_v9  ;;  %10398 = vmatprep.subr.bf16.mxu0 %v11318_v10  ;;  %v11355_v9 = vld [vmem:[%s14257_s1 + $0xf10] sm:$0xff]   ;;  %v11358_v10 = vld [vmem:[%s14257_s1 + $0xf58] sm:$0xff]  }
 0x1c5   :  { %10419 = vmatpush3.bf16.msra.mxu1 %v11317_v8  ;;  %8220 = vmatprep.mubr.bf16.mxu1 %v2006_v0  ;;  %v11356_v8 = vld [vmem:[%s14257_s1 + $0xfd0] sm:$0xff]   ;;  %v11397_v0 = vld [vmem:[%s14257_s1 + $0x10e0] sm:$0xff]  }
 0x1c6   :  { %10420 = vmatprep.subr.bf16.mxu1 %v11320_v12  ;;  %v11360_v12 = vld [vmem:[%s14257_s1 + $0xfd8] sm:$0xff]  }
 0x1c7   :  { %10399 = vmatpush3.bf16.msra.mxu0 %v11319_v11  ;;  %v11357_v11 = vld [vmem:[%s14257_s1 + $0xf90] sm:$0xff]  }
 0x1c8   :  { %10400 = vmatprep.subr.bf16.mxu0 %v11322_v14  ;;  %v11362_v14 = vld [vmem:[%s14257_s1 + $0xf60] sm:$0xff]  }
 0x1c9   :  { %10421 = vmatpush3.bf16.msra.mxu1 %v11321_v13  ;;  %v11359_v13 = vld [vmem:[%s14257_s1 + $0xf18] sm:$0xff]  }
 0x1ca   :  { %10422 = vmatprep.subr.bf16.mxu1 %v11324_v16  ;;  %v11364_v16 = vld [vmem:[%s14257_s1 + $0xfe0] sm:$0xff]  }
 0x1cb   :  { %10401 = vmatpush3.bf16.msra.mxu0 %v11323_v15  ;;  %v11361_v15 = vld [vmem:[%s14257_s1 + $0xf98] sm:$0xff]  }
 0x1cc   :  { %10402 = vmatprep.subr.bf16.mxu0 %v11326_v18  ;;  %v11366_v18 = vld [vmem:[%s14257_s1 + $0xf68] sm:$0xff]  }
 0x1cd   :  { %10423 = vmatpush3.bf16.msra.mxu1 %v11325_v17  ;;  %v11363_v17 = vld [vmem:[%s14257_s1 + $0xf20] sm:$0xff]  }
 0x1ce   :  { %10424 = vmatprep.subr.bf16.mxu1 %v11328_v20 }
 0x1cf   :  { %10403 = vmatpush3.bf16.msra.mxu0 %v11327_v19  ;;  %v11365_v19 = vld [vmem:[%s14257_s1 + $0xfa0] sm:$0xff]  }
 0x1d0   :  { %10404 = vmatprep.subr.bf16.mxu0 %v11330_v22 }
 0x1d1   :  { %10425 = vmatpush3.bf16.msra.mxu1 %v11329_v21  ;;  %v11368_v21 = vld [vmem:[%s14257_s1 + $0xfe8] sm:$0xff]  }
 0x1d2   :  { %10426 = vmatprep.subr.bf16.mxu1 %v11332_v24 }
 0x1d3   :  { %10405 = vmatpush3.bf16.msra.mxu0 %v11331_v23  ;;  %v11367_v23 = vld [vmem:[%s14257_s1 + $0xf28] sm:$0xff]  }
 0x1d4   :  { %10406 = vmatprep.subr.bf16.mxu0 %v11334_v26 }
 0x1d5   :  { %v10104_v28 = vpop.f32.mrb[28].mxu0  ;;  %10427 = vmatpush3.bf16.msra.mxu1 %v11333_v25 }
 0x1d6   :  { %v10105_v30 = vpop.f32.mrb[29].mxu0  ;;  %10428 = vmatprep.subr.bf16.mxu1 %v11336_v29 }
 0x1d7   :  { %v10106_v32 = vadd.f32 %v10105_v30, %v10104_v28  ;;  %v10107_v33 = vpop.f32.mrb[30].mxu0  ;;  %v10126_v35 = vpop.f32.mrb[28].mxu1  ;;  %10407 = vmatpush3.bf16.msra.mxu0 %v11335_v27  ;;  %v11369_v27 = vld [vmem:[%s14257_s1 + $0xfa8] sm:$0xff]   ;;  %v11370_v28 = vld [vmem:[%s14257_s1 + $0xf70] sm:$0xff]  }
 0x1d8   :  { %v10108_v36 = vpop.f32.mrb[31].mxu0  ;;  %v10127_v37 = vpop.f32.mrb[29].mxu1  ;;  %10408 = vmatprep.subr.bf16.mxu0 %v11338_v38 }
 0x1d9   :  { %v7623_v40 = vadd.f32 %v10106_v32, %v13127_v63  ;;  %v10128_v41 = vadd.f32 %v10127_v37, %v10126_v35  ;;  %v10129_v43 = vpop.f32.mrb[30].mxu1  ;;  %10429 = vmatpush3.bf16.msra.mxu1 %v11337_v31  ;;  %v11350_v63 = vld [vmem:[%s14257_s1 + $0xf48] sm:$0xff]   ;;  %v11371_v31 = vld [vmem:[%s14257_s1 + $0xf30] sm:$0xff]  }
 0x1da   :  { %v10130_v46 = vpop.f32.mrb[31].mxu1  ;;  %10430 = vmatprep.subr.bf16.mxu1 %v11340_v42  ;;  %v11372_v35 = vld [vmem:[%s14257_s1 + $0xff0] sm:$0xff]   ;;  %v11376_v42 = vld [vmem:[%s14257_s1 + $0xff8] sm:$0xff]  }
 0x1db   :  { %v13225_v44 = vadd.f32 %v10128_v41, %v7623_v40  ;;  %10409 = vmatpush3.bf16.msra.mxu0 %v11339_v39  ;;  %v11373_v37 = vld [vmem:[%s14257_s1 + $0xfb0] sm:$0xff]   ;;  %v11374_v40 = vld [vmem:[%s14257_s1 + $0xf78] sm:$0xff]   ;;  %v11380_v46 = vld [vmem:[%s14257_s1 + $0x1000] sm:$0xff]  }
 0x1dc   :  { %10410 = vmatprep.subr.bf16.mxu0 %v11342_v47  ;;  %v11375_v41 = vld [vmem:[%s14257_s1 + $0xf38] sm:$0xff]   ;;  %v11381_v47 = vld [vmem:[%s14257_s1 + $0x10c0] sm:$0xff]  }
 0x1dd   :  { %10431 = vmatpush3.bf16.msra.mxu1 %v11341_v45  ;;  %v11378_v43 = vld [vmem:[%s14257_s1 + $0xfb8] sm:$0xff]   ;;  %v11379_v45 = vld [vmem:[%s14257_s1 + $0x1040] sm:$0xff]  }
 0x1de   :  { %10432 = vmatprep.subr.bf16.mxu1 %v11344_v49 }
 0x1df   :  { %10411 = vmatpush3.bf16.msra.mxu0 %v11343_v48  ;;  %v11382_v48 = vld [vmem:[%s14257_s1 + $0x1080] sm:$0xff]  }
 0x1e0   :  { %10440 = vmatprep.subr.bf16.mxu0 %v11346_v54  ;;  %v11387_v54 = vld [vmem:[%s14257_s1 + $0x1050] sm:$0xff]  }
 0x1e1   :  { %10433 = vmatpush3.bf16.msra.mxu1 %v11345_v52  ;;  %v11385_v52 = vld [vmem:[%s14257_s1 + $0x10c8] sm:$0xff]  }
 0x1e2   :  { %10462 = vmatprep.subr.bf16.mxu1 %v11348_v58  ;;  %8181 = vmatmul.mubr.bf16.vlgmr.msra.gmra.mrb[56].mxu0 %v1982_v56  ;;  %v11389_v56 = vld [vmem:[%s14257_s1 + $0x10d0] sm:$0xff]   ;;  %v11391_v58 = vld [vmem:[%s14257_s1 + $0x1058] sm:$0xff]  }
 0x1e3   :  { %10441 = vmatpush3.bf16.msra.mxu0 %v11347_v60  ;;  %8260 = vmatprep.mubr.bf16.mxu0 %v2003_v2  ;;  %v11393_v60 = vld [vmem:[%s14257_s1 + $0x10d8] sm:$0xff]   ;;  %v11399_v2 = vld [vmem:[%s14257_s1 + $0x1068] sm:$0xff]  }
 0x1e4   :  { %8221 = vmatmul.mubr.bf16.vlgmr.msra.gmra.mrb[56].mxu1 %v2004_v62  ;;  %10442 = vmatprep.subr.bf16.mxu0 %v11350_v63  ;;  %v11395_v62 = vld [vmem:[%s14257_s1 + $0x1060] sm:$0xff]  }
 0x1e5   :  { %10463 = vmatpush3.bf16.msra.mxu1 %v11349_v1  ;;  %8300 = vmatprep.mubr.bf16.mxu1 %v2007_v5  ;;  %v11396_v63 = vld [vmem:[%s14257_s1 + $0x1020] sm:$0xff]   ;;  %v11401_v5 = vld [vmem:[%s14257_s1 + $0x10e8] sm:$0xff]  }
 0x1e6   :  { %10464 = vmatprep.subr.bf16.mxu1 %v11352_v3  ;;  %v11398_v1 = vld [vmem:[%s14257_s1 + $0x10a0] sm:$0xff]   ;;  %v11400_v3 = vld [vmem:[%s14257_s1 + $0x1028] sm:$0xff]  }
 0x1e7   :  { %10443 = vmatpush3.bf16.msra.mxu0 %v11351_v4 }
 0x1e8   :  { %10444 = vmatprep.subr.bf16.mxu0 %v11354_v6 }
 0x1e9   :  { %10465 = vmatpush3.bf16.msra.mxu1 %v11353_v7  ;;  %v11402_v7 = vld [vmem:[%s14257_s1 + $0x10a8] sm:$0xff]  }
 0x1ea   :  { %10466 = vmatprep.subr.bf16.mxu1 %v11356_v8 }
 0x1eb   :  { %10445 = vmatpush3.bf16.msra.mxu0 %v11355_v9 }
 0x1ec   :  { %10446 = vmatprep.subr.bf16.mxu0 %v11358_v10 }
 0x1ed   :  { %10467 = vmatpush3.bf16.msra.mxu1 %v11357_v11 }
 0x1ee   :  { %10468 = vmatprep.subr.bf16.mxu1 %v11360_v12 }
 0x1ef   :  { %10447 = vmatpush3.bf16.msra.mxu0 %v11359_v13  ;;  %v11403_v13 = vld [vmem:[%s14257_s1 + $0x1070] sm:$0xff]  }
 0x1f0   :  { %10448 = vmatprep.subr.bf16.mxu0 %v11362_v14  ;;  %v11404_v14 = vld [vmem:[%s14257_s1 + $0x1030] sm:$0xff]  }
 0x1f1   :  { %10469 = vmatpush3.bf16.msra.mxu1 %v11361_v15 }
 0x1f2   :  { %10470 = vmatprep.subr.bf16.mxu1 %v11364_v16 }
 0x1f3   :  { %10449 = vmatpush3.bf16.msra.mxu0 %v11363_v17  ;;  %v11405_v17 = vld [vmem:[%s14257_s1 + $0x10f0] sm:$0xff]  }
 0x1f4   :  { %10450 = vmatprep.subr.bf16.mxu0 %v11366_v18 }
 0x1f5   :  { %v10148_v20 = vpop.f32.mrb[32].mxu0  ;;  %10471 = vmatpush3.bf16.msra.mxu1 %v11365_v19 }
 0x1f6   :  { %v10149_v22 = vpop.f32.mrb[33].mxu0  ;;  %10472 = vmatprep.subr.bf16.mxu1 %v11368_v21 }
 0x1f7   :  { %v10150_v24 = vadd.f32 %v10149_v22, %v10148_v20  ;;  %v10151_v25 = vpop.f32.mrb[34].mxu0  ;;  %v10170_v26 = vpop.f32.mrb[32].mxu1  ;;  %10451 = vmatpush3.bf16.msra.mxu0 %v11367_v23  ;;  %v11406_v20 = vld [vmem:[%s14257_s1 + $0x10b0] sm:$0xff]   ;;  %v11407_v22 = vld [vmem:[%s14257_s1 + $0x1078] sm:$0xff]  }
 0x1f8   :  { %v10152_v29 = vpop.f32.mrb[35].mxu0  ;;  %v10171_v30 = vpop.f32.mrb[33].mxu1  ;;  %10452 = vmatprep.subr.bf16.mxu0 %v11370_v28  ;;  %v11408_v23 = vld [vmem:[%s14257_s1 + $0x1038] sm:$0xff]   ;;  %v23_v25 = vld [vmem:[%s14258_s0 + $0x40] sm:$0xff] }
 0x1f9   :  { %v7703_v32 = vadd.f32 %v10150_v24, %v13225_v44  ;;  %v10172_v33 = vadd.f32 %v10171_v30, %v10170_v26  ;;  %v10173_v36 = vpop.f32.mrb[34].mxu1  ;;  %10473 = vmatpush3.bf16.msra.mxu1 %v11369_v27  ;;  %v1989_v44 = vrot.slane %v13251_v57, %v11763_v34  ;;  %v11390_v57 = vld [vmem:[%s14257_s1 + $0x1090] sm:$0xff]   ;;  %v11409_v24 = vld [vmem:[%s14257_s1 + $0x10f8] sm:$0xff]   ;;  %v2015_v26 = vrot.slane %v23_v25, %v11763_v34  ;;  %v11411_v29 = vld [vmem:[%s14257_s1 + $0x1140] sm:$0xff]  }
 0x1fa   :  { %v10174_v38 = vpop.f32.mrb[35].mxu1  ;;  %10474 = vmatprep.subr.bf16.mxu1 %v11372_v35  ;;  %v11410_v27 = vld [vmem:[%s14257_s1 + $0x10b8] sm:$0xff]   ;;  %v2008_v28 = vcombine.high %v23_v25, %v23_v25  ;;  %v11412_v36 = vld [vmem:[%s14257_s1 + $0x1100] sm:$0xff]   ;;  %v11448_v25 = vld [vmem:[%s14257_s1 + $0x1248] sm:$0xff]  }
 0x1fb   :  { %v13339_v39 = vadd.f32 %v10172_v33, %v7703_v32  ;;  %10453 = vmatpush3.bf16.msra.mxu0 %v11371_v31  ;;  %v2005_v49 = vcombine.high %v1989_v44, %v1989_v44  ;;  %v2023_v30 = vcombine.high %v2015_v26, %v2015_v26  ;;  %v2031_v31 = vrot.slane %v2015_v26, %v11763_v34  ;;  %v11413_v33 = vld [vmem:[%s14257_s1 + $0x11c0] sm:$0xff]   ;;  %v11449_v26 = vld [vmem:[%s14257_s1 + $0x1208] sm:$0xff]  }
 0x1fc   :  { %10454 = vmatprep.subr.bf16.mxu0 %v11374_v40  ;;  %v13463_v32 = vrot.slane %v2008_v28, %v11763_v34  ;;  %v11451_v28 = vld [vmem:[%s14257_s1 + $0x1288] sm:$0xff]  }
 0x1fd   :  { %10475 = vmatpush3.bf16.msra.mxu1 %v11373_v37  ;;  %v2045_v35 = vrot.slane %v2023_v30, %v11763_v34  ;;  %v2053_v38 = vcombine.high %v2031_v31, %v2031_v31  ;;  %v11453_v30 = vld [vmem:[%s14257_s1 + $0x1210] sm:$0xff]  }
 0x1fe   :  { %10476 = vmatprep.subr.bf16.mxu1 %v11376_v42  ;;  %v2024_v37 = vcombine.high %v13463_v32, %v13463_v32 }
 0x1ff   :  { %10455 = vmatpush3.bf16.msra.mxu0 %v11375_v41  ;;  %v2055_v40 = vcombine.high %v2045_v35, %v2045_v35  ;;  %v11414_v41 = vld [vmem:[%s14257_s1 + $0x1180] sm:$0xff]  }
 0x200   :  { %10484 = vmatprep.subr.bf16.mxu0 %v11379_v45  ;;  %v2052_v42 = vrot.slane %v2024_v37, %v11763_v34  ;;  %v11459_v37 = vld [vmem:[%s14257_s1 + $0x1298] sm:$0xff]  }
 0x201   :  { %10477 = vmatpush3.bf16.msra.mxu1 %v11378_v43  ;;  %v11417_v43 = vld [vmem:[%s14257_s1 + $0x11c8] sm:$0xff]  }
 0x202   :  { %8261 = vmatmul.mubr.bf16.vlgmr.msra.gmra.mrb[60].mxu0 %v1989_v44  ;;  %10506 = vmatprep.subr.bf16.mxu1 %v11381_v47  ;;  %v11416_v44 = vld [vmem:[%s14257_s1 + $0x1108] sm:$0xff]   ;;  %v2056_v45 = vcombine.high %v2052_v42, %v2052_v42 }
 0x203   :  { %10485 = vmatpush3.bf16.msra.mxu0 %v11380_v46  ;;  %8340 = vmatprep.mubr.bf16.mxu0 %v2045_v35  ;;  %v11419_v46 = vld [vmem:[%s14257_s1 + $0x1150] sm:$0xff]   ;;  %v11418_v47 = vld [vmem:[%s14257_s1 + $0x1188] sm:$0xff]   ;;  %v11457_v35 = vld [vmem:[%s14257_s1 + $0x1218] sm:$0xff]  }
 0x204   :  { %8301 = vmatmul.mubr.bf16.vlgmr.msra.gmra.mrb[60].mxu1 %v2005_v49  ;;  %10486 = vmatprep.subr.bf16.mxu0 %v11383_v50  ;;  %v11420_v49 = vld [vmem:[%s14257_s1 + $0x1110] sm:$0xff]   ;;  %v11423_v50 = vld [vmem:[%s14257_s1 + $0x1158] sm:$0xff]  }
 0x205   :  { %10507 = vmatpush3.bf16.msra.mxu1 %v11382_v48  ;;  %8380 = vmatprep.mubr.bf16.mxu1 %v2055_v40  ;;  %v11421_v48 = vld [vmem:[%s14257_s1 + $0x11d0] sm:$0xff]   ;;  %v11462_v40 = vld [vmem:[%s14257_s1 + $0x12e0] sm:$0xff]  }
 0x206   :  { %10508 = vmatprep.subr.bf16.mxu1 %v11385_v52  ;;  %v11425_v52 = vld [vmem:[%s14257_s1 + $0x11d8] sm:$0xff]  }
 0x207   :  { %10487 = vmatpush3.bf16.msra.mxu0 %v11384_v51  ;;  %v11422_v51 = vld [vmem:[%s14257_s1 + $0x1190] sm:$0xff]  }
 0x208   :  { %10488 = vmatprep.subr.bf16.mxu0 %v11387_v54  ;;  %v11427_v54 = vld [vmem:[%s14257_s1 + $0x1160] sm:$0xff]  }
 0x209   :  { %10509 = vmatpush3.bf16.msra.mxu1 %v11386_v53  ;;  %v11424_v53 = vld [vmem:[%s14257_s1 + $0x1118] sm:$0xff]  }
 0x20a   :  { %10510 = vmatprep.subr.bf16.mxu1 %v11389_v56  ;;  %v11429_v56 = vld [vmem:[%s14257_s1 + $0x11e0] sm:$0xff]  }
 0x20b   :  { %10489 = vmatpush3.bf16.msra.mxu0 %v11388_v55  ;;  %v11426_v55 = vld [vmem:[%s14257_s1 + $0x1198] sm:$0xff]  }
 0x20c   :  { %10490 = vmatprep.subr.bf16.mxu0 %v11391_v58  ;;  %v11431_v58 = vld [vmem:[%s14257_s1 + $0x1168] sm:$0xff]  }
 0x20d   :  { %10511 = vmatpush3.bf16.msra.mxu1 %v11390_v57  ;;  %v11428_v57 = vld [vmem:[%s14257_s1 + $0x1120] sm:$0xff]  }
 0x20e   :  { %10512 = vmatprep.subr.bf16.mxu1 %v11393_v60 }
 0x20f   :  { %10491 = vmatpush3.bf16.msra.mxu0 %v11392_v59  ;;  %v11430_v59 = vld [vmem:[%s14257_s1 + $0x11a0] sm:$0xff]  }
 0x210   :  { %10492 = vmatprep.subr.bf16.mxu0 %v11395_v62 }
 0x211   :  { %10513 = vmatpush3.bf16.msra.mxu1 %v11394_v61  ;;  %v11433_v61 = vld [vmem:[%s14257_s1 + $0x11e8] sm:$0xff]  }
 0x212   :  { %10514 = vmatprep.subr.bf16.mxu1 %v11397_v0 }
 0x213   :  { %10493 = vmatpush3.bf16.msra.mxu0 %v11396_v63  ;;  %v11432_v63 = vld [vmem:[%s14257_s1 + $0x1128] sm:$0xff]  }
 0x214   :  { %10494 = vmatprep.subr.bf16.mxu0 %v11399_v2 }
 0x215   :  { %v10192_v4 = vpop.f32.mrb[36].mxu0  ;;  %10515 = vmatpush3.bf16.msra.mxu1 %v11398_v1 }
 0x216   :  { %v10193_v6 = vpop.f32.mrb[37].mxu0  ;;  %10516 = vmatprep.subr.bf16.mxu1 %v11401_v5 }
 0x217   :  { %v10194_v8 = vadd.f32 %v10193_v6, %v10192_v4  ;;  %v10195_v9 = vpop.f32.mrb[38].mxu0  ;;  %v10214_v10 = vpop.f32.mrb[36].mxu1  ;;  %10495 = vmatpush3.bf16.msra.mxu0 %v11400_v3  ;;  %v11434_v3 = vld [vmem:[%s14257_s1 + $0x11a8] sm:$0xff]   ;;  %v11435_v4 = vld [vmem:[%s14257_s1 + $0x1170] sm:$0xff]  }
 0x218   :  { %v10196_v11 = vpop.f32.mrb[39].mxu0  ;;  %v10215_v12 = vpop.f32.mrb[37].mxu1  ;;  %10496 = vmatprep.subr.bf16.mxu0 %v11403_v13 }
 0x219   :  { %v7783_v15 = vadd.f32 %v10194_v8, %v13339_v39  ;;  %v10216_v16 = vadd.f32 %v10215_v12, %v10214_v10  ;;  %v10217_v18 = vpop.f32.mrb[38].mxu1  ;;  %10517 = vmatpush3.bf16.msra.mxu1 %v11402_v7  ;;  %v11415_v39 = vld [vmem:[%s14257_s1 + $0x1148] sm:$0xff]   ;;  %v11436_v7 = vld [vmem:[%s14257_s1 + $0x1130] sm:$0xff]  }
 0x21a   :  { %v10218_v21 = vpop.f32.mrb[39].mxu1  ;;  %10518 = vmatprep.subr.bf16.mxu1 %v11405_v17  ;;  %v11437_v10 = vld [vmem:[%s14257_s1 + $0x11f0] sm:$0xff]   ;;  %v11441_v17 = vld [vmem:[%s14257_s1 + $0x11f8] sm:$0xff]  }
 0x21b   :  { %v13437_v19 = vadd.f32 %v10216_v16, %v7783_v15  ;;  %10497 = vmatpush3.bf16.msra.mxu0 %v11404_v14  ;;  %v11438_v12 = vld [vmem:[%s14257_s1 + $0x11b0] sm:$0xff]   ;;  %v11439_v15 = vld [vmem:[%s14257_s1 + $0x1178] sm:$0xff]   ;;  %v11445_v21 = vld [vmem:[%s14257_s1 + $0x1200] sm:$0xff]  }
 0x21c   :  { %10498 = vmatprep.subr.bf16.mxu0 %v11407_v22  ;;  %v11440_v16 = vld [vmem:[%s14257_s1 + $0x1138] sm:$0xff]   ;;  %v11446_v22 = vld [vmem:[%s14257_s1 + $0x12c0] sm:$0xff]  }
 0x21d   :  { %10519 = vmatpush3.bf16.msra.mxu1 %v11406_v20  ;;  %v11443_v18 = vld [vmem:[%s14257_s1 + $0x11b8] sm:$0xff]   ;;  %v11444_v20 = vld [vmem:[%s14257_s1 + $0x1240] sm:$0xff]  }
 0x21e   :  { %10520 = vmatprep.subr.bf16.mxu1 %v11409_v24 }
 0x21f   :  { %10499 = vmatpush3.bf16.msra.mxu0 %v11408_v23  ;;  %v11447_v23 = vld [vmem:[%s14257_s1 + $0x1280] sm:$0xff]  }
 0x220   :  { %10528 = vmatprep.subr.bf16.mxu0 %v11411_v29  ;;  %v11452_v29 = vld [vmem:[%s14257_s1 + $0x1250] sm:$0xff]  }
 0x221   :  { %10521 = vmatpush3.bf16.msra.mxu1 %v11410_v27  ;;  %v11450_v27 = vld [vmem:[%s14257_s1 + $0x12c8] sm:$0xff]  }
 0x222   :  { %10550 = vmatprep.subr.bf16.mxu1 %v11413_v33  ;;  %8341 = vmatmul.mubr.bf16.vlgmr.msra.gmra.mrb[64].mxu0 %v2031_v31  ;;  %v11454_v31 = vld [vmem:[%s14257_s1 + $0x12d0] sm:$0xff]   ;;  %v11456_v33 = vld [vmem:[%s14257_s1 + $0x1258] sm:$0xff]  }
 0x223   :  { %10529 = vmatpush3.bf16.msra.mxu0 %v11412_v36  ;;  %8420 = vmatprep.mubr.bf16.mxu0 %v2052_v42  ;;  %v11458_v36 = vld [vmem:[%s14257_s1 + $0x12d8] sm:$0xff]   ;;  %v11464_v42 = vld [vmem:[%s14257_s1 + $0x1268] sm:$0xff]  }
 0x224   :  { %8381 = vmatmul.mubr.bf16.vlgmr.msra.gmra.mrb[64].mxu1 %v2053_v38  ;;  %10530 = vmatprep.subr.bf16.mxu0 %v11415_v39  ;;  %v11460_v38 = vld [vmem:[%s14257_s1 + $0x1260] sm:$0xff]  }
 0x225   :  { %10551 = vmatpush3.bf16.msra.mxu1 %v11414_v41  ;;  %8460 = vmatprep.mubr.bf16.mxu1 %v2056_v45  ;;  %v11461_v39 = vld [vmem:[%s14257_s1 + $0x1220] sm:$0xff]   ;;  %v11466_v45 = vld [vmem:[%s14257_s1 + $0x12e8] sm:$0xff]  }
 0x226   :  { %10552 = vmatprep.subr.bf16.mxu1 %v11417_v43  ;;  %v11463_v41 = vld [vmem:[%s14257_s1 + $0x12a0] sm:$0xff]   ;;  %v11465_v43 = vld [vmem:[%s14257_s1 + $0x1228] sm:$0xff]  }
 0x227   :  { %10531 = vmatpush3.bf16.msra.mxu0 %v11416_v44 }
 0x228   :  { %10532 = vmatprep.subr.bf16.mxu0 %v11419_v46 }
 0x229   :  { %10553 = vmatpush3.bf16.msra.mxu1 %v11418_v47  ;;  %v11467_v47 = vld [vmem:[%s14257_s1 + $0x12a8] sm:$0xff]  }
 0x22a   :  { %10554 = vmatprep.subr.bf16.mxu1 %v11421_v48 }
 0x22b   :  { %10533 = vmatpush3.bf16.msra.mxu0 %v11420_v49 }
 0x22c   :  { %10534 = vmatprep.subr.bf16.mxu0 %v11423_v50 }
 0x22d   :  { %10555 = vmatpush3.bf16.msra.mxu1 %v11422_v51 }
 0x22e   :  { %10556 = vmatprep.subr.bf16.mxu1 %v11425_v52 }
 0x22f   :  { %10535 = vmatpush3.bf16.msra.mxu0 %v11424_v53  ;;  %v11468_v53 = vld [vmem:[%s14257_s1 + $0x1270] sm:$0xff]  }
 0x230   :  { %10536 = vmatprep.subr.bf16.mxu0 %v11427_v54  ;;  %v11469_v54 = vld [vmem:[%s14257_s1 + $0x1230] sm:$0xff]  }
 0x231   :  { %10557 = vmatpush3.bf16.msra.mxu1 %v11426_v55 }
 0x232   :  { %10558 = vmatprep.subr.bf16.mxu1 %v11429_v56 }
 0x233   :  { %10537 = vmatpush3.bf16.msra.mxu0 %v11428_v57  ;;  %v11470_v57 = vld [vmem:[%s14257_s1 + $0x12f0] sm:$0xff]  }
 0x234   :  { %10538 = vmatprep.subr.bf16.mxu0 %v11431_v58 }
 0x235   :  { %v10236_v60 = vpop.f32.mrb[40].mxu0  ;;  %10559 = vmatpush3.bf16.msra.mxu1 %v11430_v59 }
 0x236   :  { %v10237_v62 = vpop.f32.mrb[41].mxu0  ;;  %10560 = vmatprep.subr.bf16.mxu1 %v11433_v61 }
 0x237   :  { %v10238_v0 = vadd.f32 %v10237_v62, %v10236_v60  ;;  %v10239_v1 = vpop.f32.mrb[42].mxu0  ;;  %v10258_v2 = vpop.f32.mrb[40].mxu1  ;;  %10539 = vmatpush3.bf16.msra.mxu0 %v11432_v63  ;;  %v11471_v60 = vld [vmem:[%s14257_s1 + $0x12b0] sm:$0xff]   ;;  %v11472_v62 = vld [vmem:[%s14257_s1 + $0x1278] sm:$0xff]  }
 0x238   :  { %v10240_v5 = vpop.f32.mrb[43].mxu0  ;;  %v10259_v6 = vpop.f32.mrb[41].mxu1  ;;  %10540 = vmatprep.subr.bf16.mxu0 %v11435_v4  ;;  %v11473_v63 = vld [vmem:[%s14257_s1 + $0x1238] sm:$0xff]   ;;  %v24_v1 = vld [vmem:[%s14258_s0 + $0x48] sm:$0xff] }
 0x239   :  { %v7863_v8 = vadd.f32 %v10238_v0, %v13437_v19  ;;  %v10260_v9 = vadd.f32 %v10259_v6, %v10258_v2  ;;  %v10261_v11 = vpop.f32.mrb[42].mxu1  ;;  %10561 = vmatpush3.bf16.msra.mxu1 %v11434_v3  ;;  %v2038_v19 = vrot.slane %v13463_v32, %v11763_v34  ;;  %v11455_v32 = vld [vmem:[%s14257_s1 + $0x1290] sm:$0xff]   ;;  %v11474_v0 = vld [vmem:[%s14257_s1 + $0x12f8] sm:$0xff]   ;;  %v2064_v2 = vrot.slane %v24_v1, %v11763_v34  ;;  %v11476_v5 = vld [vmem:[%s14257_s1 + $0x1340] sm:$0xff]  }
 0x23a   :  { %v10262_v13 = vpop.f32.mrb[43].mxu1  ;;  %10562 = vmatprep.subr.bf16.mxu1 %v11437_v10  ;;  %v11475_v3 = vld [vmem:[%s14257_s1 + $0x12b8] sm:$0xff]   ;;  %v2057_v4 = vcombine.high %v24_v1, %v24_v1  ;;  %v11477_v11 = vld [vmem:[%s14257_s1 + $0x1300] sm:$0xff]   ;;  %v11513_v1 = vld [vmem:[%s14257_s1 + $0x1448] sm:$0xff]  }
 0x23b   :  { %v13551_v14 = vadd.f32 %v10260_v9, %v7863_v8  ;;  %10541 = vmatpush3.bf16.msra.mxu0 %v11436_v7  ;;  %v2054_v24 = vcombine.high %v2038_v19, %v2038_v19  ;;  %v2072_v6 = vcombine.high %v2064_v2, %v2064_v2  ;;  %v2080_v7 = vrot.slane %v2064_v2, %v11763_v34  ;;  %v11478_v9 = vld [vmem:[%s14257_s1 + $0x13c0] sm:$0xff]   ;;  %v11514_v2 = vld [vmem:[%s14257_s1 + $0x1408] sm:$0xff]  }
 0x23c   :  { %10542 = vmatprep.subr.bf16.mxu0 %v11439_v15  ;;  %v13675_v8 = vrot.slane %v2057_v4, %v11763_v34  ;;  %v11516_v4 = vld [vmem:[%s14257_s1 + $0x1488] sm:$0xff]  }
 0x23d   :  { %10563 = vmatpush3.bf16.msra.mxu1 %v11438_v12  ;;  %v2094_v10 = vrot.slane %v2072_v6, %v11763_v34  ;;  %v2102_v13 = vcombine.high %v2080_v7, %v2080_v7  ;;  %v11518_v6 = vld [vmem:[%s14257_s1 + $0x1410] sm:$0xff]  }
 0x23e   :  { %10564 = vmatprep.subr.bf16.mxu1 %v11441_v17  ;;  %v2073_v12 = vcombine.high %v13675_v8, %v13675_v8 }
 0x23f   :  { %10543 = vmatpush3.bf16.msra.mxu0 %v11440_v16  ;;  %v2104_v15 = vcombine.high %v2094_v10, %v2094_v10  ;;  %v11479_v16 = vld [vmem:[%s14257_s1 + $0x1380] sm:$0xff]  }
 0x240   :  { %10572 = vmatprep.subr.bf16.mxu0 %v11444_v20  ;;  %v2101_v17 = vrot.slane %v2073_v12, %v11763_v34  ;;  %v11524_v12 = vld [vmem:[%s14257_s1 + $0x1498] sm:$0xff]  }
 0x241   :  { %10565 = vmatpush3.bf16.msra.mxu1 %v11443_v18  ;;  %v11482_v18 = vld [vmem:[%s14257_s1 + $0x13c8] sm:$0xff]  }
 0x242   :  { %8421 = vmatmul.mubr.bf16.vlgmr.msra.gmra.mrb[68].mxu0 %v2038_v19  ;;  %10594 = vmatprep.subr.bf16.mxu1 %v11446_v22  ;;  %v11481_v19 = vld [vmem:[%s14257_s1 + $0x1308] sm:$0xff]   ;;  %v2105_v20 = vcombine.high %v2101_v17, %v2101_v17 }
 0x243   :  { %10573 = vmatpush3.bf16.msra.mxu0 %v11445_v21  ;;  %8500 = vmatprep.mubr.bf16.mxu0 %v2094_v10  ;;  %v11484_v21 = vld [vmem:[%s14257_s1 + $0x1350] sm:$0xff]   ;;  %v11483_v22 = vld [vmem:[%s14257_s1 + $0x1388] sm:$0xff]   ;;  %v11522_v10 = vld [vmem:[%s14257_s1 + $0x1418] sm:$0xff]  }
 0x244   :  { %8461 = vmatmul.mubr.bf16.vlgmr.msra.gmra.mrb[68].mxu1 %v2054_v24  ;;  %10574 = vmatprep.subr.bf16.mxu0 %v11448_v25  ;;  %v11485_v24 = vld [vmem:[%s14257_s1 + $0x1310] sm:$0xff]   ;;  %v11488_v25 = vld [vmem:[%s14257_s1 + $0x1358] sm:$0xff]  }
 0x245   :  { %10595 = vmatpush3.bf16.msra.mxu1 %v11447_v23  ;;  %8540 = vmatprep.mubr.bf16.mxu1 %v2104_v15  ;;  %v11486_v23 = vld [vmem:[%s14257_s1 + $0x13d0] sm:$0xff]   ;;  %v11527_v15 = vld [vmem:[%s14257_s1 + $0x14e0] sm:$0xff]  }
 0x246   :  { %10596 = vmatprep.subr.bf16.mxu1 %v11450_v27  ;;  %v11490_v27 = vld [vmem:[%s14257_s1 + $0x13d8] sm:$0xff]  }
 0x247   :  { %10575 = vmatpush3.bf16.msra.mxu0 %v11449_v26  ;;  %v11487_v26 = vld [vmem:[%s14257_s1 + $0x1390] sm:$0xff]  }
 0x248   :  { %10576 = vmatprep.subr.bf16.mxu0 %v11452_v29  ;;  %v11492_v29 = vld [vmem:[%s14257_s1 + $0x1360] sm:$0xff]  }
 0x249   :  { %10597 = vmatpush3.bf16.msra.mxu1 %v11451_v28  ;;  %v11489_v28 = vld [vmem:[%s14257_s1 + $0x1318] sm:$0xff]  }
 0x24a   :  { %10598 = vmatprep.subr.bf16.mxu1 %v11454_v31  ;;  %v11494_v31 = vld [vmem:[%s14257_s1 + $0x13e0] sm:$0xff]  }
 0x24b   :  { %10577 = vmatpush3.bf16.msra.mxu0 %v11453_v30  ;;  %v11491_v30 = vld [vmem:[%s14257_s1 + $0x1398] sm:$0xff]  }
 0x24c   :  { %10578 = vmatprep.subr.bf16.mxu0 %v11456_v33  ;;  %v11496_v33 = vld [vmem:[%s14257_s1 + $0x1368] sm:$0xff]  }
 0x24d   :  { %10599 = vmatpush3.bf16.msra.mxu1 %v11455_v32  ;;  %v11493_v32 = vld [vmem:[%s14257_s1 + $0x1320] sm:$0xff]  }
 0x24e   :  { %10600 = vmatprep.subr.bf16.mxu1 %v11458_v36 }
 0x24f   :  { %10579 = vmatpush3.bf16.msra.mxu0 %v11457_v35  ;;  %v11495_v35 = vld [vmem:[%s14257_s1 + $0x13a0] sm:$0xff]  }
 0x250   :  { %10580 = vmatprep.subr.bf16.mxu0 %v11460_v38 }
 0x251   :  { %10601 = vmatpush3.bf16.msra.mxu1 %v11459_v37  ;;  %v11498_v37 = vld [vmem:[%s14257_s1 + $0x13e8] sm:$0xff]  }
 0x252   :  { %10602 = vmatprep.subr.bf16.mxu1 %v11462_v40 }
 0x253   :  { %10581 = vmatpush3.bf16.msra.mxu0 %v11461_v39  ;;  %v11497_v39 = vld [vmem:[%s14257_s1 + $0x1328] sm:$0xff]  }
 0x254   :  { %10582 = vmatprep.subr.bf16.mxu0 %v11464_v42 }
 0x255   :  { %v10280_v44 = vpop.f32.mrb[44].mxu0  ;;  %10603 = vmatpush3.bf16.msra.mxu1 %v11463_v41 }
 0x256   :  { %v10281_v46 = vpop.f32.mrb[45].mxu0  ;;  %10604 = vmatprep.subr.bf16.mxu1 %v11466_v45 }
 0x257   :  { %v10282_v48 = vadd.f32 %v10281_v46, %v10280_v44  ;;  %v10283_v49 = vpop.f32.mrb[46].mxu0  ;;  %v10302_v50 = vpop.f32.mrb[44].mxu1  ;;  %10583 = vmatpush3.bf16.msra.mxu0 %v11465_v43  ;;  %v11499_v43 = vld [vmem:[%s14257_s1 + $0x13a8] sm:$0xff]   ;;  %v11500_v44 = vld [vmem:[%s14257_s1 + $0x1370] sm:$0xff]  }
 0x258   :  { %v10284_v51 = vpop.f32.mrb[47].mxu0  ;;  %v10303_v52 = vpop.f32.mrb[45].mxu1  ;;  %10584 = vmatprep.subr.bf16.mxu0 %v11468_v53 }
 0x259   :  { %v7943_v55 = vadd.f32 %v10282_v48, %v13551_v14  ;;  %v10304_v56 = vadd.f32 %v10303_v52, %v10302_v50  ;;  %v10305_v58 = vpop.f32.mrb[46].mxu1  ;;  %10605 = vmatpush3.bf16.msra.mxu1 %v11467_v47  ;;  %v11480_v14 = vld [vmem:[%s14257_s1 + $0x1348] sm:$0xff]   ;;  %v11501_v47 = vld [vmem:[%s14257_s1 + $0x1330] sm:$0xff]  }
 0x25a   :  { %v10306_v61 = vpop.f32.mrb[47].mxu1  ;;  %10606 = vmatprep.subr.bf16.mxu1 %v11470_v57  ;;  %v11502_v50 = vld [vmem:[%s14257_s1 + $0x13f0] sm:$0xff]   ;;  %v11506_v57 = vld [vmem:[%s14257_s1 + $0x13f8] sm:$0xff]  }
 0x25b   :  { %v13649_v59 = vadd.f32 %v10304_v56, %v7943_v55  ;;  %10585 = vmatpush3.bf16.msra.mxu0 %v11469_v54  ;;  %v11503_v52 = vld [vmem:[%s14257_s1 + $0x13b0] sm:$0xff]   ;;  %v11504_v55 = vld [vmem:[%s14257_s1 + $0x1378] sm:$0xff]   ;;  %v11510_v61 = vld [vmem:[%s14257_s1 + $0x1400] sm:$0xff]  }
 0x25c   :  { %10586 = vmatprep.subr.bf16.mxu0 %v11472_v62  ;;  %v11505_v56 = vld [vmem:[%s14257_s1 + $0x1338] sm:$0xff]   ;;  %v11511_v62 = vld [vmem:[%s14257_s1 + $0x14c0] sm:$0xff]  }
 0x25d   :  { %10607 = vmatpush3.bf16.msra.mxu1 %v11471_v60  ;;  %v11508_v58 = vld [vmem:[%s14257_s1 + $0x13b8] sm:$0xff]   ;;  %v11509_v60 = vld [vmem:[%s14257_s1 + $0x1440] sm:$0xff]  }
 0x25e   :  { %10608 = vmatprep.subr.bf16.mxu1 %v11474_v0 }
 0x25f   :  { %10587 = vmatpush3.bf16.msra.mxu0 %v11473_v63  ;;  %v11512_v63 = vld [vmem:[%s14257_s1 + $0x1480] sm:$0xff]  }
 0x260   :  { %10616 = vmatprep.subr.bf16.mxu0 %v11476_v5  ;;  %v11517_v5 = vld [vmem:[%s14257_s1 + $0x1450] sm:$0xff]  }
 0x261   :  { %10609 = vmatpush3.bf16.msra.mxu1 %v11475_v3  ;;  %v11515_v3 = vld [vmem:[%s14257_s1 + $0x14c8] sm:$0xff]  }
 0x262   :  { %10638 = vmatprep.subr.bf16.mxu1 %v11478_v9  ;;  %8501 = vmatmul.mubr.bf16.vlgmr.msra.gmra.mrb[72].mxu0 %v2080_v7  ;;  %v11519_v7 = vld [vmem:[%s14257_s1 + $0x14d0] sm:$0xff]   ;;  %v11521_v9 = vld [vmem:[%s14257_s1 + $0x1458] sm:$0xff]  }
 0x263   :  { %10617 = vmatpush3.bf16.msra.mxu0 %v11477_v11  ;;  %8580 = vmatprep.mubr.bf16.mxu0 %v2101_v17  ;;  %v11523_v11 = vld [vmem:[%s14257_s1 + $0x14d8] sm:$0xff]   ;;  %v11529_v17 = vld [vmem:[%s14257_s1 + $0x1468] sm:$0xff]  }
 0x264   :  { %8541 = vmatmul.mubr.bf16.vlgmr.msra.gmra.mrb[72].mxu1 %v2102_v13  ;;  %10618 = vmatprep.subr.bf16.mxu0 %v11480_v14  ;;  %v11525_v13 = vld [vmem:[%s14257_s1 + $0x1460] sm:$0xff]  }
 0x265   :  { %10639 = vmatpush3.bf16.msra.mxu1 %v11479_v16  ;;  %8620 = vmatprep.mubr.bf16.mxu1 %v2105_v20  ;;  %v11526_v14 = vld [vmem:[%s14257_s1 + $0x1420] sm:$0xff]   ;;  %v11531_v20 = vld [vmem:[%s14257_s1 + $0x14e8] sm:$0xff]  }
 0x266   :  { %10640 = vmatprep.subr.bf16.mxu1 %v11482_v18  ;;  %v11528_v16 = vld [vmem:[%s14257_s1 + $0x14a0] sm:$0xff]   ;;  %v11530_v18 = vld [vmem:[%s14257_s1 + $0x1428] sm:$0xff]  }
 0x267   :  { %10619 = vmatpush3.bf16.msra.mxu0 %v11481_v19 }
 0x268   :  { %10620 = vmatprep.subr.bf16.mxu0 %v11484_v21 }
 0x269   :  { %10641 = vmatpush3.bf16.msra.mxu1 %v11483_v22  ;;  %v11532_v22 = vld [vmem:[%s14257_s1 + $0x14a8] sm:$0xff]  }
 0x26a   :  { %10642 = vmatprep.subr.bf16.mxu1 %v11486_v23 }
 0x26b   :  { %10621 = vmatpush3.bf16.msra.mxu0 %v11485_v24 }
 0x26c   :  { %10622 = vmatprep.subr.bf16.mxu0 %v11488_v25 }
 0x26d   :  { %10643 = vmatpush3.bf16.msra.mxu1 %v11487_v26 }
 0x26e   :  { %10644 = vmatprep.subr.bf16.mxu1 %v11490_v27 }
 0x26f   :  { %10623 = vmatpush3.bf16.msra.mxu0 %v11489_v28  ;;  %v11533_v28 = vld [vmem:[%s14257_s1 + $0x1470] sm:$0xff]  }
 0x270   :  { %10624 = vmatprep.subr.bf16.mxu0 %v11492_v29  ;;  %v11534_v29 = vld [vmem:[%s14257_s1 + $0x1430] sm:$0xff]  }
 0x271   :  { %10645 = vmatpush3.bf16.msra.mxu1 %v11491_v30 }
 0x272   :  { %10646 = vmatprep.subr.bf16.mxu1 %v11494_v31 }
 0x273   :  { %10625 = vmatpush3.bf16.msra.mxu0 %v11493_v32  ;;  %v11535_v32 = vld [vmem:[%s14257_s1 + $0x14f0] sm:$0xff]  }
 0x274   :  { %10626 = vmatprep.subr.bf16.mxu0 %v11496_v33 }
 0x275   :  { %v10324_v36 = vpop.f32.mrb[48].mxu0  ;;  %10647 = vmatpush3.bf16.msra.mxu1 %v11495_v35 }
 0x276   :  { %v10325_v38 = vpop.f32.mrb[49].mxu0  ;;  %10648 = vmatprep.subr.bf16.mxu1 %v11498_v37 }
 0x277   :  { %v10326_v40 = vadd.f32 %v10325_v38, %v10324_v36  ;;  %v10327_v41 = vpop.f32.mrb[50].mxu0  ;;  %v10346_v42 = vpop.f32.mrb[48].mxu1  ;;  %10627 = vmatpush3.bf16.msra.mxu0 %v11497_v39  ;;  %v11536_v36 = vld [vmem:[%s14257_s1 + $0x14b0] sm:$0xff]   ;;  %v11537_v38 = vld [vmem:[%s14257_s1 + $0x1478] sm:$0xff]  }
 0x278   :  { %v10328_v45 = vpop.f32.mrb[51].mxu0  ;;  %v10347_v46 = vpop.f32.mrb[49].mxu1  ;;  %10628 = vmatprep.subr.bf16.mxu0 %v11500_v44  ;;  %v11538_v39 = vld [vmem:[%s14257_s1 + $0x1438] sm:$0xff]   ;;  %v25_v41 = vld [vmem:[%s14258_s0 + $0x50] sm:$0xff] }
 0x279   :  { %v8023_v48 = vadd.f32 %v10326_v40, %v13649_v59  ;;  %v10348_v49 = vadd.f32 %v10347_v46, %v10346_v42  ;;  %v10349_v51 = vpop.f32.mrb[50].mxu1  ;;  %10649 = vmatpush3.bf16.msra.mxu1 %v11499_v43  ;;  %v2087_v59 = vrot.slane %v13675_v8, %v11763_v34  ;;  %v11520_v8 = vld [vmem:[%s14257_s1 + $0x1490] sm:$0xff]   ;;  %v11539_v40 = vld [vmem:[%s14257_s1 + $0x14f8] sm:$0xff]   ;;  %v2113_v42 = vrot.slane %v25_v41, %v11763_v34  ;;  %v11541_v45 = vld [vmem:[%s14257_s1 + $0x1540] sm:$0xff]  }
 0x27a   :  { %v10350_v53 = vpop.f32.mrb[51].mxu1  ;;  %10650 = vmatprep.subr.bf16.mxu1 %v11502_v50  ;;  %v11540_v43 = vld [vmem:[%s14257_s1 + $0x14b8] sm:$0xff]   ;;  %v2106_v44 = vcombine.high %v25_v41, %v25_v41  ;;  %v11542_v51 = vld [vmem:[%s14257_s1 + $0x1500] sm:$0xff]   ;;  %v11578_v41 = vld [vmem:[%s14257_s1 + $0x1648] sm:$0xff]  }
 0x27b   :  { %v13763_v54 = vadd.f32 %v10348_v49, %v8023_v48  ;;  %10629 = vmatpush3.bf16.msra.mxu0 %v11501_v47  ;;  %v2103_v0 = vcombine.high %v2087_v59, %v2087_v59  ;;  %v2121_v46 = vcombine.high %v2113_v42, %v2113_v42  ;;  %v2129_v47 = vrot.slane %v2113_v42, %v11763_v34  ;;  %v11543_v49 = vld [vmem:[%s14257_s1 + $0x15c0] sm:$0xff]   ;;  %v11579_v42 = vld [vmem:[%s14257_s1 + $0x1608] sm:$0xff]  }
 0x27c   :  { %10630 = vmatprep.subr.bf16.mxu0 %v11504_v55  ;;  %v13887_v48 = vrot.slane %v2106_v44, %v11763_v34  ;;  %v11581_v44 = vld [vmem:[%s14257_s1 + $0x1688] sm:$0xff]  }
 0x27d   :  { %10651 = vmatpush3.bf16.msra.mxu1 %v11503_v52  ;;  %v2143_v50 = vrot.slane %v2121_v46, %v11763_v34  ;;  %v2151_v53 = vcombine.high %v2129_v47, %v2129_v47  ;;  %v11583_v46 = vld [vmem:[%s14257_s1 + $0x1610] sm:$0xff]  }
 0x27e   :  { %10652 = vmatprep.subr.bf16.mxu1 %v11506_v57  ;;  %v2122_v52 = vcombine.high %v13887_v48, %v13887_v48 }
 0x27f   :  { %10631 = vmatpush3.bf16.msra.mxu0 %v11505_v56  ;;  %v2153_v55 = vcombine.high %v2143_v50, %v2143_v50  ;;  %v11544_v56 = vld [vmem:[%s14257_s1 + $0x1580] sm:$0xff]  }
 0x280   :  { %10660 = vmatprep.subr.bf16.mxu0 %v11509_v60  ;;  %v2150_v57 = vrot.slane %v2122_v52, %v11763_v34  ;;  %v11589_v52 = vld [vmem:[%s14257_s1 + $0x1698] sm:$0xff]  }
 0x281   :  { %10653 = vmatpush3.bf16.msra.mxu1 %v11508_v58  ;;  %v11547_v58 = vld [vmem:[%s14257_s1 + $0x15c8] sm:$0xff]  }
 0x282   :  { %8581 = vmatmul.mubr.bf16.vlgmr.msra.gmra.mrb[76].mxu0 %v2087_v59  ;;  %10682 = vmatprep.subr.bf16.mxu1 %v11511_v62  ;;  %v11546_v59 = vld [vmem:[%s14257_s1 + $0x1508] sm:$0xff]   ;;  %v2154_v60 = vcombine.high %v2150_v57, %v2150_v57 }
 0x283   :  { %10661 = vmatpush3.bf16.msra.mxu0 %v11510_v61  ;;  %8660 = vmatprep.mubr.bf16.mxu0 %v2143_v50  ;;  %v11549_v61 = vld [vmem:[%s14257_s1 + $0x1550] sm:$0xff]   ;;  %v11548_v62 = vld [vmem:[%s14257_s1 + $0x1588] sm:$0xff]   ;;  %v11587_v50 = vld [vmem:[%s14257_s1 + $0x1618] sm:$0xff]  }
 0x284   :  { %8621 = vmatmul.mubr.bf16.vlgmr.msra.gmra.mrb[76].mxu1 %v2103_v0  ;;  %10662 = vmatprep.subr.bf16.mxu0 %v11513_v1  ;;  %v11550_v0 = vld [vmem:[%s14257_s1 + $0x1510] sm:$0xff]   ;;  %v11553_v1 = vld [vmem:[%s14257_s1 + $0x1558] sm:$0xff]  }
 0x285   :  { %10683 = vmatpush3.bf16.msra.mxu1 %v11512_v63  ;;  %8700 = vmatprep.mubr.bf16.mxu1 %v2153_v55  ;;  %v11551_v63 = vld [vmem:[%s14257_s1 + $0x15d0] sm:$0xff]   ;;  %v11592_v55 = vld [vmem:[%s14257_s1 + $0x16e0] sm:$0xff]  }
 0x286   :  { %10684 = vmatprep.subr.bf16.mxu1 %v11515_v3  ;;  %v11555_v3 = vld [vmem:[%s14257_s1 + $0x15d8] sm:$0xff]  }
 0x287   :  { %10663 = vmatpush3.bf16.msra.mxu0 %v11514_v2  ;;  %v11552_v2 = vld [vmem:[%s14257_s1 + $0x1590] sm:$0xff]  }
 0x288   :  { %10664 = vmatprep.subr.bf16.mxu0 %v11517_v5  ;;  %v11557_v5 = vld [vmem:[%s14257_s1 + $0x1560] sm:$0xff]  }
 0x289   :  { %10685 = vmatpush3.bf16.msra.mxu1 %v11516_v4  ;;  %v11554_v4 = vld [vmem:[%s14257_s1 + $0x1518] sm:$0xff]  }
 0x28a   :  { %10686 = vmatprep.subr.bf16.mxu1 %v11519_v7  ;;  %v11559_v7 = vld [vmem:[%s14257_s1 + $0x15e0] sm:$0xff]  }
 0x28b   :  { %10665 = vmatpush3.bf16.msra.mxu0 %v11518_v6  ;;  %v11556_v6 = vld [vmem:[%s14257_s1 + $0x1598] sm:$0xff]  }
 0x28c   :  { %10666 = vmatprep.subr.bf16.mxu0 %v11521_v9  ;;  %v11561_v9 = vld [vmem:[%s14257_s1 + $0x1568] sm:$0xff]  }
 0x28d   :  { %10687 = vmatpush3.bf16.msra.mxu1 %v11520_v8  ;;  %v11558_v8 = vld [vmem:[%s14257_s1 + $0x1520] sm:$0xff]  }
 0x28e   :  { %10688 = vmatprep.subr.bf16.mxu1 %v11523_v11 }
 0x28f   :  { %10667 = vmatpush3.bf16.msra.mxu0 %v11522_v10  ;;  %v11560_v10 = vld [vmem:[%s14257_s1 + $0x15a0] sm:$0xff]  }
 0x290   :  { %10668 = vmatprep.subr.bf16.mxu0 %v11525_v13 }
 0x291   :  { %10689 = vmatpush3.bf16.msra.mxu1 %v11524_v12  ;;  %v11563_v12 = vld [vmem:[%s14257_s1 + $0x15e8] sm:$0xff]  }
 0x292   :  { %10690 = vmatprep.subr.bf16.mxu1 %v11527_v15 }
 0x293   :  { %10669 = vmatpush3.bf16.msra.mxu0 %v11526_v14  ;;  %v11562_v14 = vld [vmem:[%s14257_s1 + $0x1528] sm:$0xff]  }
 0x294   :  { %10670 = vmatprep.subr.bf16.mxu0 %v11529_v17 }
 0x295   :  { %v10368_v19 = vpop.f32.mrb[52].mxu0  ;;  %10691 = vmatpush3.bf16.msra.mxu1 %v11528_v16 }
 0x296   :  { %v10369_v21 = vpop.f32.mrb[53].mxu0  ;;  %10692 = vmatprep.subr.bf16.mxu1 %v11531_v20 }
 0x297   :  { %v10370_v23 = vadd.f32 %v10369_v21, %v10368_v19  ;;  %v10371_v24 = vpop.f32.mrb[54].mxu0  ;;  %v10390_v25 = vpop.f32.mrb[52].mxu1  ;;  %10671 = vmatpush3.bf16.msra.mxu0 %v11530_v18  ;;  %v11564_v18 = vld [vmem:[%s14257_s1 + $0x15a8] sm:$0xff]   ;;  %v11565_v19 = vld [vmem:[%s14257_s1 + $0x1570] sm:$0xff]  }
 0x298   :  { %v10372_v26 = vpop.f32.mrb[55].mxu0  ;;  %v10391_v27 = vpop.f32.mrb[53].mxu1  ;;  %10672 = vmatprep.subr.bf16.mxu0 %v11533_v28 }
 0x299   :  { %v8103_v30 = vadd.f32 %v10370_v23, %v13763_v54  ;;  %v10392_v31 = vadd.f32 %v10391_v27, %v10390_v25  ;;  %v10393_v33 = vpop.f32.mrb[54].mxu1  ;;  %10693 = vmatpush3.bf16.msra.mxu1 %v11532_v22  ;;  %v11545_v54 = vld [vmem:[%s14257_s1 + $0x1548] sm:$0xff]   ;;  %v11566_v22 = vld [vmem:[%s14257_s1 + $0x1530] sm:$0xff]  }
 0x29a   :  { %v10394_v37 = vpop.f32.mrb[55].mxu1  ;;  %10694 = vmatprep.subr.bf16.mxu1 %v11535_v32  ;;  %v11567_v25 = vld [vmem:[%s14257_s1 + $0x15f0] sm:$0xff]   ;;  %v11571_v32 = vld [vmem:[%s14257_s1 + $0x15f8] sm:$0xff]  }
 0x29b   :  { %v13861_v35 = vadd.f32 %v10392_v31, %v8103_v30  ;;  %10673 = vmatpush3.bf16.msra.mxu0 %v11534_v29  ;;  %v11568_v27 = vld [vmem:[%s14257_s1 + $0x15b0] sm:$0xff]   ;;  %v11569_v30 = vld [vmem:[%s14257_s1 + $0x1578] sm:$0xff]   ;;  %v11575_v37 = vld [vmem:[%s14257_s1 + $0x1600] sm:$0xff]  }
 0x29c   :  { %10674 = vmatprep.subr.bf16.mxu0 %v11537_v38  ;;  %v11570_v31 = vld [vmem:[%s14257_s1 + $0x1538] sm:$0xff]   ;;  %v11576_v38 = vld [vmem:[%s14257_s1 + $0x16c0] sm:$0xff]  }
 0x29d   :  { %10695 = vmatpush3.bf16.msra.mxu1 %v11536_v36  ;;  %v11573_v33 = vld [vmem:[%s14257_s1 + $0x15b8] sm:$0xff]   ;;  %v11574_v36 = vld [vmem:[%s14257_s1 + $0x1640] sm:$0xff]  }
 0x29e   :  { %10696 = vmatprep.subr.bf16.mxu1 %v11539_v40 }
 0x29f   :  { %10675 = vmatpush3.bf16.msra.mxu0 %v11538_v39  ;;  %v11577_v39 = vld [vmem:[%s14257_s1 + $0x1680] sm:$0xff]  }
 0x2a0   :  { %10704 = vmatprep.subr.bf16.mxu0 %v11541_v45  ;;  %v11582_v45 = vld [vmem:[%s14257_s1 + $0x1650] sm:$0xff]  }
 0x2a1   :  { %10697 = vmatpush3.bf16.msra.mxu1 %v11540_v43  ;;  %v11580_v43 = vld [vmem:[%s14257_s1 + $0x16c8] sm:$0xff]  }
 0x2a2   :  { %10726 = vmatprep.subr.bf16.mxu1 %v11543_v49  ;;  %8661 = vmatmul.mubr.bf16.vlgmr.msra.gmra.mrb[80].mxu0 %v2129_v47  ;;  %v11584_v47 = vld [vmem:[%s14257_s1 + $0x16d0] sm:$0xff]   ;;  %v11586_v49 = vld [vmem:[%s14257_s1 + $0x1658] sm:$0xff]  }
 0x2a3   :  { %10705 = vmatpush3.bf16.msra.mxu0 %v11542_v51  ;;  %8740 = vmatprep.mubr.bf16.mxu0 %v2150_v57  ;;  %v11588_v51 = vld [vmem:[%s14257_s1 + $0x16d8] sm:$0xff]   ;;  %v11594_v57 = vld [vmem:[%s14257_s1 + $0x1668] sm:$0xff]  }
 0x2a4   :  { %8701 = vmatmul.mubr.bf16.vlgmr.msra.gmra.mrb[80].mxu1 %v2151_v53  ;;  %10706 = vmatprep.subr.bf16.mxu0 %v11545_v54  ;;  %v11590_v53 = vld [vmem:[%s14257_s1 + $0x1660] sm:$0xff]  }
 0x2a5   :  { %10727 = vmatpush3.bf16.msra.mxu1 %v11544_v56  ;;  %8780 = vmatprep.mubr.bf16.mxu1 %v2154_v60  ;;  %v11591_v54 = vld [vmem:[%s14257_s1 + $0x1620] sm:$0xff]   ;;  %v11596_v60 = vld [vmem:[%s14257_s1 + $0x16e8] sm:$0xff]  }
 0x2a6   :  { %10728 = vmatprep.subr.bf16.mxu1 %v11547_v58  ;;  %v11593_v56 = vld [vmem:[%s14257_s1 + $0x16a0] sm:$0xff]   ;;  %v11595_v58 = vld [vmem:[%s14257_s1 + $0x1628] sm:$0xff]  }
 0x2a7   :  { %10707 = vmatpush3.bf16.msra.mxu0 %v11546_v59 }
 0x2a8   :  { %10708 = vmatprep.subr.bf16.mxu0 %v11549_v61 }
 0x2a9   :  { %10729 = vmatpush3.bf16.msra.mxu1 %v11548_v62  ;;  %v11597_v62 = vld [vmem:[%s14257_s1 + $0x16a8] sm:$0xff]  }
 0x2aa   :  { %10730 = vmatprep.subr.bf16.mxu1 %v11551_v63 }
 0x2ab   :  { %10709 = vmatpush3.bf16.msra.mxu0 %v11550_v0 }
 0x2ac   :  { %10710 = vmatprep.subr.bf16.mxu0 %v11553_v1 }
 0x2ad   :  { %10731 = vmatpush3.bf16.msra.mxu1 %v11552_v2 }
 0x2ae   :  { %10732 = vmatprep.subr.bf16.mxu1 %v11555_v3 }
 0x2af   :  { %10711 = vmatpush3.bf16.msra.mxu0 %v11554_v4  ;;  %v11598_v4 = vld [vmem:[%s14257_s1 + $0x1670] sm:$0xff]  }
 0x2b0   :  { %10712 = vmatprep.subr.bf16.mxu0 %v11557_v5  ;;  %v11599_v5 = vld [vmem:[%s14257_s1 + $0x1630] sm:$0xff]  }
 0x2b1   :  { %10733 = vmatpush3.bf16.msra.mxu1 %v11556_v6 }
 0x2b2   :  { %10734 = vmatprep.subr.bf16.mxu1 %v11559_v7 }
 0x2b3   :  { %10713 = vmatpush3.bf16.msra.mxu0 %v11558_v8  ;;  %v11600_v8 = vld [vmem:[%s14257_s1 + $0x16f0] sm:$0xff]  }
 0x2b4   :  { %10714 = vmatprep.subr.bf16.mxu0 %v11561_v9 }
 0x2b5   :  { %v10412_v11 = vpop.f32.mrb[56].mxu0  ;;  %10735 = vmatpush3.bf16.msra.mxu1 %v11560_v10 }
 0x2b6   :  { %v10413_v13 = vpop.f32.mrb[57].mxu0  ;;  %10736 = vmatprep.subr.bf16.mxu1 %v11563_v12 }
 0x2b7   :  { %v10414_v15 = vadd.f32 %v10413_v13, %v10412_v11  ;;  %v10415_v16 = vpop.f32.mrb[58].mxu0  ;;  %v10434_v17 = vpop.f32.mrb[56].mxu1  ;;  %10715 = vmatpush3.bf16.msra.mxu0 %v11562_v14  ;;  %v11601_v11 = vld [vmem:[%s14257_s1 + $0x16b0] sm:$0xff]   ;;  %v11602_v13 = vld [vmem:[%s14257_s1 + $0x1678] sm:$0xff]  }
 0x2b8   :  { %v10416_v20 = vpop.f32.mrb[59].mxu0  ;;  %v10435_v21 = vpop.f32.mrb[57].mxu1  ;;  %10716 = vmatprep.subr.bf16.mxu0 %v11565_v19  ;;  %v11603_v14 = vld [vmem:[%s14257_s1 + $0x1638] sm:$0xff]  }
 0x2b9   :  { %v8183_v23 = vadd.f32 %v10414_v15, %v13861_v35  ;;  %v10436_v24 = vadd.f32 %v10435_v21, %v10434_v17  ;;  %v10437_v26 = vpop.f32.mrb[58].mxu1  ;;  %10737 = vmatpush3.bf16.msra.mxu1 %v11564_v18  ;;  %v2136_v35 = vrot.slane %v13887_v48, %v11763_v34  ;;  %v11585_v48 = vld [vmem:[%s14257_s1 + $0x1690] sm:$0xff]   ;;  %v11604_v15 = vld [vmem:[%s14257_s1 + $0x16f8] sm:$0xff]   ;;  %v11606_v20 = vld [vmem:[%s14257_s1 + $0x1740] sm:$0xff]  }
 0x2ba   :  { %v10438_v28 = vpop.f32.mrb[59].mxu1  ;;  %10738 = vmatprep.subr.bf16.mxu1 %v11567_v25  ;;  %v26_v16 = vld [vmem:[%s14258_s0 + $0x58] sm:$0xff]  ;;  %v11607_v26 = vld [vmem:[%s14257_s1 + $0x1700] sm:$0xff]  }
 0x2bb   :  { %v13975_v29 = vadd.f32 %v10436_v24, %v8183_v23  ;;  %10717 = vmatpush3.bf16.msra.mxu0 %v11566_v22  ;;  %v2152_v40 = vcombine.high %v2136_v35, %v2136_v35  ;;  %v2162_v17 = vrot.slane %v26_v16, %v11763_v34  ;;  %v11605_v18 = vld [vmem:[%s14257_s1 + $0x16b8] sm:$0xff]   ;;  %v2155_v19 = vcombine.high %v26_v16, %v26_v16  ;;  %v11608_v24 = vld [vmem:[%s14257_s1 + $0x17c0] sm:$0xff]   ;;  %v11643_v16 = vld [vmem:[%s14257_s1 + $0x1850] sm:$0xff]  }
 0x2bc   :  { %10718 = vmatprep.subr.bf16.mxu0 %v11569_v30 }
 0x2bd   :  { %10739 = vmatpush3.bf16.msra.mxu1 %v11568_v27  ;;  %v2170_v21 = vcombine.high %v2162_v17, %v2162_v17  ;;  %v2178_v22 = vrot.slane %v2162_v17, %v11763_v34  ;;  %v14099_v23 = vrot.slane %v2155_v19, %v11763_v34  ;;  %v11644_v17 = vld [vmem:[%s14257_s1 + $0x1810] sm:$0xff]   ;;  %v11646_v19 = vld [vmem:[%s14257_s1 + $0x1818] sm:$0xff]  }
 0x2be   :  { %10740 = vmatprep.subr.bf16.mxu1 %v11571_v32 }
 0x2bf   :  { %10719 = vmatpush3.bf16.msra.mxu0 %v11570_v31  ;;  %v2192_v25 = vrot.slane %v2170_v21, %v11763_v34  ;;  %v2171_v27 = vcombine.high %v14099_v23, %v14099_v23  ;;  %v2200_v28 = vcombine.high %v2178_v22, %v2178_v22  ;;  %v11609_v31 = vld [vmem:[%s14257_s1 + $0x1780] sm:$0xff]  }
 0x2c0   :  { %10748 = vmatprep.subr.bf16.mxu0 %v11574_v36  ;;  %v8995_v21 = vld.sshfl [vmem:[%s14258_s0 + $0x60] sm:$0x11 pattern:$0x75316420] }
 0x2c1   :  { %10741 = vmatpush3.bf16.msra.mxu1 %v11573_v33  ;;  %v2202_v30 = vcombine.high %v2192_v25, %v2192_v25  ;;  %v2199_v32 = vrot.slane %v2171_v27, %v11763_v34  ;;  %v11612_v33 = vld [vmem:[%s14257_s1 + $0x17c8] sm:$0xff]  }
 0x2c2   :  { %8741 = vmatmul.mubr.bf16.vlgmr.msra.gmra.mrb[84].mxu0 %v2136_v35  ;;  %10770 = vmatprep.subr.bf16.mxu1 %v11576_v38  ;;  %v11611_v35 = vld [vmem:[%s14257_s1 + $0x1708] sm:$0xff]  }
 0x2c3   :  { %10749 = vmatpush3.bf16.msra.mxu0 %v11575_v37  ;;  %8820 = vmatprep.mubr.bf16.mxu0 %v2192_v25  ;;  %v2203_v36 = vcombine.high %v2199_v32, %v2199_v32  ;;  %v11614_v37 = vld [vmem:[%s14257_s1 + $0x1750] sm:$0xff]   ;;  %v11613_v38 = vld [vmem:[%s14257_s1 + $0x1788] sm:$0xff]  }
 0x2c4   :  { %8781 = vmatmul.mubr.bf16.vlgmr.msra.gmra.mrb[84].mxu1 %v2152_v40  ;;  %10750 = vmatprep.subr.bf16.mxu0 %v11578_v41  ;;  %v11615_v40 = vld [vmem:[%s14257_s1 + $0x1710] sm:$0xff]   ;;  %v11618_v41 = vld [vmem:[%s14257_s1 + $0x1758] sm:$0xff]   ;;  %v11649_v25 = vld [vmem:[%s14257_s1 + $0x1868] sm:$0xff]  }
 0x2c5   :  { %10771 = vmatpush3.bf16.msra.mxu1 %v11577_v39  ;;  %8860 = vmatprep.mubr.bf16.mxu1 %v2202_v30  ;;  %v11616_v39 = vld [vmem:[%s14257_s1 + $0x17d0] sm:$0xff]  }
 0x2c6   :  { %10772 = vmatprep.subr.bf16.mxu1 %v11580_v43  ;;  %v11620_v43 = vld [vmem:[%s14257_s1 + $0x17d8] sm:$0xff]  }
 0x2c7   :  { %10751 = vmatpush3.bf16.msra.mxu0 %v11579_v42  ;;  %v11617_v42 = vld [vmem:[%s14257_s1 + $0x1790] sm:$0xff]  }
 0x2c8   :  { %10752 = vmatprep.subr.bf16.mxu0 %v11582_v45  ;;  %v11622_v45 = vld [vmem:[%s14257_s1 + $0x1760] sm:$0xff]  }
 0x2c9   :  { %10773 = vmatpush3.bf16.msra.mxu1 %v11581_v44  ;;  %v11619_v44 = vld [vmem:[%s14257_s1 + $0x1718] sm:$0xff]  }
 0x2ca   :  { %10774 = vmatprep.subr.bf16.mxu1 %v11584_v47  ;;  %v11624_v47 = vld [vmem:[%s14257_s1 + $0x17e0] sm:$0xff]  }
 0x2cb   :  { %10753 = vmatpush3.bf16.msra.mxu0 %v11583_v46  ;;  %v11621_v46 = vld [vmem:[%s14257_s1 + $0x1798] sm:$0xff]  }
 0x2cc   :  { %10754 = vmatprep.subr.bf16.mxu0 %v11586_v49  ;;  %v11626_v49 = vld [vmem:[%s14257_s1 + $0x1768] sm:$0xff]  }
 0x2cd   :  { %10775 = vmatpush3.bf16.msra.mxu1 %v11585_v48  ;;  %v11623_v48 = vld [vmem:[%s14257_s1 + $0x1720] sm:$0xff]  }
 0x2ce   :  { %10776 = vmatprep.subr.bf16.mxu1 %v11588_v51 }
 0x2cf   :  { %10755 = vmatpush3.bf16.msra.mxu0 %v11587_v50  ;;  %v11625_v50 = vld [vmem:[%s14257_s1 + $0x17a0] sm:$0xff]  }
 0x2d0   :  { %10756 = vmatprep.subr.bf16.mxu0 %v11590_v53 }
 0x2d1   :  { %10777 = vmatpush3.bf16.msra.mxu1 %v11589_v52  ;;  %v11628_v52 = vld [vmem:[%s14257_s1 + $0x17e8] sm:$0xff]  }
 0x2d2   :  { %10778 = vmatprep.subr.bf16.mxu1 %v11592_v55 }
 0x2d3   :  { %10757 = vmatpush3.bf16.msra.mxu0 %v11591_v54  ;;  %v11627_v54 = vld [vmem:[%s14257_s1 + $0x1728] sm:$0xff]  }
 0x2d4   :  { %10758 = vmatprep.subr.bf16.mxu0 %v11594_v57 }
 0x2d5   :  { %v10456_v59 = vpop.f32.mrb[60].mxu0  ;;  %10779 = vmatpush3.bf16.msra.mxu1 %v11593_v56 }
 0x2d6   :  { %v10457_v61 = vpop.f32.mrb[61].mxu0  ;;  %10780 = vmatprep.subr.bf16.mxu1 %v11596_v60 }
 0x2d7   :  { %v10458_v63 = vadd.f32 %v10457_v61, %v10456_v59  ;;  %v10459_v0 = vpop.f32.mrb[62].mxu0  ;;  %v10478_v1 = vpop.f32.mrb[60].mxu1  ;;  %10759 = vmatpush3.bf16.msra.mxu0 %v11595_v58  ;;  %v11629_v58 = vld [vmem:[%s14257_s1 + $0x17a8] sm:$0xff]   ;;  %v11630_v59 = vld [vmem:[%s14257_s1 + $0x1770] sm:$0xff]  }
 0x2d8   :  { %v10460_v2 = vpop.f32.mrb[63].mxu0  ;;  %v10479_v3 = vpop.f32.mrb[61].mxu1  ;;  %10760 = vmatprep.subr.bf16.mxu0 %v11598_v4  ;;  %v11632_v0 = vld [vmem:[%s14257_s1 + $0x17f0] sm:$0xff]  }
 0x2d9   :  { %v8263_v6 = vadd.f32 %v10458_v63, %v13975_v29  ;;  %v10480_v7 = vadd.f32 %v10479_v3, %v10478_v1  ;;  %v10481_v9 = vpop.f32.mrb[62].mxu1  ;;  %10781 = vmatpush3.bf16.msra.mxu1 %v11597_v62  ;;  %v11610_v29 = vld [vmem:[%s14257_s1 + $0x1748] sm:$0xff]   ;;  %v11631_v2 = vld [vmem:[%s14257_s1 + $0x1730] sm:$0xff]  }
 0x2da   :  { %v10482_v12 = vpop.f32.mrb[63].mxu1  ;;  %10782 = vmatprep.subr.bf16.mxu1 %v11600_v8  ;;  %v11635_v8 = vld [vmem:[%s14257_s1 + $0x1738] sm:$0xff]   ;;  %v2185_v9 = vrot.slane %v14099_v23, %v11763_v34  ;;  %v11648_v23 = vld [vmem:[%s14257_s1 + $0x1820] sm:$0xff]  }
 0x2db   :  { %v14073_v10 = vadd.f32 %v10480_v7, %v8263_v6  ;;  %10761 = vmatpush3.bf16.msra.mxu0 %v11599_v5  ;;  %v11634_v5 = vld [vmem:[%s14257_s1 + $0x1778] sm:$0xff]   ;;  %v11633_v6 = vld [vmem:[%s14257_s1 + $0x17b0] sm:$0xff]   ;;  %v11640_v12 = vld [vmem:[%s14257_s1 + $0x1800] sm:$0xff]  }
 0x2dc   :  { %10762 = vmatprep.subr.bf16.mxu0 %v11602_v13  ;;  %v11636_v7 = vld [vmem:[%s14257_s1 + $0x17f8] sm:$0xff]   ;;  %v2201_v13 = vcombine.high %v2185_v9, %v2185_v9 }
 0x2dd   :  { %10783 = vmatpush3.bf16.msra.mxu1 %v11601_v11  ;;  %v11638_v11 = vld [vmem:[%s14257_s1 + $0x17b8] sm:$0xff]  }
 0x2de   :  { %10784 = vmatprep.subr.bf16.mxu1 %v11604_v15  ;;  %v11642_v15 = vld [vmem:[%s14257_s1 + $0x1808] sm:$0xff]  }
 0x2df   :  { %10763 = vmatpush3.bf16.msra.mxu0 %v11603_v14  ;;  %v11641_v14 = vld [vmem:[%s14257_s1 + $0x1848] sm:$0xff]  }
 0x2e0   :  { %10792 = vmatprep.subr.bf16.mxu0 %v11606_v20  ;;  %v11647_v20 = vld [vmem:[%s14257_s1 + $0x1860] sm:$0xff]  }
 0x2e1   :  { %10785 = vmatpush3.bf16.msra.mxu1 %v11605_v18  ;;  %v11645_v18 = vld [vmem:[%s14257_s1 + $0x1858] sm:$0xff]  }
 0x2e2   :  { %10814 = vmatprep.subr.bf16.mxu1 %v11608_v24  ;;  %8821 = vmatmul.mubr.bf16.vlgmr.msra.gmra.mrb[88].mxu0 %v2178_v22  ;;  %v2211_v22 = vcombine.high %v8995_v21, %v8995_v21 }
 0x2e3   :  { %10793 = vmatpush3.bf16.msra.mxu0 %v11607_v26  ;;  %8900 = vmatprep.mubr.bf16.mxu0 %v2199_v32  ;;  %v11651_v32 = vld [vmem:[%s14257_s1 + $0x1870] sm:$0xff]  }
 0x2e4   :  { %8861 = vmatmul.mubr.bf16.vlgmr.msra.gmra.mrb[88].mxu1 %v2200_v28  ;;  %10794 = vmatprep.subr.bf16.mxu0 %v11610_v29  ;;  %v2225_v24 = vrot.slane %v2211_v22, %v11763_v34  ;;  %v11650_v28 = vld [vmem:[%s14257_s1 + $0x1828] sm:$0xff]  }
 0x2e5   :  { %10815 = vmatpush3.bf16.msra.mxu1 %v11609_v31  ;;  %8940 = vmatprep.mubr.bf16.mxu1 %v2203_v36 }
 0x2e6   :  { %10816 = vmatprep.subr.bf16.mxu1 %v11612_v33 }
 0x2e7   :  { %10795 = vmatpush3.bf16.msra.mxu0 %v11611_v35 }
 0x2e8   :  { %10796 = vmatprep.subr.bf16.mxu0 %v11614_v37 }
 0x2e9   :  { %10817 = vmatpush3.bf16.msra.mxu1 %v11613_v38 }
 0x2ea   :  { %10818 = vmatprep.subr.bf16.mxu1 %v11616_v39  ;;  %v11652_v39 = vld [vmem:[%s14257_s1 + $0x1830] sm:$0xff]  }
 0x2eb   :  { %10797 = vmatpush3.bf16.msra.mxu0 %v11615_v40 }
 0x2ec   :  { %10798 = vmatprep.subr.bf16.mxu0 %v11618_v41 }
 0x2ed   :  { %10819 = vmatpush3.bf16.msra.mxu1 %v11617_v42  ;;  %v11653_v42 = vld [vmem:[%s14257_s1 + $0x1878] sm:$0xff]  }
 0x2ee   :  { %10820 = vmatprep.subr.bf16.mxu1 %v11620_v43  ;;  %v11654_v43 = vld [vmem:[%s14257_s1 + $0x1838] sm:$0xff]  }
 0x2ef   :  { %10799 = vmatpush3.bf16.msra.mxu0 %v11619_v44  ;;  %v2218_v44 = vrot.slane %v8995_v21, %v11763_v34 }
 0x2f0   :  { %10800 = vmatprep.subr.bf16.mxu0 %v11622_v45 }
 0x2f1   :  { %10821 = vmatpush3.bf16.msra.mxu1 %v11621_v46 }
 0x2f2   :  { %10822 = vmatprep.subr.bf16.mxu1 %v11624_v47 }
 0x2f3   :  { %10801 = vmatpush3.bf16.msra.mxu0 %v11623_v48 }
 0x2f4   :  { %10802 = vmatprep.subr.bf16.mxu0 %v11626_v49 }
 0x2f5   :  { %v10500_v51 = vpop.f32.mrb[64].mxu0  ;;  %10823 = vmatpush3.bf16.msra.mxu1 %v11625_v50 }
 0x2f6   :  { %v10501_v53 = vpop.f32.mrb[65].mxu0  ;;  %10824 = vmatprep.subr.bf16.mxu1 %v11628_v52 }
 0x2f7   :  { %v10502_v55 = vadd.f32 %v10501_v53, %v10500_v51  ;;  %v10503_v56 = vpop.f32.mrb[66].mxu0  ;;  %v10522_v57 = vpop.f32.mrb[64].mxu1  ;;  %10803 = vmatpush3.bf16.msra.mxu0 %v11627_v54 }
 0x2f8   :  { %v10504_v60 = vpop.f32.mrb[67].mxu0  ;;  %v10523_v61 = vpop.f32.mrb[65].mxu1  ;;  %10804 = vmatprep.subr.bf16.mxu0 %v11630_v59 }
 0x2f9   :  { %v8343_v62 = vadd.f32 %v10502_v55, %v14073_v10  ;;  %v10524_v63 = vadd.f32 %v10523_v61, %v10522_v57  ;;  %v10525_v1 = vpop.f32.mrb[66].mxu1  ;;  %10825 = vmatpush3.bf16.msra.mxu1 %v11629_v58  ;;  %v11639_v10 = vld [vmem:[%s14257_s1 + $0x1840] sm:$0xff]  }
 0x2fa   :  { %v10526_v3 = vpop.f32.mrb[67].mxu1  ;;  %10826 = vmatprep.subr.bf16.mxu1 %v11632_v0 }
 0x2fb   :  { %v8383_v4 = vadd.f32 %v10524_v63, %v8343_v62  ;;  %10805 = vmatpush3.bf16.msra.mxu0 %v11631_v2 }
 0x2fc   :  { %10806 = vmatprep.subr.bf16.mxu0 %v11634_v5 }
 0x2fd   :  { %10827 = vmatpush3.bf16.msra.mxu1 %v11633_v6 }
 0x2fe   :  { %10828 = vmatprep.subr.bf16.mxu1 %v11636_v7 }
 0x2ff   :  { %10807 = vmatpush3.bf16.msra.mxu0 %v11635_v8 }
 0x300   :  { %10836 = vmatprep.subr.bf16.mxu0 %v11639_v10 }
 0x301   :  { %10829 = vmatpush3.bf16.msra.mxu1 %v11638_v11 }
 0x302   :  { %8901 = vmatmul.mubr.bf16.vlgmr.msra.gmra.mrb[92].mxu0 %v2185_v9 }
 0x303   :  { %10837 = vmatpush3.bf16.msra.mxu0 %v11640_v12  ;;  %8980 = vmatprep.mubr.bf16.mxu0 %v2225_v24 }
 0x304   :  { %8941 = vmatmul.mubr.bf16.vlgmr.msra.gmra.mrb[92].mxu1 %v2201_v13  ;;  %10838 = vmatprep.subr.bf16.mxu0 %v11641_v14 }
 0x307   :  { %10839 = vmatpush3.bf16.msra.mxu0 %v11642_v15 }
 0x308   :  { %10840 = vmatprep.subr.bf16.mxu0 %v11643_v16 }
 0x30b   :  { %10841 = vmatpush3.bf16.msra.mxu0 %v11644_v17 }
 0x30c   :  { %10842 = vmatprep.subr.bf16.mxu0 %v11645_v18 }
 0x30f   :  { %10843 = vmatpush3.bf16.msra.mxu0 %v11646_v19 }
 0x310   :  { %10844 = vmatprep.subr.bf16.mxu0 %v11647_v20 }
 0x313   :  { %10845 = vmatpush3.bf16.msra.mxu0 %v11648_v23 }
 0x314   :  { %10846 = vmatprep.subr.bf16.mxu0 %v11649_v25 }
 0x315   :  { %v10544_v26 = vpop.f32.mrb[68].mxu0 }
 0x316   :  { %v10545_v27 = vpop.f32.mrb[69].mxu0 }
 0x317   :  { %v10546_v29 = vadd.f32 %v10545_v27, %v10544_v26  ;;  %v10547_v30 = vpop.f32.mrb[70].mxu0  ;;  %v10566_v31 = vpop.f32.mrb[68].mxu1  ;;  %10847 = vmatpush3.bf16.msra.mxu0 %v11650_v28 }
 0x318   :  { %v10548_v33 = vpop.f32.mrb[71].mxu0  ;;  %v10567_v35 = vpop.f32.mrb[69].mxu1  ;;  %10848 = vmatprep.subr.bf16.mxu0 %v11651_v32 }
 0x319   :  { %v8423_v36 = vadd.f32 %v10546_v29, %v8383_v4  ;;  %v10568_v37 = vadd.f32 %v10567_v35, %v10566_v31  ;;  %v10569_v38 = vpop.f32.mrb[70].mxu1 }
 0x31a   :  { %v10570_v40 = vpop.f32.mrb[71].mxu1 }
 0x31b   :  { %v8463_v41 = vadd.f32 %v10568_v37, %v8423_v36  ;;  %10849 = vmatpush3.bf16.msra.mxu0 %v11652_v39 }
 0x31c   :  { %10850 = vmatprep.subr.bf16.mxu0 %v11653_v42 }
 0x31f   :  { %10851 = vmatpush3.bf16.msra.mxu0 %v11654_v43 }
 0x322   :  { %8981 = vmatmul.mubr.bf16.vlgmr.msra.gmra.mrb[96].mxu0 %v2218_v44 }
 0x335   :  { %v10588_v45 = vpop.f32.mrb[72].mxu0 }
 0x336   :  { %v10589_v46 = vpop.f32.mrb[73].mxu0 }
 0x337   :  { %v10590_v47 = vadd.f32 %v10589_v46, %v10588_v45  ;;  %v10591_v48 = vpop.f32.mrb[74].mxu0  ;;  %v10610_v49 = vpop.f32.mrb[72].mxu1 }
 0x338   :  { %v10592_v50 = vpop.f32.mrb[75].mxu0  ;;  %v10611_v51 = vpop.f32.mrb[73].mxu1 }
 0x339   :  { %v8503_v52 = vadd.f32 %v10590_v47, %v8463_v41  ;;  %v10612_v53 = vadd.f32 %v10611_v51, %v10610_v49  ;;  %v10613_v54 = vpop.f32.mrb[74].mxu1 }
 0x33a   :  { %v10614_v55 = vpop.f32.mrb[75].mxu1 }
 0x33b   :  { %v8543_v56 = vadd.f32 %v10612_v53, %v8503_v52 }
 0x355   :  { %v10632_v57 = vpop.f32.mrb[76].mxu0 }
 0x356   :  { %v10633_v58 = vpop.f32.mrb[77].mxu0 }
 0x357   :  { %v10634_v59 = vadd.f32 %v10633_v58, %v10632_v57  ;;  %v10635_v60 = vpop.f32.mrb[78].mxu0  ;;  %v10654_v61 = vpop.f32.mrb[76].mxu1 }
 0x358   :  { %v10636_v34 = vpop.f32.mrb[79].mxu0  ;;  %v10655_v62 = vpop.f32.mrb[77].mxu1 }
 0x359   :  { %v8583_v63 = vadd.f32 %v10634_v59, %v8543_v56  ;;  %v10656_v0 = vadd.f32 %v10655_v62, %v10654_v61  ;;  %v10657_v1 = vpop.f32.mrb[78].mxu1 }
 0x35a   :  { %v10658_v2 = vpop.f32.mrb[79].mxu1 }
 0x35b   :  { %v8623_v3 = vadd.f32 %v10656_v0, %v8583_v63 }
 0x375   :  { %v10676_v4 = vpop.f32.mrb[80].mxu0 }
 0x376   :  { %v10677_v5 = vpop.f32.mrb[81].mxu0 }
 0x377   :  { %v10678_v6 = vadd.f32 %v10677_v5, %v10676_v4  ;;  %v10679_v7 = vpop.f32.mrb[82].mxu0  ;;  %v10698_v8 = vpop.f32.mrb[80].mxu1 }
 0x378   :  { %v10680_v9 = vpop.f32.mrb[83].mxu0  ;;  %v10699_v10 = vpop.f32.mrb[81].mxu1 }
 0x379   :  { %v8663_v11 = vadd.f32 %v10678_v6, %v8623_v3  ;;  %v10700_v12 = vadd.f32 %v10699_v10, %v10698_v8  ;;  %v10701_v13 = vpop.f32.mrb[82].mxu1 }
 0x37a   :  { %v10702_v14 = vpop.f32.mrb[83].mxu1 }
 0x37b   :  { %v8703_v15 = vadd.f32 %v10700_v12, %v8663_v11 }
 0x395   :  { %v10720_v16 = vpop.f32.mrb[84].mxu0 }
 0x396   :  { %v10721_v17 = vpop.f32.mrb[85].mxu0 }
 0x397   :  { %v10722_v18 = vadd.f32 %v10721_v17, %v10720_v16  ;;  %v10723_v19 = vpop.f32.mrb[86].mxu0  ;;  %v10742_v20 = vpop.f32.mrb[84].mxu1 }
 0x398   :  { %v10724_v21 = vpop.f32.mrb[87].mxu0  ;;  %v10743_v22 = vpop.f32.mrb[85].mxu1 }
 0x399   :  { %v8743_v23 = vadd.f32 %v10722_v18, %v8703_v15  ;;  %v10744_v24 = vadd.f32 %v10743_v22, %v10742_v20  ;;  %v10745_v25 = vpop.f32.mrb[86].mxu1 }
 0x39a   :  { %v10746_v26 = vpop.f32.mrb[87].mxu1 }
 0x39b   :  { %v8783_v27 = vadd.f32 %v10744_v24, %v8743_v23 }
 0x3b5   :  { %v10764_v28 = vpop.f32.mrb[88].mxu0 }
 0x3b6   :  { %v10765_v29 = vpop.f32.mrb[89].mxu0 }
 0x3b7   :  { %v10766_v30 = vadd.f32 %v10765_v29, %v10764_v28  ;;  %v10767_v31 = vpop.f32.mrb[90].mxu0  ;;  %v10786_v32 = vpop.f32.mrb[88].mxu1 }
 0x3b8   :  { %v10768_v33 = vpop.f32.mrb[91].mxu0  ;;  %v10787_v35 = vpop.f32.mrb[89].mxu1 }
 0x3b9   :  { %v8823_v36 = vadd.f32 %v10766_v30, %v8783_v27  ;;  %v10788_v37 = vadd.f32 %v10787_v35, %v10786_v32  ;;  %v10789_v38 = vpop.f32.mrb[90].mxu1 }
 0x3ba   :  { %v10790_v39 = vpop.f32.mrb[91].mxu1 }
 0x3bb   :  { %v8863_v40 = vadd.f32 %v10788_v37, %v8823_v36 }
 0x3d5   :  { %v10808_v41 = vpop.f32.mrb[92].mxu0 }
 0x3d6   :  { %v10809_v42 = vpop.f32.mrb[93].mxu0 }
 0x3d7   :  { %v10810_v43 = vadd.f32 %v10809_v42, %v10808_v41  ;;  %v10811_v44 = vpop.f32.mrb[94].mxu0  ;;  %v10830_v45 = vpop.f32.mrb[92].mxu1 }
 0x3d8   :  { %v10812_v46 = vpop.f32.mrb[95].mxu0  ;;  %v10831_v47 = vpop.f32.mrb[93].mxu1 }
 0x3d9   :  { %v8903_v48 = vadd.f32 %v10810_v43, %v8863_v40  ;;  %v10832_v49 = vadd.f32 %v10831_v47, %v10830_v45  ;;  %v10833_v50 = vpop.f32.mrb[94].mxu1 }
 0x3da   :  { %v10834_v51 = vpop.f32.mrb[95].mxu1 }
 0x3db   :  { %v8943_v52 = vadd.f32 %v10832_v49, %v8903_v48 }
 0x3f5   :  { %v10852_v53 = vpop.f32.mrb[96].mxu0 }
 0x3f6   :  { %v10853_v54 = vpop.f32.mrb[97].mxu0 }
 0x3f7   :  { %v10854_v55 = vadd.f32 %v10853_v54, %v10852_v53  ;;  %v10855_v56 = vpop.f32.mrb[98].mxu0 }
 0x3f8   :  { %v10856_v57 = vpop.f32.mrb[99].mxu0 }
 0x3f9   :  { %v8983_v58 = vadd.f32 %v10854_v55, %v8943_v52 }
 0x3fb   :  { %8989 = vst.msk [vmem:[%s14260_s3] sm:$0x3] %vm8988_vm0, %v8983_v58 }

</bundles_post_ra>
